<compile_context>
chip_gen: v7x
topology: tpu7x:2x2x1
jax: 0.10.0
libtpu: 0.0.40
codegen_flags: <defaults>
</compile_context>

<pallas_src>
import functools

import jax
import jax.numpy as jnp
from jax import lax
from jax.experimental import pallas as pl
from jax.experimental.pallas import tpu as pltpu

EPS = 1e-5          # nn.BatchNorm2d default eps
NEG_SLOPE = 0.01    # F.leaky_relu default negative_slope


def _leaky(x):
    return jnp.where(x >= 0, x, NEG_SLOPE * x)


def _round_up(x, m):
    return (x + m - 1) // m * m


# ---------------- fused Pallas kernel ----------------

def make_fused_kernel(*, N, C, CP, F, H, W, kh, kw, padding, dilation, r):
    """Build the fused conv0+bn0+lrelu+pool+conv1+bn1+lrelu kernel (static shapes)."""
    Ho1 = H + 2 * padding - dilation * (kh - 1)
    Wo1 = W + 2 * padding - dilation * (kw - 1)
    Hp, Wp = Ho1 // r, Wo1 // r                      # avg_pool2d floors
    Ho2 = Hp + 2 * padding - dilation * (kh - 1)
    Wo2 = Wp + 2 * padding - dilation * (kw - 1)
    M1 = N * Ho1 * Wo1
    M2 = N * Ho2 * Wo2
    K1 = kh * kw * CP                                # stage-1 contraction depth
    K2 = kh * kw * F                                 # stage-2 contraction depth

    def kernel(xp_ref, w0_ref, g0_ref, b0_ref, w1_ref, g1_ref, b1_ref,
               out_ref, col1_ref, acc1_ref, pad2_ref, col2_ref):
        # ---- stage-1 im2col: kh*kw windowed copies into a VMEM col buffer ----
        for tap in range(kh * kw):
            ki, kj = tap // kw, tap % kw
            di, dj = ki * dilation, kj * dilation
            col1_ref[:, :, :, tap * CP:(tap + 1) * CP] = \
                xp_ref[:, di:di + Ho1, dj:dj + Wo1, :]

        # ---- conv_0: single MXU contraction (K = kh*kw*CP) into VMEM scratch ----
        acc1_ref[...] = jnp.dot(col1_ref[...].reshape(M1, K1), w0_ref[...],
                                preferred_element_type=jnp.float32)

        # ---- batch_norm_0: training-mode batch stats (single pass) + leaky ----
        a = acc1_ref[...]                             # [M1, F]
        s1 = jnp.sum(a, axis=0, keepdims=True)
        s2 = jnp.sum(a * a, axis=0, keepdims=True)
        mean = s1 * (1.0 / M1)
        var = s2 * (1.0 / M1) - mean * mean           # biased variance
        inv = lax.rsqrt(var + EPS)
        y = _leaky((acc1_ref[...] - mean) * inv * g0_ref[...] + b0_ref[...])

        # ---- avg_pool2d(r): reshape + small sums (pure on-chip, F lanes only) ----
        y = y.reshape(N, Ho1, Wo1, F)
        if Ho1 % r or Wo1 % r:                        # floor like F.avg_pool2d
            y = y[:, :Hp * r, :Wp * r, :]
        y = y.reshape(N, Hp, r, Wp * r, F)            # split outer (H) dim: free
        y = jnp.sum(y, axis=2)
        y = y.reshape(N, Hp, Wp, r, F)                # split sublane (W) dim
        y = jnp.sum(y, axis=3)
        pooled = y * (1.0 / (r * r))                  # [N, Hp, Wp, F]

        # ---- halo for conv_1 in VMEM: zero only the border strips ----
        if padding > 0:
            hpp, wpp = Hp + 2 * padding, Wp + 2 * padding
            pad2_ref[:, :padding, :, :] = jnp.zeros((N, padding, wpp, F), jnp.float32)
            pad2_ref[:, Hp + padding:, :, :] = jnp.zeros((N, padding, wpp, F), jnp.float32)
            pad2_ref[:, :, :padding, :] = jnp.zeros((N, hpp, padding, F), jnp.float32)
            pad2_ref[:, :, Wp + padding:, :] = jnp.zeros((N, hpp, padding, F), jnp.float32)
        pad2_ref[:, padding:padding + Hp, padding:padding + Wp, :] = pooled

        # ---- stage-2 im2col over the VMEM-resident pooled tile ----
        for tap in range(kh * kw):
            ki, kj = tap // kw, tap % kw
            di, dj = ki * dilation, kj * dilation
            col2_ref[:, :, :, tap * F:(tap + 1) * F] = \
                pad2_ref[:, di:di + Ho2, dj:dj + Wo2, :]

        # ---- conv_1: single MXU contraction (K = kh*kw*F) ----
        acc2 = jnp.dot(col2_ref[...].reshape(M2, K2), w1_ref[...],
                       preferred_element_type=jnp.float32)     # [M2, F]

        # ---- batch_norm_1 + leaky_relu; packed NHWC store ----
        t1 = jnp.sum(acc2, axis=0, keepdims=True)
        t2 = jnp.sum(acc2 * acc2, axis=0, keepdims=True)
        mean2 = t1 * (1.0 / M2)
        var2 = t2 * (1.0 / M2) - mean2 * mean2
        inv2 = lax.rsqrt(var2 + EPS)
        y2 = _leaky((acc2 - mean2) * inv2 * g1_ref[...] + b1_ref[...])
        out_ref[...] = y2.reshape(N, Ho2, Wo2, F)     # sublane split is free

    dims = (Ho1, Wo1, Hp, Wp, Ho2, Wo2, M1, M2, K1, K2)
    return kernel, dims


# ---------------- JAX wrapper (cheap one-shot layout prep only) ----------------

def block_forward(x_nchw, params, kernel_size, padding, dilation, reduction_factor):
    w0, g0, b0, w1, g1, b1 = params          # conv weights + BN affine (conv bias=False)
    kh = kw = kernel_size
    N, C, H, W = x_nchw.shape
    F = w0.shape[0]
    CP = _round_up(C, 8)                     # sublane-aligned input-channel depth

    kernel, dims = make_fused_kernel(N=N, C=C, CP=CP, F=F, H=H, W=W, kh=kh, kw=kw,
                                     padding=padding, dilation=dilation,
                                     r=reduction_factor)
    Ho1, Wo1, Hp, Wp, Ho2, Wo2, M1, M2, K1, K2 = dims

    # NCHW -> NHWC once (NCHW external interface), spatial + channel zero-pad
    x_nhwc = jnp.transpose(x_nchw, (0, 2, 3, 1)).astype(jnp.float32)
    x_pad = jnp.pad(x_nhwc, ((0, 0), (padding, padding), (padding, padding),
                             (0, CP - C)))

    # weights packed as a single [kh*kw*Cin, F] contraction matrix (no F padding)
    w0m = jnp.transpose(w0, (2, 3, 1, 0)).reshape(kh * kw, C, F)
    w0m = jnp.pad(w0m, ((0, 0), (0, CP - C), (0, 0))).reshape(K1, F)     # [72, F]
    w1m = jnp.transpose(w1, (2, 3, 1, 0)).reshape(K2, F)                 # [72, F]

    g0r = g0.reshape(1, F).astype(jnp.float32)
    b0r = b0.reshape(1, F).astype(jnp.float32)
    g1r = g1.reshape(1, F).astype(jnp.float32)
    b1r = b1.reshape(1, F).astype(jnp.float32)

    # advisory cost estimate with REAL (unpadded) sizes
    flops = 2 * M1 * (kh * kw * C) * F + 2 * M2 * (kh * kw * F) * F
    bytes_accessed = 4 * (N * C * H * W + w0.size + w1.size + 4 * F
                          + N * Ho2 * Wo2 * F)

    out_nhwc = pl.pallas_call(
        kernel,
        out_shape=jax.ShapeDtypeStruct((N, Ho2, Wo2, F), jnp.float32),
        in_specs=[pl.BlockSpec(memory_space=pltpu.MemorySpace.VMEM)] * 7,
        out_specs=pl.BlockSpec(memory_space=pltpu.MemorySpace.VMEM),
        scratch_shapes=[
            pltpu.VMEM((N, Ho1, Wo1, K1), jnp.float32),                     # col1
            pltpu.VMEM((M1, F), jnp.float32),                               # acc1
            pltpu.VMEM((N, Hp + 2 * padding, Wp + 2 * padding, F),
                       jnp.float32),                                        # pad2
            pltpu.VMEM((N, Ho2, Wo2, K2), jnp.float32),                     # col2
        ],
        cost_estimate=pl.CostEstimate(flops=flops, transcendentals=0,
                                      bytes_accessed=bytes_accessed),
    )(x_pad, w0m, g0r, b0r, w1m, g1r, b1r)

    return jnp.transpose(out_nhwc, (0, 3, 1, 2))      # back to NCHW


# ---------------- pure-JAX reference for correctness check ----------------

def reference(x, w0, g0, b0, w1, g1, b1, padding, dilation, r):
    def conv(x_, w_):
        return lax.conv_general_dilated(
            x_, w_, (1, 1), [(padding, padding), (padding, padding)],
            rhs_dilation=(dilation, dilation),
            dimension_numbers=("NCHW", "OIHW", "NCHW"))

    def bn(x_, g_, b_):
        mean = jnp.mean(x_, axis=(0, 2, 3), keepdims=True)
        var = jnp.mean((x_ - mean) ** 2, axis=(0, 2, 3), keepdims=True)
        return (x_ - mean) * lax.rsqrt(var + EPS) * g_.reshape(1, -1, 1, 1) + b_.reshape(1, -1, 1, 1)

    y = _leaky(bn(conv(x, w0), g0, b0))
    y = lax.reduce_window(y, 0.0, lax.add, (1, 1, r, r), (1, 1, r, r), "VALID") / (r * r)
    y = _leaky(bn(conv(y, w1), g1, b1))
    return y


if __name__ == "__main__":
    # module config: input_shape=(2,4,16,16), num_filters=8, kernel_size=3,
    # padding=1, bias=False, dilation=1, reduction_factor=2
    N, C, H, W = 2, 4, 16, 16
    F, KS, PAD, DIL, RF = 8, 3, 1, 1, 2

    key = jax.random.PRNGKey(0)
    ks = jax.random.split(key, 7)
    x = jax.random.normal(ks[0], (N, C, H, W), jnp.float32)
    w0 = 0.1 * jax.random.normal(ks[1], (F, C, KS, KS), jnp.float32)   # conv_0.weight
    g0 = 1.0 + 0.1 * jax.random.normal(ks[2], (F,), jnp.float32)       # batch_norm_0.weight
    b0 = 0.1 * jax.random.normal(ks[3], (F,), jnp.float32)             # batch_norm_0.bias
    w1 = 0.1 * jax.random.normal(ks[4], (F, F, KS, KS), jnp.float32)   # conv_1.weight
    g1 = 1.0 + 0.1 * jax.random.normal(ks[5], (F,), jnp.float32)       # batch_norm_1.weight
    b1 = 0.1 * jax.random.normal(ks[6], (F,), jnp.float32)             # batch_norm_1.bias

    fwd = jax.jit(functools.partial(block_forward, kernel_size=KS, padding=PAD,
                                    dilation=DIL, reduction_factor=RF))
    out = fwd(x, (w0, g0, b0, w1, g1, b1))
    out = jax.block_until_ready(out)

    assert out.shape == (N, F, H // RF, W // RF), out.shape
    ref = reference(x, w0, g0, b0, w1, g1, b1, PAD, DIL, RF)
    if not jnp.allclose(out, ref, atol=1e-4, rtol=1e-4):
        raise AssertionError("Pallas kernel output does not match JAX reference")
    print("KERNEL_OK")
</pallas_src>

<mosaic_0001>
module attributes {stable_mosaic.version = 11 : i64} {
  func.func @kernel(%arg0: memref<2x18x18x8xf32, #tpu.memory_space<vmem>>, %arg1: memref<72x8xf32, #tpu.memory_space<vmem>>, %arg2: memref<1x8xf32, #tpu.memory_space<vmem>>, %arg3: memref<1x8xf32, #tpu.memory_space<vmem>>, %arg4: memref<72x8xf32, #tpu.memory_space<vmem>>, %arg5: memref<1x8xf32, #tpu.memory_space<vmem>>, %arg6: memref<1x8xf32, #tpu.memory_space<vmem>>, %arg7: memref<2x8x8x8xf32, #tpu.memory_space<vmem>>, %arg8: memref<2x16x16x72xf32, #tpu.memory_space<vmem>>, %arg9: memref<512x8xf32, #tpu.memory_space<vmem>>, %arg10: memref<2x10x10x8xf32, #tpu.memory_space<vmem>>, %arg11: memref<2x8x8x72xf32, #tpu.memory_space<vmem>>) attributes {dimension_semantics = [], scalar_prefetch = 0 : i64, scratch_operands = 4 : i64, tpu.core_type = #tpu.core_type<tc>} {
    %c0 = arith.constant 0 : index
    %c0_0 = arith.constant 0 : index
    %c0_1 = arith.constant 0 : index
    %c0_2 = arith.constant 0 : index
    %0 = vector.load %arg0[%c0, %c0_0, %c0_1, %c0_2] : memref<2x18x18x8xf32, #tpu.memory_space<vmem>>, vector<2x16x16x8xf32>
    %c0_3 = arith.constant 0 : index
    %c0_4 = arith.constant 0 : index
    %c0_5 = arith.constant 0 : index
    %c0_6 = arith.constant 0 : index
    %1 = vector.load %arg8[%c0_3, %c0_4, %c0_5, %c0_6] : memref<2x16x16x72xf32, #tpu.memory_space<vmem>>, vector<2x16x16x8xf32>
    tpu.vector_store %arg8[%c0_3, %c0_4, %c0_5, %c0_6], %0 {strides = array<i32>} : memref<2x16x16x72xf32, #tpu.memory_space<vmem>>, vector<2x16x16x8xf32>,
    %c0_7 = arith.constant 0 : index
    %c0_8 = arith.constant 0 : index
    %c1 = arith.constant 1 : index
    %c0_9 = arith.constant 0 : index
    %2 = vector.load %arg0[%c0_7, %c0_8, %c1, %c0_9] : memref<2x18x18x8xf32, #tpu.memory_space<vmem>>, vector<2x16x16x8xf32>
    %c0_10 = arith.constant 0 : index
    %c0_11 = arith.constant 0 : index
    %c0_12 = arith.constant 0 : index
    %c8 = arith.constant 8 : index
    %3 = vector.load %arg8[%c0_10, %c0_11, %c0_12, %c8] : memref<2x16x16x72xf32, #tpu.memory_space<vmem>>, vector<2x16x16x8xf32>
    tpu.vector_store %arg8[%c0_10, %c0_11, %c0_12, %c8], %2 {strides = array<i32>} : memref<2x16x16x72xf32, #tpu.memory_space<vmem>>, vector<2x16x16x8xf32>,
    %c0_13 = arith.constant 0 : index
    %c0_14 = arith.constant 0 : index
    %c2 = arith.constant 2 : index
    %c0_15 = arith.constant 0 : index
    %4 = vector.load %arg0[%c0_13, %c0_14, %c2, %c0_15] : memref<2x18x18x8xf32, #tpu.memory_space<vmem>>, vector<2x16x16x8xf32>
    %c0_16 = arith.constant 0 : index
    %c0_17 = arith.constant 0 : index
    %c0_18 = arith.constant 0 : index
    %c16 = arith.constant 16 : index
    %5 = vector.load %arg8[%c0_16, %c0_17, %c0_18, %c16] : memref<2x16x16x72xf32, #tpu.memory_space<vmem>>, vector<2x16x16x8xf32>
    tpu.vector_store %arg8[%c0_16, %c0_17, %c0_18, %c16], %4 {strides = array<i32>} : memref<2x16x16x72xf32, #tpu.memory_space<vmem>>, vector<2x16x16x8xf32>,
    %c0_19 = arith.constant 0 : index
    %c1_20 = arith.constant 1 : index
    %c0_21 = arith.constant 0 : index
    %c0_22 = arith.constant 0 : index
    %6 = vector.load %arg0[%c0_19, %c1_20, %c0_21, %c0_22] : memref<2x18x18x8xf32, #tpu.memory_space<vmem>>, vector<2x16x16x8xf32>
    %c0_23 = arith.constant 0 : index
    %c0_24 = arith.constant 0 : index
    %c0_25 = arith.constant 0 : index
    %c24 = arith.constant 24 : index
    %7 = vector.load %arg8[%c0_23, %c0_24, %c0_25, %c24] : memref<2x16x16x72xf32, #tpu.memory_space<vmem>>, vector<2x16x16x8xf32>
    tpu.vector_store %arg8[%c0_23, %c0_24, %c0_25, %c24], %6 {strides = array<i32>} : memref<2x16x16x72xf32, #tpu.memory_space<vmem>>, vector<2x16x16x8xf32>,
    %c0_26 = arith.constant 0 : index
    %c1_27 = arith.constant 1 : index
    %c1_28 = arith.constant 1 : index
    %c0_29 = arith.constant 0 : index
    %8 = vector.load %arg0[%c0_26, %c1_27, %c1_28, %c0_29] : memref<2x18x18x8xf32, #tpu.memory_space<vmem>>, vector<2x16x16x8xf32>
    %c0_30 = arith.constant 0 : index
    %c0_31 = arith.constant 0 : index
    %c0_32 = arith.constant 0 : index
    %c32 = arith.constant 32 : index
    %9 = vector.load %arg8[%c0_30, %c0_31, %c0_32, %c32] : memref<2x16x16x72xf32, #tpu.memory_space<vmem>>, vector<2x16x16x8xf32>
    tpu.vector_store %arg8[%c0_30, %c0_31, %c0_32, %c32], %8 {strides = array<i32>} : memref<2x16x16x72xf32, #tpu.memory_space<vmem>>, vector<2x16x16x8xf32>,
    %c0_33 = arith.constant 0 : index
    %c1_34 = arith.constant 1 : index
    %c2_35 = arith.constant 2 : index
    %c0_36 = arith.constant 0 : index
    %10 = vector.load %arg0[%c0_33, %c1_34, %c2_35, %c0_36] : memref<2x18x18x8xf32, #tpu.memory_space<vmem>>, vector<2x16x16x8xf32>
    %c0_37 = arith.constant 0 : index
    %c0_38 = arith.constant 0 : index
    %c0_39 = arith.constant 0 : index
    %c40 = arith.constant 40 : index
    %11 = vector.load %arg8[%c0_37, %c0_38, %c0_39, %c40] : memref<2x16x16x72xf32, #tpu.memory_space<vmem>>, vector<2x16x16x8xf32>
    tpu.vector_store %arg8[%c0_37, %c0_38, %c0_39, %c40], %10 {strides = array<i32>} : memref<2x16x16x72xf32, #tpu.memory_space<vmem>>, vector<2x16x16x8xf32>,
    %c0_40 = arith.constant 0 : index
    %c2_41 = arith.constant 2 : index
    %c0_42 = arith.constant 0 : index
    %c0_43 = arith.constant 0 : index
    %12 = vector.load %arg0[%c0_40, %c2_41, %c0_42, %c0_43] : memref<2x18x18x8xf32, #tpu.memory_space<vmem>>, vector<2x16x16x8xf32>
    %c0_44 = arith.constant 0 : index
    %c0_45 = arith.constant 0 : index
    %c0_46 = arith.constant 0 : index
    %c48 = arith.constant 48 : index
    %13 = vector.load %arg8[%c0_44, %c0_45, %c0_46, %c48] : memref<2x16x16x72xf32, #tpu.memory_space<vmem>>, vector<2x16x16x8xf32>
    tpu.vector_store %arg8[%c0_44, %c0_45, %c0_46, %c48], %12 {strides = array<i32>} : memref<2x16x16x72xf32, #tpu.memory_space<vmem>>, vector<2x16x16x8xf32>,
    %c0_47 = arith.constant 0 : index
    %c2_48 = arith.constant 2 : index
    %c1_49 = arith.constant 1 : index
    %c0_50 = arith.constant 0 : index
    %14 = vector.load %arg0[%c0_47, %c2_48, %c1_49, %c0_50] : memref<2x18x18x8xf32, #tpu.memory_space<vmem>>, vector<2x16x16x8xf32>
    %c0_51 = arith.constant 0 : index
    %c0_52 = arith.constant 0 : index
    %c0_53 = arith.constant 0 : index
    %c56 = arith.constant 56 : index
    %15 = vector.load %arg8[%c0_51, %c0_52, %c0_53, %c56] : memref<2x16x16x72xf32, #tpu.memory_space<vmem>>, vector<2x16x16x8xf32>
    tpu.vector_store %arg8[%c0_51, %c0_52, %c0_53, %c56], %14 {strides = array<i32>} : memref<2x16x16x72xf32, #tpu.memory_space<vmem>>, vector<2x16x16x8xf32>,
    %c0_54 = arith.constant 0 : index
    %c2_55 = arith.constant 2 : index
    %c2_56 = arith.constant 2 : index
    %c0_57 = arith.constant 0 : index
    %16 = vector.load %arg0[%c0_54, %c2_55, %c2_56, %c0_57] : memref<2x18x18x8xf32, #tpu.memory_space<vmem>>, vector<2x16x16x8xf32>
    %c0_58 = arith.constant 0 : index
    %c0_59 = arith.constant 0 : index
    %c0_60 = arith.constant 0 : index
    %c64 = arith.constant 64 : index
    %17 = vector.load %arg8[%c0_58, %c0_59, %c0_60, %c64] : memref<2x16x16x72xf32, #tpu.memory_space<vmem>>, vector<2x16x16x8xf32>
    tpu.vector_store %arg8[%c0_58, %c0_59, %c0_60, %c64], %16 {strides = array<i32>} : memref<2x16x16x72xf32, #tpu.memory_space<vmem>>, vector<2x16x16x8xf32>,
    %c0_61 = arith.constant 0 : index
    %c0_62 = arith.constant 0 : index
    %c0_63 = arith.constant 0 : index
    %c0_64 = arith.constant 0 : index
    %18 = vector.load %arg8[%c0_61, %c0_62, %c0_63, %c0_64] : memref<2x16x16x72xf32, #tpu.memory_space<vmem>>, vector<2x16x16x72xf32>
    %19 = vector.shape_cast %18 : vector<2x16x16x72xf32> to vector<512x72xf32>
    %c0_65 = arith.constant 0 : index
    %c0_66 = arith.constant 0 : index
    %20 = vector.load %arg1[%c0_65, %c0_66] : memref<72x8xf32, #tpu.memory_space<vmem>>, vector<72x8xf32>
    %cst = arith.constant dense<0.000000e+00> : vector<512x8xf32>
    %21 = tpu.matmul %19, %20, %cst {dimension_numbers = #tpu.dot_dimension_numbers<[1], [0], [0], [1], [0, 0, 1, 1], [], []>} : vector<512x72xf32>, vector<72x8xf32>, vector<512x8xf32> -> vector<512x8xf32>
    %c0_67 = arith.constant 0 : index
    %c0_68 = arith.constant 0 : index
    %22 = vector.load %arg9[%c0_67, %c0_68] : memref<512x8xf32, #tpu.memory_space<vmem>>, vector<512x8xf32>
    tpu.vector_store %arg9[%c0_67, %c0_68], %21 {strides = array<i32>} : memref<512x8xf32, #tpu.memory_space<vmem>>, vector<512x8xf32>,
    %c0_69 = arith.constant 0 : index
    %c0_70 = arith.constant 0 : index
    %23 = vector.load %arg9[%c0_69, %c0_70] : memref<512x8xf32, #tpu.memory_space<vmem>>, vector<512x8xf32>
    %cst_71 = arith.constant dense<0.000000e+00> : vector<8xf32>
    %24 = vector.multi_reduction <add>, %23, %cst_71 [0] : vector<512x8xf32> to vector<8xf32>
    %25 = vector.shape_cast %24 : vector<8xf32> to vector<1x8xf32>
    %26 = arith.mulf %23, %23 : vector<512x8xf32>
    %cst_72 = arith.constant dense<0.000000e+00> : vector<8xf32>
    %27 = vector.multi_reduction <add>, %26, %cst_72 [0] : vector<512x8xf32> to vector<8xf32>
    %28 = vector.shape_cast %27 : vector<8xf32> to vector<1x8xf32>
    %cst_73 = arith.constant 0.001953125 : f32
    %29 = vector.broadcast %cst_73 : f32 to vector<1x8xf32>
    %30 = arith.mulf %25, %29 : vector<1x8xf32>
    %cst_74 = arith.constant 0.001953125 : f32
    %31 = vector.broadcast %cst_74 : f32 to vector<1x8xf32>
    %32 = arith.mulf %28, %31 : vector<1x8xf32>
    %33 = arith.mulf %30, %30 : vector<1x8xf32>
    %34 = arith.subf %32, %33 : vector<1x8xf32>
    %cst_75 = arith.constant 9.99999974E-6 : f32
    %35 = vector.broadcast %cst_75 : f32 to vector<1x8xf32>
    %36 = arith.addf %34, %35 : vector<1x8xf32>
    %37 = math.rsqrt %36 : vector<1x8xf32>
    %c0_76 = arith.constant 0 : index
    %c0_77 = arith.constant 0 : index
    %38 = vector.load %arg9[%c0_76, %c0_77] : memref<512x8xf32, #tpu.memory_space<vmem>>, vector<512x8xf32>
    %39 = vector.broadcast %30 : vector<1x8xf32> to vector<512x8xf32>
    %40 = arith.subf %38, %39 : vector<512x8xf32>
    %41 = vector.broadcast %37 : vector<1x8xf32> to vector<512x8xf32>
    %42 = arith.mulf %40, %41 : vector<512x8xf32>
    %c0_78 = arith.constant 0 : index
    %c0_79 = arith.constant 0 : index
    %43 = vector.load %arg2[%c0_78, %c0_79] : memref<1x8xf32, #tpu.memory_space<vmem>>, vector<1x8xf32>
    %44 = vector.broadcast %43 : vector<1x8xf32> to vector<512x8xf32>
    %45 = arith.mulf %42, %44 : vector<512x8xf32>
    %c0_80 = arith.constant 0 : index
    %c0_81 = arith.constant 0 : index
    %46 = vector.load %arg3[%c0_80, %c0_81] : memref<1x8xf32, #tpu.memory_space<vmem>>, vector<1x8xf32>
    %47 = vector.broadcast %46 : vector<1x8xf32> to vector<512x8xf32>
    %48 = arith.addf %45, %47 : vector<512x8xf32>
    %cst_82 = arith.constant 0.000000e+00 : f32
    %49 = vector.broadcast %cst_82 : f32 to vector<512x8xf32>
    %50 = arith.cmpf oge, %48, %49 : vector<512x8xf32>
    %cst_83 = arith.constant 0.00999999977 : f32
    %51 = vector.broadcast %cst_83 : f32 to vector<512x8xf32>
    %52 = arith.mulf %51, %48 : vector<512x8xf32>
    %53 = arith.select %50, %48, %52 : vector<512x8xi1>, vector<512x8xf32>
    %54 = vector.shape_cast %53 : vector<512x8xf32> to vector<2x16x16x8xf32>
    %55 = vector.shape_cast %54 : vector<2x16x16x8xf32> to vector<2x8x2x16x8xf32>
    %cst_84 = arith.constant dense<0.000000e+00> : vector<2x8x16x8xf32>
    %56 = vector.multi_reduction <add>, %55, %cst_84 [2] : vector<2x8x2x16x8xf32> to vector<2x8x16x8xf32>
    %57 = vector.shape_cast %56 : vector<2x8x16x8xf32> to vector<2x8x8x2x8xf32>
    %cst_85 = arith.constant dense<0.000000e+00> : vector<2x8x8x8xf32>
    %58 = vector.multi_reduction <add>, %57, %cst_85 [3] : vector<2x8x8x2x8xf32> to vector<2x8x8x8xf32>
    %cst_86 = arith.constant 2.500000e-01 : f32
    %59 = vector.broadcast %cst_86 : f32 to vector<2x8x8x8xf32>
    %60 = arith.mulf %58, %59 : vector<2x8x8x8xf32>
    %cst_87 = arith.constant 0.000000e+00 : f32
    %61 = vector.broadcast %cst_87 : f32 to vector<2x1x10x8xf32>
    %c0_88 = arith.constant 0 : index
    %c0_89 = arith.constant 0 : index
    %c0_90 = arith.constant 0 : index
    %c0_91 = arith.constant 0 : index
    %62 = vector.load %arg10[%c0_88, %c0_89, %c0_90, %c0_91] : memref<2x10x10x8xf32, #tpu.memory_space<vmem>>, vector<2x1x10x8xf32>
    tpu.vector_store %arg10[%c0_88, %c0_89, %c0_90, %c0_91], %61 {strides = array<i32>} : memref<2x10x10x8xf32, #tpu.memory_space<vmem>>, vector<2x1x10x8xf32>,
    %cst_92 = arith.constant 0.000000e+00 : f32
    %63 = vector.broadcast %cst_92 : f32 to vector<2x1x10x8xf32>
    %c0_93 = arith.constant 0 : index
    %c9 = arith.constant 9 : index
    %c0_94 = arith.constant 0 : index
    %c0_95 = arith.constant 0 : index
    %64 = vector.load %arg10[%c0_93, %c9, %c0_94, %c0_95] : memref<2x10x10x8xf32, #tpu.memory_space<vmem>>, vector<2x1x10x8xf32>
    tpu.vector_store %arg10[%c0_93, %c9, %c0_94, %c0_95], %63 {strides = array<i32>} : memref<2x10x10x8xf32, #tpu.memory_space<vmem>>, vector<2x1x10x8xf32>,
    %cst_96 = arith.constant 0.000000e+00 : f32
    %65 = vector.broadcast %cst_96 : f32 to vector<2x10x1x8xf32>
    %c0_97 = arith.constant 0 : index
    %c0_98 = arith.constant 0 : index
    %c0_99 = arith.constant 0 : index
    %c0_100 = arith.constant 0 : index
    %66 = vector.load %arg10[%c0_97, %c0_98, %c0_99, %c0_100] : memref<2x10x10x8xf32, #tpu.memory_space<vmem>>, vector<2x10x1x8xf32>
    tpu.vector_store %arg10[%c0_97, %c0_98, %c0_99, %c0_100], %65 {strides = array<i32>} : memref<2x10x10x8xf32, #tpu.memory_space<vmem>>, vector<2x10x1x8xf32>,
    %cst_101 = arith.constant 0.000000e+00 : f32
    %67 = vector.broadcast %cst_101 : f32 to vector<2x10x1x8xf32>
    %c0_102 = arith.constant 0 : index
    %c0_103 = arith.constant 0 : index
    %c9_104 = arith.constant 9 : index
    %c0_105 = arith.constant 0 : index
    %68 = vector.load %arg10[%c0_102, %c0_103, %c9_104, %c0_105] : memref<2x10x10x8xf32, #tpu.memory_space<vmem>>, vector<2x10x1x8xf32>
    tpu.vector_store %arg10[%c0_102, %c0_103, %c9_104, %c0_105], %67 {strides = array<i32>} : memref<2x10x10x8xf32, #tpu.memory_space<vmem>>, vector<2x10x1x8xf32>,
    %c0_106 = arith.constant 0 : index
    %c1_107 = arith.constant 1 : index
    %c1_108 = arith.constant 1 : index
    %c0_109 = arith.constant 0 : index
    %69 = vector.load %arg10[%c0_106, %c1_107, %c1_108, %c0_109] : memref<2x10x10x8xf32, #tpu.memory_space<vmem>>, vector<2x8x8x8xf32>
    tpu.vector_store %arg10[%c0_106, %c1_107, %c1_108, %c0_109], %60 {strides = array<i32>} : memref<2x10x10x8xf32, #tpu.memory_space<vmem>>, vector<2x8x8x8xf32>,
    %c0_110 = arith.constant 0 : index
    %c0_111 = arith.constant 0 : index
    %c0_112 = arith.constant 0 : index
    %c0_113 = arith.constant 0 : index
    %70 = vector.load %arg10[%c0_110, %c0_111, %c0_112, %c0_113] : memref<2x10x10x8xf32, #tpu.memory_space<vmem>>, vector<2x8x8x8xf32>
    %c0_114 = arith.constant 0 : index
    %c0_115 = arith.constant 0 : index
    %c0_116 = arith.constant 0 : index
    %c0_117 = arith.constant 0 : index
    %71 = vector.load %arg11[%c0_114, %c0_115, %c0_116, %c0_117] : memref<2x8x8x72xf32, #tpu.memory_space<vmem>>, vector<2x8x8x8xf32>
    tpu.vector_store %arg11[%c0_114, %c0_115, %c0_116, %c0_117], %70 {strides = array<i32>} : memref<2x8x8x72xf32, #tpu.memory_space<vmem>>, vector<2x8x8x8xf32>,
    %c0_118 = arith.constant 0 : index
    %c0_119 = arith.constant 0 : index
    %c1_120 = arith.constant 1 : index
    %c0_121 = arith.constant 0 : index
    %72 = vector.load %arg10[%c0_118, %c0_119, %c1_120, %c0_121] : memref<2x10x10x8xf32, #tpu.memory_space<vmem>>, vector<2x8x8x8xf32>
    %c0_122 = arith.constant 0 : index
    %c0_123 = arith.constant 0 : index
    %c0_124 = arith.constant 0 : index
    %c8_125 = arith.constant 8 : index
    %73 = vector.load %arg11[%c0_122, %c0_123, %c0_124, %c8_125] : memref<2x8x8x72xf32, #tpu.memory_space<vmem>>, vector<2x8x8x8xf32>
    tpu.vector_store %arg11[%c0_122, %c0_123, %c0_124, %c8_125], %72 {strides = array<i32>} : memref<2x8x8x72xf32, #tpu.memory_space<vmem>>, vector<2x8x8x8xf32>,
    %c0_126 = arith.constant 0 : index
    %c0_127 = arith.constant 0 : index
    %c2_128 = arith.constant 2 : index
    %c0_129 = arith.constant 0 : index
    %74 = vector.load %arg10[%c0_126, %c0_127, %c2_128, %c0_129] : memref<2x10x10x8xf32, #tpu.memory_space<vmem>>, vector<2x8x8x8xf32>
    %c0_130 = arith.constant 0 : index
    %c0_131 = arith.constant 0 : index
    %c0_132 = arith.constant 0 : index
    %c16_133 = arith.constant 16 : index
    %75 = vector.load %arg11[%c0_130, %c0_131, %c0_132, %c16_133] : memref<2x8x8x72xf32, #tpu.memory_space<vmem>>, vector<2x8x8x8xf32>
    tpu.vector_store %arg11[%c0_130, %c0_131, %c0_132, %c16_133], %74 {strides = array<i32>} : memref<2x8x8x72xf32, #tpu.memory_space<vmem>>, vector<2x8x8x8xf32>,
    %c0_134 = arith.constant 0 : index
    %c1_135 = arith.constant 1 : index
    %c0_136 = arith.constant 0 : index
    %c0_137 = arith.constant 0 : index
    %76 = vector.load %arg10[%c0_134, %c1_135, %c0_136, %c0_137] : memref<2x10x10x8xf32, #tpu.memory_space<vmem>>, vector<2x8x8x8xf32>
    %c0_138 = arith.constant 0 : index
    %c0_139 = arith.constant 0 : index
    %c0_140 = arith.constant 0 : index
    %c24_141 = arith.constant 24 : index
    %77 = vector.load %arg11[%c0_138, %c0_139, %c0_140, %c24_141] : memref<2x8x8x72xf32, #tpu.memory_space<vmem>>, vector<2x8x8x8xf32>
    tpu.vector_store %arg11[%c0_138, %c0_139, %c0_140, %c24_141], %76 {strides = array<i32>} : memref<2x8x8x72xf32, #tpu.memory_space<vmem>>, vector<2x8x8x8xf32>,
    %c0_142 = arith.constant 0 : index
    %c1_143 = arith.constant 1 : index
    %c1_144 = arith.constant 1 : index
    %c0_145 = arith.constant 0 : index
    %78 = vector.load %arg10[%c0_142, %c1_143, %c1_144, %c0_145] : memref<2x10x10x8xf32, #tpu.memory_space<vmem>>, vector<2x8x8x8xf32>
    %c0_146 = arith.constant 0 : index
    %c0_147 = arith.constant 0 : index
    %c0_148 = arith.constant 0 : index
    %c32_149 = arith.constant 32 : index
    %79 = vector.load %arg11[%c0_146, %c0_147, %c0_148, %c32_149] : memref<2x8x8x72xf32, #tpu.memory_space<vmem>>, vector<2x8x8x8xf32>
    tpu.vector_store %arg11[%c0_146, %c0_147, %c0_148, %c32_149], %78 {strides = array<i32>} : memref<2x8x8x72xf32, #tpu.memory_space<vmem>>, vector<2x8x8x8xf32>,
    %c0_150 = arith.constant 0 : index
    %c1_151 = arith.constant 1 : index
    %c2_152 = arith.constant 2 : index
    %c0_153 = arith.constant 0 : index
    %80 = vector.load %arg10[%c0_150, %c1_151, %c2_152, %c0_153] : memref<2x10x10x8xf32, #tpu.memory_space<vmem>>, vector<2x8x8x8xf32>
    %c0_154 = arith.constant 0 : index
    %c0_155 = arith.constant 0 : index
    %c0_156 = arith.constant 0 : index
    %c40_157 = arith.constant 40 : index
    %81 = vector.load %arg11[%c0_154, %c0_155, %c0_156, %c40_157] : memref<2x8x8x72xf32, #tpu.memory_space<vmem>>, vector<2x8x8x8xf32>
    tpu.vector_store %arg11[%c0_154, %c0_155, %c0_156, %c40_157], %80 {strides = array<i32>} : memref<2x8x8x72xf32, #tpu.memory_space<vmem>>, vector<2x8x8x8xf32>,
    %c0_158 = arith.constant 0 : index
    %c2_159 = arith.constant 2 : index
    %c0_160 = arith.constant 0 : index
    %c0_161 = arith.constant 0 : index
    %82 = vector.load %arg10[%c0_158, %c2_159, %c0_160, %c0_161] : memref<2x10x10x8xf32, #tpu.memory_space<vmem>>, vector<2x8x8x8xf32>
    %c0_162 = arith.constant 0 : index
    %c0_163 = arith.constant 0 : index
    %c0_164 = arith.constant 0 : index
    %c48_165 = arith.constant 48 : index
    %83 = vector.load %arg11[%c0_162, %c0_163, %c0_164, %c48_165] : memref<2x8x8x72xf32, #tpu.memory_space<vmem>>, vector<2x8x8x8xf32>
    tpu.vector_store %arg11[%c0_162, %c0_163, %c0_164, %c48_165], %82 {strides = array<i32>} : memref<2x8x8x72xf32, #tpu.memory_space<vmem>>, vector<2x8x8x8xf32>,
    %c0_166 = arith.constant 0 : index
    %c2_167 = arith.constant 2 : index
    %c1_168 = arith.constant 1 : index
    %c0_169 = arith.constant 0 : index
    %84 = vector.load %arg10[%c0_166, %c2_167, %c1_168, %c0_169] : memref<2x10x10x8xf32, #tpu.memory_space<vmem>>, vector<2x8x8x8xf32>
    %c0_170 = arith.constant 0 : index
    %c0_171 = arith.constant 0 : index
    %c0_172 = arith.constant 0 : index
    %c56_173 = arith.constant 56 : index
    %85 = vector.load %arg11[%c0_170, %c0_171, %c0_172, %c56_173] : memref<2x8x8x72xf32, #tpu.memory_space<vmem>>, vector<2x8x8x8xf32>
    tpu.vector_store %arg11[%c0_170, %c0_171, %c0_172, %c56_173], %84 {strides = array<i32>} : memref<2x8x8x72xf32, #tpu.memory_space<vmem>>, vector<2x8x8x8xf32>,
    %c0_174 = arith.constant 0 : index
    %c2_175 = arith.constant 2 : index
    %c2_176 = arith.constant 2 : index
    %c0_177 = arith.constant 0 : index
    %86 = vector.load %arg10[%c0_174, %c2_175, %c2_176, %c0_177] : memref<2x10x10x8xf32, #tpu.memory_space<vmem>>, vector<2x8x8x8xf32>
    %c0_178 = arith.constant 0 : index
    %c0_179 = arith.constant 0 : index
    %c0_180 = arith.constant 0 : index
    %c64_181 = arith.constant 64 : index
    %87 = vector.load %arg11[%c0_178, %c0_179, %c0_180, %c64_181] : memref<2x8x8x72xf32, #tpu.memory_space<vmem>>, vector<2x8x8x8xf32>
    tpu.vector_store %arg11[%c0_178, %c0_179, %c0_180, %c64_181], %86 {strides = array<i32>} : memref<2x8x8x72xf32, #tpu.memory_space<vmem>>, vector<2x8x8x8xf32>,
    %c0_182 = arith.constant 0 : index
    %c0_183 = arith.constant 0 : index
    %c0_184 = arith.constant 0 : index
    %c0_185 = arith.constant 0 : index
    %88 = vector.load %arg11[%c0_182, %c0_183, %c0_184, %c0_185] : memref<2x8x8x72xf32, #tpu.memory_space<vmem>>, vector<2x8x8x72xf32>
    %89 = vector.shape_cast %88 : vector<2x8x8x72xf32> to vector<128x72xf32>
    %c0_186 = arith.constant 0 : index
    %c0_187 = arith.constant 0 : index
    %90 = vector.load %arg4[%c0_186, %c0_187] : memref<72x8xf32, #tpu.memory_space<vmem>>, vector<72x8xf32>
    %cst_188 = arith.constant dense<0.000000e+00> : vector<128x8xf32>
    %91 = tpu.matmul %89, %90, %cst_188 {dimension_numbers = #tpu.dot_dimension_numbers<[1], [0], [0], [1], [0, 0, 1, 1], [], []>} : vector<128x72xf32>, vector<72x8xf32>, vector<128x8xf32> -> vector<128x8xf32>
    %cst_189 = arith.constant dense<0.000000e+00> : vector<8xf32>
    %92 = vector.multi_reduction <add>, %91, %cst_189 [0] : vector<128x8xf32> to vector<8xf32>
    %93 = vector.shape_cast %92 : vector<8xf32> to vector<1x8xf32>
    %94 = arith.mulf %91, %91 : vector<128x8xf32>
    %cst_190 = arith.constant dense<0.000000e+00> : vector<8xf32>
    %95 = vector.multi_reduction <add>, %94, %cst_190 [0] : vector<128x8xf32> to vector<8xf32>
    %96 = vector.shape_cast %95 : vector<8xf32> to vector<1x8xf32>
    %cst_191 = arith.constant 7.812500e-03 : f32
    %97 = vector.broadcast %cst_191 : f32 to vector<1x8xf32>
    %98 = arith.mulf %93, %97 : vector<1x8xf32>
    %cst_192 = arith.constant 7.812500e-03 : f32
    %99 = vector.broadcast %cst_192 : f32 to vector<1x8xf32>
    %100 = arith.mulf %96, %99 : vector<1x8xf32>
    %101 = arith.mulf %98, %98 : vector<1x8xf32>
    %102 = arith.subf %100, %101 : vector<1x8xf32>
    %cst_193 = arith.constant 9.99999974E-6 : f32
    %103 = vector.broadcast %cst_193 : f32 to vector<1x8xf32>
    %104 = arith.addf %102, %103 : vector<1x8xf32>
    %105 = math.rsqrt %104 : vector<1x8xf32>
    %106 = vector.broadcast %98 : vector<1x8xf32> to vector<128x8xf32>
    %107 = arith.subf %91, %106 : vector<128x8xf32>
    %108 = vector.broadcast %105 : vector<1x8xf32> to vector<128x8xf32>
    %109 = arith.mulf %107, %108 : vector<128x8xf32>
    %c0_194 = arith.constant 0 : index
    %c0_195 = arith.constant 0 : index
    %110 = vector.load %arg5[%c0_194, %c0_195] : memref<1x8xf32, #tpu.memory_space<vmem>>, vector<1x8xf32>
    %111 = vector.broadcast %110 : vector<1x8xf32> to vector<128x8xf32>
    %112 = arith.mulf %109, %111 : vector<128x8xf32>
    %c0_196 = arith.constant 0 : index
    %c0_197 = arith.constant 0 : index
    %113 = vector.load %arg6[%c0_196, %c0_197] : memref<1x8xf32, #tpu.memory_space<vmem>>, vector<1x8xf32>
    %114 = vector.broadcast %113 : vector<1x8xf32> to vector<128x8xf32>
    %115 = arith.addf %112, %114 : vector<128x8xf32>
    %cst_198 = arith.constant 0.000000e+00 : f32
    %116 = vector.broadcast %cst_198 : f32 to vector<128x8xf32>
    %117 = arith.cmpf oge, %115, %116 : vector<128x8xf32>
    %cst_199 = arith.constant 0.00999999977 : f32
    %118 = vector.broadcast %cst_199 : f32 to vector<128x8xf32>
    %119 = arith.mulf %118, %115 : vector<128x8xf32>
    %120 = arith.select %117, %115, %119 : vector<128x8xi1>, vector<128x8xf32>
    %121 = vector.shape_cast %120 : vector<128x8xf32> to vector<2x8x8x8xf32>
    %c0_200 = arith.constant 0 : index
    %c0_201 = arith.constant 0 : index
    %c0_202 = arith.constant 0 : index
    %c0_203 = arith.constant 0 : index
    %122 = vector.load %arg7[%c0_200, %c0_201, %c0_202, %c0_203] : memref<2x8x8x8xf32, #tpu.memory_space<vmem>>, vector<2x8x8x8xf32>
    tpu.vector_store %arg7[%c0_200, %c0_201, %c0_202, %c0_203], %121 {strides = array<i32>} : memref<2x8x8x8xf32, #tpu.memory_space<vmem>>, vector<2x8x8x8xf32>,
    return
  }
}

</mosaic_0001>

<bundles_post_ra>
// kernel: block_forward.1
= control target key start
LH: loop header
LB: loop body
LE: loop exit
PB: predicated region body
PF: predicated region fallthrough
CT: control target
= control target key end

     0   :  { %s9008_s28 = smov 8   ;;  %vm15931_vm0 = vcmask 64512   ;;  %vm15912_vm1 = vcmask 130112   ;;  %s9009_s20 = smov 16   ;;  %vm15911_vm2 = vcmask 195712   ;;  %vm15910_vm3 = vcmask 261312   ;;  %s15853_s0 = inlined_call_operand.vmem [shape: f32[2,18,18,8], index: 0, kind: input, shape index: {}]   ;;  %s15854_s1 = inlined_call_operand.vmem [shape: f32[72,8], index: 1, kind: input, shape index: {}]   ;;  %s15855_s2 = inlined_call_operand.vmem [shape: f32[1,8], index: 2, kind: input, shape index: {}]   ;;  %s15856_s3 = inlined_call_operand.vmem [shape: f32[1,8], index: 3, kind: input, shape index: {}]   ;;  %s15857_s4 = inlined_call_operand.vmem [shape: f32[72,8], index: 4, kind: input, shape index: {}]   ;;  %s15858_s5 = inlined_call_operand.vmem [shape: f32[1,8], index: 5, kind: input, shape index: {}]   ;;  %s15859_s6 = inlined_call_operand.vmem [shape: f32[1,8], index: 6, kind: input, shape index: {}]   ;;  %s15860_s7 = inlined_call_operand.vmem [shape: f32[2,8,8,8], index: 7, kind: output, shape index: {}]  }
   0x1   :  { %v155_v0 = vld [vmem:[%s15853_s0 + $0x1] sm:$0xff]  ;;  %v157_v1 = vld [vmem:[%s15853_s0 + $0x19] sm:$0xff]  ;;  %v156_v2 = vld [vmem:[%s15853_s0 + $0x9] sm:$0xff]  ;;  %s9010_s18 = smov 24   ;;  %s9011_s10 = smov 32   ;;  %vm15909_vm4 = vcmask 326912  }
   0x2   :  { %283 = vrot.lane.b32.xlu0 %v155_v0, %s9008_s28  ;;  %287 = vrot.lane.b32.xlu1 %v157_v1, %s9008_s28  ;;  %v158_v3 = vld [vmem:[%s15853_s0 + $0x21] sm:$0xff]  ;;  %v159_v4 = vld [vmem:[%s15853_s0 + $0x31] sm:$0xff]  ;;  %s9012_s27 = smov 40   ;;  %s9013_s15 = smov 48   ;;  %vm15908_vm5 = vcmask 392512   ;;  %vm15907_vm6 = vcmask 458112  }
   0x3   :  { %v160_v5 = vld [vmem:[%s15853_s0 + $0x39] sm:$0xff]  ;;  %v161_v6 = vld [vmem:[%s15853_s0 + $0x49] sm:$0xff]  ;;  %v162_v7 = vld [vmem:[%s15853_s0 + $0x51] sm:$0xff]  ;;  %s9014_s16 = smov 56   ;;  %s9015_s23 = smov 64   ;;  %vm15906_vm7 = vcmask 523712  }
   0x4   :  { %v163_v8 = vld [vmem:[%s15853_s0 + $0x61] sm:$0xff]  ;;  %v164_v9 = vld [vmem:[%s15853_s0 + $0x69] sm:$0xff]  ;;  %v165_v10 = vld [vmem:[%s15853_s0 + $0x79] sm:$0xff]  ;;  %vm15898_vm8 = vcmask 589312   ;;  %vm15897_vm9 = vcmask 588800   ;;  %vm15930_vm10 = vcmask 58368  }
   0x5   :  { %v166_v11 = vld [vmem:[%s15853_s0 + $0x81] sm:$0xff]  ;;  %v9112_v13 = vld [vmem:[%s15853_s0 + $0x18] sm:$0xff]  ;;  %v9137_v18 = vld [vmem:[%s15853_s0 + $0x30] sm:$0xff]  ;;  %vm6648_vm11 = vcmask 57344  }
   0x6   :  { %285 = vrot.lane.b32.xlu0 %v156_v2, %s9008_s28  ;;  %289 = vrot.lane.b32.xlu1 %v158_v3, %s9008_s28  ;;  %v26_v12 = vld [vmem:[%s15853_s0] sm:$0xff]  ;;  %v167_v14 = vld [vmem:[%s15853_s0 + $0x91] sm:$0xff]  ;;  %93 = vst.msk [vmem:[#allocation2 + $0x10] sm:$0xff] %vm15931_vm0, %v9112_v13  ;;  %95 = vst.msk [vmem:[#allocation2 + $0x20] sm:$0xff] %vm15931_vm0, %v9137_v18 }
   0x7   :  { %v168_v15 = vld [vmem:[%s15853_s0 + $0x99] sm:$0xff]  ;;  %91 = vst.msk [vmem:[#allocation2] sm:$0xff] %vm15931_vm0, %v26_v12  ;;  %v27_v16 = vld [vmem:[%s15853_s0 + $0x8] sm:$0xff]  ;;  %v170_v22 = vld [vmem:[%s15853_s0 + $0xb1] sm:$0xff] }
   0x8   :  { %92 = vst.msk [vmem:[#allocation2 + $0x8] sm:$0xff] %vm15931_vm0, %v27_v16  ;;  %v9130_v17 = vld [vmem:[%s15853_s0 + $0x20] sm:$0xff]  ;;  %v9142_v19 = vld [vmem:[%s15853_s0 + $0x38] sm:$0xff]  ;;  %v9153_v20 = vld [vmem:[%s15853_s0 + $0x48] sm:$0xff] }
   0x9   :  { %94 = vst.msk [vmem:[#allocation2 + $0x18] sm:$0xff] %vm15931_vm0, %v9130_v17  ;;  %96 = vst.msk [vmem:[#allocation2 + $0x28] sm:$0xff] %vm15931_vm0, %v9142_v19  ;;  %v169_v21 = vld [vmem:[%s15853_s0 + $0xa9] sm:$0xff]  ;;  %v9173_v24 = vld [vmem:[%s15853_s0 + $0x60] sm:$0xff] }
   0xa   :  { %291 = vrot.lane.b32.xlu0 %v159_v4, %s9008_s28  ;;  %293 = vrot.lane.b32.xlu1 %v160_v5, %s9008_s28  ;;  %97 = vst.msk [vmem:[#allocation2 + $0x30] sm:$0xff] %vm15931_vm0, %v9153_v20  ;;  %v9166_v23 = vld [vmem:[%s15853_s0 + $0x50] sm:$0xff]  ;;  %v9178_v25 = vld [vmem:[%s15853_s0 + $0x68] sm:$0xff]  ;;  %99 = vst.msk [vmem:[#allocation2 + $0x40] sm:$0xff] %vm15931_vm0, %v9173_v24 }
   0xb   :  { %98 = vst.msk [vmem:[#allocation2 + $0x38] sm:$0xff] %vm15931_vm0, %v9166_v23  ;;  %100 = vst.msk [vmem:[#allocation2 + $0x48] sm:$0xff] %vm15931_vm0, %v9178_v25  ;;  %v9187_v26 = vld [vmem:[%s15853_s0 + $0x78] sm:$0xff]  ;;  %v9192_v27 = vld [vmem:[%s15853_s0 + $0x80] sm:$0xff] }
   0xc   :  { %v171_v28 = vld [vmem:[%s15853_s0 + $0xc1] sm:$0xff]  ;;  %101 = vst.msk [vmem:[#allocation2 + $0x50] sm:$0xff] %vm15931_vm0, %v9187_v26  ;;  %102 = vst.msk [vmem:[#allocation2 + $0x58] sm:$0xff] %vm15931_vm0, %v9192_v27  ;;  %v172_v29 = vld [vmem:[%s15853_s0 + $0xc9] sm:$0xff] }
   0xd   :  { %v9209_v30 = vld [vmem:[%s15853_s0 + $0x90] sm:$0xff]  ;;  %v9214_v31 = vld [vmem:[%s15853_s0 + $0x98] sm:$0xff]  ;;  %v9223_v32 = vld [vmem:[%s15853_s0 + $0xa8] sm:$0xff] }
   0xe   :  { %295 = vrot.lane.b32.xlu0 %v161_v6, %s9008_s28  ;;  %297 = vrot.lane.b32.xlu1 %v162_v7, %s9008_s28  ;;  %103 = vst.msk [vmem:[#allocation2 + $0x60] sm:$0xff] %vm15931_vm0, %v9209_v30  ;;  %104 = vst.msk [vmem:[#allocation2 + $0x68] sm:$0xff] %vm15931_vm0, %v9214_v31  ;;  %v9228_v33 = vld [vmem:[%s15853_s0 + $0xb0] sm:$0xff]  ;;  %v9237_v34 = vld [vmem:[%s15853_s0 + $0xc0] sm:$0xff] }
   0xf   :  { %105 = vst.msk [vmem:[#allocation2 + $0x70] sm:$0xff] %vm15931_vm0, %v9223_v32  ;;  %106 = vst.msk [vmem:[#allocation2 + $0x78] sm:$0xff] %vm15931_vm0, %v9228_v33  ;;  %v173_v35 = vld [vmem:[%s15853_s0 + $0xd9] sm:$0xff]  ;;  %v9249_v36 = vld [vmem:[%s15853_s0 + $0xc8] sm:$0xff] }
  0x10   :  { %107 = vst.msk [vmem:[#allocation2 + $0x80] sm:$0xff] %vm15931_vm0, %v9237_v34  ;;  %v174_v37 = vld [vmem:[%s15853_s0 + $0xe1] sm:$0xff]  ;;  %108 = vst.msk [vmem:[#allocation2 + $0x88] sm:$0xff] %vm15931_vm0, %v9249_v36  ;;  %v9259_v38 = vld [vmem:[%s15853_s0 + $0xd8] sm:$0xff] }
  0x11   :  { %v9264_v39 = vld [vmem:[%s15853_s0 + $0xe0] sm:$0xff]  ;;  %109 = vst.msk [vmem:[#allocation2 + $0x90] sm:$0xff] %vm15931_vm0, %v9259_v38  ;;  %v9273_v40 = vld [vmem:[%s15853_s0 + $0xf0] sm:$0xff]  ;;  %v9280_v41 = vld [vmem:[%s15853_s0 + $0xf8] sm:$0xff] }
  0x12   :  { %299 = vrot.lane.b32.xlu0 %v163_v8, %s9008_s28  ;;  %301 = vrot.lane.b32.xlu1 %v164_v9, %s9008_s28  ;;  %110 = vst.msk [vmem:[#allocation2 + $0x98] sm:$0xff] %vm15931_vm0, %v9264_v39  ;;  %111 = vst.msk [vmem:[#allocation2 + $0xa0] sm:$0xff] %vm15931_vm0, %v9273_v40  ;;  %v9289_v42 = vld [vmem:[%s15853_s0 + $0x108] sm:$0xff]  ;;  %v9294_v43 = vld [vmem:[%s15853_s0 + $0x110] sm:$0xff] }
  0x13   :  { %112 = vst.msk [vmem:[#allocation2 + $0xa8] sm:$0xff] %vm15931_vm0, %v9280_v41  ;;  %v175_v44 = vld [vmem:[%s15853_s0 + $0xf1] sm:$0xff]  ;;  %v176_v45 = vld [vmem:[%s15853_s0 + $0xf9] sm:$0xff]  ;;  %113 = vst.msk [vmem:[#allocation2 + $0xb0] sm:$0xff] %vm15931_vm0, %v9289_v42 }
  0x14   :  { %114 = vst.msk [vmem:[#allocation2 + $0xb8] sm:$0xff] %vm15931_vm0, %v9294_v43  ;;  %v9309_v46 = vld [vmem:[%s15853_s0 + $0x120] sm:$0xff]  ;;  %v9316_v47 = vld [vmem:[%s15853_s0 + $0x128] sm:$0xff]  ;;  %v9323_v48 = vld [vmem:[%s15853_s0 + $0x138] sm:$0xff] }
  0x15   :  { %115 = vst.msk [vmem:[#allocation2 + $0xc0] sm:$0xff] %vm15931_vm0, %v9309_v46  ;;  %116 = vst.msk [vmem:[#allocation2 + $0xc8] sm:$0xff] %vm15931_vm0, %v9316_v47  ;;  %v9328_v49 = vld [vmem:[%s15853_s0 + $0x140] sm:$0xff]  ;;  %v177_v50 = vld [vmem:[%s15853_s0 + $0x109] sm:$0xff] }
  0x16   :  { %303 = vrot.lane.b32.xlu0 %v165_v10, %s9008_s28  ;;  %305 = vrot.lane.b32.xlu1 %v166_v11, %s9008_s28  ;;  %117 = vst.msk [vmem:[#allocation2 + $0xd0] sm:$0xff] %vm15931_vm0, %v9323_v48  ;;  %118 = vst.msk [vmem:[#allocation2 + $0xd8] sm:$0xff] %vm15931_vm0, %v9328_v49  ;;  %v178_v51 = vld [vmem:[%s15853_s0 + $0x111] sm:$0xff]  ;;  %v179_v54 = vld [vmem:[%s15853_s0 + $0x121] sm:$0xff] }
  0x17   :  { %v9345_v52 = vld [vmem:[%s15853_s0 + $0x150] sm:$0xff]  ;;  %v9352_v53 = vld [vmem:[%s15853_s0 + $0x158] sm:$0xff]  ;;  %v9367_v56 = vld [vmem:[%s15853_s0 + $0x168] sm:$0xff] }
  0x18   :  { %119 = vst.msk [vmem:[#allocation2 + $0xe0] sm:$0xff] %vm15931_vm0, %v9345_v52  ;;  %120 = vst.msk [vmem:[#allocation2 + $0xe8] sm:$0xff] %vm15931_vm0, %v9352_v53  ;;  %v180_v55 = vld [vmem:[%s15853_s0 + $0x129] sm:$0xff]  ;;  %v181_v58 = vld [vmem:[%s15853_s0 + $0x139] sm:$0xff] }
  0x19   :  { %121 = vst.msk [vmem:[#allocation2 + $0xf0] sm:$0xff] %vm15931_vm0, %v9367_v56  ;;  %v9374_v57 = vld [vmem:[%s15853_s0 + $0x170] sm:$0xff]  ;;  %v182_v59 = vld [vmem:[%s15853_s0 + $0x141] sm:$0xff]  ;;  %v59_v61 = vld [vmem:[%s15853_s0 + $0x1b8] sm:$0xff] }
  0x1a   :  { %307 = vrot.lane.b32.xlu0 %v167_v14, %s9008_s28  ;;  %309 = vrot.lane.b32.xlu1 %v168_v15, %s9008_s28  ;;  %122 = vst.msk [vmem:[#allocation2 + $0xf8] sm:$0xff] %vm15931_vm0, %v9374_v57  ;;  %v58_v60 = vld [vmem:[%s15853_s0 + $0x1b0] sm:$0xff]  ;;  %124 = vst.msk [vmem:[#allocation2 + $0x108] sm:$0xff] %vm15931_vm0, %v59_v61  ;;  %v184_v63 = vld [vmem:[%s15853_s0 + $0x159] sm:$0xff] }
  0x1b   :  { %123 = vst.msk [vmem:[#allocation2 + $0x100] sm:$0xff] %vm15931_vm0, %v58_v60  ;;  %v183_v62 = vld [vmem:[%s15853_s0 + $0x151] sm:$0xff]  ;;  %v9405_v0 = vld [vmem:[%s15853_s0 + $0x1c8] sm:$0xff]  ;;  %v9427_v4 = vld [vmem:[%s15853_s0 + $0x1e0] sm:$0xff] }
  0x1c   :  { %125 = vst.msk [vmem:[#allocation2 + $0x110] sm:$0xff] %vm15931_vm0, %v9405_v0  ;;  %v9412_v1 = vld [vmem:[%s15853_s0 + $0x1d0] sm:$0xff]  ;;  %127 = vst.msk [vmem:[#allocation2 + $0x120] sm:$0xff] %vm15931_vm0, %v9427_v4  ;;  %v9434_v5 = vld [vmem:[%s15853_s0 + $0x1e8] sm:$0xff] }
  0x1d   :  { %126 = vst.msk [vmem:[#allocation2 + $0x118] sm:$0xff] %vm15931_vm0, %v9412_v1  ;;  %v185_v2 = vld [vmem:[%s15853_s0 + $0x169] sm:$0xff]  ;;  %v186_v3 = vld [vmem:[%s15853_s0 + $0x171] sm:$0xff]  ;;  %128 = vst.msk [vmem:[#allocation2 + $0x128] sm:$0xff] %vm15931_vm0, %v9434_v5 }
  0x1e   :  { %311 = vrot.lane.b32.xlu0 %v169_v21, %s9008_s28  ;;  %313 = vrot.lane.b32.xlu1 %v170_v22, %s9008_s28  ;;  %v187_v6 = vld [vmem:[%s15853_s0 + $0x1b1] sm:$0xff]  ;;  %v188_v7 = vld [vmem:[%s15853_s0 + $0x1b9] sm:$0xff] }
  0x1f   :  { %v9449_v8 = vld [vmem:[%s15853_s0 + $0x1f8] sm:$0xff]  ;;  %v9456_v9 = vld [vmem:[%s15853_s0 + $0x200] sm:$0xff]  ;;  %v189_v10 = vld [vmem:[%s15853_s0 + $0x1c9] sm:$0xff] }
  0x20   :  { %129 = vst.msk [vmem:[#allocation2 + $0x130] sm:$0xff] %vm15931_vm0, %v9449_v8  ;;  %130 = vst.msk [vmem:[#allocation2 + $0x138] sm:$0xff] %vm15931_vm0, %v9456_v9  ;;  %v190_v11 = vld [vmem:[%s15853_s0 + $0x1d1] sm:$0xff]  ;;  %v191_v15 = vld [vmem:[%s15853_s0 + $0x1e1] sm:$0xff] }
  0x21   :  { %v9471_v12 = vld [vmem:[%s15853_s0 + $0x210] sm:$0xff]  ;;  %v9478_v14 = vld [vmem:[%s15853_s0 + $0x218] sm:$0xff]  ;;  %v9493_v21 = vld [vmem:[%s15853_s0 + $0x228] sm:$0xff] }
  0x22   :  { %315 = vrot.lane.b32.xlu0 %v171_v28, %s9008_s28  ;;  %317 = vrot.lane.b32.xlu1 %v172_v29, %s9008_s28  ;;  %131 = vst.msk [vmem:[#allocation2 + $0x140] sm:$0xff] %vm15931_vm0, %v9471_v12  ;;  %132 = vst.msk [vmem:[#allocation2 + $0x148] sm:$0xff] %vm15931_vm0, %v9478_v14  ;;  %v192_v16 = vld [vmem:[%s15853_s0 + $0x1e9] sm:$0xff]  ;;  %v193_v28 = vld [vmem:[%s15853_s0 + $0x1f9] sm:$0xff] }
  0x23   :  { %133 = vst.msk [vmem:[#allocation2 + $0x150] sm:$0xff] %vm15931_vm0, %v9493_v21  ;;  %v9500_v22 = vld [vmem:[%s15853_s0 + $0x230] sm:$0xff]  ;;  %v194_v29 = vld [vmem:[%s15853_s0 + $0x201] sm:$0xff] }
  0x24   :  { %134 = vst.msk [vmem:[#allocation2 + $0x158] sm:$0xff] %vm15931_vm0, %v9500_v22  ;;  %v199_v60 = vld [vmem:[%s15853_s0 + $0x241] sm:$0xff]  ;;  %v200_v61 = vld [vmem:[%s15853_s0 + $0x249] sm:$0xff] }
  0x26   :  { %319 = vrot.lane.b32.xlu0 %v173_v35, %s9008_s28  ;;  %321 = vrot.lane.b32.xlu1 %v174_v37, %s9008_s28  ;;  %v9515_v35 = vld [vmem:[%s15853_s0 + $0x240] sm:$0xff]  ;;  %v9522_v37 = vld [vmem:[%s15853_s0 + $0x248] sm:$0xff] }
  0x27   :  { %135 = vst.msk [vmem:[#allocation2 + $0x160] sm:$0xff] %vm15931_vm0, %v9515_v35  ;;  %136 = vst.msk [vmem:[#allocation2 + $0x168] sm:$0xff] %vm15931_vm0, %v9522_v37 }
  0x2a   :  { %323 = vrot.lane.b32.xlu0 %v175_v44, %s9008_s28  ;;  %325 = vrot.lane.b32.xlu1 %v176_v45, %s9008_s28  ;;  %v195_v44 = vld [vmem:[%s15853_s0 + $0x211] sm:$0xff]  ;;  %v196_v45 = vld [vmem:[%s15853_s0 + $0x219] sm:$0xff] }
  0x2e   :  { %327 = vrot.lane.b32.xlu0 %v177_v50, %s9008_s28  ;;  %329 = vrot.lane.b32.xlu1 %v178_v51, %s9008_s28  ;;  %v9537_v50 = vld [vmem:[%s15853_s0 + $0x258] sm:$0xff]  ;;  %v9544_v51 = vld [vmem:[%s15853_s0 + $0x260] sm:$0xff] }
  0x2f   :  { %137 = vst.msk [vmem:[#allocation2 + $0x170] sm:$0xff] %vm15931_vm0, %v9537_v50  ;;  %138 = vst.msk [vmem:[#allocation2 + $0x178] sm:$0xff] %vm15931_vm0, %v9544_v51 }
  0x32   :  { %331 = vrot.lane.b32.xlu0 %v179_v54, %s9008_s28  ;;  %333 = vrot.lane.b32.xlu1 %v180_v55, %s9008_s28  ;;  %v197_v54 = vld [vmem:[%s15853_s0 + $0x229] sm:$0xff]  ;;  %v198_v55 = vld [vmem:[%s15853_s0 + $0x231] sm:$0xff] }
  0x36   :  { %335 = vrot.lane.b32.xlu0 %v181_v58, %s9008_s28  ;;  %337 = vrot.lane.b32.xlu1 %v182_v59, %s9008_s28  ;;  %v9559_v58 = vld [vmem:[%s15853_s0 + $0x270] sm:$0xff]  ;;  %v9566_v59 = vld [vmem:[%s15853_s0 + $0x278] sm:$0xff] }
  0x37   :  { %139 = vst.msk [vmem:[#allocation2 + $0x180] sm:$0xff] %vm15931_vm0, %v9559_v58  ;;  %140 = vst.msk [vmem:[#allocation2 + $0x188] sm:$0xff] %vm15931_vm0, %v9566_v59 }
  0x3a   :  { %339 = vrot.lane.b32.xlu0 %v183_v62, %s9008_s28  ;;  %341 = vrot.lane.b32.xlu1 %v184_v63, %s9008_s28  ;;  %v9581_v62 = vld [vmem:[%s15853_s0 + $0x288] sm:$0xff]  ;;  %v9588_v63 = vld [vmem:[%s15853_s0 + $0x290] sm:$0xff] }
  0x3b   :  { %141 = vst.msk [vmem:[#allocation2 + $0x190] sm:$0xff] %vm15931_vm0, %v9581_v62  ;;  %142 = vst.msk [vmem:[#allocation2 + $0x198] sm:$0xff] %vm15931_vm0, %v9588_v63 }
  0x3e   :  { %343 = vrot.lane.b32.xlu0 %v185_v2, %s9008_s28  ;;  %345 = vrot.lane.b32.xlu1 %v186_v3, %s9008_s28  ;;  %v201_v2 = vld [vmem:[%s15853_s0 + $0x259] sm:$0xff]  ;;  %v202_v3 = vld [vmem:[%s15853_s0 + $0x261] sm:$0xff] }
  0x42   :  { %347 = vrot.lane.b32.xlu0 %v187_v6, %s9008_s28  ;;  %349 = vrot.lane.b32.xlu1 %v188_v7, %s9008_s28  ;;  %v9603_v6 = vld [vmem:[%s15853_s0 + $0x2a0] sm:$0xff]  ;;  %v9610_v7 = vld [vmem:[%s15853_s0 + $0x2a8] sm:$0xff] }
  0x43   :  { %143 = vst.msk [vmem:[#allocation2 + $0x1a0] sm:$0xff] %vm15931_vm0, %v9603_v6  ;;  %144 = vst.msk [vmem:[#allocation2 + $0x1a8] sm:$0xff] %vm15931_vm0, %v9610_v7 }
  0x46   :  { %351 = vrot.lane.b32.xlu0 %v189_v10, %s9008_s28  ;;  %353 = vrot.lane.b32.xlu1 %v190_v11, %s9008_s28  ;;  %v203_v10 = vld [vmem:[%s15853_s0 + $0x271] sm:$0xff]  ;;  %v204_v11 = vld [vmem:[%s15853_s0 + $0x279] sm:$0xff] }
  0x4a   :  { %355 = vrot.lane.b32.xlu0 %v191_v15, %s9008_s28  ;;  %357 = vrot.lane.b32.xlu1 %v192_v16, %s9008_s28  ;;  %v9625_v15 = vld [vmem:[%s15853_s0 + $0x2b8] sm:$0xff]  ;;  %v9632_v16 = vld [vmem:[%s15853_s0 + $0x2c0] sm:$0xff] }
  0x4b   :  { %145 = vst.msk [vmem:[#allocation2 + $0x1b0] sm:$0xff] %vm15931_vm0, %v9625_v15  ;;  %146 = vst.msk [vmem:[#allocation2 + $0x1b8] sm:$0xff] %vm15931_vm0, %v9632_v16 }
  0x4e   :  { %359 = vrot.lane.b32.xlu0 %v193_v28, %s9008_s28  ;;  %361 = vrot.lane.b32.xlu1 %v194_v29, %s9008_s28  ;;  %v205_v28 = vld [vmem:[%s15853_s0 + $0x289] sm:$0xff]  ;;  %v206_v29 = vld [vmem:[%s15853_s0 + $0x291] sm:$0xff] }
  0x52   :  { %363 = vrot.lane.b32.xlu0 %v195_v44, %s9008_s28  ;;  %365 = vrot.lane.b32.xlu1 %v196_v45, %s9008_s28  ;;  %v9647_v44 = vld [vmem:[%s15853_s0 + $0x2d0] sm:$0xff]  ;;  %v9654_v45 = vld [vmem:[%s15853_s0 + $0x2d8] sm:$0xff] }
  0x53   :  { %147 = vst.msk [vmem:[#allocation2 + $0x1c0] sm:$0xff] %vm15931_vm0, %v9647_v44  ;;  %148 = vst.msk [vmem:[#allocation2 + $0x1c8] sm:$0xff] %vm15931_vm0, %v9654_v45 }
  0x56   :  { %367 = vrot.lane.b32.xlu0 %v197_v54, %s9008_s28  ;;  %369 = vrot.lane.b32.xlu1 %v198_v55, %s9008_s28  ;;  %v207_v54 = vld [vmem:[%s15853_s0 + $0x2a1] sm:$0xff]  ;;  %v208_v55 = vld [vmem:[%s15853_s0 + $0x2a9] sm:$0xff] }
  0x5a   :  { %371 = vrot.lane.b32.xlu0 %v199_v60, %s9008_s28  ;;  %373 = vrot.lane.b32.xlu1 %v200_v61, %s9008_s28  ;;  %v9669_v60 = vld [vmem:[%s15853_s0 + $0x2e8] sm:$0xff]  ;;  %v9676_v61 = vld [vmem:[%s15853_s0 + $0x2f0] sm:$0xff] }
  0x5b   :  { %149 = vst.msk [vmem:[#allocation2 + $0x1d0] sm:$0xff] %vm15931_vm0, %v9669_v60  ;;  %150 = vst.msk [vmem:[#allocation2 + $0x1d8] sm:$0xff] %vm15931_vm0, %v9676_v61 }
  0x5e   :  { %375 = vrot.lane.b32.xlu0 %v201_v2, %s9008_s28  ;;  %377 = vrot.lane.b32.xlu1 %v202_v3, %s9008_s28  ;;  %v209_v2 = vld [vmem:[%s15853_s0 + $0x2b9] sm:$0xff]  ;;  %v210_v3 = vld [vmem:[%s15853_s0 + $0x2c1] sm:$0xff] }
  0x62   :  { %379 = vrot.lane.b32.xlu0 %v203_v10, %s9008_s28  ;;  %381 = vrot.lane.b32.xlu1 %v204_v11, %s9008_s28  ;;  %v9691_v10 = vld [vmem:[%s15853_s0 + $0x300] sm:$0xff]  ;;  %v9698_v11 = vld [vmem:[%s15853_s0 + $0x308] sm:$0xff] }
  0x63   :  { %16096 = vst [vmem:[#allocation6_spill] sm:$0xff] %v9691_v10  ;;  %151 = vst.msk [vmem:[#allocation2 + $0x1e0] sm:$0xff] %vm15931_vm0, %v9691_v10 }
  0x64   :  { %16097 = vst [vmem:[#allocation7_spill] sm:$0xff] %v9698_v11  ;;  %152 = vst.msk [vmem:[#allocation2 + $0x1e8] sm:$0xff] %vm15931_vm0, %v9698_v11 }
  0x66   :  { %383 = vrot.lane.b32.xlu0 %v205_v28, %s9008_s28  ;;  %385 = vrot.lane.b32.xlu1 %v206_v29, %s9008_s28  ;;  %v211_v28 = vld [vmem:[%s15853_s0 + $0x2d1] sm:$0xff]  ;;  %v212_v29 = vld [vmem:[%s15853_s0 + $0x2d9] sm:$0xff] }
  0x6a   :  { %387 = vrot.lane.b32.xlu0 %v207_v54, %s9008_s28  ;;  %389 = vrot.lane.b32.xlu1 %v208_v55, %s9008_s28  ;;  %v9713_v54 = vld [vmem:[%s15853_s0 + $0x318] sm:$0xff]  ;;  %v9720_v55 = vld [vmem:[%s15853_s0 + $0x320] sm:$0xff] }
  0x6b   :  { %16098 = vst [vmem:[#allocation8_spill] sm:$0xff] %v9713_v54  ;;  %153 = vst.msk [vmem:[#allocation2 + $0x1f0] sm:$0xff] %vm15931_vm0, %v9713_v54 }
  0x6c   :  { %16099 = vst [vmem:[#allocation9_spill] sm:$0xff] %v9720_v55  ;;  %154 = vst.msk [vmem:[#allocation2 + $0x1f8] sm:$0xff] %vm15931_vm0, %v9720_v55 }
  0x6e   :  { %391 = vrot.lane.b32.xlu0 %v209_v2, %s9008_s28  ;;  %393 = vrot.lane.b32.xlu1 %v210_v3, %s9008_s28  ;;  %v213_v2 = vld [vmem:[%s15853_s0 + $0x2e9] sm:$0xff]  ;;  %v214_v3 = vld [vmem:[%s15853_s0 + $0x2f1] sm:$0xff] }
  0x72   :  { %395 = vrot.lane.b32.xlu0 %v211_v28, %s9008_s28  ;;  %397 = vrot.lane.b32.xlu1 %v212_v29, %s9008_s28  ;;  %v215_v28 = vld [vmem:[%s15853_s0 + $0x301] sm:$0xff]  ;;  %v216_v29 = vld [vmem:[%s15853_s0 + $0x309] sm:$0xff] }
  0x74   :  { %v284_v54 = vpop.permute.xlu0 %283  ;;  %v288_v11 = vpop.permute.xlu1 %287 }
  0x75   :  { %476 = vst.msk [vmem:[#allocation2] sm:$0xff] %vm15912_vm1, %v284_v54  ;;  %478 = vst.msk [vmem:[#allocation2 + $0x10] sm:$0xff] %vm15912_vm1, %v288_v11  ;;  %v217_v11 = vld [vmem:[%s15853_s0 + $0x319] sm:$0xff]  ;;  %v218_v54 = vld [vmem:[%s15853_s0 + $0x321] sm:$0xff] }
  0x76   :  { %399 = vrot.lane.b32.xlu0 %v213_v2, %s9008_s28  ;;  %401 = vrot.lane.b32.xlu1 %v214_v3, %s9008_s28 }
  0x78   :  { %v286_v55 = vpop.permute.xlu0 %285  ;;  %v290_v10 = vpop.permute.xlu1 %289 }
  0x79   :  { %477 = vst.msk [vmem:[#allocation2 + $0x8] sm:$0xff] %vm15912_vm1, %v286_v55  ;;  %479 = vst.msk [vmem:[#allocation2 + $0x18] sm:$0xff] %vm15912_vm1, %v290_v10  ;;  %v540_v10 = vld [vmem:[%s15853_s0 + $0x2] sm:$0xff]  ;;  %v541_v55 = vld [vmem:[%s15853_s0 + $0xa] sm:$0xff] }
  0x7a   :  { %403 = vrot.lane.b32.xlu0 %v215_v28, %s9008_s28  ;;  %405 = vrot.lane.b32.xlu1 %v216_v29, %s9008_s28 }
  0x7c   :  { %v292_v2 = vpop.permute.xlu0 %291  ;;  %v294_v3 = vpop.permute.xlu1 %293 }
  0x7d   :  { %480 = vst.msk [vmem:[#allocation2 + $0x20] sm:$0xff] %vm15912_vm1, %v292_v2  ;;  %481 = vst.msk [vmem:[#allocation2 + $0x28] sm:$0xff] %vm15912_vm1, %v294_v3 }
  0x7e   :  { %407 = vrot.lane.b32.xlu0 %v217_v11, %s9008_s28  ;;  %409 = vrot.lane.b32.xlu1 %v218_v54, %s9008_s28  ;;  %v542_v11 = vld [vmem:[%s15853_s0 + $0x1a] sm:$0xff]  ;;  %v543_v54 = vld [vmem:[%s15853_s0 + $0x22] sm:$0xff] }
  0x80   :  { %v296_v28 = vpop.permute.xlu0 %295  ;;  %v298_v29 = vpop.permute.xlu1 %297 }
  0x81   :  { %482 = vst.msk [vmem:[#allocation2 + $0x30] sm:$0xff] %vm15912_vm1, %v296_v28  ;;  %483 = vst.msk [vmem:[#allocation2 + $0x38] sm:$0xff] %vm15912_vm1, %v298_v29 }
  0x82   :  { %668 = vrot.lane.b32.xlu0 %v540_v10, %s9009_s20  ;;  %670 = vrot.lane.b32.xlu1 %v541_v55, %s9009_s20  ;;  %v544_v10 = vld [vmem:[%s15853_s0 + $0x32] sm:$0xff]  ;;  %v545_v55 = vld [vmem:[%s15853_s0 + $0x3a] sm:$0xff] }
  0x84   :  { %v300_v2 = vpop.permute.xlu0 %299  ;;  %v302_v3 = vpop.permute.xlu1 %301 }
  0x85   :  { %484 = vst.msk [vmem:[#allocation2 + $0x40] sm:$0xff] %vm15912_vm1, %v300_v2  ;;  %485 = vst.msk [vmem:[#allocation2 + $0x48] sm:$0xff] %vm15912_vm1, %v302_v3 }
  0x86   :  { %672 = vrot.lane.b32.xlu0 %v542_v11, %s9009_s20  ;;  %674 = vrot.lane.b32.xlu1 %v543_v54, %s9009_s20  ;;  %v546_v11 = vld [vmem:[%s15853_s0 + $0x4a] sm:$0xff]  ;;  %v547_v54 = vld [vmem:[%s15853_s0 + $0x52] sm:$0xff] }
  0x88   :  { %v304_v28 = vpop.permute.xlu0 %303  ;;  %v306_v29 = vpop.permute.xlu1 %305 }
  0x89   :  { %486 = vst.msk [vmem:[#allocation2 + $0x50] sm:$0xff] %vm15912_vm1, %v304_v28  ;;  %487 = vst.msk [vmem:[#allocation2 + $0x58] sm:$0xff] %vm15912_vm1, %v306_v29 }
  0x8a   :  { %676 = vrot.lane.b32.xlu0 %v544_v10, %s9009_s20  ;;  %678 = vrot.lane.b32.xlu1 %v545_v55, %s9009_s20  ;;  %v548_v10 = vld [vmem:[%s15853_s0 + $0x62] sm:$0xff]  ;;  %v549_v55 = vld [vmem:[%s15853_s0 + $0x6a] sm:$0xff] }
  0x8c   :  { %v308_v2 = vpop.permute.xlu0 %307  ;;  %v310_v3 = vpop.permute.xlu1 %309 }
  0x8d   :  { %488 = vst.msk [vmem:[#allocation2 + $0x60] sm:$0xff] %vm15912_vm1, %v308_v2  ;;  %489 = vst.msk [vmem:[#allocation2 + $0x68] sm:$0xff] %vm15912_vm1, %v310_v3 }
  0x8e   :  { %680 = vrot.lane.b32.xlu0 %v546_v11, %s9009_s20  ;;  %682 = vrot.lane.b32.xlu1 %v547_v54, %s9009_s20  ;;  %v550_v11 = vld [vmem:[%s15853_s0 + $0x7a] sm:$0xff]  ;;  %v551_v54 = vld [vmem:[%s15853_s0 + $0x82] sm:$0xff] }
  0x90   :  { %v312_v28 = vpop.permute.xlu0 %311  ;;  %v314_v29 = vpop.permute.xlu1 %313 }
  0x91   :  { %490 = vst.msk [vmem:[#allocation2 + $0x70] sm:$0xff] %vm15912_vm1, %v312_v28  ;;  %491 = vst.msk [vmem:[#allocation2 + $0x78] sm:$0xff] %vm15912_vm1, %v314_v29 }
  0x92   :  { %684 = vrot.lane.b32.xlu0 %v548_v10, %s9009_s20  ;;  %686 = vrot.lane.b32.xlu1 %v549_v55, %s9009_s20  ;;  %v552_v10 = vld [vmem:[%s15853_s0 + $0x92] sm:$0xff]  ;;  %v553_v55 = vld [vmem:[%s15853_s0 + $0x9a] sm:$0xff] }
  0x94   :  { %v316_v2 = vpop.permute.xlu0 %315  ;;  %v318_v3 = vpop.permute.xlu1 %317 }
  0x95   :  { %492 = vst.msk [vmem:[#allocation2 + $0x80] sm:$0xff] %vm15912_vm1, %v316_v2  ;;  %493 = vst.msk [vmem:[#allocation2 + $0x88] sm:$0xff] %vm15912_vm1, %v318_v3 }
  0x96   :  { %688 = vrot.lane.b32.xlu0 %v550_v11, %s9009_s20  ;;  %690 = vrot.lane.b32.xlu1 %v551_v54, %s9009_s20  ;;  %v554_v11 = vld [vmem:[%s15853_s0 + $0xaa] sm:$0xff]  ;;  %v555_v54 = vld [vmem:[%s15853_s0 + $0xb2] sm:$0xff] }
  0x98   :  { %v320_v28 = vpop.permute.xlu0 %319  ;;  %v322_v29 = vpop.permute.xlu1 %321 }
  0x99   :  { %494 = vst.msk [vmem:[#allocation2 + $0x90] sm:$0xff] %vm15912_vm1, %v320_v28  ;;  %495 = vst.msk [vmem:[#allocation2 + $0x98] sm:$0xff] %vm15912_vm1, %v322_v29 }
  0x9a   :  { %692 = vrot.lane.b32.xlu0 %v552_v10, %s9009_s20  ;;  %694 = vrot.lane.b32.xlu1 %v553_v55, %s9009_s20  ;;  %v556_v10 = vld [vmem:[%s15853_s0 + $0xc2] sm:$0xff]  ;;  %v557_v55 = vld [vmem:[%s15853_s0 + $0xca] sm:$0xff] }
  0x9c   :  { %v324_v2 = vpop.permute.xlu0 %323  ;;  %v326_v3 = vpop.permute.xlu1 %325 }
  0x9d   :  { %496 = vst.msk [vmem:[#allocation2 + $0xa0] sm:$0xff] %vm15912_vm1, %v324_v2  ;;  %497 = vst.msk [vmem:[#allocation2 + $0xa8] sm:$0xff] %vm15912_vm1, %v326_v3 }
  0x9e   :  { %696 = vrot.lane.b32.xlu0 %v554_v11, %s9009_s20  ;;  %698 = vrot.lane.b32.xlu1 %v555_v54, %s9009_s20  ;;  %v558_v11 = vld [vmem:[%s15853_s0 + $0xda] sm:$0xff]  ;;  %v559_v54 = vld [vmem:[%s15853_s0 + $0xe2] sm:$0xff] }
  0xa0   :  { %v328_v28 = vpop.permute.xlu0 %327  ;;  %v330_v29 = vpop.permute.xlu1 %329 }
  0xa1   :  { %498 = vst.msk [vmem:[#allocation2 + $0xb0] sm:$0xff] %vm15912_vm1, %v328_v28  ;;  %499 = vst.msk [vmem:[#allocation2 + $0xb8] sm:$0xff] %vm15912_vm1, %v330_v29 }
  0xa2   :  { %700 = vrot.lane.b32.xlu0 %v556_v10, %s9009_s20  ;;  %702 = vrot.lane.b32.xlu1 %v557_v55, %s9009_s20  ;;  %v560_v10 = vld [vmem:[%s15853_s0 + $0xf2] sm:$0xff]  ;;  %v561_v55 = vld [vmem:[%s15853_s0 + $0xfa] sm:$0xff] }
  0xa4   :  { %v332_v2 = vpop.permute.xlu0 %331  ;;  %v334_v3 = vpop.permute.xlu1 %333 }
  0xa5   :  { %500 = vst.msk [vmem:[#allocation2 + $0xc0] sm:$0xff] %vm15912_vm1, %v332_v2  ;;  %501 = vst.msk [vmem:[#allocation2 + $0xc8] sm:$0xff] %vm15912_vm1, %v334_v3 }
  0xa6   :  { %704 = vrot.lane.b32.xlu0 %v558_v11, %s9009_s20  ;;  %706 = vrot.lane.b32.xlu1 %v559_v54, %s9009_s20  ;;  %v562_v11 = vld [vmem:[%s15853_s0 + $0x10a] sm:$0xff]  ;;  %v563_v54 = vld [vmem:[%s15853_s0 + $0x112] sm:$0xff] }
  0xa8   :  { %v336_v28 = vpop.permute.xlu0 %335  ;;  %v338_v29 = vpop.permute.xlu1 %337 }
  0xa9   :  { %502 = vst.msk [vmem:[#allocation2 + $0xd0] sm:$0xff] %vm15912_vm1, %v336_v28  ;;  %503 = vst.msk [vmem:[#allocation2 + $0xd8] sm:$0xff] %vm15912_vm1, %v338_v29 }
  0xaa   :  { %708 = vrot.lane.b32.xlu0 %v560_v10, %s9009_s20  ;;  %710 = vrot.lane.b32.xlu1 %v561_v55, %s9009_s20  ;;  %v564_v10 = vld [vmem:[%s15853_s0 + $0x122] sm:$0xff]  ;;  %v565_v55 = vld [vmem:[%s15853_s0 + $0x12a] sm:$0xff] }
  0xac   :  { %v340_v2 = vpop.permute.xlu0 %339  ;;  %v342_v3 = vpop.permute.xlu1 %341 }
  0xad   :  { %504 = vst.msk [vmem:[#allocation2 + $0xe0] sm:$0xff] %vm15912_vm1, %v340_v2  ;;  %505 = vst.msk [vmem:[#allocation2 + $0xe8] sm:$0xff] %vm15912_vm1, %v342_v3 }
  0xae   :  { %712 = vrot.lane.b32.xlu0 %v562_v11, %s9009_s20  ;;  %714 = vrot.lane.b32.xlu1 %v563_v54, %s9009_s20  ;;  %v566_v11 = vld [vmem:[%s15853_s0 + $0x13a] sm:$0xff]  ;;  %v567_v54 = vld [vmem:[%s15853_s0 + $0x142] sm:$0xff] }
  0xb0   :  { %v344_v28 = vpop.permute.xlu0 %343  ;;  %v346_v29 = vpop.permute.xlu1 %345 }
  0xb1   :  { %506 = vst.msk [vmem:[#allocation2 + $0xf0] sm:$0xff] %vm15912_vm1, %v344_v28  ;;  %507 = vst.msk [vmem:[#allocation2 + $0xf8] sm:$0xff] %vm15912_vm1, %v346_v29 }
  0xb2   :  { %716 = vrot.lane.b32.xlu0 %v564_v10, %s9009_s20  ;;  %718 = vrot.lane.b32.xlu1 %v565_v55, %s9009_s20  ;;  %v568_v10 = vld [vmem:[%s15853_s0 + $0x152] sm:$0xff]  ;;  %v569_v55 = vld [vmem:[%s15853_s0 + $0x15a] sm:$0xff] }
  0xb4   :  { %v348_v2 = vpop.permute.xlu0 %347  ;;  %v350_v3 = vpop.permute.xlu1 %349 }
  0xb5   :  { %508 = vst.msk [vmem:[#allocation2 + $0x100] sm:$0xff] %vm15912_vm1, %v348_v2  ;;  %509 = vst.msk [vmem:[#allocation2 + $0x108] sm:$0xff] %vm15912_vm1, %v350_v3 }
  0xb6   :  { %720 = vrot.lane.b32.xlu0 %v566_v11, %s9009_s20  ;;  %722 = vrot.lane.b32.xlu1 %v567_v54, %s9009_s20  ;;  %v570_v11 = vld [vmem:[%s15853_s0 + $0x16a] sm:$0xff]  ;;  %v571_v54 = vld [vmem:[%s15853_s0 + $0x172] sm:$0xff] }
  0xb8   :  { %v352_v28 = vpop.permute.xlu0 %351  ;;  %v354_v29 = vpop.permute.xlu1 %353 }
  0xb9   :  { %510 = vst.msk [vmem:[#allocation2 + $0x110] sm:$0xff] %vm15912_vm1, %v352_v28  ;;  %511 = vst.msk [vmem:[#allocation2 + $0x118] sm:$0xff] %vm15912_vm1, %v354_v29 }
  0xba   :  { %724 = vrot.lane.b32.xlu0 %v568_v10, %s9009_s20  ;;  %726 = vrot.lane.b32.xlu1 %v569_v55, %s9009_s20  ;;  %v572_v10 = vld [vmem:[%s15853_s0 + $0x1b2] sm:$0xff]  ;;  %v573_v55 = vld [vmem:[%s15853_s0 + $0x1ba] sm:$0xff] }
  0xbc   :  { %v356_v2 = vpop.permute.xlu0 %355  ;;  %v358_v3 = vpop.permute.xlu1 %357 }
  0xbd   :  { %512 = vst.msk [vmem:[#allocation2 + $0x120] sm:$0xff] %vm15912_vm1, %v356_v2  ;;  %513 = vst.msk [vmem:[#allocation2 + $0x128] sm:$0xff] %vm15912_vm1, %v358_v3 }
  0xbe   :  { %728 = vrot.lane.b32.xlu0 %v570_v11, %s9009_s20  ;;  %730 = vrot.lane.b32.xlu1 %v571_v54, %s9009_s20  ;;  %v574_v11 = vld [vmem:[%s15853_s0 + $0x1ca] sm:$0xff]  ;;  %v575_v54 = vld [vmem:[%s15853_s0 + $0x1d2] sm:$0xff] }
  0xc0   :  { %v360_v28 = vpop.permute.xlu0 %359  ;;  %v362_v29 = vpop.permute.xlu1 %361 }
  0xc1   :  { %514 = vst.msk [vmem:[#allocation2 + $0x130] sm:$0xff] %vm15912_vm1, %v360_v28  ;;  %515 = vst.msk [vmem:[#allocation2 + $0x138] sm:$0xff] %vm15912_vm1, %v362_v29 }
  0xc2   :  { %732 = vrot.lane.b32.xlu0 %v572_v10, %s9009_s20  ;;  %734 = vrot.lane.b32.xlu1 %v573_v55, %s9009_s20  ;;  %v576_v10 = vld [vmem:[%s15853_s0 + $0x1e2] sm:$0xff]  ;;  %v577_v55 = vld [vmem:[%s15853_s0 + $0x1ea] sm:$0xff] }
  0xc4   :  { %v364_v2 = vpop.permute.xlu0 %363  ;;  %v366_v3 = vpop.permute.xlu1 %365 }
  0xc5   :  { %516 = vst.msk [vmem:[#allocation2 + $0x140] sm:$0xff] %vm15912_vm1, %v364_v2  ;;  %517 = vst.msk [vmem:[#allocation2 + $0x148] sm:$0xff] %vm15912_vm1, %v366_v3 }
  0xc6   :  { %736 = vrot.lane.b32.xlu0 %v574_v11, %s9009_s20  ;;  %738 = vrot.lane.b32.xlu1 %v575_v54, %s9009_s20  ;;  %v578_v11 = vld [vmem:[%s15853_s0 + $0x1fa] sm:$0xff]  ;;  %v579_v54 = vld [vmem:[%s15853_s0 + $0x202] sm:$0xff] }
  0xc8   :  { %v368_v28 = vpop.permute.xlu0 %367  ;;  %v370_v29 = vpop.permute.xlu1 %369 }
  0xc9   :  { %518 = vst.msk [vmem:[#allocation2 + $0x150] sm:$0xff] %vm15912_vm1, %v368_v28  ;;  %519 = vst.msk [vmem:[#allocation2 + $0x158] sm:$0xff] %vm15912_vm1, %v370_v29 }
  0xca   :  { %740 = vrot.lane.b32.xlu0 %v576_v10, %s9009_s20  ;;  %742 = vrot.lane.b32.xlu1 %v577_v55, %s9009_s20  ;;  %v580_v10 = vld [vmem:[%s15853_s0 + $0x212] sm:$0xff]  ;;  %v581_v55 = vld [vmem:[%s15853_s0 + $0x21a] sm:$0xff] }
  0xcc   :  { %v372_v2 = vpop.permute.xlu0 %371  ;;  %v374_v3 = vpop.permute.xlu1 %373 }
  0xcd   :  { %520 = vst.msk [vmem:[#allocation2 + $0x160] sm:$0xff] %vm15912_vm1, %v372_v2  ;;  %521 = vst.msk [vmem:[#allocation2 + $0x168] sm:$0xff] %vm15912_vm1, %v374_v3 }
  0xce   :  { %744 = vrot.lane.b32.xlu0 %v578_v11, %s9009_s20  ;;  %746 = vrot.lane.b32.xlu1 %v579_v54, %s9009_s20  ;;  %v582_v11 = vld [vmem:[%s15853_s0 + $0x22a] sm:$0xff]  ;;  %v583_v54 = vld [vmem:[%s15853_s0 + $0x232] sm:$0xff] }
  0xd0   :  { %v376_v28 = vpop.permute.xlu0 %375  ;;  %v378_v29 = vpop.permute.xlu1 %377 }
  0xd1   :  { %522 = vst.msk [vmem:[#allocation2 + $0x170] sm:$0xff] %vm15912_vm1, %v376_v28  ;;  %523 = vst.msk [vmem:[#allocation2 + $0x178] sm:$0xff] %vm15912_vm1, %v378_v29 }
  0xd2   :  { %748 = vrot.lane.b32.xlu0 %v580_v10, %s9009_s20  ;;  %750 = vrot.lane.b32.xlu1 %v581_v55, %s9009_s20  ;;  %v584_v10 = vld [vmem:[%s15853_s0 + $0x242] sm:$0xff]  ;;  %v585_v55 = vld [vmem:[%s15853_s0 + $0x24a] sm:$0xff] }
  0xd4   :  { %v380_v2 = vpop.permute.xlu0 %379  ;;  %v382_v3 = vpop.permute.xlu1 %381 }
  0xd5   :  { %524 = vst.msk [vmem:[#allocation2 + $0x180] sm:$0xff] %vm15912_vm1, %v380_v2  ;;  %525 = vst.msk [vmem:[#allocation2 + $0x188] sm:$0xff] %vm15912_vm1, %v382_v3 }
  0xd6   :  { %752 = vrot.lane.b32.xlu0 %v582_v11, %s9009_s20  ;;  %754 = vrot.lane.b32.xlu1 %v583_v54, %s9009_s20  ;;  %v586_v11 = vld [vmem:[%s15853_s0 + $0x25a] sm:$0xff]  ;;  %v587_v54 = vld [vmem:[%s15853_s0 + $0x262] sm:$0xff] }
  0xd8   :  { %v384_v28 = vpop.permute.xlu0 %383  ;;  %v386_v29 = vpop.permute.xlu1 %385 }
  0xd9   :  { %526 = vst.msk [vmem:[#allocation2 + $0x190] sm:$0xff] %vm15912_vm1, %v384_v28  ;;  %527 = vst.msk [vmem:[#allocation2 + $0x198] sm:$0xff] %vm15912_vm1, %v386_v29 }
  0xda   :  { %756 = vrot.lane.b32.xlu0 %v584_v10, %s9009_s20  ;;  %758 = vrot.lane.b32.xlu1 %v585_v55, %s9009_s20  ;;  %v588_v10 = vld [vmem:[%s15853_s0 + $0x272] sm:$0xff]  ;;  %v589_v55 = vld [vmem:[%s15853_s0 + $0x27a] sm:$0xff] }
  0xdc   :  { %v388_v2 = vpop.permute.xlu0 %387  ;;  %v390_v3 = vpop.permute.xlu1 %389 }
  0xdd   :  { %528 = vst.msk [vmem:[#allocation2 + $0x1a0] sm:$0xff] %vm15912_vm1, %v388_v2  ;;  %529 = vst.msk [vmem:[#allocation2 + $0x1a8] sm:$0xff] %vm15912_vm1, %v390_v3 }
  0xde   :  { %760 = vrot.lane.b32.xlu0 %v586_v11, %s9009_s20  ;;  %762 = vrot.lane.b32.xlu1 %v587_v54, %s9009_s20  ;;  %v590_v11 = vld [vmem:[%s15853_s0 + $0x28a] sm:$0xff]  ;;  %v591_v54 = vld [vmem:[%s15853_s0 + $0x292] sm:$0xff] }
  0xe0   :  { %v392_v28 = vpop.permute.xlu0 %391  ;;  %v394_v29 = vpop.permute.xlu1 %393 }
  0xe1   :  { %530 = vst.msk [vmem:[#allocation2 + $0x1b0] sm:$0xff] %vm15912_vm1, %v392_v28  ;;  %531 = vst.msk [vmem:[#allocation2 + $0x1b8] sm:$0xff] %vm15912_vm1, %v394_v29 }
  0xe2   :  { %764 = vrot.lane.b32.xlu0 %v588_v10, %s9009_s20  ;;  %766 = vrot.lane.b32.xlu1 %v589_v55, %s9009_s20  ;;  %v592_v10 = vld [vmem:[%s15853_s0 + $0x2a2] sm:$0xff]  ;;  %v593_v55 = vld [vmem:[%s15853_s0 + $0x2aa] sm:$0xff] }
  0xe4   :  { %v396_v2 = vpop.permute.xlu0 %395  ;;  %v398_v3 = vpop.permute.xlu1 %397 }
  0xe5   :  { %532 = vst.msk [vmem:[#allocation2 + $0x1c0] sm:$0xff] %vm15912_vm1, %v396_v2  ;;  %533 = vst.msk [vmem:[#allocation2 + $0x1c8] sm:$0xff] %vm15912_vm1, %v398_v3 }
  0xe6   :  { %768 = vrot.lane.b32.xlu0 %v590_v11, %s9009_s20  ;;  %770 = vrot.lane.b32.xlu1 %v591_v54, %s9009_s20  ;;  %v594_v11 = vld [vmem:[%s15853_s0 + $0x2ba] sm:$0xff]  ;;  %v595_v54 = vld [vmem:[%s15853_s0 + $0x2c2] sm:$0xff] }
  0xe8   :  { %v400_v28 = vpop.permute.xlu0 %399  ;;  %v402_v29 = vpop.permute.xlu1 %401 }
  0xe9   :  { %534 = vst.msk [vmem:[#allocation2 + $0x1d0] sm:$0xff] %vm15912_vm1, %v400_v28  ;;  %535 = vst.msk [vmem:[#allocation2 + $0x1d8] sm:$0xff] %vm15912_vm1, %v402_v29 }
  0xea   :  { %772 = vrot.lane.b32.xlu0 %v592_v10, %s9009_s20  ;;  %774 = vrot.lane.b32.xlu1 %v593_v55, %s9009_s20  ;;  %v596_v10 = vld [vmem:[%s15853_s0 + $0x2d2] sm:$0xff]  ;;  %v597_v55 = vld [vmem:[%s15853_s0 + $0x2da] sm:$0xff] }
  0xec   :  { %v404_v2 = vpop.permute.xlu0 %403  ;;  %v406_v3 = vpop.permute.xlu1 %405 }
  0xed   :  { %536 = vst.msk [vmem:[#allocation2 + $0x1e0] sm:$0xff] %vm15912_vm1, %v404_v2  ;;  %537 = vst.msk [vmem:[#allocation2 + $0x1e8] sm:$0xff] %vm15912_vm1, %v406_v3 }
  0xee   :  { %776 = vrot.lane.b32.xlu0 %v594_v11, %s9009_s20  ;;  %778 = vrot.lane.b32.xlu1 %v595_v54, %s9009_s20  ;;  %v598_v11 = vld [vmem:[%s15853_s0 + $0x2ea] sm:$0xff]  ;;  %v599_v54 = vld [vmem:[%s15853_s0 + $0x2f2] sm:$0xff] }
  0xf0   :  { %v408_v28 = vpop.permute.xlu0 %407  ;;  %v410_v29 = vpop.permute.xlu1 %409 }
  0xf1   :  { %538 = vst.msk [vmem:[#allocation2 + $0x1f0] sm:$0xff] %vm15912_vm1, %v408_v28  ;;  %539 = vst.msk [vmem:[#allocation2 + $0x1f8] sm:$0xff] %vm15912_vm1, %v410_v29 }
  0xf2   :  { %780 = vrot.lane.b32.xlu0 %v596_v10, %s9009_s20  ;;  %782 = vrot.lane.b32.xlu1 %v597_v55, %s9009_s20  ;;  %v600_v10 = vld [vmem:[%s15853_s0 + $0x302] sm:$0xff]  ;;  %v601_v55 = vld [vmem:[%s15853_s0 + $0x30a] sm:$0xff] }
  0xf4   :  { %v669_v2 = vpop.permute.xlu0 %668  ;;  %v671_v3 = vpop.permute.xlu1 %670 }
  0xf5   :  { %861 = vst.msk [vmem:[#allocation2] sm:$0xff] %vm15911_vm2, %v669_v2  ;;  %862 = vst.msk [vmem:[#allocation2 + $0x8] sm:$0xff] %vm15911_vm2, %v671_v3 }
  0xf6   :  { %784 = vrot.lane.b32.xlu0 %v598_v11, %s9009_s20  ;;  %786 = vrot.lane.b32.xlu1 %v599_v54, %s9009_s20  ;;  %v602_v11 = vld [vmem:[%s15853_s0 + $0x31a] sm:$0xff]  ;;  %v603_v54 = vld [vmem:[%s15853_s0 + $0x322] sm:$0xff] }
  0xf8   :  { %v673_v28 = vpop.permute.xlu0 %672  ;;  %v675_v29 = vpop.permute.xlu1 %674 }
  0xf9   :  { %863 = vst.msk [vmem:[#allocation2 + $0x10] sm:$0xff] %vm15911_vm2, %v673_v28  ;;  %864 = vst.msk [vmem:[#allocation2 + $0x18] sm:$0xff] %vm15911_vm2, %v675_v29 }
  0xfa   :  { %788 = vrot.lane.b32.xlu0 %v600_v10, %s9009_s20  ;;  %790 = vrot.lane.b32.xlu1 %v601_v55, %s9009_s20 }
  0xfc   :  { %v677_v2 = vpop.permute.xlu0 %676  ;;  %v679_v3 = vpop.permute.xlu1 %678 }
  0xfd   :  { %865 = vst.msk [vmem:[#allocation2 + $0x20] sm:$0xff] %vm15911_vm2, %v677_v2  ;;  %866 = vst.msk [vmem:[#allocation2 + $0x28] sm:$0xff] %vm15911_vm2, %v679_v3 }
  0xfe   :  { %792 = vrot.lane.b32.xlu0 %v602_v11, %s9009_s20  ;;  %794 = vrot.lane.b32.xlu1 %v603_v54, %s9009_s20 }
 0x100   :  { %v681_v10 = vpop.permute.xlu0 %680  ;;  %v683_v55 = vpop.permute.xlu1 %682 }
 0x101   :  { %867 = vst.msk [vmem:[#allocation2 + $0x30] sm:$0xff] %vm15911_vm2, %v681_v10  ;;  %868 = vst.msk [vmem:[#allocation2 + $0x38] sm:$0xff] %vm15911_vm2, %v683_v55 }
 0x102   :  { %1054 = vrot.lane.b32.xlu0 %v9112_v13, %s9010_s18  ;;  %1056 = vrot.lane.b32.xlu1 %v9130_v17, %s9010_s18 }
 0x104   :  { %v685_v28 = vpop.permute.xlu0 %684  ;;  %v687_v29 = vpop.permute.xlu1 %686 }
 0x105   :  { %869 = vst.msk [vmem:[#allocation2 + $0x40] sm:$0xff] %vm15911_vm2, %v685_v28  ;;  %870 = vst.msk [vmem:[#allocation2 + $0x48] sm:$0xff] %vm15911_vm2, %v687_v29 }
 0x106   :  { %1058 = vrot.lane.b32.xlu0 %v9137_v18, %s9010_s18  ;;  %1060 = vrot.lane.b32.xlu1 %v9142_v19, %s9010_s18 }
 0x108   :  { %v689_v11 = vpop.permute.xlu0 %688  ;;  %v691_v54 = vpop.permute.xlu1 %690 }
 0x109   :  { %871 = vst.msk [vmem:[#allocation2 + $0x50] sm:$0xff] %vm15911_vm2, %v689_v11  ;;  %872 = vst.msk [vmem:[#allocation2 + $0x58] sm:$0xff] %vm15911_vm2, %v691_v54  ;;  %v8292_v11 = vld [vmem:[%s15853_s0 + $0x330] sm:$0xff]  ;;  %v8293_v54 = vld [vmem:[%s15853_s0 + $0x338] sm:$0xff] }
 0x10a   :  { %1062 = vrot.lane.b32.xlu0 %v9153_v20, %s9010_s18  ;;  %1064 = vrot.lane.b32.xlu1 %v9166_v23, %s9010_s18 }
 0x10c   :  { %v693_v13 = vpop.permute.xlu0 %692  ;;  %v695_v17 = vpop.permute.xlu1 %694 }
 0x10d   :  { %873 = vst.msk [vmem:[#allocation2 + $0x60] sm:$0xff] %vm15911_vm2, %v693_v13  ;;  %874 = vst.msk [vmem:[#allocation2 + $0x68] sm:$0xff] %vm15911_vm2, %v695_v17 }
 0x10e   :  { %1066 = vrot.lane.b32.xlu0 %v9173_v24, %s9010_s18  ;;  %1068 = vrot.lane.b32.xlu1 %v9178_v25, %s9010_s18 }
 0x110   :  { %v697_v18 = vpop.permute.xlu0 %696  ;;  %v699_v19 = vpop.permute.xlu1 %698 }
 0x111   :  { %875 = vst.msk [vmem:[#allocation2 + $0x70] sm:$0xff] %vm15911_vm2, %v697_v18  ;;  %876 = vst.msk [vmem:[#allocation2 + $0x78] sm:$0xff] %vm15911_vm2, %v699_v19  ;;  %v8294_v18 = vld [vmem:[%s15853_s0 + $0x19] sm:$0xff]  ;;  %v8295_v19 = vld [vmem:[%s15853_s0 + $0x21] sm:$0xff] }
 0x112   :  { %1070 = vrot.lane.b32.xlu0 %v9187_v26, %s9010_s18  ;;  %1072 = vrot.lane.b32.xlu1 %v9192_v27, %s9010_s18 }
 0x114   :  { %v701_v20 = vpop.permute.xlu0 %700  ;;  %v703_v23 = vpop.permute.xlu1 %702 }
 0x115   :  { %877 = vst.msk [vmem:[#allocation2 + $0x80] sm:$0xff] %vm15911_vm2, %v701_v20  ;;  %878 = vst.msk [vmem:[#allocation2 + $0x88] sm:$0xff] %vm15911_vm2, %v703_v23 }
 0x116   :  { %1074 = vrot.lane.b32.xlu0 %v9209_v30, %s9010_s18  ;;  %1076 = vrot.lane.b32.xlu1 %v9214_v31, %s9010_s18 }
 0x118   :  { %v705_v24 = vpop.permute.xlu0 %704  ;;  %v707_v25 = vpop.permute.xlu1 %706 }
 0x119   :  { %879 = vst.msk [vmem:[#allocation2 + $0x90] sm:$0xff] %vm15911_vm2, %v705_v24  ;;  %880 = vst.msk [vmem:[#allocation2 + $0x98] sm:$0xff] %vm15911_vm2, %v707_v25  ;;  %v10289_v24 = vld [vmem:[%s15853_s0 + $0x31] sm:$0xff]  ;;  %v10294_v25 = vld [vmem:[%s15853_s0 + $0x39] sm:$0xff] }
 0x11a   :  { %1078 = vrot.lane.b32.xlu0 %v9223_v32, %s9010_s18  ;;  %1080 = vrot.lane.b32.xlu1 %v9228_v33, %s9010_s18 }
 0x11c   :  { %v709_v26 = vpop.permute.xlu0 %708  ;;  %v711_v27 = vpop.permute.xlu1 %710 }
 0x11d   :  { %881 = vst.msk [vmem:[#allocation2 + $0xa0] sm:$0xff] %vm15911_vm2, %v709_v26  ;;  %882 = vst.msk [vmem:[#allocation2 + $0xa8] sm:$0xff] %vm15911_vm2, %v711_v27 }
 0x11e   :  { %1082 = vrot.lane.b32.xlu0 %v9237_v34, %s9010_s18  ;;  %1084 = vrot.lane.b32.xlu1 %v9249_v36, %s9010_s18 }
 0x120   :  { %v713_v30 = vpop.permute.xlu0 %712  ;;  %v715_v31 = vpop.permute.xlu1 %714 }
 0x121   :  { %883 = vst.msk [vmem:[#allocation2 + $0xb0] sm:$0xff] %vm15911_vm2, %v713_v30  ;;  %884 = vst.msk [vmem:[#allocation2 + $0xb8] sm:$0xff] %vm15911_vm2, %v715_v31  ;;  %v10305_v30 = vld [vmem:[%s15853_s0 + $0x49] sm:$0xff]  ;;  %v10310_v31 = vld [vmem:[%s15853_s0 + $0x51] sm:$0xff] }
 0x122   :  { %1086 = vrot.lane.b32.xlu0 %v9259_v38, %s9010_s18  ;;  %1088 = vrot.lane.b32.xlu1 %v9264_v39, %s9010_s18 }
 0x124   :  { %v717_v32 = vpop.permute.xlu0 %716  ;;  %v719_v33 = vpop.permute.xlu1 %718 }
 0x125   :  { %885 = vst.msk [vmem:[#allocation2 + $0xc0] sm:$0xff] %vm15911_vm2, %v717_v32  ;;  %886 = vst.msk [vmem:[#allocation2 + $0xc8] sm:$0xff] %vm15911_vm2, %v719_v33 }
 0x126   :  { %1090 = vrot.lane.b32.xlu0 %v9273_v40, %s9010_s18  ;;  %1092 = vrot.lane.b32.xlu1 %v9280_v41, %s9010_s18 }
 0x128   :  { %v721_v34 = vpop.permute.xlu0 %720  ;;  %v723_v36 = vpop.permute.xlu1 %722 }
 0x129   :  { %887 = vst.msk [vmem:[#allocation2 + $0xd0] sm:$0xff] %vm15911_vm2, %v721_v34  ;;  %888 = vst.msk [vmem:[#allocation2 + $0xd8] sm:$0xff] %vm15911_vm2, %v723_v36  ;;  %v10321_v34 = vld [vmem:[%s15853_s0 + $0x61] sm:$0xff]  ;;  %v10326_v36 = vld [vmem:[%s15853_s0 + $0x69] sm:$0xff] }
 0x12a   :  { %1094 = vrot.lane.b32.xlu0 %v9289_v42, %s9010_s18  ;;  %1096 = vrot.lane.b32.xlu1 %v9294_v43, %s9010_s18 }
 0x12c   :  { %v725_v38 = vpop.permute.xlu0 %724  ;;  %v727_v39 = vpop.permute.xlu1 %726 }
 0x12d   :  { %889 = vst.msk [vmem:[#allocation2 + $0xe0] sm:$0xff] %vm15911_vm2, %v725_v38  ;;  %890 = vst.msk [vmem:[#allocation2 + $0xe8] sm:$0xff] %vm15911_vm2, %v727_v39 }
 0x12e   :  { %1098 = vrot.lane.b32.xlu0 %v9309_v46, %s9010_s18  ;;  %1100 = vrot.lane.b32.xlu1 %v9316_v47, %s9010_s18 }
 0x130   :  { %v729_v40 = vpop.permute.xlu0 %728  ;;  %v731_v41 = vpop.permute.xlu1 %730 }
 0x131   :  { %891 = vst.msk [vmem:[#allocation2 + $0xf0] sm:$0xff] %vm15911_vm2, %v729_v40  ;;  %892 = vst.msk [vmem:[#allocation2 + $0xf8] sm:$0xff] %vm15911_vm2, %v731_v41  ;;  %v10337_v40 = vld [vmem:[%s15853_s0 + $0x79] sm:$0xff]  ;;  %v10342_v41 = vld [vmem:[%s15853_s0 + $0x81] sm:$0xff] }
 0x132   :  { %1102 = vrot.lane.b32.xlu0 %v9323_v48, %s9010_s18  ;;  %1104 = vrot.lane.b32.xlu1 %v9328_v49, %s9010_s18  ;;  %v8260_v48 = vld [vmem:[%s15853_s0 + $0x180] sm:$0xff]  ;;  %v8261_v49 = vld [vmem:[%s15853_s0 + $0x188] sm:$0xff] }
 0x134   :  { %v733_v42 = vpop.permute.xlu0 %732  ;;  %v735_v43 = vpop.permute.xlu1 %734 }
 0x135   :  { %893 = vst.msk [vmem:[#allocation2 + $0x100] sm:$0xff] %vm15911_vm2, %v733_v42  ;;  %894 = vst.msk [vmem:[#allocation2 + $0x108] sm:$0xff] %vm15911_vm2, %v735_v43 }
 0x136   :  { %1106 = vrot.lane.b32.xlu0 %v9345_v52, %s9010_s18  ;;  %1108 = vrot.lane.b32.xlu1 %v9352_v53, %s9010_s18 }
 0x138   :  { %v737_v46 = vpop.permute.xlu0 %736  ;;  %v739_v47 = vpop.permute.xlu1 %738 }
 0x139   :  { %895 = vst.msk [vmem:[#allocation2 + $0x110] sm:$0xff] %vm15911_vm2, %v737_v46  ;;  %896 = vst.msk [vmem:[#allocation2 + $0x118] sm:$0xff] %vm15911_vm2, %v739_v47  ;;  %v10353_v46 = vld [vmem:[%s15853_s0 + $0x91] sm:$0xff]  ;;  %v10358_v47 = vld [vmem:[%s15853_s0 + $0x99] sm:$0xff] }
 0x13a   :  { %1110 = vrot.lane.b32.xlu0 %v9367_v56, %s9010_s18  ;;  %1112 = vrot.lane.b32.xlu1 %v9374_v57, %s9010_s18 }
 0x13c   :  { %v741_v52 = vpop.permute.xlu0 %740  ;;  %v743_v53 = vpop.permute.xlu1 %742 }
 0x13d   :  { %897 = vst.msk [vmem:[#allocation2 + $0x120] sm:$0xff] %vm15911_vm2, %v741_v52  ;;  %898 = vst.msk [vmem:[#allocation2 + $0x128] sm:$0xff] %vm15911_vm2, %v743_v53  ;;  %v10369_v52 = vld [vmem:[%s15853_s0 + $0xa9] sm:$0xff]  ;;  %v10374_v53 = vld [vmem:[%s15853_s0 + $0xb1] sm:$0xff] }
 0x13e   :  { %1114 = vrot.lane.b32.xlu0 %v8260_v48, %s9010_s18  ;;  %1116 = vrot.lane.b32.xlu1 %v8261_v49, %s9010_s18 }
 0x140   :  { %v745_v56 = vpop.permute.xlu0 %744  ;;  %v747_v57 = vpop.permute.xlu1 %746 }
 0x141   :  { %899 = vst.msk [vmem:[#allocation2 + $0x130] sm:$0xff] %vm15911_vm2, %v745_v56  ;;  %900 = vst.msk [vmem:[#allocation2 + $0x138] sm:$0xff] %vm15911_vm2, %v747_v57 }
 0x142   :  { %1118 = vrot.lane.b32.xlu0 %v9405_v0, %s9010_s18  ;;  %1120 = vrot.lane.b32.xlu1 %v9412_v1, %s9010_s18 }
 0x144   :  { %v749_v2 = vpop.permute.xlu0 %748  ;;  %v751_v3 = vpop.permute.xlu1 %750 }
 0x145   :  { %901 = vst.msk [vmem:[#allocation2 + $0x140] sm:$0xff] %vm15911_vm2, %v749_v2  ;;  %902 = vst.msk [vmem:[#allocation2 + $0x148] sm:$0xff] %vm15911_vm2, %v751_v3  ;;  %v10385_v2 = vld [vmem:[%s15853_s0 + $0xc1] sm:$0xff]  ;;  %v10390_v3 = vld [vmem:[%s15853_s0 + $0xc9] sm:$0xff] }
 0x146   :  { %1122 = vrot.lane.b32.xlu0 %v9427_v4, %s9010_s18  ;;  %1124 = vrot.lane.b32.xlu1 %v9434_v5, %s9010_s18 }
 0x148   :  { %v753_v10 = vpop.permute.xlu0 %752  ;;  %v755_v55 = vpop.permute.xlu1 %754 }
 0x149   :  { %903 = vst.msk [vmem:[#allocation2 + $0x150] sm:$0xff] %vm15911_vm2, %v753_v10  ;;  %904 = vst.msk [vmem:[#allocation2 + $0x158] sm:$0xff] %vm15911_vm2, %v755_v55 }
 0x14a   :  { %1126 = vrot.lane.b32.xlu0 %v9449_v8, %s9010_s18  ;;  %1128 = vrot.lane.b32.xlu1 %v9456_v9, %s9010_s18 }
 0x14c   :  { %v757_v0 = vpop.permute.xlu0 %756  ;;  %v759_v1 = vpop.permute.xlu1 %758 }
 0x14d   :  { %905 = vst.msk [vmem:[#allocation2 + $0x160] sm:$0xff] %vm15911_vm2, %v757_v0  ;;  %906 = vst.msk [vmem:[#allocation2 + $0x168] sm:$0xff] %vm15911_vm2, %v759_v1  ;;  %v10401_v0 = vld [vmem:[%s15853_s0 + $0xd9] sm:$0xff]  ;;  %v10406_v1 = vld [vmem:[%s15853_s0 + $0xe1] sm:$0xff] }
 0x14e   :  { %1130 = vrot.lane.b32.xlu0 %v9471_v12, %s9010_s18  ;;  %1132 = vrot.lane.b32.xlu1 %v9478_v14, %s9010_s18 }
 0x150   :  { %v761_v4 = vpop.permute.xlu0 %760  ;;  %v763_v5 = vpop.permute.xlu1 %762 }
 0x151   :  { %907 = vst.msk [vmem:[#allocation2 + $0x170] sm:$0xff] %vm15911_vm2, %v761_v4  ;;  %908 = vst.msk [vmem:[#allocation2 + $0x178] sm:$0xff] %vm15911_vm2, %v763_v5 }
 0x152   :  { %1134 = vrot.lane.b32.xlu0 %v9493_v21, %s9010_s18  ;;  %1136 = vrot.lane.b32.xlu1 %v9500_v22, %s9010_s18 }
 0x154   :  { %v765_v8 = vpop.permute.xlu0 %764  ;;  %v767_v9 = vpop.permute.xlu1 %766 }
 0x155   :  { %909 = vst.msk [vmem:[#allocation2 + $0x180] sm:$0xff] %vm15911_vm2, %v765_v8  ;;  %910 = vst.msk [vmem:[#allocation2 + $0x188] sm:$0xff] %vm15911_vm2, %v767_v9  ;;  %v3301_v8 = vld [vmem:[%s15854_s1] sm:$0xff]  ;;  %v3302_v9 = vld [vmem:[%s15854_s1 + $0x8] sm:$0xff] }
 0x156   :  { %1138 = vrot.lane.b32.xlu0 %v9515_v35, %s9010_s18  ;;  %1140 = vrot.lane.b32.xlu1 %v9522_v37, %s9010_s18 }
 0x158   :  { %v769_v12 = vpop.permute.xlu0 %768  ;;  %v771_v14 = vpop.permute.xlu1 %770 }
 0x159   :  { %911 = vst.msk [vmem:[#allocation2 + $0x190] sm:$0xff] %vm15911_vm2, %v769_v12  ;;  %912 = vst.msk [vmem:[#allocation2 + $0x198] sm:$0xff] %vm15911_vm2, %v771_v14  ;;  %v8952_v12 = vpack.c.bf16 %v3302_v9, %v3301_v8  ;;  %v10423_v14 = vld [vmem:[%s15853_s0 + $0xf1] sm:$0xff] }
 0x15a   :  { %1142 = vrot.lane.b32.xlu0 %v9537_v50, %s9010_s18  ;;  %1144 = vrot.lane.b32.xlu1 %v9544_v51, %s9010_s18 }
 0x15b   :  { %8953 = vmatprep.subr.bf16.mxu0 %v8952_v12  ;;  %8984 = vmatprep.subr.bf16.mxu1 %v8952_v12 }
 0x15c   :  { %v773_v21 = vpop.permute.xlu0 %772  ;;  %v775_v22 = vpop.permute.xlu1 %774  ;;  %8955 = vmatpush3.bf16.msra.mxu0 %v8952_v12  ;;  %8989 = vmatpush3.bf16.msra.mxu1 %v8952_v12 }
 0x15d   :  { %913 = vst.msk [vmem:[#allocation2 + $0x1a0] sm:$0xff] %vm15911_vm2, %v773_v21  ;;  %914 = vst.msk [vmem:[#allocation2 + $0x1a8] sm:$0xff] %vm15911_vm2, %v775_v22  ;;  %v10428_v21 = vld [vmem:[%s15853_s0 + $0xf9] sm:$0xff] }
 0x15e   :  { %1146 = vrot.lane.b32.xlu0 %v9559_v58, %s9010_s18  ;;  %1148 = vrot.lane.b32.xlu1 %v9566_v59, %s9010_s18 }
 0x160   :  { %v777_v35 = vpop.permute.xlu0 %776  ;;  %v779_v37 = vpop.permute.xlu1 %778 }
 0x161   :  { %915 = vst.msk [vmem:[#allocation2 + $0x1b0] sm:$0xff] %vm15911_vm2, %v777_v35  ;;  %916 = vst.msk [vmem:[#allocation2 + $0x1b8] sm:$0xff] %vm15911_vm2, %v779_v37  ;;  %v3303_v37 = vld [vmem:[%s15854_s1 + $0x10] sm:$0xff] }
 0x162   :  { %1150 = vrot.lane.b32.xlu0 %v9581_v62, %s9010_s18  ;;  %1152 = vrot.lane.b32.xlu1 %v9588_v63, %s9010_s18 }
 0x164   :  { %v781_v50 = vpop.permute.xlu0 %780  ;;  %v783_v51 = vpop.permute.xlu1 %782 }
 0x165   :  { %917 = vst.msk [vmem:[#allocation2 + $0x1c0] sm:$0xff] %vm15911_vm2, %v781_v50  ;;  %918 = vst.msk [vmem:[#allocation2 + $0x1c8] sm:$0xff] %vm15911_vm2, %v783_v51  ;;  %v3304_v50 = vld [vmem:[%s15854_s1 + $0x18] sm:$0xff] }
 0x166   :  { %1154 = vrot.lane.b32.xlu0 %v9603_v6, %s9010_s18  ;;  %1156 = vrot.lane.b32.xlu1 %v9610_v7, %s9010_s18  ;;  %v8956_v51 = vpack.c.bf16 %v3304_v50, %v3303_v37 }
 0x168   :  { %v785_v58 = vpop.permute.xlu0 %784  ;;  %v787_v59 = vpop.permute.xlu1 %786  ;;  %8957 = vmatprep.subr.bf16.mxu0 %v8956_v51  ;;  %8985 = vmatprep.subr.bf16.mxu1 %v8956_v51 }
 0x169   :  { %919 = vst.msk [vmem:[#allocation2 + $0x1d0] sm:$0xff] %vm15911_vm2, %v785_v58  ;;  %920 = vst.msk [vmem:[#allocation2 + $0x1d8] sm:$0xff] %vm15911_vm2, %v787_v59  ;;  %v8358_v58 = vld [vmem:[%s15853_s0 + $0x1a] sm:$0xff]  ;;  %v8359_v59 = vld [vmem:[%s15853_s0 + $0x22] sm:$0xff]  ;;  %8959 = vmatpush3.bf16.msra.mxu0 %v8956_v51  ;;  %8990 = vmatpush3.bf16.msra.mxu1 %v8956_v51 }
 0x16a   :  { %1158 = vrot.lane.b32.xlu0 %v9625_v15, %s9010_s18  ;;  %1160 = vrot.lane.b32.xlu1 %v9632_v16, %s9010_s18 }
 0x16c   :  { %v789_v62 = vpop.permute.xlu0 %788  ;;  %v791_v63 = vpop.permute.xlu1 %790 }
 0x16d   :  { %921 = vst.msk [vmem:[#allocation2 + $0x1e0] sm:$0xff] %vm15911_vm2, %v789_v62  ;;  %922 = vst.msk [vmem:[#allocation2 + $0x1e8] sm:$0xff] %vm15911_vm2, %v791_v63 }
 0x16e   :  { %1162 = vrot.lane.b32.xlu0 %v9647_v44, %s9010_s18  ;;  %1164 = vrot.lane.b32.xlu1 %v9654_v45, %s9010_s18  ;;  %v16100_v44 = vld [vmem:[#allocation6_spill] sm:$0xff]  ;;  %v16101_v45 = vld [vmem:[#allocation7_spill] sm:$0xff] }
 0x170   :  { %v793_v6 = vpop.permute.xlu0 %792  ;;  %v795_v7 = vpop.permute.xlu1 %794 }
 0x171   :  { %923 = vst.msk [vmem:[#allocation2 + $0x1f0] sm:$0xff] %vm15911_vm2, %v793_v6  ;;  %924 = vst.msk [vmem:[#allocation2 + $0x1f8] sm:$0xff] %vm15911_vm2, %v795_v7  ;;  %v3305_v6 = vld [vmem:[%s15854_s1 + $0x20] sm:$0xff]  ;;  %v3306_v7 = vld [vmem:[%s15854_s1 + $0x28] sm:$0xff] }
 0x172   :  { %1166 = vrot.lane.b32.xlu0 %v9669_v60, %s9010_s18  ;;  %1168 = vrot.lane.b32.xlu1 %v9676_v61, %s9010_s18  ;;  %v16102_v60 = vld [vmem:[#allocation8_spill] sm:$0xff]  ;;  %v16103_v61 = vld [vmem:[#allocation9_spill] sm:$0xff] }
 0x174   :  { %v1055_v15 = vpop.permute.xlu0 %1054  ;;  %v1057_v16 = vpop.permute.xlu1 %1056 }
 0x175   :  { %1247 = vst.msk [vmem:[#allocation2] sm:$0xff] %vm15910_vm3, %v1055_v15  ;;  %1248 = vst.msk [vmem:[#allocation2 + $0x8] sm:$0xff] %vm15910_vm3, %v1057_v16  ;;  %v8960_v15 = vpack.c.bf16 %v3306_v7, %v3305_v6  ;;  %v8422_v16 = vld [vmem:[%s15853_s0 + $0x30] sm:$0xff] }
 0x176   :  { %1170 = vrot.lane.b32.xlu0 %v16100_v44, %s9010_s18  ;;  %1172 = vrot.lane.b32.xlu1 %v16101_v45, %s9010_s18  ;;  %v8423_v44 = vld [vmem:[%s15853_s0 + $0x38] sm:$0xff]  ;;  %v8430_v7 = vld [vmem:[%s15853_s0 + $0x90] sm:$0xff] }
 0x177   :  { %8961 = vmatprep.subr.bf16.mxu0 %v8960_v15  ;;  %8986 = vmatprep.subr.bf16.mxu1 %v8960_v15 }
 0x178   :  { %v1059_v28 = vpop.permute.xlu0 %1058  ;;  %v1061_v29 = vpop.permute.xlu1 %1060  ;;  %8963 = vmatpush3.bf16.msra.mxu0 %v8960_v15  ;;  %8991 = vmatpush3.bf16.msra.mxu1 %v8960_v15  ;;  %v8431_v15 = vld [vmem:[%s15853_s0 + $0x98] sm:$0xff] }
 0x179   :  { %1249 = vst.msk [vmem:[#allocation2 + $0x10] sm:$0xff] %vm15910_vm3, %v1059_v28  ;;  %1250 = vst.msk [vmem:[#allocation2 + $0x18] sm:$0xff] %vm15910_vm3, %v1061_v29  ;;  %v3307_v29 = vld [vmem:[%s15854_s1 + $0x30] sm:$0xff] }
 0x17a   :  { %1174 = vrot.lane.b32.xlu0 %v16102_v60, %s9010_s18  ;;  %1176 = vrot.lane.b32.xlu1 %v16103_v61, %s9010_s18  ;;  %v3308_v60 = vld [vmem:[%s15854_s1 + $0x38] sm:$0xff] }
 0x17b   :  { %v8964_v61 = vpack.c.bf16 %v3308_v60, %v3307_v29  ;;  %v8558_v29 = vld [vmem:[%s15853_s0 + $0x92] sm:$0xff] }
 0x17c   :  { %v1063_v13 = vpop.permute.xlu0 %1062  ;;  %v1065_v17 = vpop.permute.xlu1 %1064 }
 0x17d   :  { %1251 = vst.msk [vmem:[#allocation2 + $0x20] sm:$0xff] %vm15910_vm3, %v1063_v13  ;;  %1252 = vst.msk [vmem:[#allocation2 + $0x28] sm:$0xff] %vm15910_vm3, %v1065_v17  ;;  %8965 = vmatprep.subr.bf16.mxu0 %v8964_v61  ;;  %8987 = vmatprep.subr.bf16.mxu1 %v8964_v61  ;;  %v3309_v13 = vld [vmem:[%s15854_s1 + $0x40] sm:$0xff]  ;;  %v8550_v17 = vld [vmem:[%s15853_s0 + $0x32] sm:$0xff] }
 0x17e   :  { %1178 = vrot.lane.b32.xlu0 %v8292_v11, %s9010_s18  ;;  %1180 = vrot.lane.b32.xlu1 %v8293_v54, %s9010_s18 }
 0x17f   :  { %8967 = vmatpush3.bf16.msra.mxu0 %v8964_v61  ;;  %8992 = vmatpush3.bf16.msra.mxu1 %v8964_v61 }
 0x180   :  { %v1067_v20 = vpop.permute.xlu0 %1066  ;;  %v1069_v23 = vpop.permute.xlu1 %1068  ;;  %8812 = vmatprep.subr.mxu0 %v3309_v13  ;;  %8988 = vmatprep.subr.mxu1 %v3309_v13 }
 0x181   :  { %1253 = vst.msk [vmem:[#allocation2 + $0x30] sm:$0xff] %vm15910_vm3, %v1067_v20  ;;  %1254 = vst.msk [vmem:[#allocation2 + $0x38] sm:$0xff] %vm15910_vm3, %v1069_v23  ;;  %v8551_v20 = vld [vmem:[%s15853_s0 + $0x3a] sm:$0xff] }
 0x182   :  { %1439 = vrot.lane.b32.xlu0 %v8294_v18, %s9011_s10  ;;  %1441 = vrot.lane.b32.xlu1 %v8295_v19, %s9011_s10 }
 0x183   :  { %8813 = vmatpush3.msra.mxu0 %v3309_v13  ;;  %8993 = vmatpush3.msra.mxu1 %v3309_v13  ;;  %v8433_v13 = vld [vmem:[%s15853_s0 + $0xb0] sm:$0xff] }
 0x184   :  { %v1071_v26 = vpop.permute.xlu0 %1070  ;;  %v1073_v27 = vpop.permute.xlu1 %1072 }
 0x185   :  { %1255 = vst.msk [vmem:[#allocation2 + $0x40] sm:$0xff] %vm15910_vm3, %v1071_v26  ;;  %1256 = vst.msk [vmem:[#allocation2 + $0x48] sm:$0xff] %vm15910_vm3, %v1073_v27  ;;  %v8425_v26 = vld [vmem:[%s15853_s0 + $0x50] sm:$0xff] }
 0x186   :  { %1443 = vrot.lane.b32.xlu0 %v10289_v24, %s9011_s10  ;;  %1445 = vrot.lane.b32.xlu1 %v10294_v25, %s9011_s10 }
 0x188   :  { %v1075_v32 = vpop.permute.xlu0 %1074  ;;  %v1077_v33 = vpop.permute.xlu1 %1076 }
 0x189   :  { %1257 = vst.msk [vmem:[#allocation2 + $0x50] sm:$0xff] %vm15910_vm3, %v1075_v32  ;;  %1258 = vst.msk [vmem:[#allocation2 + $0x58] sm:$0xff] %vm15910_vm3, %v1077_v33 }
 0x18a   :  { %1447 = vrot.lane.b32.xlu0 %v10305_v30, %s9011_s10  ;;  %1449 = vrot.lane.b32.xlu1 %v10310_v31, %s9011_s10 }
 0x18c   :  { %v1079_v38 = vpop.permute.xlu0 %1078  ;;  %v1081_v39 = vpop.permute.xlu1 %1080 }
 0x18d   :  { %1259 = vst.msk [vmem:[#allocation2 + $0x60] sm:$0xff] %vm15910_vm3, %v1079_v38  ;;  %1260 = vst.msk [vmem:[#allocation2 + $0x68] sm:$0xff] %vm15910_vm3, %v1081_v39  ;;  %v8552_v39 = vld [vmem:[%s15853_s0 + $0x4a] sm:$0xff] }
 0x18e   :  { %1451 = vrot.lane.b32.xlu0 %v10321_v34, %s9011_s10  ;;  %1453 = vrot.lane.b32.xlu1 %v10326_v36, %s9011_s10 }
 0x190   :  { %v1083_v42 = vpop.permute.xlu0 %1082  ;;  %v1085_v43 = vpop.permute.xlu1 %1084 }
 0x191   :  { %1261 = vst.msk [vmem:[#allocation2 + $0x70] sm:$0xff] %vm15910_vm3, %v1083_v42  ;;  %1262 = vst.msk [vmem:[#allocation2 + $0x78] sm:$0xff] %vm15910_vm3, %v1085_v43 }
 0x192   :  { %1455 = vrot.lane.b32.xlu0 %v10337_v40, %s9011_s10  ;;  %1457 = vrot.lane.b32.xlu1 %v10342_v41, %s9011_s10 }
 0x194   :  { %v1087_v48 = vpop.permute.xlu0 %1086  ;;  %v1089_v49 = vpop.permute.xlu1 %1088 }
 0x195   :  { %1263 = vst.msk [vmem:[#allocation2 + $0x80] sm:$0xff] %vm15910_vm3, %v1087_v48  ;;  %1264 = vst.msk [vmem:[#allocation2 + $0x88] sm:$0xff] %vm15910_vm3, %v1089_v49  ;;  %v8426_v49 = vld [vmem:[%s15853_s0 + $0x60] sm:$0xff] }
 0x196   :  { %1459 = vrot.lane.b32.xlu0 %v10353_v46, %s9011_s10  ;;  %1461 = vrot.lane.b32.xlu1 %v10358_v47, %s9011_s10 }
 0x198   :  { %v1091_v56 = vpop.permute.xlu0 %1090  ;;  %v1093_v57 = vpop.permute.xlu1 %1092 }
 0x199   :  { %1265 = vst.msk [vmem:[#allocation2 + $0x90] sm:$0xff] %vm15910_vm3, %v1091_v56  ;;  %1266 = vst.msk [vmem:[#allocation2 + $0x98] sm:$0xff] %vm15910_vm3, %v1093_v57  ;;  %v8427_v56 = vld [vmem:[%s15853_s0 + $0x68] sm:$0xff] }
 0x19a   :  { %1463 = vrot.lane.b32.xlu0 %v10369_v52, %s9011_s10  ;;  %1465 = vrot.lane.b32.xlu1 %v10374_v53, %s9011_s10 }
 0x19c   :  { %v1095_v10 = vpop.permute.xlu0 %1094  ;;  %v1097_v55 = vpop.permute.xlu1 %1096 }
 0x19d   :  { %1267 = vst.msk [vmem:[#allocation2 + $0xa0] sm:$0xff] %vm15910_vm3, %v1095_v10  ;;  %1268 = vst.msk [vmem:[#allocation2 + $0xa8] sm:$0xff] %vm15910_vm3, %v1097_v55 }
 0x19e   :  { %1467 = vrot.lane.b32.xlu0 %v10385_v2, %s9011_s10  ;;  %1469 = vrot.lane.b32.xlu1 %v10390_v3, %s9011_s10 }
 0x1a0   :  { %v1099_v4 = vpop.permute.xlu0 %1098  ;;  %v1101_v5 = vpop.permute.xlu1 %1100 }
 0x1a1   :  { %1269 = vst.msk [vmem:[#allocation2 + $0xb0] sm:$0xff] %vm15910_vm3, %v1099_v4  ;;  %1270 = vst.msk [vmem:[#allocation2 + $0xb8] sm:$0xff] %vm15910_vm3, %v1101_v5  ;;  %v8554_v5 = vld [vmem:[%s15853_s0 + $0x62] sm:$0xff] }
 0x1a2   :  { %1471 = vrot.lane.b32.xlu0 %v10401_v0, %s9011_s10  ;;  %1473 = vrot.lane.b32.xlu1 %v10406_v1, %s9011_s10 }
 0x1a4   :  { %v1103_v22 = vpop.permute.xlu0 %1102  ;;  %v1105_v35 = vpop.permute.xlu1 %1104 }
 0x1a5   :  { %1271 = vst.msk [vmem:[#allocation2 + $0xc0] sm:$0xff] %vm15910_vm3, %v1103_v22  ;;  %1272 = vst.msk [vmem:[#allocation2 + $0xc8] sm:$0xff] %vm15910_vm3, %v1105_v35  ;;  %v8428_v22 = vld [vmem:[%s15853_s0 + $0x78] sm:$0xff]  ;;  %v8429_v35 = vld [vmem:[%s15853_s0 + $0x80] sm:$0xff] }
 0x1a6   :  { %1475 = vrot.lane.b32.xlu0 %v10423_v14, %s9011_s10  ;;  %1477 = vrot.lane.b32.xlu1 %v10428_v21, %s9011_s10 }
 0x1a8   :  { %v1107_v62 = vpop.permute.xlu0 %1106  ;;  %v1109_v63 = vpop.permute.xlu1 %1108 }
 0x1a9   :  { %1273 = vst.msk [vmem:[#allocation2 + $0xd0] sm:$0xff] %vm15910_vm3, %v1107_v62  ;;  %1274 = vst.msk [vmem:[#allocation2 + $0xd8] sm:$0xff] %vm15910_vm3, %v1109_v63 }
 0x1aa   :  { %1824 = vrot.lane.b32.xlu0 %v8358_v58, %s9012_s27  ;;  %1826 = vrot.lane.b32.xlu1 %v8359_v59, %s9012_s27  ;;  %v8556_v59 = vld [vmem:[%s15853_s0 + $0x7a] sm:$0xff] }
 0x1ac   :  { %v1111_v45 = vpop.permute.xlu0 %1110  ;;  %v1113_v28 = vpop.permute.xlu1 %1112 }
 0x1ad   :  { %1275 = vst.msk [vmem:[#allocation2 + $0xe0] sm:$0xff] %vm15910_vm3, %v1111_v45  ;;  %1276 = vst.msk [vmem:[#allocation2 + $0xe8] sm:$0xff] %vm15910_vm3, %v1113_v28 }
 0x1ae   :  { %2210 = vrot.lane.b32.xlu0 %v8422_v16, %s9013_s15  ;;  %2212 = vrot.lane.b32.xlu1 %v8423_v44, %s9013_s15 }
 0x1b0   :  { %v1115_v11 = vpop.permute.xlu0 %1114  ;;  %v1117_v54 = vpop.permute.xlu1 %1116 }
 0x1b1   :  { %1277 = vst.msk [vmem:[#allocation2 + $0xf0] sm:$0xff] %vm15910_vm3, %v1115_v11  ;;  %1278 = vst.msk [vmem:[#allocation2 + $0xf8] sm:$0xff] %vm15910_vm3, %v1117_v54  ;;  %v8432_v54 = vld [vmem:[%s15853_s0 + $0xa8] sm:$0xff] }
 0x1b2   :  { %2595 = vrot.lane.b32.xlu0 %v10289_v24, %s9014_s16  ;;  %2597 = vrot.lane.b32.xlu1 %v10294_v25, %s9014_s16  ;;  %v8424_v25 = vld [vmem:[%s15853_s0 + $0x48] sm:$0xff] }
 0x1b4   :  { %v1119_v18 = vpop.permute.xlu0 %1118  ;;  %v1121_v19 = vpop.permute.xlu1 %1120 }
 0x1b5   :  { %1279 = vst.msk [vmem:[#allocation2 + $0x100] sm:$0xff] %vm15910_vm3, %v1119_v18  ;;  %1280 = vst.msk [vmem:[#allocation2 + $0x108] sm:$0xff] %vm15910_vm3, %v1121_v19 }
 0x1b6   :  { %2980 = vrot.lane.b32.xlu0 %v8550_v17, %s9015_s23  ;;  %1828 = vrot.lane.b32.xlu1 %v8550_v17, %s9012_s27 }
 0x1b8   :  { %v1123_v23 = vpop.permute.xlu0 %1122  ;;  %v1125_v24 = vpop.permute.xlu1 %1124 }
 0x1b9   :  { %1281 = vst.msk [vmem:[#allocation2 + $0x110] sm:$0xff] %vm15910_vm3, %v1123_v23  ;;  %1282 = vst.msk [vmem:[#allocation2 + $0x118] sm:$0xff] %vm15910_vm3, %v1125_v24  ;;  %v8560_v23 = vld [vmem:[%s15853_s0 + $0xaa] sm:$0xff] }
 0x1ba   :  { %2982 = vrot.lane.b32.xlu0 %v8551_v20, %s9015_s23  ;;  %1830 = vrot.lane.b32.xlu1 %v8551_v20, %s9012_s27 }
 0x1bc   :  { %v1127_v27 = vpop.permute.xlu0 %1126  ;;  %v1129_v32 = vpop.permute.xlu1 %1128 }
 0x1bd   :  { %1283 = vst.msk [vmem:[#allocation2 + $0x120] sm:$0xff] %vm15910_vm3, %v1127_v27  ;;  %1284 = vst.msk [vmem:[#allocation2 + $0x128] sm:$0xff] %vm15910_vm3, %v1129_v32  ;;  %v8434_v27 = vld [vmem:[%s15853_s0 + $0xc0] sm:$0xff]  ;;  %v8435_v32 = vld [vmem:[%s15853_s0 + $0xc8] sm:$0xff] }
 0x1be   :  { %2214 = vrot.lane.b32.xlu0 %v8424_v25, %s9013_s15  ;;  %2216 = vrot.lane.b32.xlu1 %v8425_v26, %s9013_s15 }
 0x1c0   :  { %v1131_v33 = vpop.permute.xlu0 %1130  ;;  %v1133_v38 = vpop.permute.xlu1 %1132 }
 0x1c1   :  { %1285 = vst.msk [vmem:[#allocation2 + $0x130] sm:$0xff] %vm15910_vm3, %v1131_v33  ;;  %1286 = vst.msk [vmem:[#allocation2 + $0x138] sm:$0xff] %vm15910_vm3, %v1133_v38 }
 0x1c2   :  { %2599 = vrot.lane.b32.xlu0 %v10305_v30, %s9014_s16  ;;  %2601 = vrot.lane.b32.xlu1 %v10310_v31, %s9014_s16  ;;  %v8553_v30 = vld [vmem:[%s15853_s0 + $0x52] sm:$0xff] }
 0x1c4   :  { %v1135_v42 = vpop.permute.xlu0 %1134  ;;  %v1137_v43 = vpop.permute.xlu1 %1136 }
 0x1c5   :  { %1287 = vst.msk [vmem:[#allocation2 + $0x140] sm:$0xff] %vm15910_vm3, %v1135_v42  ;;  %1288 = vst.msk [vmem:[#allocation2 + $0x148] sm:$0xff] %vm15910_vm3, %v1137_v43  ;;  %v8562_v43 = vld [vmem:[%s15853_s0 + $0xc2] sm:$0xff] }
 0x1c6   :  { %2984 = vrot.lane.b32.xlu0 %v8552_v39, %s9015_s23  ;;  %1832 = vrot.lane.b32.xlu1 %v8552_v39, %s9012_s27 }
 0x1c8   :  { %v1139_v48 = vpop.permute.xlu0 %1138  ;;  %v1141_v31 = vpop.permute.xlu1 %1140 }
 0x1c9   :  { %1289 = vst.msk [vmem:[#allocation2 + $0x150] sm:$0xff] %vm15910_vm3, %v1139_v48  ;;  %1290 = vst.msk [vmem:[#allocation2 + $0x158] sm:$0xff] %vm15910_vm3, %v1141_v31 }
 0x1ca   :  { %2986 = vrot.lane.b32.xlu0 %v8553_v30, %s9015_s23  ;;  %1834 = vrot.lane.b32.xlu1 %v8553_v30, %s9012_s27 }
 0x1cc   :  { %v1143_v57 = vpop.permute.xlu0 %1142  ;;  %v1145_v10 = vpop.permute.xlu1 %1144 }
 0x1cd   :  { %1291 = vst.msk [vmem:[#allocation2 + $0x160] sm:$0xff] %vm15910_vm3, %v1143_v57  ;;  %1292 = vst.msk [vmem:[#allocation2 + $0x168] sm:$0xff] %vm15910_vm3, %v1145_v10 }
 0x1ce   :  { %2218 = vrot.lane.b32.xlu0 %v8426_v49, %s9013_s15  ;;  %2220 = vrot.lane.b32.xlu1 %v8427_v56, %s9013_s15  ;;  %v8436_v49 = vld [vmem:[%s15853_s0 + $0xd8] sm:$0xff]  ;;  %v8437_v56 = vld [vmem:[%s15853_s0 + $0xe0] sm:$0xff] }
 0x1d0   :  { %v1147_v55 = vpop.permute.xlu0 %1146  ;;  %v1149_v4 = vpop.permute.xlu1 %1148 }
 0x1d1   :  { %1293 = vst.msk [vmem:[#allocation2 + $0x170] sm:$0xff] %vm15910_vm3, %v1147_v55  ;;  %1294 = vst.msk [vmem:[#allocation2 + $0x178] sm:$0xff] %vm15910_vm3, %v1149_v4 }
 0x1d2   :  { %2603 = vrot.lane.b32.xlu0 %v10321_v34, %s9014_s16  ;;  %2605 = vrot.lane.b32.xlu1 %v10326_v36, %s9014_s16  ;;  %v8555_v34 = vld [vmem:[%s15853_s0 + $0x6a] sm:$0xff] }
 0x1d4   :  { %v1151_v8 = vpop.permute.xlu0 %1150  ;;  %v1153_v9 = vpop.permute.xlu1 %1152 }
 0x1d5   :  { %1295 = vst.msk [vmem:[#allocation2 + $0x180] sm:$0xff] %vm15910_vm3, %v1151_v8  ;;  %1296 = vst.msk [vmem:[#allocation2 + $0x188] sm:$0xff] %vm15910_vm3, %v1153_v9 }
 0x1d6   :  { %2988 = vrot.lane.b32.xlu0 %v8554_v5, %s9015_s23  ;;  %1836 = vrot.lane.b32.xlu1 %v8554_v5, %s9012_s27  ;;  %v8564_v5 = vld [vmem:[%s15853_s0 + $0xda] sm:$0xff] }
 0x1d8   :  { %v1155_v12 = vpop.permute.xlu0 %1154  ;;  %v1157_v36 = vpop.permute.xlu1 %1156 }
 0x1d9   :  { %1297 = vst.msk [vmem:[#allocation2 + $0x190] sm:$0xff] %vm15910_vm3, %v1155_v12  ;;  %1298 = vst.msk [vmem:[#allocation2 + $0x198] sm:$0xff] %vm15910_vm3, %v1157_v36  ;;  %v8438_v12 = vld [vmem:[%s15853_s0 + $0xf0] sm:$0xff]  ;;  %v8439_v36 = vld [vmem:[%s15853_s0 + $0xf8] sm:$0xff] }
 0x1da   :  { %2990 = vrot.lane.b32.xlu0 %v8555_v34, %s9015_s23  ;;  %1838 = vrot.lane.b32.xlu1 %v8555_v34, %s9012_s27 }
 0x1dc   :  { %v1159_v37 = vpop.permute.xlu0 %1158  ;;  %v1161_v50 = vpop.permute.xlu1 %1160 }
 0x1dd   :  { %1299 = vst.msk [vmem:[#allocation2 + $0x1a0] sm:$0xff] %vm15910_vm3, %v1159_v37  ;;  %1300 = vst.msk [vmem:[#allocation2 + $0x1a8] sm:$0xff] %vm15910_vm3, %v1161_v50 }
 0x1de   :  { %2222 = vrot.lane.b32.xlu0 %v8428_v22, %s9013_s15  ;;  %2224 = vrot.lane.b32.xlu1 %v8429_v35, %s9013_s15 }
 0x1e0   :  { %v1163_v51 = vpop.permute.xlu0 %1162  ;;  %v1165_v58 = vpop.permute.xlu1 %1164 }
 0x1e1   :  { %1301 = vst.msk [vmem:[#allocation2 + $0x1b0] sm:$0xff] %vm15910_vm3, %v1163_v51  ;;  %1302 = vst.msk [vmem:[#allocation2 + $0x1b8] sm:$0xff] %vm15910_vm3, %v1165_v58  ;;  %v8566_v58 = vld [vmem:[%s15853_s0 + $0xf2] sm:$0xff] }
 0x1e2   :  { %2607 = vrot.lane.b32.xlu0 %v10337_v40, %s9014_s16  ;;  %2609 = vrot.lane.b32.xlu1 %v10342_v41, %s9014_s16  ;;  %v8557_v40 = vld [vmem:[%s15853_s0 + $0x82] sm:$0xff] }
 0x1e4   :  { %v1167_v62 = vpop.permute.xlu0 %1166  ;;  %v1169_v63 = vpop.permute.xlu1 %1168 }
 0x1e5   :  { %1303 = vst.msk [vmem:[#allocation2 + $0x1c0] sm:$0xff] %vm15910_vm3, %v1167_v62  ;;  %1304 = vst.msk [vmem:[#allocation2 + $0x1c8] sm:$0xff] %vm15910_vm3, %v1169_v63 }
 0x1e6   :  { %2992 = vrot.lane.b32.xlu0 %v8556_v59, %s9015_s23  ;;  %1840 = vrot.lane.b32.xlu1 %v8556_v59, %s9012_s27 }
 0x1e8   :  { %v1171_v6 = vpop.permute.xlu0 %1170  ;;  %v1173_v41 = vpop.permute.xlu1 %1172 }
 0x1e9   :  { %1305 = vst.msk [vmem:[#allocation2 + $0x1d0] sm:$0xff] %vm15910_vm3, %v1171_v6  ;;  %1306 = vst.msk [vmem:[#allocation2 + $0x1d8] sm:$0xff] %vm15910_vm3, %v1173_v41  ;;  %v8440_v6 = vld [vmem:[%s15853_s0 + $0x108] sm:$0xff]  ;;  %v8441_v41 = vld [vmem:[%s15853_s0 + $0x110] sm:$0xff] }
 0x1ea   :  { %2994 = vrot.lane.b32.xlu0 %v8557_v40, %s9015_s23  ;;  %1842 = vrot.lane.b32.xlu1 %v8557_v40, %s9012_s27 }
 0x1ec   :  { %v1175_v16 = vpop.permute.xlu0 %1174  ;;  %v1177_v44 = vpop.permute.xlu1 %1176 }
 0x1ed   :  { %1307 = vst.msk [vmem:[#allocation2 + $0x1e0] sm:$0xff] %vm15910_vm3, %v1175_v16  ;;  %1308 = vst.msk [vmem:[#allocation2 + $0x1e8] sm:$0xff] %vm15910_vm3, %v1177_v44  ;;  %v8504_v16 = vld [vmem:[%s15853_s0 + $0x109] sm:$0xff] }
 0x1ee   :  { %2226 = vrot.lane.b32.xlu0 %v8430_v7, %s9013_s15  ;;  %2228 = vrot.lane.b32.xlu1 %v8431_v15, %s9013_s15 }
 0x1f0   :  { %v1179_v45 = vpop.permute.xlu0 %1178  ;;  %v1181_v28 = vpop.permute.xlu1 %1180 }
 0x1f1   :  { %1309 = vst.msk [vmem:[#allocation2 + $0x1f0] sm:$0xff] %vm15910_vm3, %v1179_v45  ;;  %1310 = vst.msk [vmem:[#allocation2 + $0x1f8] sm:$0xff] %vm15910_vm3, %v1181_v28 }
 0x1f2   :  { %2611 = vrot.lane.b32.xlu0 %v10353_v46, %s9014_s16  ;;  %2613 = vrot.lane.b32.xlu1 %v10358_v47, %s9014_s16  ;;  %v8559_v46 = vld [vmem:[%s15853_s0 + $0x9a] sm:$0xff] }
 0x1f4   :  { %v1440_v60 = vpop.permute.xlu0 %1439  ;;  %v1442_v61 = vpop.permute.xlu1 %1441 }
 0x1f5   :  { %1632 = vst.msk [vmem:[#allocation2] sm:$0xff] %vm15909_vm4, %v1440_v60  ;;  %1633 = vst.msk [vmem:[#allocation2 + $0x8] sm:$0xff] %vm15909_vm4, %v1442_v61  ;;  %v8568_v60 = vld [vmem:[%s15853_s0 + $0x10a] sm:$0xff] }
 0x1f6   :  { %2996 = vrot.lane.b32.xlu0 %v8558_v29, %s9015_s23  ;;  %1844 = vrot.lane.b32.xlu1 %v8558_v29, %s9012_s27  ;;  %v8505_v29 = vld [vmem:[%s15853_s0 + $0x111] sm:$0xff] }
 0x1f8   :  { %v1444_v47 = vpop.permute.xlu0 %1443  ;;  %v1446_v11 = vpop.permute.xlu1 %1445 }
 0x1f9   :  { %1634 = vst.msk [vmem:[#allocation2 + $0x10] sm:$0xff] %vm15909_vm4, %v1444_v47  ;;  %1635 = vst.msk [vmem:[#allocation2 + $0x18] sm:$0xff] %vm15909_vm4, %v1446_v11 }
 0x1fa   :  { %2998 = vrot.lane.b32.xlu0 %v8559_v46, %s9015_s23  ;;  %1846 = vrot.lane.b32.xlu1 %v8559_v46, %s9012_s27 }
 0x1fc   :  { %v1448_v17 = vpop.permute.xlu0 %1447  ;;  %v1450_v18 = vpop.permute.xlu1 %1449 }
 0x1fd   :  { %1636 = vst.msk [vmem:[#allocation2 + $0x20] sm:$0xff] %vm15909_vm4, %v1448_v17  ;;  %1637 = vst.msk [vmem:[#allocation2 + $0x28] sm:$0xff] %vm15909_vm4, %v1450_v18 }
 0x1fe   :  { %2230 = vrot.lane.b32.xlu0 %v8432_v54, %s9013_s15  ;;  %2232 = vrot.lane.b32.xlu1 %v8433_v13, %s9013_s15  ;;  %v8569_v13 = vld [vmem:[%s15853_s0 + $0x112] sm:$0xff] }
 0x200   :  { %v1452_v19 = vpop.permute.xlu0 %1451  ;;  %v1454_v20 = vpop.permute.xlu1 %1453 }
 0x201   :  { %1638 = vst.msk [vmem:[#allocation2 + $0x30] sm:$0xff] %vm15909_vm4, %v1452_v19  ;;  %1639 = vst.msk [vmem:[#allocation2 + $0x38] sm:$0xff] %vm15909_vm4, %v1454_v20  ;;  %v8442_v19 = vld [vmem:[%s15853_s0 + $0x120] sm:$0xff]  ;;  %v8443_v20 = vld [vmem:[%s15853_s0 + $0x128] sm:$0xff] }
 0x202   :  { %2615 = vrot.lane.b32.xlu0 %v10369_v52, %s9014_s16  ;;  %2617 = vrot.lane.b32.xlu1 %v10374_v53, %s9014_s16  ;;  %v8561_v52 = vld [vmem:[%s15853_s0 + $0xb2] sm:$0xff] }
 0x204   :  { %v1456_v24 = vpop.permute.xlu0 %1455  ;;  %v1458_v25 = vpop.permute.xlu1 %1457 }
 0x205   :  { %1640 = vst.msk [vmem:[#allocation2 + $0x40] sm:$0xff] %vm15909_vm4, %v1456_v24  ;;  %1641 = vst.msk [vmem:[#allocation2 + $0x48] sm:$0xff] %vm15909_vm4, %v1458_v25 }
 0x206   :  { %3000 = vrot.lane.b32.xlu0 %v8560_v23, %s9015_s23  ;;  %1848 = vrot.lane.b32.xlu1 %v8560_v23, %s9012_s27 }
 0x208   :  { %v1460_v26 = vpop.permute.xlu0 %1459  ;;  %v1462_v53 = vpop.permute.xlu1 %1461 }
 0x209   :  { %1642 = vst.msk [vmem:[#allocation2 + $0x50] sm:$0xff] %vm15909_vm4, %v1460_v26  ;;  %1643 = vst.msk [vmem:[#allocation2 + $0x58] sm:$0xff] %vm15909_vm4, %v1462_v53 }
 0x20a   :  { %3002 = vrot.lane.b32.xlu0 %v8561_v52, %s9015_s23  ;;  %1850 = vrot.lane.b32.xlu1 %v8561_v52, %s9012_s27  ;;  %v8506_v52 = vld [vmem:[%s15853_s0 + $0x121] sm:$0xff] }
 0x20c   :  { %v1464_v33 = vpop.permute.xlu0 %1463  ;;  %v1466_v38 = vpop.permute.xlu1 %1465 }
 0x20d   :  { %1644 = vst.msk [vmem:[#allocation2 + $0x60] sm:$0xff] %vm15909_vm4, %v1464_v33  ;;  %1645 = vst.msk [vmem:[#allocation2 + $0x68] sm:$0xff] %vm15909_vm4, %v1466_v38  ;;  %v8570_v33 = vld [vmem:[%s15853_s0 + $0x122] sm:$0xff] }
 0x20e   :  { %2234 = vrot.lane.b32.xlu0 %v8434_v27, %s9013_s15  ;;  %2236 = vrot.lane.b32.xlu1 %v8435_v32, %s9013_s15  ;;  %v8507_v32 = vld [vmem:[%s15853_s0 + $0x129] sm:$0xff] }
 0x210   :  { %v1468_v39 = vpop.permute.xlu0 %1467  ;;  %v1470_v42 = vpop.permute.xlu1 %1469 }
 0x211   :  { %1646 = vst.msk [vmem:[#allocation2 + $0x70] sm:$0xff] %vm15909_vm4, %v1468_v39  ;;  %1647 = vst.msk [vmem:[#allocation2 + $0x78] sm:$0xff] %vm15909_vm4, %v1470_v42 }
 0x212   :  { %2619 = vrot.lane.b32.xlu0 %v10385_v2, %s9014_s16  ;;  %2621 = vrot.lane.b32.xlu1 %v10390_v3, %s9014_s16  ;;  %v8563_v2 = vld [vmem:[%s15853_s0 + $0xca] sm:$0xff] }
 0x214   :  { %v1472_v30 = vpop.permute.xlu0 %1471  ;;  %v1474_v48 = vpop.permute.xlu1 %1473 }
 0x215   :  { %1648 = vst.msk [vmem:[#allocation2 + $0x80] sm:$0xff] %vm15909_vm4, %v1472_v30  ;;  %1649 = vst.msk [vmem:[#allocation2 + $0x88] sm:$0xff] %vm15909_vm4, %v1474_v48  ;;  %v8571_v30 = vld [vmem:[%s15853_s0 + $0x12a] sm:$0xff] }
 0x216   :  { %3004 = vrot.lane.b32.xlu0 %v8562_v43, %s9015_s23  ;;  %1852 = vrot.lane.b32.xlu1 %v8562_v43, %s9012_s27 }
 0x218   :  { %v1476_v31 = vpop.permute.xlu0 %1475  ;;  %v1478_v3 = vpop.permute.xlu1 %1477 }
 0x219   :  { %1650 = vst.msk [vmem:[#allocation2 + $0x90] sm:$0xff] %vm15909_vm4, %v1476_v31  ;;  %1651 = vst.msk [vmem:[#allocation2 + $0x98] sm:$0xff] %vm15909_vm4, %v1478_v3  ;;  %v8444_v3 = vld [vmem:[%s15853_s0 + $0x138] sm:$0xff] }
 0x21a   :  { %3006 = vrot.lane.b32.xlu0 %v8563_v2, %s9015_s23  ;;  %1854 = vrot.lane.b32.xlu1 %v8563_v2, %s9012_s27 }
 0x21c   :  { %v1825_v57 = vpop.permute.xlu0 %1824  ;;  %v1827_v10 = vpop.permute.xlu1 %1826 }
 0x21d   :  { %2017 = vst.msk [vmem:[#allocation2] sm:$0xff] %vm15908_vm5, %v1825_v57  ;;  %2018 = vst.msk [vmem:[#allocation2 + $0x8] sm:$0xff] %vm15908_vm5, %v1827_v10 }
 0x21e   :  { %2238 = vrot.lane.b32.xlu0 %v8436_v49, %s9013_s15  ;;  %2240 = vrot.lane.b32.xlu1 %v8437_v56, %s9013_s15  ;;  %v8445_v49 = vld [vmem:[%s15853_s0 + $0x140] sm:$0xff] }
 0x220   :  { %v2211_v55 = vpop.permute.xlu0 %2210  ;;  %v2213_v4 = vpop.permute.xlu1 %2212 }
 0x221   :  { %2403 = vst.msk [vmem:[#allocation2] sm:$0xff] %vm15907_vm6, %v2211_v55  ;;  %2404 = vst.msk [vmem:[#allocation2 + $0x8] sm:$0xff] %vm15907_vm6, %v2213_v4  ;;  %v8508_v55 = vld [vmem:[%s15853_s0 + $0x139] sm:$0xff] }
 0x222   :  { %2623 = vrot.lane.b32.xlu0 %v10401_v0, %s9014_s16  ;;  %2625 = vrot.lane.b32.xlu1 %v10406_v1, %s9014_s16  ;;  %v8565_v0 = vld [vmem:[%s15853_s0 + $0xe2] sm:$0xff] }
 0x224   :  { %v2596_v8 = vpop.permute.xlu0 %2595  ;;  %v2598_v9 = vpop.permute.xlu1 %2597 }
 0x225   :  { %2788 = vst.msk [vmem:[#allocation2] sm:$0xff] %vm15906_vm7, %v2596_v8  ;;  %2789 = vst.msk [vmem:[#allocation2 + $0x8] sm:$0xff] %vm15906_vm7, %v2598_v9  ;;  %v8509_v8 = vld [vmem:[%s15853_s0 + $0x141] sm:$0xff] }
 0x226   :  { %3008 = vrot.lane.b32.xlu0 %v8564_v5, %s9015_s23  ;;  %1856 = vrot.lane.b32.xlu1 %v8564_v5, %s9012_s27  ;;  %v8572_v9 = vld [vmem:[%s15853_s0 + $0x13a] sm:$0xff] }
 0x228   :  { %v2981_v1 = vpop.permute.xlu0 %2980  ;;  %v1829_v34 = vpop.permute.xlu1 %1828 }
 0x229   :  { %3173 = vst.msk [vmem:[#allocation2] sm:$0xff] %vm15898_vm8, %v2981_v1 }
 0x22a   :  { %2019 = vst.msk [vmem:[#allocation2 + $0x10] sm:$0xff] %vm15908_vm5, %v1829_v34  ;;  %3010 = vrot.lane.b32.xlu0 %v8565_v0, %s9015_s23  ;;  %1858 = vrot.lane.b32.xlu1 %v8565_v0, %s9012_s27 }
 0x22c   :  { %v2983_v22 = vpop.permute.xlu0 %2982  ;;  %v1831_v35 = vpop.permute.xlu1 %1830 }
 0x22d   :  { %3174 = vst.msk [vmem:[#allocation2 + $0x8] sm:$0xff] %vm15898_vm8, %v2983_v22  ;;  %v8573_v22 = vld [vmem:[%s15853_s0 + $0x142] sm:$0xff] }
 0x22e   :  { %2020 = vst.msk [vmem:[#allocation2 + $0x18] sm:$0xff] %vm15908_vm5, %v1831_v35  ;;  %2242 = vrot.lane.b32.xlu0 %v8438_v12, %s9013_s15  ;;  %2244 = vrot.lane.b32.xlu1 %v8439_v36, %s9013_s15 }
 0x230   :  { %v2215_v37 = vpop.permute.xlu0 %2214  ;;  %v2217_v50 = vpop.permute.xlu1 %2216  ;;  %v3237_v51 = vld [vmem:[#allocation2] sm:$0xff] }
 0x231   :  { %2405 = vst.msk [vmem:[#allocation2 + $0x10] sm:$0xff] %vm15907_vm6, %v2215_v37  ;;  %2406 = vst.msk [vmem:[#allocation2 + $0x18] sm:$0xff] %vm15907_vm6, %v2217_v50  ;;  %8814 = vmatprep.mubr.msk.f32.mxu0 %vm15897_vm9, %v3237_v51  ;;  %v8446_v51 = vld [vmem:[%s15853_s0 + $0x150] sm:$0xff] }
 0x232   :  { %2627 = vrot.lane.b32.xlu0 %v10423_v14, %s9014_s16  ;;  %2629 = vrot.lane.b32.xlu1 %v10428_v21, %s9014_s16  ;;  %v8567_v14 = vld [vmem:[%s15853_s0 + $0xfa] sm:$0xff] }
 0x234   :  { %v2600_v59 = vpop.permute.xlu0 %2599  ;;  %v2602_v62 = vpop.permute.xlu1 %2601  ;;  %v3238_v63 = vld [vmem:[#allocation2 + $0x8] sm:$0xff] }
 0x235   :  { %2790 = vst.msk [vmem:[#allocation2 + $0x10] sm:$0xff] %vm15906_vm7, %v2600_v59  ;;  %2791 = vst.msk [vmem:[#allocation2 + $0x18] sm:$0xff] %vm15906_vm7, %v2602_v62  ;;  %8815 = vmatmul.mubr.msk.f32.vlgmr.msra.gmra.mrb[0].mxu0 %vm15897_vm9, %v3238_v63  ;;  %v8510_v63 = vld [vmem:[%s15853_s0 + $0x151] sm:$0xff] }
 0x236   :  { %3012 = vrot.lane.b32.xlu0 %v8566_v58, %s9015_s23  ;;  %1860 = vrot.lane.b32.xlu1 %v8566_v58, %s9012_s27  ;;  %v8447_v58 = vld [vmem:[%s15853_s0 + $0x158] sm:$0xff] }
 0x238   :  { %v2985_v21 = vpop.permute.xlu0 %2984  ;;  %v1833_v40 = vpop.permute.xlu1 %1832 }
 0x239   :  { %3175 = vst.msk [vmem:[#allocation2 + $0x10] sm:$0xff] %vm15898_vm8, %v2985_v21 }
 0x23a   :  { %2021 = vst.msk [vmem:[#allocation2 + $0x20] sm:$0xff] %vm15908_vm5, %v1833_v40  ;;  %3014 = vrot.lane.b32.xlu0 %v8567_v14, %s9015_s23  ;;  %1862 = vrot.lane.b32.xlu1 %v8567_v14, %s9012_s27  ;;  %v8511_v40 = vld [vmem:[%s15853_s0 + $0x159] sm:$0xff] }
 0x23c   :  { %v2987_v7 = vpop.permute.xlu0 %2986  ;;  %v1835_v15 = vpop.permute.xlu1 %1834 }
 0x23d   :  { %3176 = vst.msk [vmem:[#allocation2 + $0x18] sm:$0xff] %vm15898_vm8, %v2987_v7 }
 0x23e   :  { %2022 = vst.msk [vmem:[#allocation2 + $0x28] sm:$0xff] %vm15908_vm5, %v1835_v15  ;;  %2246 = vrot.lane.b32.xlu0 %v8440_v6, %s9013_s15  ;;  %2248 = vrot.lane.b32.xlu1 %v8441_v41, %s9013_s15  ;;  %v8574_v6 = vld [vmem:[%s15853_s0 + $0x152] sm:$0xff] }
 0x240   :  { %v2219_v44 = vpop.permute.xlu0 %2218  ;;  %v2221_v45 = vpop.permute.xlu1 %2220  ;;  %v3239_v28 = vld [vmem:[#allocation2 + $0x10] sm:$0xff] }
 0x241   :  { %2407 = vst.msk [vmem:[#allocation2 + $0x20] sm:$0xff] %vm15907_vm6, %v2219_v44  ;;  %2408 = vst.msk [vmem:[#allocation2 + $0x28] sm:$0xff] %vm15907_vm6, %v2221_v45  ;;  %8817 = vmatprep.mubr.msk.f32.mxu0 %vm15897_vm9, %v3239_v28  ;;  %v8575_v28 = vld [vmem:[%s15853_s0 + $0x15a] sm:$0xff] }
 0x242   :  { %2631 = vrot.lane.b32.xlu0 %v8504_v16, %s9014_s16  ;;  %1479 = vrot.lane.b32.xlu1 %v8504_v16, %s9011_s10 }
 0x244   :  { %v2604_v61 = vpop.permute.xlu0 %2603  ;;  %v2606_v46 = vpop.permute.xlu1 %2605  ;;  %v3240_v47 = vld [vmem:[#allocation2 + $0x18] sm:$0xff] }
 0x245   :  { %2792 = vst.msk [vmem:[#allocation2 + $0x20] sm:$0xff] %vm15906_vm7, %v2604_v61  ;;  %2793 = vst.msk [vmem:[#allocation2 + $0x28] sm:$0xff] %vm15906_vm7, %v2606_v46  ;;  %8818 = vmatmul.mubr.msk.f32.gmra.mrb[2].mxu0 %vm15897_vm9, %v3240_v47  ;;  %v8448_v61 = vld [vmem:[%s15853_s0 + $0x168] sm:$0xff]  ;;  %v8449_v46 = vld [vmem:[%s15853_s0 + $0x170] sm:$0xff] }
 0x246   :  { %2633 = vrot.lane.b32.xlu0 %v8505_v29, %s9014_s16  ;;  %3016 = vrot.lane.b32.xlu1 %v8568_v60, %s9015_s23 }
 0x248   :  { %v2989_v11 = vpop.permute.xlu0 %2988  ;;  %v1837_v54 = vpop.permute.xlu1 %1836 }
 0x249   :  { %3177 = vst.msk [vmem:[#allocation2 + $0x20] sm:$0xff] %vm15898_vm8, %v2989_v11 }
 0x24a   :  { %2023 = vst.msk [vmem:[#allocation2 + $0x30] sm:$0xff] %vm15908_vm5, %v1837_v54  ;;  %1481 = vrot.lane.b32.xlu0 %v8505_v29, %s9011_s10  ;;  %1864 = vrot.lane.b32.xlu1 %v8568_v60, %s9012_s27  ;;  %v8512_v54 = vld [vmem:[%s15853_s0 + $0x169] sm:$0xff] }
 0x24c   :  { %v2991_v17 = vpop.permute.xlu0 %2990  ;;  %v1839_v18 = vpop.permute.xlu1 %1838 }
 0x24d   :  { %3178 = vst.msk [vmem:[#allocation2 + $0x28] sm:$0xff] %vm15898_vm8, %v2991_v17 }
 0x24e   :  { %2024 = vst.msk [vmem:[#allocation2 + $0x38] sm:$0xff] %vm15908_vm5, %v1839_v18  ;;  %3018 = vrot.lane.b32.xlu0 %v8569_v13, %s9015_s23  ;;  %1866 = vrot.lane.b32.xlu1 %v8569_v13, %s9012_s27 }
 0x250   :  { %v2223_v23 = vpop.permute.xlu0 %2222  ;;  %v2225_v24 = vpop.permute.xlu1 %2224  ;;  %v3241_v25 = vld [vmem:[#allocation2 + $0x20] sm:$0xff] }
 0x251   :  { %2409 = vst.msk [vmem:[#allocation2 + $0x30] sm:$0xff] %vm15907_vm6, %v2223_v23  ;;  %2410 = vst.msk [vmem:[#allocation2 + $0x38] sm:$0xff] %vm15907_vm6, %v2225_v24  ;;  %8820 = vmatprep.mubr.msk.f32.mxu0 %vm15897_vm9, %v3241_v25 }
 0x252   :  { %2250 = vrot.lane.b32.xlu0 %v8442_v19, %s9013_s15  ;;  %2252 = vrot.lane.b32.xlu1 %v8443_v20, %s9013_s15  ;;  %v8513_v19 = vld [vmem:[%s15853_s0 + $0x171] sm:$0xff] }
 0x253   :  { %v8576_v20 = vld [vmem:[%s15853_s0 + $0x16a] sm:$0xff] }
 0x254   :  { %v2608_v26 = vpop.permute.xlu0 %2607  ;;  %v2610_v53 = vpop.permute.xlu1 %2609  ;;  %v3242_v27 = vld [vmem:[#allocation2 + $0x28] sm:$0xff] }
 0x255   :  { %2794 = vst.msk [vmem:[#allocation2 + $0x30] sm:$0xff] %vm15906_vm7, %v2608_v26  ;;  %2795 = vst.msk [vmem:[#allocation2 + $0x38] sm:$0xff] %vm15906_vm7, %v2610_v53  ;;  %8821 = vmatmul.mubr.msk.f32.gmra.mrb[4].mxu0 %vm15897_vm9, %v3242_v27  ;;  %v8577_v53 = vld [vmem:[%s15853_s0 + $0x172] sm:$0xff] }
 0x256   :  { %2635 = vrot.lane.b32.xlu0 %v8506_v52, %s9014_s16  ;;  %1483 = vrot.lane.b32.xlu1 %v8506_v52, %s9011_s10 }
 0x258   :  { %v2993_v38 = vpop.permute.xlu0 %2992  ;;  %v1841_v39 = vpop.permute.xlu1 %1840 }
 0x259   :  { %3179 = vst.msk [vmem:[#allocation2 + $0x30] sm:$0xff] %vm15898_vm8, %v2993_v38  ;;  %v8451_v38 = vld [vmem:[%s15853_s0 + $0x188] sm:$0xff] }
 0x25a   :  { %2025 = vst.msk [vmem:[#allocation2 + $0x40] sm:$0xff] %vm15908_vm5, %v1841_v39  ;;  %2637 = vrot.lane.b32.xlu0 %v8507_v32, %s9014_s16  ;;  %3020 = vrot.lane.b32.xlu1 %v8570_v33, %s9015_s23 }
 0x25c   :  { %v2995_v42 = vpop.permute.xlu0 %2994  ;;  %v1843_v43 = vpop.permute.xlu1 %1842 }
 0x25d   :  { %3180 = vst.msk [vmem:[#allocation2 + $0x38] sm:$0xff] %vm15898_vm8, %v2995_v42 }
 0x25e   :  { %2026 = vst.msk [vmem:[#allocation2 + $0x48] sm:$0xff] %vm15908_vm5, %v1843_v43  ;;  %1485 = vrot.lane.b32.xlu0 %v8507_v32, %s9011_s10  ;;  %1868 = vrot.lane.b32.xlu1 %v8570_v33, %s9012_s27  ;;  %v8450_v33 = vld [vmem:[%s15853_s0 + $0x180] sm:$0xff] }
 0x260   :  { %v2227_v48 = vpop.permute.xlu0 %2226  ;;  %v2229_v2 = vpop.permute.xlu1 %2228  ;;  %v3243_v31 = vld [vmem:[#allocation2 + $0x30] sm:$0xff] }
 0x261   :  { %2411 = vst.msk [vmem:[#allocation2 + $0x40] sm:$0xff] %vm15907_vm6, %v2227_v48  ;;  %2412 = vst.msk [vmem:[#allocation2 + $0x48] sm:$0xff] %vm15907_vm6, %v2229_v2  ;;  %8823 = vmatprep.mubr.msk.f32.mxu0 %vm15897_vm9, %v3243_v31 }
 0x262   :  { %3022 = vrot.lane.b32.xlu0 %v8571_v30, %s9015_s23  ;;  %1870 = vrot.lane.b32.xlu1 %v8571_v30, %s9012_s27  ;;  %v8514_v30 = vld [vmem:[%s15853_s0 + $0x181] sm:$0xff] }
 0x264   :  { %v2612_v56 = vpop.permute.xlu0 %2611  ;;  %v2614_v57 = vpop.permute.xlu1 %2613  ;;  %v3244_v10 = vld [vmem:[#allocation2 + $0x38] sm:$0xff] }
 0x265   :  { %2796 = vst.msk [vmem:[#allocation2 + $0x40] sm:$0xff] %vm15906_vm7, %v2612_v56  ;;  %2797 = vst.msk [vmem:[#allocation2 + $0x48] sm:$0xff] %vm15906_vm7, %v2614_v57  ;;  %8824 = vmatmul.mubr.msk.f32.gmra.mrb[6].mxu0 %vm15897_vm9, %v3244_v10 }
 0x266   :  { %2254 = vrot.lane.b32.xlu0 %v8444_v3, %s9013_s15  ;;  %2256 = vrot.lane.b32.xlu1 %v8445_v49, %s9013_s15  ;;  %v8515_v3 = vld [vmem:[%s15853_s0 + $0x189] sm:$0xff] }
 0x267   :  { %v8578_v49 = vld [vmem:[%s15853_s0 + $0x182] sm:$0xff] }
 0x268   :  { %v2997_v4 = vpop.permute.xlu0 %2996  ;;  %v1845_v5 = vpop.permute.xlu1 %1844 }
 0x269   :  { %3181 = vst.msk [vmem:[#allocation2 + $0x40] sm:$0xff] %vm15898_vm8, %v2997_v4  ;;  %v8579_v4 = vld [vmem:[%s15853_s0 + $0x18a] sm:$0xff] }
 0x26a   :  { %2027 = vst.msk [vmem:[#allocation2 + $0x50] sm:$0xff] %vm15908_vm5, %v1845_v5  ;;  %2639 = vrot.lane.b32.xlu0 %v8508_v55, %s9014_s16  ;;  %1487 = vrot.lane.b32.xlu1 %v8508_v55, %s9011_s10 }
 0x26c   :  { %v2999_v0 = vpop.permute.xlu0 %2998  ;;  %v1847_v1 = vpop.permute.xlu1 %1846 }
 0x26d   :  { %3182 = vst.msk [vmem:[#allocation2 + $0x48] sm:$0xff] %vm15898_vm8, %v2999_v0  ;;  %v8452_v0 = vld [vmem:[%s15853_s0 + $0x198] sm:$0xff] }
 0x26e   :  { %2028 = vst.msk [vmem:[#allocation2 + $0x58] sm:$0xff] %vm15908_vm5, %v1847_v1  ;;  %2641 = vrot.lane.b32.xlu0 %v8509_v8, %s9014_s16  ;;  %3024 = vrot.lane.b32.xlu1 %v8572_v9, %s9015_s23  ;;  %v8453_v1 = vld [vmem:[%s15853_s0 + $0x1a0] sm:$0xff] }
 0x270   :  { %v2231_v34 = vpop.permute.xlu0 %2230  ;;  %v2233_v12 = vpop.permute.xlu1 %2232  ;;  %v3245_v36 = vld [vmem:[#allocation2 + $0x40] sm:$0xff] }
 0x271   :  { %2413 = vst.msk [vmem:[#allocation2 + $0x50] sm:$0xff] %vm15907_vm6, %v2231_v34  ;;  %2414 = vst.msk [vmem:[#allocation2 + $0x58] sm:$0xff] %vm15907_vm6, %v2233_v12  ;;  %8826 = vmatprep.mubr.msk.f32.mxu0 %vm15897_vm9, %v3245_v36 }
 0x272   :  { %1489 = vrot.lane.b32.xlu0 %v8509_v8, %s9011_s10  ;;  %1872 = vrot.lane.b32.xlu1 %v8572_v9, %s9012_s27 }
 0x274   :  { %v2616_v35 = vpop.permute.xlu0 %2615  ;;  %v2618_v37 = vpop.permute.xlu1 %2617  ;;  %v3246_v50 = vld [vmem:[#allocation2 + $0x48] sm:$0xff] }
 0x275   :  { %2798 = vst.msk [vmem:[#allocation2 + $0x50] sm:$0xff] %vm15906_vm7, %v2616_v35  ;;  %2799 = vst.msk [vmem:[#allocation2 + $0x58] sm:$0xff] %vm15906_vm7, %v2618_v37  ;;  %8827 = vmatmul.mubr.msk.f32.gmra.mrb[8].mxu0 %vm15897_vm9, %v3246_v50  ;;  %v8326_v35 = vld [vmem:[%s15853_s0 + $0x1c9] sm:$0xff] }
 0x276   :  { %3026 = vrot.lane.b32.xlu0 %v8573_v22, %s9015_s23  ;;  %1874 = vrot.lane.b32.xlu1 %v8573_v22, %s9012_s27  ;;  %v8516_v22 = vld [vmem:[%s15853_s0 + $0x199] sm:$0xff] }
 0x278   :  { %v3001_v59 = vpop.permute.xlu0 %3000  ;;  %v1849_v62 = vpop.permute.xlu1 %1848 }
 0x279   :  { %3183 = vst.msk [vmem:[#allocation2 + $0x50] sm:$0xff] %vm15898_vm8, %v3001_v59 }
 0x27a   :  { %2029 = vst.msk [vmem:[#allocation2 + $0x60] sm:$0xff] %vm15908_vm5, %v1849_v62  ;;  %2258 = vrot.lane.b32.xlu0 %v8446_v51, %s9013_s15  ;;  %2260 = vrot.lane.b32.xlu1 %v8447_v58, %s9013_s15  ;;  %v8517_v51 = vld [vmem:[%s15853_s0 + $0x1a1] sm:$0xff] }
 0x27b   :  { %v8580_v58 = vld [vmem:[%s15853_s0 + $0x19a] sm:$0xff] }
 0x27c   :  { %v3003_v14 = vpop.permute.xlu0 %3002  ;;  %v1851_v21 = vpop.permute.xlu1 %1850 }
 0x27d   :  { %3184 = vst.msk [vmem:[#allocation2 + $0x58] sm:$0xff] %vm15898_vm8, %v3003_v14  ;;  %v8390_v14 = vld [vmem:[%s15853_s0 + $0x1ca] sm:$0xff] }
 0x27e   :  { %2030 = vst.msk [vmem:[#allocation2 + $0x68] sm:$0xff] %vm15908_vm5, %v1851_v21  ;;  %2643 = vrot.lane.b32.xlu0 %v8510_v63, %s9014_s16  ;;  %1491 = vrot.lane.b32.xlu1 %v8510_v63, %s9011_s10  ;;  %v8327_v63 = vld [vmem:[%s15853_s0 + $0x1d1] sm:$0xff] }
 0x280   :  { %v2235_v41 = vpop.permute.xlu0 %2234  ;;  %v2237_v7 = vpop.permute.xlu1 %2236  ;;  %v3247_v15 = vld [vmem:[#allocation2 + $0x50] sm:$0xff] }
 0x281   :  { %2415 = vst.msk [vmem:[#allocation2 + $0x60] sm:$0xff] %vm15907_vm6, %v2235_v41  ;;  %2416 = vst.msk [vmem:[#allocation2 + $0x68] sm:$0xff] %vm15907_vm6, %v2237_v7  ;;  %8829 = vmatprep.mubr.msk.f32.mxu0 %vm15897_vm9, %v3247_v15  ;;  %v8581_v41 = vld [vmem:[%s15853_s0 + $0x1a2] sm:$0xff]  ;;  %v8391_v7 = vld [vmem:[%s15853_s0 + $0x1d2] sm:$0xff] }
 0x282   :  { %2645 = vrot.lane.b32.xlu0 %v8511_v40, %s9014_s16  ;;  %3028 = vrot.lane.b32.xlu1 %v8574_v6, %s9015_s23 }
 0x284   :  { %v2620_v16 = vpop.permute.xlu0 %2619  ;;  %v2622_v44 = vpop.permute.xlu1 %2621  ;;  %v3248_v45 = vld [vmem:[#allocation2 + $0x58] sm:$0xff] }
 0x285   :  { %2800 = vst.msk [vmem:[#allocation2 + $0x60] sm:$0xff] %vm15906_vm7, %v2620_v16  ;;  %2801 = vst.msk [vmem:[#allocation2 + $0x68] sm:$0xff] %vm15906_vm7, %v2622_v44  ;;  %8830 = vmatmul.mubr.msk.f32.gmra.mrb[10].mxu0 %vm15897_vm9, %v3248_v45  ;;  %v8454_v44 = vld [vmem:[%s15853_s0 + $0x1e0] sm:$0xff]  ;;  %v8455_v45 = vld [vmem:[%s15853_s0 + $0x1e8] sm:$0xff] }
 0x286   :  { %1493 = vrot.lane.b32.xlu0 %v8511_v40, %s9011_s10  ;;  %1876 = vrot.lane.b32.xlu1 %v8574_v6, %s9012_s27 }
 0x288   :  { %v3005_v29 = vpop.permute.xlu0 %3004  ;;  %v1853_v60 = vpop.permute.xlu1 %1852 }
 0x289   :  { %3185 = vst.msk [vmem:[#allocation2 + $0x60] sm:$0xff] %vm15898_vm8, %v3005_v29 }
 0x28a   :  { %2031 = vst.msk [vmem:[#allocation2 + $0x70] sm:$0xff] %vm15908_vm5, %v1853_v60  ;;  %3030 = vrot.lane.b32.xlu0 %v8575_v28, %s9015_s23  ;;  %1878 = vrot.lane.b32.xlu1 %v8575_v28, %s9012_s27 }
 0x28c   :  { %v3007_v47 = vpop.permute.xlu0 %3006  ;;  %v1855_v11 = vpop.permute.xlu1 %1854 }
 0x28d   :  { %3186 = vst.msk [vmem:[#allocation2 + $0x68] sm:$0xff] %vm15898_vm8, %v3007_v47 }
 0x28e   :  { %2032 = vst.msk [vmem:[#allocation2 + $0x78] sm:$0xff] %vm15908_vm5, %v1855_v11  ;;  %2262 = vrot.lane.b32.xlu0 %v8448_v61, %s9013_s15  ;;  %2264 = vrot.lane.b32.xlu1 %v8449_v46, %s9013_s15  ;;  %v8518_v61 = vld [vmem:[%s15853_s0 + $0x1e1] sm:$0xff]  ;;  %v8519_v11 = vld [vmem:[%s15853_s0 + $0x1e9] sm:$0xff] }
 0x290   :  { %v2239_v13 = vpop.permute.xlu0 %2238  ;;  %v2241_v17 = vpop.permute.xlu1 %2240  ;;  %v3249_v18 = vld [vmem:[#allocation2 + $0x60] sm:$0xff] }
 0x291   :  { %2417 = vst.msk [vmem:[#allocation2 + $0x70] sm:$0xff] %vm15907_vm6, %v2239_v13  ;;  %2418 = vst.msk [vmem:[#allocation2 + $0x78] sm:$0xff] %vm15907_vm6, %v2241_v17  ;;  %8832 = vmatprep.mubr.msk.f32.mxu0 %vm15897_vm9, %v3249_v18 }
 0x292   :  { %2647 = vrot.lane.b32.xlu0 %v8512_v54, %s9014_s16  ;;  %1495 = vrot.lane.b32.xlu1 %v8512_v54, %s9011_s10  ;;  %v8582_v54 = vld [vmem:[%s15853_s0 + $0x1e2] sm:$0xff] }
 0x294   :  { %v2624_v23 = vpop.permute.xlu0 %2623  ;;  %v2626_v24 = vpop.permute.xlu1 %2625  ;;  %v3250_v25 = vld [vmem:[#allocation2 + $0x68] sm:$0xff] }
 0x295   :  { %2802 = vst.msk [vmem:[#allocation2 + $0x70] sm:$0xff] %vm15906_vm7, %v2624_v23  ;;  %2803 = vst.msk [vmem:[#allocation2 + $0x78] sm:$0xff] %vm15906_vm7, %v2626_v24  ;;  %8833 = vmatmul.mubr.msk.f32.gmra.mrb[12].mxu0 %vm15897_vm9, %v3250_v25  ;;  %v8583_v23 = vld [vmem:[%s15853_s0 + $0x1ea] sm:$0xff] }
 0x296   :  { %2649 = vrot.lane.b32.xlu0 %v8513_v19, %s9014_s16  ;;  %3032 = vrot.lane.b32.xlu1 %v8576_v20, %s9015_s23 }
 0x298   :  { %v3009_v52 = vpop.permute.xlu0 %3008  ;;  %v1857_v26 = vpop.permute.xlu1 %1856 }
 0x299   :  { %3187 = vst.msk [vmem:[#allocation2 + $0x70] sm:$0xff] %vm15898_vm8, %v3009_v52  ;;  %v8456_v52 = vld [vmem:[%s15853_s0 + $0x1f8] sm:$0xff] }
 0x29a   :  { %2033 = vst.msk [vmem:[#allocation2 + $0x80] sm:$0xff] %vm15908_vm5, %v1857_v26  ;;  %1497 = vrot.lane.b32.xlu0 %v8513_v19, %s9011_s10  ;;  %1880 = vrot.lane.b32.xlu1 %v8576_v20, %s9012_s27  ;;  %v8457_v26 = vld [vmem:[%s15853_s0 + $0x200] sm:$0xff] }
 0x29c   :  { %v3011_v27 = vpop.permute.xlu0 %3010  ;;  %v1859_v32 = vpop.permute.xlu1 %1858 }
 0x29d   :  { %3188 = vst.msk [vmem:[#allocation2 + $0x78] sm:$0xff] %vm15898_vm8, %v3011_v27 }
 0x29e   :  { %2034 = vst.msk [vmem:[#allocation2 + $0x88] sm:$0xff] %vm15908_vm5, %v1859_v32  ;;  %3034 = vrot.lane.b32.xlu0 %v8577_v53, %s9015_s23  ;;  %1882 = vrot.lane.b32.xlu1 %v8577_v53, %s9012_s27 }
 0x2a0   :  { %v2243_v39 = vpop.permute.xlu0 %2242  ;;  %v2245_v42 = vpop.permute.xlu1 %2244  ;;  %v3251_v43 = vld [vmem:[#allocation2 + $0x70] sm:$0xff] }
 0x2a1   :  { %2419 = vst.msk [vmem:[#allocation2 + $0x80] sm:$0xff] %vm15907_vm6, %v2243_v39  ;;  %2420 = vst.msk [vmem:[#allocation2 + $0x88] sm:$0xff] %vm15907_vm6, %v2245_v42  ;;  %8835 = vmatprep.mubr.msk.f32.mxu0 %vm15897_vm9, %v3251_v43  ;;  %v8521_v42 = vld [vmem:[%s15853_s0 + $0x201] sm:$0xff] }
 0x2a2   :  { %2266 = vrot.lane.b32.xlu0 %v8450_v33, %s9013_s15  ;;  %2268 = vrot.lane.b32.xlu1 %v8451_v38, %s9013_s15  ;;  %v8520_v33 = vld [vmem:[%s15853_s0 + $0x1f9] sm:$0xff] }
 0x2a3   :  { %v8584_v43 = vld [vmem:[%s15853_s0 + $0x1fa] sm:$0xff] }
 0x2a4   :  { %v2628_v48 = vpop.permute.xlu0 %2627  ;;  %v2630_v2 = vpop.permute.xlu1 %2629  ;;  %v3252_v31 = vld [vmem:[#allocation2 + $0x78] sm:$0xff] }
 0x2a5   :  { %2804 = vst.msk [vmem:[#allocation2 + $0x80] sm:$0xff] %vm15906_vm7, %v2628_v48  ;;  %2805 = vst.msk [vmem:[#allocation2 + $0x88] sm:$0xff] %vm15906_vm7, %v2630_v2  ;;  %8836 = vmatmul.mubr.msk.f32.gmra.mrb[14].mxu0 %vm15897_vm9, %v3252_v31 }
 0x2a6   :  { %2651 = vrot.lane.b32.xlu0 %v8514_v30, %s9014_s16  ;;  %1499 = vrot.lane.b32.xlu1 %v8514_v30, %s9011_s10 }
 0x2a8   :  { %v3013_v56 = vpop.permute.xlu0 %3012  ;;  %v1861_v57 = vpop.permute.xlu1 %1860 }
 0x2a9   :  { %3189 = vst.msk [vmem:[#allocation2 + $0x80] sm:$0xff] %vm15898_vm8, %v3013_v56 }
 0x2aa   :  { %2035 = vst.msk [vmem:[#allocation2 + $0x90] sm:$0xff] %vm15908_vm5, %v1861_v57  ;;  %2653 = vrot.lane.b32.xlu0 %v8515_v3, %s9014_s16  ;;  %3036 = vrot.lane.b32.xlu1 %v8578_v49, %s9015_s23 }
 0x2ac   :  { %v3015_v10 = vpop.permute.xlu0 %3014  ;;  %v1863_v55 = vpop.permute.xlu1 %1862 }
 0x2ad   :  { %3190 = vst.msk [vmem:[#allocation2 + $0x88] sm:$0xff] %vm15898_vm8, %v3015_v10  ;;  %v8458_v10 = vld [vmem:[%s15853_s0 + $0x210] sm:$0xff] }
 0x2ae   :  { %2036 = vst.msk [vmem:[#allocation2 + $0x98] sm:$0xff] %vm15908_vm5, %v1863_v55  ;;  %1501 = vrot.lane.b32.xlu0 %v8515_v3, %s9011_s10  ;;  %1884 = vrot.lane.b32.xlu1 %v8578_v49, %s9012_s27  ;;  %v8585_v49 = vld [vmem:[%s15853_s0 + $0x202] sm:$0xff]  ;;  %v8459_v55 = vld [vmem:[%s15853_s0 + $0x218] sm:$0xff] }
 0x2b0   :  { %v2247_v5 = vpop.permute.xlu0 %2246  ;;  %v2249_v8 = vpop.permute.xlu1 %2248  ;;  %v3253_v9 = vld [vmem:[#allocation2 + $0x80] sm:$0xff] }
 0x2b1   :  { %2421 = vst.msk [vmem:[#allocation2 + $0x90] sm:$0xff] %vm15907_vm6, %v2247_v5  ;;  %2422 = vst.msk [vmem:[#allocation2 + $0x98] sm:$0xff] %vm15907_vm6, %v2249_v8  ;;  %8838 = vmatprep.mubr.msk.f32.mxu0 %vm15897_vm9, %v3253_v9  ;;  %v8522_v9 = vld [vmem:[%s15853_s0 + $0x211] sm:$0xff] }
 0x2b2   :  { %3038 = vrot.lane.b32.xlu0 %v8579_v4, %s9015_s23  ;;  %1886 = vrot.lane.b32.xlu1 %v8579_v4, %s9012_s27 }
 0x2b4   :  { %v2632_v34 = vpop.permute.xlu0 %2631  ;;  %v1480_v12 = vpop.permute.xlu1 %1479  ;;  %v3254_v36 = vld [vmem:[#allocation2 + $0x88] sm:$0xff] }
 0x2b5   :  { %2806 = vst.msk [vmem:[#allocation2 + $0x90] sm:$0xff] %vm15906_vm7, %v2632_v34  ;;  %8839 = vmatmul.mubr.msk.f32.gmra.mrb[16].mxu0 %vm15897_vm9, %v3254_v36  ;;  %v8523_v34 = vld [vmem:[%s15853_s0 + $0x219] sm:$0xff] }
 0x2b6   :  { %1652 = vst.msk [vmem:[#allocation2 + $0xa0] sm:$0xff] %vm15909_vm4, %v1480_v12  ;;  %2270 = vrot.lane.b32.xlu0 %v8452_v0, %s9013_s15  ;;  %2272 = vrot.lane.b32.xlu1 %v8453_v1, %s9013_s15  ;;  %v8586_v12 = vld [vmem:[%s15853_s0 + $0x212] sm:$0xff] }
 0x2b8   :  { %v2634_v37 = vpop.permute.xlu0 %2633  ;;  %v3017_v50 = vpop.permute.xlu1 %3016 }
 0x2b9   :  { %2807 = vst.msk [vmem:[#allocation2 + $0x98] sm:$0xff] %vm15906_vm7, %v2634_v37 }
 0x2ba   :  { %3191 = vst.msk [vmem:[#allocation2 + $0x90] sm:$0xff] %vm15898_vm8, %v3017_v50  ;;  %2655 = vrot.lane.b32.xlu0 %v8516_v22, %s9014_s16  ;;  %1503 = vrot.lane.b32.xlu1 %v8326_v35, %s9011_s10 }
 0x2bc   :  { %v1482_v59 = vpop.permute.xlu0 %1481  ;;  %v1865_v62 = vpop.permute.xlu1 %1864 }
 0x2bd   :  { %1653 = vst.msk [vmem:[#allocation2 + $0xa8] sm:$0xff] %vm15909_vm4, %v1482_v59 }
 0x2be   :  { %2037 = vst.msk [vmem:[#allocation2 + $0xa0] sm:$0xff] %vm15908_vm5, %v1865_v62  ;;  %2657 = vrot.lane.b32.xlu0 %v8517_v51, %s9014_s16  ;;  %3040 = vrot.lane.b32.xlu1 %v8580_v58, %s9015_s23  ;;  %v8587_v51 = vld [vmem:[%s15853_s0 + $0x21a] sm:$0xff]  ;;  %v8460_v62 = vld [vmem:[%s15853_s0 + $0x228] sm:$0xff] }
 0x2c0   :  { %v3019_v21 = vpop.permute.xlu0 %3018  ;;  %v1867_v40 = vpop.permute.xlu1 %1866 }
 0x2c1   :  { %v3255_v6 = vld [vmem:[#allocation2 + $0x90] sm:$0xff]  ;;  %3192 = vst.msk [vmem:[#allocation2 + $0x98] sm:$0xff] %vm15898_vm8, %v3019_v21 }
 0x2c2   :  { %2038 = vst.msk [vmem:[#allocation2 + $0xa8] sm:$0xff] %vm15908_vm5, %v1867_v40  ;;  %8841 = vmatprep.mubr.msk.f32.mxu0 %vm15897_vm9, %v3255_v6  ;;  %1505 = vrot.lane.b32.xlu0 %v8327_v63, %s9011_s10  ;;  %v8461_v63 = vld [vmem:[%s15853_s0 + $0x230] sm:$0xff] }
 0x2c3   :  { %1888 = vrot.lane.b32.xlu1 %v8390_v14, %s9012_s27  ;;  %v8524_v6 = vld [vmem:[%s15853_s0 + $0x229] sm:$0xff] }
 0x2c4   :  { %v2251_v15 = vpop.permute.xlu0 %2250  ;;  %v2253_v16 = vpop.permute.xlu1 %2252 }
 0x2c5   :  { %2423 = vst.msk [vmem:[#allocation2 + $0xa0] sm:$0xff] %vm15907_vm6, %v2251_v15  ;;  %2424 = vst.msk [vmem:[#allocation2 + $0xa8] sm:$0xff] %vm15907_vm6, %v2253_v16 }
 0x2c6   :  { %3042 = vrot.lane.b32.xlu0 %v8581_v41, %s9015_s23 }
 0x2c7   :  { %1890 = vrot.lane.b32.xlu1 %v8391_v7, %s9012_s27 }
 0x2c8   :  { %v2636_v28 = vpop.permute.xlu0 %2635  ;;  %v1484_v29 = vpop.permute.xlu1 %1483  ;;  %v3256_v60 = vld [vmem:[#allocation2 + $0x98] sm:$0xff] }
 0x2c9   :  { %2808 = vst.msk [vmem:[#allocation2 + $0xa0] sm:$0xff] %vm15906_vm7, %v2636_v28  ;;  %8842 = vmatmul.mubr.msk.f32.gmra.mrb[18].mxu0 %vm15897_vm9, %v3256_v60 }
 0x2ca   :  { %1654 = vst.msk [vmem:[#allocation2 + $0xb0] sm:$0xff] %vm15909_vm4, %v1484_v29  ;;  %2274 = vrot.lane.b32.xlu0 %v8454_v44, %s9013_s15  ;;  %v8525_v44 = vld [vmem:[%s15853_s0 + $0x231] sm:$0xff] }
 0x2cb   :  { %2276 = vrot.lane.b32.xlu1 %v8455_v45, %s9013_s15  ;;  %v8588_v45 = vld [vmem:[%s15853_s0 + $0x22a] sm:$0xff] }
 0x2cc   :  { %v2638_v46 = vpop.permute.xlu0 %2637  ;;  %v3021_v47 = vpop.permute.xlu1 %3020 }
 0x2cd   :  { %2809 = vst.msk [vmem:[#allocation2 + $0xa8] sm:$0xff] %vm15906_vm7, %v2638_v46 }
 0x2ce   :  { %3193 = vst.msk [vmem:[#allocation2 + $0xa0] sm:$0xff] %vm15898_vm8, %v3021_v47  ;;  %2659 = vrot.lane.b32.xlu0 %v8518_v61, %s9014_s16  ;;  %v8589_v47 = vld [vmem:[%s15853_s0 + $0x232] sm:$0xff] }
 0x2cf   :  { %1507 = vrot.lane.b32.xlu1 %v8518_v61, %s9011_s10 }
 0x2d0   :  { %v1486_v13 = vpop.permute.xlu0 %1485  ;;  %v1869_v17 = vpop.permute.xlu1 %1868 }
 0x2d1   :  { %1655 = vst.msk [vmem:[#allocation2 + $0xb8] sm:$0xff] %vm15909_vm4, %v1486_v13  ;;  %v8462_v13 = vld [vmem:[%s15853_s0 + $0x240] sm:$0xff] }
 0x2d2   :  { %2039 = vst.msk [vmem:[#allocation2 + $0xb0] sm:$0xff] %vm15908_vm5, %v1869_v17  ;;  %2661 = vrot.lane.b32.xlu0 %v8519_v11, %s9014_s16 }
 0x2d3   :  { %3044 = vrot.lane.b32.xlu1 %v8582_v54, %s9015_s23 }
 0x2d4   :  { %v3023_v18 = vpop.permute.xlu0 %3022  ;;  %v1871_v19 = vpop.permute.xlu1 %1870 }
 0x2d5   :  { %v3257_v20 = vld [vmem:[#allocation2 + $0xa0] sm:$0xff]  ;;  %3194 = vst.msk [vmem:[#allocation2 + $0xa8] sm:$0xff] %vm15898_vm8, %v3023_v18 }
 0x2d6   :  { %2040 = vst.msk [vmem:[#allocation2 + $0xb8] sm:$0xff] %vm15908_vm5, %v1871_v19  ;;  %8844 = vmatprep.mubr.msk.f32.mxu0 %vm15897_vm9, %v3257_v20  ;;  %1509 = vrot.lane.b32.xlu0 %v8519_v11, %s9011_s10  ;;  %v8463_v20 = vld [vmem:[%s15853_s0 + $0x248] sm:$0xff] }
 0x2d7   :  { %1892 = vrot.lane.b32.xlu1 %v8582_v54, %s9012_s27 }
 0x2d8   :  { %v2255_v24 = vpop.permute.xlu0 %2254  ;;  %v2257_v25 = vpop.permute.xlu1 %2256 }
 0x2d9   :  { %2425 = vst.msk [vmem:[#allocation2 + $0xb0] sm:$0xff] %vm15907_vm6, %v2255_v24  ;;  %2426 = vst.msk [vmem:[#allocation2 + $0xb8] sm:$0xff] %vm15907_vm6, %v2257_v25  ;;  %v8526_v25 = vld [vmem:[%s15853_s0 + $0x241] sm:$0xff] }
 0x2da   :  { %3046 = vrot.lane.b32.xlu0 %v8583_v23, %s9015_s23 }
 0x2db   :  { %1894 = vrot.lane.b32.xlu1 %v8583_v23, %s9012_s27 }
 0x2dc   :  { %v2640_v53 = vpop.permute.xlu0 %2639  ;;  %v1488_v27 = vpop.permute.xlu1 %1487  ;;  %v3258_v32 = vld [vmem:[#allocation2 + $0xa8] sm:$0xff] }
 0x2dd   :  { %2810 = vst.msk [vmem:[#allocation2 + $0xb0] sm:$0xff] %vm15906_vm7, %v2640_v53  ;;  %8845 = vmatmul.mubr.msk.f32.gmra.mrb[20].mxu0 %vm15897_vm9, %v3258_v32  ;;  %v8527_v53 = vld [vmem:[%s15853_s0 + $0x249] sm:$0xff] }
 0x2de   :  { %1656 = vst.msk [vmem:[#allocation2 + $0xc0] sm:$0xff] %vm15909_vm4, %v1488_v27  ;;  %2278 = vrot.lane.b32.xlu0 %v8456_v52, %s9013_s15  ;;  %v8590_v32 = vld [vmem:[%s15853_s0 + $0x242] sm:$0xff] }
 0x2df   :  { %2280 = vrot.lane.b32.xlu1 %v8457_v26, %s9013_s15 }
 0x2e0   :  { %v2642_v38 = vpop.permute.xlu0 %2641  ;;  %v3025_v39 = vpop.permute.xlu1 %3024 }
 0x2e1   :  { %2811 = vst.msk [vmem:[#allocation2 + $0xb8] sm:$0xff] %vm15906_vm7, %v2642_v38 }
 0x2e2   :  { %3195 = vst.msk [vmem:[#allocation2 + $0xb0] sm:$0xff] %vm15898_vm8, %v3025_v39  ;;  %2663 = vrot.lane.b32.xlu0 %v8520_v33, %s9014_s16 }
 0x2e3   :  { %1511 = vrot.lane.b32.xlu1 %v8520_v33, %s9011_s10 }
 0x2e4   :  { %v1490_v30 = vpop.permute.xlu0 %1489  ;;  %v1873_v48 = vpop.permute.xlu1 %1872 }
 0x2e5   :  { %1657 = vst.msk [vmem:[#allocation2 + $0xc8] sm:$0xff] %vm15909_vm4, %v1490_v30 }
 0x2e6   :  { %2041 = vst.msk [vmem:[#allocation2 + $0xc0] sm:$0xff] %vm15908_vm5, %v1873_v48  ;;  %2665 = vrot.lane.b32.xlu0 %v8521_v42, %s9014_s16 }
 0x2e7   :  { %3048 = vrot.lane.b32.xlu1 %v8584_v43, %s9015_s23 }
 0x2e8   :  { %v3027_v2 = vpop.permute.xlu0 %3026  ;;  %v1875_v31 = vpop.permute.xlu1 %1874 }
 0x2e9   :  { %v3259_v3 = vld [vmem:[#allocation2 + $0xb0] sm:$0xff]  ;;  %3196 = vst.msk [vmem:[#allocation2 + $0xb8] sm:$0xff] %vm15898_vm8, %v3027_v2 }
 0x2ea   :  { %2042 = vst.msk [vmem:[#allocation2 + $0xc8] sm:$0xff] %vm15908_vm5, %v1875_v31  ;;  %8847 = vmatprep.mubr.msk.f32.mxu0 %vm15897_vm9, %v3259_v3  ;;  %1513 = vrot.lane.b32.xlu0 %v8521_v42, %s9011_s10  ;;  %v8464_v3 = vld [vmem:[%s15853_s0 + $0x258] sm:$0xff] }
 0x2eb   :  { %1896 = vrot.lane.b32.xlu1 %v8584_v43, %s9012_s27  ;;  %v8591_v43 = vld [vmem:[%s15853_s0 + $0x24a] sm:$0xff] }
 0x2ec   :  { %v2259_v56 = vpop.permute.xlu0 %2258  ;;  %v2261_v57 = vpop.permute.xlu1 %2260 }
 0x2ed   :  { %2427 = vst.msk [vmem:[#allocation2 + $0xc0] sm:$0xff] %vm15907_vm6, %v2259_v56  ;;  %2428 = vst.msk [vmem:[#allocation2 + $0xc8] sm:$0xff] %vm15907_vm6, %v2261_v57  ;;  %v8465_v57 = vld [vmem:[%s15853_s0 + $0x260] sm:$0xff] }
 0x2ee   :  { %3050 = vrot.lane.b32.xlu0 %v8585_v49, %s9015_s23 }
 0x2ef   :  { %1898 = vrot.lane.b32.xlu1 %v8585_v49, %s9012_s27 }
 0x2f0   :  { %v2644_v4 = vpop.permute.xlu0 %2643  ;;  %v1492_v5 = vpop.permute.xlu1 %1491  ;;  %v3260_v8 = vld [vmem:[#allocation2 + $0xb8] sm:$0xff] }
 0x2f1   :  { %2812 = vst.msk [vmem:[#allocation2 + $0xc0] sm:$0xff] %vm15906_vm7, %v2644_v4  ;;  %8848 = vmatmul.mubr.msk.f32.gmra.mrb[22].mxu0 %vm15897_vm9, %v3260_v8  ;;  %v8529_v8 = vld [vmem:[%s15853_s0 + $0x261] sm:$0xff] }
 0x2f2   :  { %1658 = vst.msk [vmem:[#allocation2 + $0xd0] sm:$0xff] %vm15909_vm4, %v1492_v5  ;;  %2282 = vrot.lane.b32.xlu0 %v8458_v10, %s9013_s15 }
 0x2f3   :  { %2284 = vrot.lane.b32.xlu1 %v8459_v55, %s9013_s15  ;;  %v8528_v55 = vld [vmem:[%s15853_s0 + $0x259] sm:$0xff] }
 0x2f4   :  { %v2646_v0 = vpop.permute.xlu0 %2645  ;;  %v3029_v1 = vpop.permute.xlu1 %3028 }
 0x2f5   :  { %2813 = vst.msk [vmem:[#allocation2 + $0xc8] sm:$0xff] %vm15906_vm7, %v2646_v0  ;;  %v8592_v0 = vld [vmem:[%s15853_s0 + $0x25a] sm:$0xff] }
 0x2f6   :  { %3197 = vst.msk [vmem:[#allocation2 + $0xc0] sm:$0xff] %vm15898_vm8, %v3029_v1  ;;  %2667 = vrot.lane.b32.xlu0 %v8522_v9, %s9014_s16 }
 0x2f7   :  { %1515 = vrot.lane.b32.xlu1 %v8522_v9, %s9011_s10 }
 0x2f8   :  { %v1494_v36 = vpop.permute.xlu0 %1493  ;;  %v1877_v22 = vpop.permute.xlu1 %1876 }
 0x2f9   :  { %1659 = vst.msk [vmem:[#allocation2 + $0xd8] sm:$0xff] %vm15909_vm4, %v1494_v36 }
 0x2fa   :  { %2043 = vst.msk [vmem:[#allocation2 + $0xd0] sm:$0xff] %vm15908_vm5, %v1877_v22  ;;  %2669 = vrot.lane.b32.xlu0 %v8523_v34, %s9014_s16 }
 0x2fb   :  { %3052 = vrot.lane.b32.xlu1 %v8586_v12, %s9015_s23 }
 0x2fc   :  { %v3031_v35 = vpop.permute.xlu0 %3030  ;;  %v1879_v37 = vpop.permute.xlu1 %1878 }
 0x2fd   :  { %v3261_v50 = vld [vmem:[#allocation2 + $0xc0] sm:$0xff]  ;;  %3198 = vst.msk [vmem:[#allocation2 + $0xc8] sm:$0xff] %vm15898_vm8, %v3031_v35 }
 0x2fe   :  { %2044 = vst.msk [vmem:[#allocation2 + $0xd8] sm:$0xff] %vm15908_vm5, %v1879_v37  ;;  %8850 = vmatprep.mubr.msk.f32.mxu0 %vm15897_vm9, %v3261_v50  ;;  %1517 = vrot.lane.b32.xlu0 %v8523_v34, %s9011_s10  ;;  %v8593_v37 = vld [vmem:[%s15853_s0 + $0x262] sm:$0xff] }
 0x2ff   :  { %1900 = vrot.lane.b32.xlu1 %v8586_v12, %s9012_s27 }
 0x300   :  { %v2263_v58 = vpop.permute.xlu0 %2262  ;;  %v2265_v59 = vpop.permute.xlu1 %2264 }
 0x301   :  { %2429 = vst.msk [vmem:[#allocation2 + $0xd0] sm:$0xff] %vm15907_vm6, %v2263_v58  ;;  %2430 = vst.msk [vmem:[#allocation2 + $0xd8] sm:$0xff] %vm15907_vm6, %v2265_v59  ;;  %v8466_v58 = vld [vmem:[%s15853_s0 + $0x270] sm:$0xff] }
 0x302   :  { %3054 = vrot.lane.b32.xlu0 %v8587_v51, %s9015_s23 }
 0x303   :  { %1902 = vrot.lane.b32.xlu1 %v8587_v51, %s9012_s27 }
 0x304   :  { %v2648_v14 = vpop.permute.xlu0 %2647  ;;  %v1496_v21 = vpop.permute.xlu1 %1495  ;;  %v3262_v40 = vld [vmem:[#allocation2 + $0xc8] sm:$0xff] }
 0x305   :  { %2814 = vst.msk [vmem:[#allocation2 + $0xd0] sm:$0xff] %vm15906_vm7, %v2648_v14  ;;  %8851 = vmatmul.mubr.msk.f32.gmra.mrb[24].mxu0 %vm15897_vm9, %v3262_v40 }
 0x306   :  { %1660 = vst.msk [vmem:[#allocation2 + $0xe0] sm:$0xff] %vm15909_vm4, %v1496_v21  ;;  %2286 = vrot.lane.b32.xlu0 %v8460_v62, %s9013_s15  ;;  %v8530_v21 = vld [vmem:[%s15853_s0 + $0x271] sm:$0xff] }
 0x307   :  { %2288 = vrot.lane.b32.xlu1 %v8461_v63, %s9013_s15  ;;  %v8467_v63 = vld [vmem:[%s15853_s0 + $0x278] sm:$0xff] }
 0x308   :  { %v2650_v41 = vpop.permute.xlu0 %2649  ;;  %v8816_v7 = vpop.f32.mrb[0].mxu0 }
 0x309   :  { %2815 = vst.msk [vmem:[#allocation2 + $0xd8] sm:$0xff] %vm15906_vm7, %v2650_v41  ;;  %v3033_v15 = vpop.permute.xlu1 %3032  ;;  %v3569_v16 = vpop.f32.mrb[1].mxu0  ;;  %v8531_v41 = vld [vmem:[%s15853_s0 + $0x279] sm:$0xff] }
 0x30a   :  { %3889 = vst.msk [vmem:[#allocation3 + $0x8] sm:$0xff] %vm15931_vm0, %v8816_v7  ;;  %3888 = vst.msk [vmem:[#allocation3] sm:$0xff] %vm15931_vm0, %v3569_v16  ;;  %2671 = vrot.lane.b32.xlu0 %v8524_v6, %s9014_s16  ;;  %v8594_v16 = vld [vmem:[%s15853_s0 + $0x272] sm:$0xff] }
 0x30b   :  { %3199 = vst.msk [vmem:[#allocation2 + $0xd0] sm:$0xff] %vm15898_vm8, %v3033_v15  ;;  %1519 = vrot.lane.b32.xlu1 %v8524_v6, %s9011_s10 }
 0x30c   :  { %v1498_v28 = vpop.permute.xlu0 %1497 }
 0x30d   :  { %1661 = vst.msk [vmem:[#allocation2 + $0xe8] sm:$0xff] %vm15909_vm4, %v1498_v28  ;;  %v1881_v29 = vpop.permute.xlu1 %1880 }
 0x30e   :  { %2045 = vst.msk [vmem:[#allocation2 + $0xe0] sm:$0xff] %vm15908_vm5, %v1881_v29  ;;  %2673 = vrot.lane.b32.xlu0 %v8525_v44, %s9014_s16 }
 0x30f   :  { %3056 = vrot.lane.b32.xlu1 %v8588_v45, %s9015_s23 }
 0x310   :  { %v3035_v60 = vpop.permute.xlu0 %3034 }
 0x311   :  { %3200 = vst.msk [vmem:[#allocation2 + $0xd8] sm:$0xff] %vm15898_vm8, %v3035_v60  ;;  %v1883_v61 = vpop.permute.xlu1 %1882 }
 0x312   :  { %v3263_v46 = vld [vmem:[#allocation2 + $0xd0] sm:$0xff]  ;;  %2046 = vst.msk [vmem:[#allocation2 + $0xe8] sm:$0xff] %vm15908_vm5, %v1883_v61  ;;  %1521 = vrot.lane.b32.xlu0 %v8525_v44, %s9011_s10  ;;  %v8595_v61 = vld [vmem:[%s15853_s0 + $0x27a] sm:$0xff] }
 0x313   :  { %8853 = vmatprep.mubr.msk.f32.mxu0 %vm15897_vm9, %v3263_v46  ;;  %1904 = vrot.lane.b32.xlu1 %v8588_v45, %s9012_s27 }
 0x314   :  { %v2267_v11 = vpop.permute.xlu0 %2266 }
 0x315   :  { %2431 = vst.msk [vmem:[#allocation2 + $0xe0] sm:$0xff] %vm15907_vm6, %v2267_v11  ;;  %v2269_v54 = vpop.permute.xlu1 %2268  ;;  %v8468_v11 = vld [vmem:[%s15853_s0 + $0x288] sm:$0xff] }
 0x316   :  { %2432 = vst.msk [vmem:[#allocation2 + $0xe8] sm:$0xff] %vm15907_vm6, %v2269_v54  ;;  %3058 = vrot.lane.b32.xlu0 %v8589_v47, %s9015_s23 }
 0x317   :  { %1906 = vrot.lane.b32.xlu1 %v8589_v47, %s9012_s27 }
 0x318   :  { %v2652_v17 = vpop.permute.xlu0 %2651  ;;  %v8819_v18 = vpop.f32.mrb[2].mxu0  ;;  %v3264_v19 = vld [vmem:[#allocation2 + $0xd8] sm:$0xff] }
 0x319   :  { %2816 = vst.msk [vmem:[#allocation2 + $0xe0] sm:$0xff] %vm15906_vm7, %v2652_v17  ;;  %v1500_v23 = vpop.permute.xlu1 %1499  ;;  %v3579_v24 = vpop.f32.mrb[3].mxu0  ;;  %8854 = vmatmul.mubr.msk.f32.gmra.mrb[26].mxu0 %vm15897_vm9, %v3264_v19  ;;  %v8469_v17 = vld [vmem:[%s15853_s0 + $0x290] sm:$0xff] }
 0x31a   :  { %3891 = vst.msk [vmem:[#allocation3 + $0x18] sm:$0xff] %vm15931_vm0, %v8819_v18  ;;  %3890 = vst.msk [vmem:[#allocation3 + $0x10] sm:$0xff] %vm15931_vm0, %v3579_v24  ;;  %2290 = vrot.lane.b32.xlu0 %v8462_v13, %s9013_s15  ;;  %v8532_v19 = vld [vmem:[%s15853_s0 + $0x289] sm:$0xff] }
 0x31b   :  { %1662 = vst.msk [vmem:[#allocation2 + $0xf0] sm:$0xff] %vm15909_vm4, %v1500_v23  ;;  %2292 = vrot.lane.b32.xlu1 %v8463_v20, %s9013_s15 }
 0x31c   :  { %v2654_v52 = vpop.permute.xlu0 %2653 }
 0x31d   :  { %2817 = vst.msk [vmem:[#allocation2 + $0xe8] sm:$0xff] %vm15906_vm7, %v2654_v52  ;;  %v3037_v26 = vpop.permute.xlu1 %3036  ;;  %v8533_v52 = vld [vmem:[%s15853_s0 + $0x291] sm:$0xff] }
 0x31e   :  { %3201 = vst.msk [vmem:[#allocation2 + $0xe0] sm:$0xff] %vm15898_vm8, %v3037_v26  ;;  %2675 = vrot.lane.b32.xlu0 %v8526_v25, %s9014_s16 }
 0x31f   :  { %1523 = vrot.lane.b32.xlu1 %v8526_v25, %s9011_s10 }
 0x320   :  { %v1502_v27 = vpop.permute.xlu0 %1501 }
 0x321   :  { %1663 = vst.msk [vmem:[#allocation2 + $0xf8] sm:$0xff] %vm15909_vm4, %v1502_v27  ;;  %v1885_v33 = vpop.permute.xlu1 %1884 }
 0x322   :  { %2047 = vst.msk [vmem:[#allocation2 + $0xf0] sm:$0xff] %vm15908_vm5, %v1885_v33  ;;  %2677 = vrot.lane.b32.xlu0 %v8527_v53, %s9014_s16 }
 0x323   :  { %3060 = vrot.lane.b32.xlu1 %v8590_v32, %s9015_s23 }
 0x324   :  { %v3039_v38 = vpop.permute.xlu0 %3038 }
 0x325   :  { %3202 = vst.msk [vmem:[#allocation2 + $0xe8] sm:$0xff] %vm15898_vm8, %v3039_v38  ;;  %v1887_v39 = vpop.permute.xlu1 %1886  ;;  %v3265_v42 = vld [vmem:[#allocation2 + $0xe0] sm:$0xff] }
 0x326   :  { %2048 = vst.msk [vmem:[#allocation2 + $0xf8] sm:$0xff] %vm15908_vm5, %v1887_v39  ;;  %1525 = vrot.lane.b32.xlu0 %v8527_v53, %s9011_s10  ;;  %8856 = vmatprep.mubr.msk.f32.mxu0 %vm15897_vm9, %v3265_v42  ;;  %v8596_v53 = vld [vmem:[%s15853_s0 + $0x28a] sm:$0xff]  ;;  %v8597_v39 = vld [vmem:[%s15853_s0 + $0x292] sm:$0xff] }
 0x327   :  { %1908 = vrot.lane.b32.xlu1 %v8590_v32, %s9012_s27 }
 0x328   :  { %v2271_v30 = vpop.permute.xlu0 %2270  ;;  %v8822_v48 = vpop.f32.mrb[4].mxu0 }
 0x329   :  { %2433 = vst.msk [vmem:[#allocation2 + $0xf0] sm:$0xff] %vm15907_vm6, %v2271_v30  ;;  %v2273_v2 = vpop.permute.xlu1 %2272  ;;  %v3589_v31 = vpop.f32.mrb[5].mxu0  ;;  %v8470_v30 = vld [vmem:[%s15853_s0 + $0x2a0] sm:$0xff] }
 0x32a   :  { %3893 = vst.msk [vmem:[#allocation3 + $0x28] sm:$0xff] %vm15931_vm0, %v8822_v48  ;;  %3892 = vst.msk [vmem:[#allocation3 + $0x20] sm:$0xff] %vm15931_vm0, %v3589_v31  ;;  %3062 = vrot.lane.b32.xlu0 %v8591_v43, %s9015_s23 }
 0x32b   :  { %2434 = vst.msk [vmem:[#allocation2 + $0xf8] sm:$0xff] %vm15907_vm6, %v2273_v2  ;;  %1910 = vrot.lane.b32.xlu1 %v8591_v43, %s9012_s27 }
 0x32c   :  { %v2656_v49 = vpop.permute.xlu0 %2655  ;;  %v3266_v56 = vld [vmem:[#allocation2 + $0xe8] sm:$0xff] }
 0x32d   :  { %2818 = vst.msk [vmem:[#allocation2 + $0xf0] sm:$0xff] %vm15906_vm7, %v2656_v49  ;;  %v1504_v10 = vpop.permute.xlu1 %1503  ;;  %8857 = vmatmul.mubr.msk.f32.gmra.mrb[28].mxu0 %vm15897_vm9, %v3266_v56 }
 0x32e   :  { %1664 = vst.msk [vmem:[#allocation2 + $0x100] sm:$0xff] %vm15909_vm4, %v1504_v10  ;;  %2294 = vrot.lane.b32.xlu0 %v8464_v3, %s9013_s15  ;;  %v8471_v3 = vld [vmem:[%s15853_s0 + $0x2a8] sm:$0xff] }
 0x32f   :  { %2296 = vrot.lane.b32.xlu1 %v8465_v57, %s9013_s15  ;;  %v8534_v57 = vld [vmem:[%s15853_s0 + $0x2a1] sm:$0xff] }
 0x330   :  { %v2658_v4 = vpop.permute.xlu0 %2657 }
 0x331   :  { %2819 = vst.msk [vmem:[#allocation2 + $0xf8] sm:$0xff] %vm15906_vm7, %v2658_v4  ;;  %v3041_v5 = vpop.permute.xlu1 %3040  ;;  %v8535_v4 = vld [vmem:[%s15853_s0 + $0x2a9] sm:$0xff] }
 0x332   :  { %3203 = vst.msk [vmem:[#allocation2 + $0xf0] sm:$0xff] %vm15898_vm8, %v3041_v5  ;;  %2679 = vrot.lane.b32.xlu0 %v8528_v55, %s9014_s16 }
 0x333   :  { %1527 = vrot.lane.b32.xlu1 %v8528_v55, %s9011_s10 }
 0x334   :  { %v1506_v9 = vpop.permute.xlu0 %1505 }
 0x335   :  { %1665 = vst.msk [vmem:[#allocation2 + $0x108] sm:$0xff] %vm15909_vm4, %v1506_v9  ;;  %v1889_v1 = vpop.permute.xlu1 %1888 }
 0x336   :  { %2049 = vst.msk [vmem:[#allocation2 + $0x100] sm:$0xff] %vm15908_vm5, %v1889_v1  ;;  %2681 = vrot.lane.b32.xlu0 %v8529_v8, %s9014_s16 }
 0x337   :  { %3064 = vrot.lane.b32.xlu1 %v8592_v0, %s9015_s23 }
 0x338   :  { %v3043_v34 = vpop.permute.xlu0 %3042  ;;  %v8825_v12 = vpop.f32.mrb[6].mxu0 }
 0x339   :  { %3204 = vst.msk [vmem:[#allocation2 + $0xf8] sm:$0xff] %vm15898_vm8, %v3043_v34  ;;  %v1891_v36 = vpop.permute.xlu1 %1890  ;;  %v3599_v22 = vpop.f32.mrb[7].mxu0  ;;  %v3267_v35 = vld [vmem:[#allocation2 + $0xf0] sm:$0xff] }
 0x33a   :  { %3895 = vst.msk [vmem:[#allocation3 + $0x38] sm:$0xff] %vm15931_vm0, %v8825_v12  ;;  %3894 = vst.msk [vmem:[#allocation3 + $0x30] sm:$0xff] %vm15931_vm0, %v3599_v22  ;;  %1529 = vrot.lane.b32.xlu0 %v8529_v8, %s9011_s10  ;;  %8859 = vmatprep.mubr.msk.f32.mxu0 %vm15897_vm9, %v3267_v35  ;;  %v8598_v8 = vld [vmem:[%s15853_s0 + $0x2a2] sm:$0xff]  ;;  %v8599_v12 = vld [vmem:[%s15853_s0 + $0x2aa] sm:$0xff] }
 0x33b   :  { %2050 = vst.msk [vmem:[#allocation2 + $0x108] sm:$0xff] %vm15908_vm5, %v1891_v36  ;;  %1912 = vrot.lane.b32.xlu1 %v8592_v0, %s9012_s27 }
 0x33c   :  { %v2275_v50 = vpop.permute.xlu0 %2274 }
 0x33d   :  { %2435 = vst.msk [vmem:[#allocation2 + $0x100] sm:$0xff] %vm15907_vm6, %v2275_v50  ;;  %v2277_v51 = vpop.permute.xlu1 %2276  ;;  %v8472_v50 = vld [vmem:[%s15853_s0 + $0x2b8] sm:$0xff] }
 0x33e   :  { %2436 = vst.msk [vmem:[#allocation2 + $0x108] sm:$0xff] %vm15907_vm6, %v2277_v51  ;;  %3066 = vrot.lane.b32.xlu0 %v8593_v37, %s9015_s23 }
 0x33f   :  { %1914 = vrot.lane.b32.xlu1 %v8593_v37, %s9012_s27 }
 0x340   :  { %v2660_v59 = vpop.permute.xlu0 %2659  ;;  %v3268_v62 = vld [vmem:[#allocation2 + $0xf8] sm:$0xff] }
 0x341   :  { %2820 = vst.msk [vmem:[#allocation2 + $0x100] sm:$0xff] %vm15906_vm7, %v2660_v59  ;;  %v1508_v14 = vpop.permute.xlu1 %1507  ;;  %8860 = vmatmul.mubr.msk.f32.gmra.mrb[30].mxu0 %vm15897_vm9, %v3268_v62  ;;  %v8473_v59 = vld [vmem:[%s15853_s0 + $0x2c0] sm:$0xff] }
 0x342   :  { %1666 = vst.msk [vmem:[#allocation2 + $0x110] sm:$0xff] %vm15909_vm4, %v1508_v14  ;;  %2298 = vrot.lane.b32.xlu0 %v8466_v58, %s9013_s15 }
 0x343   :  { %2300 = vrot.lane.b32.xlu1 %v8467_v63, %s9013_s15  ;;  %v8536_v63 = vld [vmem:[%s15853_s0 + $0x2b9] sm:$0xff] }
 0x344   :  { %v2662_v40 = vpop.permute.xlu0 %2661 }
 0x345   :  { %2821 = vst.msk [vmem:[#allocation2 + $0x108] sm:$0xff] %vm15906_vm7, %v2662_v40  ;;  %v3045_v6 = vpop.permute.xlu1 %3044  ;;  %v8537_v40 = vld [vmem:[%s15853_s0 + $0x2c1] sm:$0xff] }
 0x346   :  { %3205 = vst.msk [vmem:[#allocation2 + $0x100] sm:$0xff] %vm15898_vm8, %v3045_v6  ;;  %2683 = vrot.lane.b32.xlu0 %v8530_v21, %s9014_s16 }
 0x347   :  { %1531 = vrot.lane.b32.xlu1 %v8530_v21, %s9011_s10 }
 0x348   :  { %v1510_v7 = vpop.permute.xlu0 %1509  ;;  %v8828_v15 = vpop.f32.mrb[8].mxu0 }
 0x349   :  { %1667 = vst.msk [vmem:[#allocation2 + $0x118] sm:$0xff] %vm15909_vm4, %v1510_v7  ;;  %v1893_v44 = vpop.permute.xlu1 %1892  ;;  %v3609_v45 = vpop.f32.mrb[9].mxu0 }
 0x34a   :  { %3897 = vst.msk [vmem:[#allocation3 + $0x48] sm:$0xff] %vm15931_vm0, %v8828_v15  ;;  %3896 = vst.msk [vmem:[#allocation3 + $0x40] sm:$0xff] %vm15931_vm0, %v3609_v45  ;;  %2685 = vrot.lane.b32.xlu0 %v8531_v41, %s9014_s16 }
 0x34b   :  { %2051 = vst.msk [vmem:[#allocation2 + $0x110] sm:$0xff] %vm15908_vm5, %v1893_v44  ;;  %3068 = vrot.lane.b32.xlu1 %v8594_v16, %s9015_s23 }
 0x34c   :  { %v3047_v28 = vpop.permute.xlu0 %3046 }
 0x34d   :  { %3206 = vst.msk [vmem:[#allocation2 + $0x108] sm:$0xff] %vm15898_vm8, %v3047_v28  ;;  %v1895_v29 = vpop.permute.xlu1 %1894  ;;  %v3269_v60 = vld [vmem:[#allocation2 + $0x100] sm:$0xff] }
 0x34e   :  { %2052 = vst.msk [vmem:[#allocation2 + $0x118] sm:$0xff] %vm15908_vm5, %v1895_v29  ;;  %1533 = vrot.lane.b32.xlu0 %v8531_v41, %s9011_s10  ;;  %8862 = vmatprep.mubr.msk.f32.mxu0 %vm15897_vm9, %v3269_v60  ;;  %v8600_v41 = vld [vmem:[%s15853_s0 + $0x2ba] sm:$0xff]  ;;  %v8601_v29 = vld [vmem:[%s15853_s0 + $0x2c2] sm:$0xff] }
 0x34f   :  { %1916 = vrot.lane.b32.xlu1 %v8594_v16, %s9012_s27 }
 0x350   :  { %v2279_v46 = vpop.permute.xlu0 %2278 }
 0x351   :  { %2437 = vst.msk [vmem:[#allocation2 + $0x110] sm:$0xff] %vm15907_vm6, %v2279_v46  ;;  %v2281_v47 = vpop.permute.xlu1 %2280  ;;  %v8474_v46 = vld [vmem:[%s15853_s0 + $0x2d0] sm:$0xff] }
 0x352   :  { %2438 = vst.msk [vmem:[#allocation2 + $0x118] sm:$0xff] %vm15907_vm6, %v2281_v47  ;;  %3070 = vrot.lane.b32.xlu0 %v8595_v61, %s9015_s23 }
 0x353   :  { %1918 = vrot.lane.b32.xlu1 %v8595_v61, %s9012_s27 }
 0x354   :  { %v2664_v54 = vpop.permute.xlu0 %2663  ;;  %v3270_v13 = vld [vmem:[#allocation2 + $0x108] sm:$0xff] }
 0x355   :  { %2822 = vst.msk [vmem:[#allocation2 + $0x110] sm:$0xff] %vm15906_vm7, %v2664_v54  ;;  %v1512_v18 = vpop.permute.xlu1 %1511  ;;  %8863 = vmatmul.mubr.msk.f32.gmra.mrb[32].mxu0 %vm15897_vm9, %v3270_v13  ;;  %v8475_v54 = vld [vmem:[%s15853_s0 + $0x2d8] sm:$0xff] }
 0x356   :  { %1668 = vst.msk [vmem:[#allocation2 + $0x120] sm:$0xff] %vm15909_vm4, %v1512_v18  ;;  %2302 = vrot.lane.b32.xlu0 %v8468_v11, %s9013_s15 }
 0x357   :  { %2304 = vrot.lane.b32.xlu1 %v8469_v17, %s9013_s15  ;;  %v8538_v17 = vld [vmem:[%s15853_s0 + $0x2d1] sm:$0xff] }
 0x358   :  { %v2666_v20 = vpop.permute.xlu0 %2665  ;;  %v8831_v23 = vpop.f32.mrb[10].mxu0 }
 0x359   :  { %2823 = vst.msk [vmem:[#allocation2 + $0x118] sm:$0xff] %vm15906_vm7, %v2666_v20  ;;  %v3049_v24 = vpop.permute.xlu1 %3048  ;;  %v3619_v25 = vpop.f32.mrb[11].mxu0  ;;  %v8539_v20 = vld [vmem:[%s15853_s0 + $0x2d9] sm:$0xff] }
 0x35a   :  { %3899 = vst.msk [vmem:[#allocation3 + $0x58] sm:$0xff] %vm15931_vm0, %v8831_v23  ;;  %3898 = vst.msk [vmem:[#allocation3 + $0x50] sm:$0xff] %vm15931_vm0, %v3619_v25  ;;  %2687 = vrot.lane.b32.xlu0 %v8532_v19, %s9014_s16 }
 0x35b   :  { %3207 = vst.msk [vmem:[#allocation2 + $0x110] sm:$0xff] %vm15898_vm8, %v3049_v24  ;;  %1535 = vrot.lane.b32.xlu1 %v8532_v19, %s9011_s10  ;;  %v8602_v24 = vld [vmem:[%s15853_s0 + $0x2d2] sm:$0xff] }
 0x35c   :  { %v1514_v26 = vpop.permute.xlu0 %1513 }
 0x35d   :  { %1669 = vst.msk [vmem:[#allocation2 + $0x128] sm:$0xff] %vm15909_vm4, %v1514_v26  ;;  %v1897_v27 = vpop.permute.xlu1 %1896 }
 0x35e   :  { %2053 = vst.msk [vmem:[#allocation2 + $0x120] sm:$0xff] %vm15908_vm5, %v1897_v27  ;;  %2689 = vrot.lane.b32.xlu0 %v8533_v52, %s9014_s16 }
 0x35f   :  { %3072 = vrot.lane.b32.xlu1 %v8596_v53, %s9015_s23 }
 0x360   :  { %v3051_v32 = vpop.permute.xlu0 %3050 }
 0x361   :  { %3208 = vst.msk [vmem:[#allocation2 + $0x118] sm:$0xff] %vm15898_vm8, %v3051_v32  ;;  %v1899_v33 = vpop.permute.xlu1 %1898 }
 0x362   :  { %v3271_v38 = vld [vmem:[#allocation2 + $0x110] sm:$0xff]  ;;  %2054 = vst.msk [vmem:[#allocation2 + $0x128] sm:$0xff] %vm15908_vm5, %v1899_v33  ;;  %1537 = vrot.lane.b32.xlu0 %v8533_v52, %s9011_s10  ;;  %v8603_v33 = vld [vmem:[%s15853_s0 + $0x2da] sm:$0xff] }
 0x363   :  { %8865 = vmatprep.mubr.msk.f32.mxu0 %vm15897_vm9, %v3271_v38  ;;  %1920 = vrot.lane.b32.xlu1 %v8596_v53, %s9012_s27 }
 0x364   :  { %v2283_v42 = vpop.permute.xlu0 %2282 }
 0x365   :  { %2439 = vst.msk [vmem:[#allocation2 + $0x120] sm:$0xff] %vm15907_vm6, %v2283_v42  ;;  %v2285_v43 = vpop.permute.xlu1 %2284  ;;  %v8476_v42 = vld [vmem:[%s15853_s0 + $0x2e8] sm:$0xff] }
 0x366   :  { %2440 = vst.msk [vmem:[#allocation2 + $0x128] sm:$0xff] %vm15907_vm6, %v2285_v43  ;;  %3074 = vrot.lane.b32.xlu0 %v8597_v39, %s9015_s23 }
 0x367   :  { %1922 = vrot.lane.b32.xlu1 %v8597_v39, %s9012_s27 }
 0x368   :  { %v2668_v48 = vpop.permute.xlu0 %2667  ;;  %v8834_v2 = vpop.f32.mrb[12].mxu0  ;;  %v3272_v31 = vld [vmem:[#allocation2 + $0x118] sm:$0xff] }
 0x369   :  { %2824 = vst.msk [vmem:[#allocation2 + $0x120] sm:$0xff] %vm15906_vm7, %v2668_v48  ;;  %v1516_v49 = vpop.permute.xlu1 %1515  ;;  %v3629_v56 = vpop.f32.mrb[13].mxu0  ;;  %8866 = vmatmul.mubr.msk.f32.gmra.mrb[34].mxu0 %vm15897_vm9, %v3272_v31  ;;  %v8477_v48 = vld [vmem:[%s15853_s0 + $0x2f0] sm:$0xff] }
 0x36a   :  { %3901 = vst.msk [vmem:[#allocation3 + $0x68] sm:$0xff] %vm15931_vm0, %v8834_v2  ;;  %3900 = vst.msk [vmem:[#allocation3 + $0x60] sm:$0xff] %vm15931_vm0, %v3629_v56  ;;  %2306 = vrot.lane.b32.xlu0 %v8470_v30, %s9013_s15  ;;  %v8540_v31 = vld [vmem:[%s15853_s0 + $0x2e9] sm:$0xff]  ;;  %v8541_v56 = vld [vmem:[%s15853_s0 + $0x2f1] sm:$0xff] }
 0x36b   :  { %1670 = vst.msk [vmem:[#allocation2 + $0x130] sm:$0xff] %vm15909_vm4, %v1516_v49  ;;  %2308 = vrot.lane.b32.xlu1 %v8471_v3, %s9013_s15 }
 0x36c   :  { %v2670_v10 = vpop.permute.xlu0 %2669 }
 0x36d   :  { %2825 = vst.msk [vmem:[#allocation2 + $0x128] sm:$0xff] %vm15906_vm7, %v2670_v10  ;;  %v3053_v55 = vpop.permute.xlu1 %3052  ;;  %v8604_v10 = vld [vmem:[%s15853_s0 + $0x2ea] sm:$0xff] }
 0x36e   :  { %3209 = vst.msk [vmem:[#allocation2 + $0x120] sm:$0xff] %vm15898_vm8, %v3053_v55  ;;  %2691 = vrot.lane.b32.xlu0 %v8534_v57, %s9014_s16 }
 0x36f   :  { %1539 = vrot.lane.b32.xlu1 %v8534_v57, %s9011_s10 }
 0x370   :  { %v1518_v5 = vpop.permute.xlu0 %1517 }
 0x371   :  { %1671 = vst.msk [vmem:[#allocation2 + $0x138] sm:$0xff] %vm15909_vm4, %v1518_v5  ;;  %v1901_v9 = vpop.permute.xlu1 %1900 }
 0x372   :  { %2055 = vst.msk [vmem:[#allocation2 + $0x130] sm:$0xff] %vm15908_vm5, %v1901_v9  ;;  %2693 = vrot.lane.b32.xlu0 %v8535_v4, %s9014_s16 }
 0x373   :  { %3076 = vrot.lane.b32.xlu1 %v8598_v8, %s9015_s23 }
 0x374   :  { %v3055_v0 = vpop.permute.xlu0 %3054 }
 0x375   :  { %3210 = vst.msk [vmem:[#allocation2 + $0x128] sm:$0xff] %vm15898_vm8, %v3055_v0  ;;  %v1903_v1 = vpop.permute.xlu1 %1902  ;;  %v3273_v34 = vld [vmem:[#allocation2 + $0x120] sm:$0xff] }
 0x376   :  { %2056 = vst.msk [vmem:[#allocation2 + $0x138] sm:$0xff] %vm15908_vm5, %v1903_v1  ;;  %1541 = vrot.lane.b32.xlu0 %v8535_v4, %s9011_s10  ;;  %8868 = vmatprep.mubr.msk.f32.mxu0 %vm15897_vm9, %v3273_v34  ;;  %v8605_v1 = vld [vmem:[%s15853_s0 + $0x2f2] sm:$0xff] }
 0x377   :  { %1924 = vrot.lane.b32.xlu1 %v8598_v8, %s9012_s27 }
 0x378   :  { %v2287_v36 = vpop.permute.xlu0 %2286  ;;  %v8837_v22 = vpop.f32.mrb[14].mxu0 }
 0x379   :  { %2441 = vst.msk [vmem:[#allocation2 + $0x130] sm:$0xff] %vm15907_vm6, %v2287_v36  ;;  %v2289_v35 = vpop.permute.xlu1 %2288  ;;  %v3639_v37 = vpop.f32.mrb[15].mxu0  ;;  %v8478_v36 = vld [vmem:[%s15853_s0 + $0x300] sm:$0xff] }
 0x37a   :  { %3903 = vst.msk [vmem:[#allocation3 + $0x78] sm:$0xff] %vm15931_vm0, %v8837_v22  ;;  %3902 = vst.msk [vmem:[#allocation3 + $0x70] sm:$0xff] %vm15931_vm0, %v3639_v37  ;;  %3078 = vrot.lane.b32.xlu0 %v8599_v12, %s9015_s23  ;;  %v8479_v37 = vld [vmem:[%s15853_s0 + $0x308] sm:$0xff] }
 0x37b   :  { %2442 = vst.msk [vmem:[#allocation2 + $0x138] sm:$0xff] %vm15907_vm6, %v2289_v35  ;;  %1926 = vrot.lane.b32.xlu1 %v8599_v12, %s9012_s27 }
 0x37c   :  { %v2672_v51 = vpop.permute.xlu0 %2671  ;;  %v3274_v58 = vld [vmem:[#allocation2 + $0x128] sm:$0xff] }
 0x37d   :  { %2826 = vst.msk [vmem:[#allocation2 + $0x130] sm:$0xff] %vm15906_vm7, %v2672_v51  ;;  %v1520_v62 = vpop.permute.xlu1 %1519  ;;  %8869 = vmatmul.mubr.msk.f32.gmra.mrb[36].mxu0 %vm15897_vm9, %v3274_v58  ;;  %v8542_v51 = vld [vmem:[%s15853_s0 + $0x301] sm:$0xff] }
 0x37e   :  { %1672 = vst.msk [vmem:[#allocation2 + $0x140] sm:$0xff] %vm15909_vm4, %v1520_v62  ;;  %2310 = vrot.lane.b32.xlu0 %v8472_v50, %s9013_s15  ;;  %v8543_v62 = vld [vmem:[%s15853_s0 + $0x309] sm:$0xff] }
 0x37f   :  { %2312 = vrot.lane.b32.xlu1 %v8473_v59, %s9013_s15 }
 0x380   :  { %v2674_v14 = vpop.permute.xlu0 %2673 }
 0x381   :  { %2827 = vst.msk [vmem:[#allocation2 + $0x138] sm:$0xff] %vm15906_vm7, %v2674_v14  ;;  %v3057_v21 = vpop.permute.xlu1 %3056  ;;  %v8606_v14 = vld [vmem:[%s15853_s0 + $0x302] sm:$0xff] }
 0x382   :  { %3211 = vst.msk [vmem:[#allocation2 + $0x130] sm:$0xff] %vm15898_vm8, %v3057_v21  ;;  %2695 = vrot.lane.b32.xlu0 %v8536_v63, %s9014_s16 }
 0x383   :  { %1543 = vrot.lane.b32.xlu1 %v8536_v63, %s9011_s10 }
 0x384   :  { %v1522_v6 = vpop.permute.xlu0 %1521 }
 0x385   :  { %1673 = vst.msk [vmem:[#allocation2 + $0x148] sm:$0xff] %vm15909_vm4, %v1522_v6  ;;  %v1905_v7 = vpop.permute.xlu1 %1904 }
 0x386   :  { %2057 = vst.msk [vmem:[#allocation2 + $0x140] sm:$0xff] %vm15908_vm5, %v1905_v7  ;;  %2697 = vrot.lane.b32.xlu0 %v8537_v40, %s9014_s16 }
 0x387   :  { %3080 = vrot.lane.b32.xlu1 %v8600_v41, %s9015_s23 }
 0x388   :  { %v3059_v15 = vpop.permute.xlu0 %3058  ;;  %v8840_v16 = vpop.f32.mrb[16].mxu0 }
 0x389   :  { %3212 = vst.msk [vmem:[#allocation2 + $0x138] sm:$0xff] %vm15898_vm8, %v3059_v15  ;;  %v1907_v44 = vpop.permute.xlu1 %1906  ;;  %v3649_v45 = vpop.f32.mrb[17].mxu0  ;;  %v3275_v28 = vld [vmem:[#allocation2 + $0x130] sm:$0xff] }
 0x38a   :  { %3905 = vst.msk [vmem:[#allocation3 + $0x88] sm:$0xff] %vm15931_vm0, %v8840_v16  ;;  %3904 = vst.msk [vmem:[#allocation3 + $0x80] sm:$0xff] %vm15931_vm0, %v3649_v45  ;;  %1545 = vrot.lane.b32.xlu0 %v8537_v40, %s9011_s10  ;;  %8871 = vmatprep.mubr.msk.f32.mxu0 %vm15897_vm9, %v3275_v28  ;;  %v8607_v16 = vld [vmem:[%s15853_s0 + $0x30a] sm:$0xff]  ;;  %v8480_v28 = vld [vmem:[%s15853_s0 + $0x318] sm:$0xff] }
 0x38b   :  { %2058 = vst.msk [vmem:[#allocation2 + $0x148] sm:$0xff] %vm15908_vm5, %v1907_v44  ;;  %1928 = vrot.lane.b32.xlu1 %v8600_v41, %s9012_s27 }
 0x38c   :  { %v2291_v60 = vpop.permute.xlu0 %2290 }
 0x38d   :  { %2443 = vst.msk [vmem:[#allocation2 + $0x140] sm:$0xff] %vm15907_vm6, %v2291_v60  ;;  %v2293_v61 = vpop.permute.xlu1 %2292 }
 0x38e   :  { %2444 = vst.msk [vmem:[#allocation2 + $0x148] sm:$0xff] %vm15907_vm6, %v2293_v61  ;;  %3082 = vrot.lane.b32.xlu0 %v8601_v29, %s9015_s23  ;;  %v8481_v61 = vld [vmem:[%s15853_s0 + $0x320] sm:$0xff] }
 0x38f   :  { %1930 = vrot.lane.b32.xlu1 %v8601_v29, %s9012_s27 }
 0x390   :  { %v2676_v47 = vpop.permute.xlu0 %2675  ;;  %v3276_v11 = vld [vmem:[#allocation2 + $0x138] sm:$0xff] }
 0x391   :  { %2828 = vst.msk [vmem:[#allocation2 + $0x140] sm:$0xff] %vm15906_vm7, %v2676_v47  ;;  %v1524_v13 = vpop.permute.xlu1 %1523  ;;  %8872 = vmatmul.mubr.msk.f32.gmra.mrb[38].mxu0 %vm15897_vm9, %v3276_v11  ;;  %v8544_v47 = vld [vmem:[%s15853_s0 + $0x319] sm:$0xff] }
 0x392   :  { %1674 = vst.msk [vmem:[#allocation2 + $0x150] sm:$0xff] %vm15909_vm4, %v1524_v13  ;;  %2314 = vrot.lane.b32.xlu0 %v8474_v46, %s9013_s15  ;;  %v8545_v13 = vld [vmem:[%s15853_s0 + $0x321] sm:$0xff] }
 0x393   :  { %2316 = vrot.lane.b32.xlu1 %v8475_v54, %s9013_s15 }
 0x394   :  { %v2678_v18 = vpop.permute.xlu0 %2677 }
 0x395   :  { %2829 = vst.msk [vmem:[#allocation2 + $0x148] sm:$0xff] %vm15906_vm7, %v2678_v18  ;;  %v3061_v19 = vpop.permute.xlu1 %3060  ;;  %v8608_v18 = vld [vmem:[%s15853_s0 + $0x31a] sm:$0xff] }
 0x396   :  { %3213 = vst.msk [vmem:[#allocation2 + $0x140] sm:$0xff] %vm15898_vm8, %v3061_v19  ;;  %2699 = vrot.lane.b32.xlu0 %v8538_v17, %s9014_s16 }
 0x397   :  { %1547 = vrot.lane.b32.xlu1 %v8538_v17, %s9011_s10 }
 0x398   :  { %v1526_v23 = vpop.permute.xlu0 %1525 }
 0x399   :  { %1675 = vst.msk [vmem:[#allocation2 + $0x158] sm:$0xff] %vm15909_vm4, %v1526_v23  ;;  %v1909_v25 = vpop.permute.xlu1 %1908 }
 0x39a   :  { %2059 = vst.msk [vmem:[#allocation2 + $0x150] sm:$0xff] %vm15908_vm5, %v1909_v25  ;;  %2701 = vrot.lane.b32.xlu0 %v8539_v20, %s9014_s16 }
 0x39b   :  { %3084 = vrot.lane.b32.xlu1 %v8602_v24, %s9015_s23 }
 0x39c   :  { %v3063_v52 = vpop.permute.xlu0 %3062  ;;  %v8843_v26 = vpop.f32.mrb[18].mxu0 }
 0x39d   :  { %3214 = vst.msk [vmem:[#allocation2 + $0x148] sm:$0xff] %vm15898_vm8, %v3063_v52  ;;  %v1911_v53 = vpop.permute.xlu1 %1910  ;;  %v3659_v27 = vpop.f32.mrb[19].mxu0  ;;  %v3277_v32 = vld [vmem:[#allocation2 + $0x140] sm:$0xff] }
 0x39e   :  { %3907 = vst.msk [vmem:[#allocation3 + $0x98] sm:$0xff] %vm15931_vm0, %v8843_v26  ;;  %3906 = vst.msk [vmem:[#allocation3 + $0x90] sm:$0xff] %vm15931_vm0, %v3659_v27  ;;  %1549 = vrot.lane.b32.xlu0 %v8539_v20, %s9011_s10  ;;  %8874 = vmatprep.mubr.msk.f32.mxu1 %vm15897_vm9, %v3277_v32  ;;  %v8609_v26 = vld [vmem:[%s15853_s0 + $0x322] sm:$0xff]  ;;  %v8482_v32 = vld [vmem:[%s15853_s0 + $0x330] sm:$0xff] }
 0x39f   :  { %2060 = vst.msk [vmem:[#allocation2 + $0x158] sm:$0xff] %vm15908_vm5, %v1911_v53  ;;  %1932 = vrot.lane.b32.xlu1 %v8602_v24, %s9012_s27 }
 0x3a0   :  { %v2295_v38 = vpop.permute.xlu0 %2294 }
 0x3a1   :  { %2445 = vst.msk [vmem:[#allocation2 + $0x150] sm:$0xff] %vm15907_vm6, %v2295_v38  ;;  %v2297_v39 = vpop.permute.xlu1 %2296 }
 0x3a2   :  { %2446 = vst.msk [vmem:[#allocation2 + $0x158] sm:$0xff] %vm15907_vm6, %v2297_v39  ;;  %3086 = vrot.lane.b32.xlu0 %v8603_v33, %s9015_s23  ;;  %v8483_v39 = vld [vmem:[%s15853_s0 + $0x338] sm:$0xff] }
 0x3a3   :  { %1934 = vrot.lane.b32.xlu1 %v8603_v33, %s9012_s27 }
 0x3a4   :  { %v2680_v43 = vpop.permute.xlu0 %2679  ;;  %v3278_v30 = vld [vmem:[#allocation2 + $0x148] sm:$0xff] }
 0x3a5   :  { %2830 = vst.msk [vmem:[#allocation2 + $0x150] sm:$0xff] %vm15906_vm7, %v2680_v43  ;;  %v1528_v2 = vpop.permute.xlu1 %1527  ;;  %8875 = vmatmul.mubr.msk.f32.vlgmr.msra.gmra.mrb[0].mxu1 %vm15897_vm9, %v3278_v30  ;;  %v8546_v43 = vld [vmem:[%s15853_s0 + $0x331] sm:$0xff] }
 0x3a6   :  { %1676 = vst.msk [vmem:[#allocation2 + $0x160] sm:$0xff] %vm15909_vm4, %v1528_v2  ;;  %2318 = vrot.lane.b32.xlu0 %v8476_v42, %s9013_s15  ;;  %v8547_v2 = vld [vmem:[%s15853_s0 + $0x339] sm:$0xff] }
 0x3a7   :  { %2320 = vrot.lane.b32.xlu1 %v8477_v48, %s9013_s15 }
 0x3a8   :  { %v2682_v3 = vpop.permute.xlu0 %2681 }
 0x3a9   :  { %2831 = vst.msk [vmem:[#allocation2 + $0x158] sm:$0xff] %vm15906_vm7, %v2682_v3  ;;  %v3065_v49 = vpop.permute.xlu1 %3064  ;;  %v8610_v3 = vld [vmem:[%s15853_s0 + $0x332] sm:$0xff] }
 0x3aa   :  { %3215 = vst.msk [vmem:[#allocation2 + $0x150] sm:$0xff] %vm15898_vm8, %v3065_v49  ;;  %2703 = vrot.lane.b32.xlu0 %v8540_v31, %s9014_s16 }
 0x3ab   :  { %1551 = vrot.lane.b32.xlu1 %v8540_v31, %s9011_s10 }
 0x3ac   :  { %v1530_v57 = vpop.permute.xlu0 %1529 }
 0x3ad   :  { %1677 = vst.msk [vmem:[#allocation2 + $0x168] sm:$0xff] %vm15909_vm4, %v1530_v57  ;;  %v1913_v55 = vpop.permute.xlu1 %1912 }
 0x3ae   :  { %2061 = vst.msk [vmem:[#allocation2 + $0x160] sm:$0xff] %vm15908_vm5, %v1913_v55  ;;  %2705 = vrot.lane.b32.xlu0 %v8541_v56, %s9014_s16 }
 0x3af   :  { %3088 = vrot.lane.b32.xlu1 %v8604_v10, %s9015_s23 }
 0x3b0   :  { %v3067_v4 = vpop.permute.xlu0 %3066  ;;  %v8846_v5 = vpop.f32.mrb[20].mxu0 }
 0x3b1   :  { %3216 = vst.msk [vmem:[#allocation2 + $0x158] sm:$0xff] %vm15898_vm8, %v3067_v4  ;;  %v1915_v8 = vpop.permute.xlu1 %1914  ;;  %v3669_v9 = vpop.f32.mrb[21].mxu0  ;;  %v3279_v0 = vld [vmem:[#allocation2 + $0x150] sm:$0xff] }
 0x3b2   :  { %3909 = vst.msk [vmem:[#allocation3 + $0xa8] sm:$0xff] %vm15931_vm0, %v8846_v5  ;;  %3908 = vst.msk [vmem:[#allocation3 + $0xa0] sm:$0xff] %vm15931_vm0, %v3669_v9  ;;  %1553 = vrot.lane.b32.xlu0 %v8541_v56, %s9011_s10  ;;  %8877 = vmatprep.mubr.msk.f32.mxu1 %vm15897_vm9, %v3279_v0  ;;  %v8611_v5 = vld [vmem:[%s15853_s0 + $0x33a] sm:$0xff]  ;;  %v8484_v0 = vld [vmem:[%s15853_s0 + $0x348] sm:$0xff] }
 0x3b3   :  { %2062 = vst.msk [vmem:[#allocation2 + $0x168] sm:$0xff] %vm15908_vm5, %v1915_v8  ;;  %1936 = vrot.lane.b32.xlu1 %v8604_v10, %s9012_s27 }
 0x3b4   :  { %v2299_v34 = vpop.permute.xlu0 %2298 }
 0x3b5   :  { %2447 = vst.msk [vmem:[#allocation2 + $0x160] sm:$0xff] %vm15907_vm6, %v2299_v34  ;;  %v2301_v12 = vpop.permute.xlu1 %2300 }
 0x3b6   :  { %2448 = vst.msk [vmem:[#allocation2 + $0x168] sm:$0xff] %vm15907_vm6, %v2301_v12  ;;  %3090 = vrot.lane.b32.xlu0 %v8605_v1, %s9015_s23  ;;  %v8485_v12 = vld [vmem:[%s15853_s0 + $0x350] sm:$0xff] }
 0x3b7   :  { %1938 = vrot.lane.b32.xlu1 %v8605_v1, %s9012_s27 }
 0x3b8   :  { %v2684_v22 = vpop.permute.xlu0 %2683  ;;  %v3280_v35 = vld [vmem:[#allocation2 + $0x158] sm:$0xff] }
 0x3b9   :  { %2832 = vst.msk [vmem:[#allocation2 + $0x160] sm:$0xff] %vm15906_vm7, %v2684_v22  ;;  %v1532_v50 = vpop.permute.xlu1 %1531  ;;  %8878 = vmatmul.mubr.msk.f32.gmra.mrb[2].mxu1 %vm15897_vm9, %v3280_v35  ;;  %v8548_v22 = vld [vmem:[%s15853_s0 + $0x349] sm:$0xff] }
 0x3ba   :  { %1678 = vst.msk [vmem:[#allocation2 + $0x170] sm:$0xff] %vm15909_vm4, %v1532_v50  ;;  %2322 = vrot.lane.b32.xlu0 %v8478_v36, %s9013_s15 }
 0x3bb   :  { %2324 = vrot.lane.b32.xlu1 %v8479_v37, %s9013_s15  ;;  %v8549_v37 = vld [vmem:[%s15853_s0 + $0x351] sm:$0xff] }
 0x3bc   :  { %v2686_v58 = vpop.permute.xlu0 %2685 }
 0x3bd   :  { %2833 = vst.msk [vmem:[#allocation2 + $0x168] sm:$0xff] %vm15906_vm7, %v2686_v58  ;;  %v3069_v59 = vpop.permute.xlu1 %3068 }
 0x3be   :  { %3217 = vst.msk [vmem:[#allocation2 + $0x160] sm:$0xff] %vm15898_vm8, %v3069_v59  ;;  %2707 = vrot.lane.b32.xlu0 %v8542_v51, %s9014_s16  ;;  %v8613_v59 = vld [vmem:[%s15853_s0 + $0x352] sm:$0xff] }
 0x3bf   :  { %1555 = vrot.lane.b32.xlu1 %v8542_v51, %s9011_s10  ;;  %v8612_v51 = vld [vmem:[%s15853_s0 + $0x34a] sm:$0xff] }
 0x3c0   :  { %v1534_v63 = vpop.permute.xlu0 %1533 }
 0x3c1   :  { %1679 = vst.msk [vmem:[#allocation2 + $0x178] sm:$0xff] %vm15909_vm4, %v1534_v63  ;;  %v1917_v21 = vpop.permute.xlu1 %1916 }
 0x3c2   :  { %2063 = vst.msk [vmem:[#allocation2 + $0x170] sm:$0xff] %vm15908_vm5, %v1917_v21  ;;  %2709 = vrot.lane.b32.xlu0 %v8543_v62, %s9014_s16 }
 0x3c3   :  { %3092 = vrot.lane.b32.xlu1 %v8606_v14, %s9015_s23 }
 0x3c4   :  { %v3071_v40 = vpop.permute.xlu0 %3070  ;;  %v8849_v6 = vpop.f32.mrb[22].mxu0 }
 0x3c5   :  { %3218 = vst.msk [vmem:[#allocation2 + $0x168] sm:$0xff] %vm15898_vm8, %v3071_v40  ;;  %v1919_v41 = vpop.permute.xlu1 %1918  ;;  %v3679_v7 = vpop.f32.mrb[23].mxu0  ;;  %v3281_v15 = vld [vmem:[#allocation2 + $0x160] sm:$0xff] }
 0x3c6   :  { %3911 = vst.msk [vmem:[#allocation3 + $0xb8] sm:$0xff] %vm15931_vm0, %v8849_v6  ;;  %3910 = vst.msk [vmem:[#allocation3 + $0xb0] sm:$0xff] %vm15931_vm0, %v3679_v7  ;;  %1557 = vrot.lane.b32.xlu0 %v8543_v62, %s9011_s10  ;;  %8880 = vmatprep.mubr.msk.f32.mxu1 %vm15897_vm9, %v3281_v15 }
 0x3c7   :  { %2064 = vst.msk [vmem:[#allocation2 + $0x178] sm:$0xff] %vm15908_vm5, %v1919_v41  ;;  %1940 = vrot.lane.b32.xlu1 %v8606_v14, %s9012_s27 }
 0x3c8   :  { %v2303_v44 = vpop.permute.xlu0 %2302 }
 0x3c9   :  { %2449 = vst.msk [vmem:[#allocation2 + $0x170] sm:$0xff] %vm15907_vm6, %v2303_v44  ;;  %v2305_v45 = vpop.permute.xlu1 %2304 }
 0x3ca   :  { %2450 = vst.msk [vmem:[#allocation2 + $0x178] sm:$0xff] %vm15907_vm6, %v2305_v45  ;;  %3094 = vrot.lane.b32.xlu0 %v8607_v16, %s9015_s23 }
 0x3cb   :  { %1942 = vrot.lane.b32.xlu1 %v8607_v16, %s9012_s27 }
 0x3cc   :  { %v2688_v29 = vpop.permute.xlu0 %2687  ;;  %v3282_v60 = vld [vmem:[#allocation2 + $0x168] sm:$0xff] }
 0x3cd   :  { %2834 = vst.msk [vmem:[#allocation2 + $0x170] sm:$0xff] %vm15906_vm7, %v2688_v29  ;;  %v1536_v46 = vpop.permute.xlu1 %1535  ;;  %8881 = vmatmul.mubr.msk.f32.gmra.mrb[4].mxu1 %vm15897_vm9, %v3282_v60 }
 0x3ce   :  { %1680 = vst.msk [vmem:[#allocation2 + $0x180] sm:$0xff] %vm15909_vm4, %v1536_v46  ;;  %2326 = vrot.lane.b32.xlu0 %v8480_v28, %s9013_s15 }
 0x3cf   :  { %2328 = vrot.lane.b32.xlu1 %v8481_v61, %s9013_s15 }
 0x3d0   :  { %v2690_v11 = vpop.permute.xlu0 %2689 }
 0x3d1   :  { %2835 = vst.msk [vmem:[#allocation2 + $0x178] sm:$0xff] %vm15906_vm7, %v2690_v11  ;;  %v3073_v54 = vpop.permute.xlu1 %3072 }
 0x3d2   :  { %3219 = vst.msk [vmem:[#allocation2 + $0x170] sm:$0xff] %vm15898_vm8, %v3073_v54  ;;  %2711 = vrot.lane.b32.xlu0 %v8544_v47, %s9014_s16 }
 0x3d3   :  { %1559 = vrot.lane.b32.xlu1 %v8544_v47, %s9011_s10 }
 0x3d4   :  { %v1538_v17 = vpop.permute.xlu0 %1537 }
 0x3d5   :  { %1681 = vst.msk [vmem:[#allocation2 + $0x188] sm:$0xff] %vm15909_vm4, %v1538_v17  ;;  %v1921_v19 = vpop.permute.xlu1 %1920 }
 0x3d6   :  { %2065 = vst.msk [vmem:[#allocation2 + $0x180] sm:$0xff] %vm15908_vm5, %v1921_v19  ;;  %2713 = vrot.lane.b32.xlu0 %v8545_v13, %s9014_s16 }
 0x3d7   :  { %3096 = vrot.lane.b32.xlu1 %v8608_v18, %s9015_s23 }
 0x3d8   :  { %v3075_v20 = vpop.permute.xlu0 %3074  ;;  %v8852_v23 = vpop.f32.mrb[24].mxu0 }
 0x3d9   :  { %3220 = vst.msk [vmem:[#allocation2 + $0x178] sm:$0xff] %vm15898_vm8, %v3075_v20  ;;  %v1923_v24 = vpop.permute.xlu1 %1922  ;;  %v3689_v25 = vpop.f32.mrb[25].mxu0  ;;  %v3283_v52 = vld [vmem:[#allocation2 + $0x170] sm:$0xff] }
 0x3da   :  { %3913 = vst.msk [vmem:[#allocation3 + $0xc8] sm:$0xff] %vm15931_vm0, %v8852_v23  ;;  %3912 = vst.msk [vmem:[#allocation3 + $0xc0] sm:$0xff] %vm15931_vm0, %v3689_v25  ;;  %1561 = vrot.lane.b32.xlu0 %v8545_v13, %s9011_s10  ;;  %8883 = vmatprep.mubr.msk.f32.mxu1 %vm15897_vm9, %v3283_v52 }
 0x3db   :  { %2066 = vst.msk [vmem:[#allocation2 + $0x188] sm:$0xff] %vm15908_vm5, %v1923_v24  ;;  %1944 = vrot.lane.b32.xlu1 %v8608_v18, %s9012_s27 }
 0x3dc   :  { %v2307_v53 = vpop.permute.xlu0 %2306 }
 0x3dd   :  { %2451 = vst.msk [vmem:[#allocation2 + $0x180] sm:$0xff] %vm15907_vm6, %v2307_v53  ;;  %v2309_v27 = vpop.permute.xlu1 %2308 }
 0x3de   :  { %2452 = vst.msk [vmem:[#allocation2 + $0x188] sm:$0xff] %vm15907_vm6, %v2309_v27  ;;  %3098 = vrot.lane.b32.xlu0 %v8609_v26, %s9015_s23 }
 0x3df   :  { %1946 = vrot.lane.b32.xlu1 %v8609_v26, %s9012_s27 }
 0x3e0   :  { %v2692_v33 = vpop.permute.xlu0 %2691  ;;  %v3284_v38 = vld [vmem:[#allocation2 + $0x178] sm:$0xff] }
 0x3e1   :  { %2836 = vst.msk [vmem:[#allocation2 + $0x180] sm:$0xff] %vm15906_vm7, %v2692_v33  ;;  %v1540_v42 = vpop.permute.xlu1 %1539  ;;  %8884 = vmatmul.mubr.msk.f32.gmra.mrb[6].mxu1 %vm15897_vm9, %v3284_v38 }
 0x3e2   :  { %1682 = vst.msk [vmem:[#allocation2 + $0x190] sm:$0xff] %vm15909_vm4, %v1540_v42  ;;  %2330 = vrot.lane.b32.xlu0 %v8482_v32, %s9013_s15 }
 0x3e3   :  { %2332 = vrot.lane.b32.xlu1 %v8483_v39, %s9013_s15 }
 0x3e4   :  { %v2694_v30 = vpop.permute.xlu0 %2693 }
 0x3e5   :  { %2837 = vst.msk [vmem:[#allocation2 + $0x188] sm:$0xff] %vm15906_vm7, %v2694_v30  ;;  %v3077_v48 = vpop.permute.xlu1 %3076 }
 0x3e6   :  { %3221 = vst.msk [vmem:[#allocation2 + $0x180] sm:$0xff] %vm15898_vm8, %v3077_v48  ;;  %2715 = vrot.lane.b32.xlu0 %v8546_v43, %s9014_s16 }
 0x3e7   :  { %1563 = vrot.lane.b32.xlu1 %v8546_v43, %s9011_s10 }
 0x3e8   :  { %v1542_v31 = vpop.permute.xlu0 %1541 }
 0x3e9   :  { %1683 = vst.msk [vmem:[#allocation2 + $0x198] sm:$0xff] %vm15909_vm4, %v1542_v31  ;;  %v1925_v49 = vpop.permute.xlu1 %1924 }
 0x3ea   :  { %2067 = vst.msk [vmem:[#allocation2 + $0x190] sm:$0xff] %vm15908_vm5, %v1925_v49  ;;  %2717 = vrot.lane.b32.xlu0 %v8547_v2, %s9014_s16 }
 0x3eb   :  { %3100 = vrot.lane.b32.xlu1 %v8610_v3, %s9015_s23 }
 0x3ec   :  { %v3079_v56 = vpop.permute.xlu0 %3078  ;;  %v8855_v57 = vpop.f32.mrb[26].mxu0 }
 0x3ed   :  { %3222 = vst.msk [vmem:[#allocation2 + $0x188] sm:$0xff] %vm15898_vm8, %v3079_v56  ;;  %v1927_v10 = vpop.permute.xlu1 %1926  ;;  %v3699_v55 = vpop.f32.mrb[27].mxu0  ;;  %v3285_v4 = vld [vmem:[#allocation2 + $0x180] sm:$0xff] }
 0x3ee   :  { %3915 = vst.msk [vmem:[#allocation3 + $0xd8] sm:$0xff] %vm15931_vm0, %v8855_v57  ;;  %3914 = vst.msk [vmem:[#allocation3 + $0xd0] sm:$0xff] %vm15931_vm0, %v3699_v55  ;;  %1565 = vrot.lane.b32.xlu0 %v8547_v2, %s9011_s10  ;;  %8886 = vmatprep.mubr.msk.f32.mxu1 %vm15897_vm9, %v3285_v4 }
 0x3ef   :  { %2068 = vst.msk [vmem:[#allocation2 + $0x198] sm:$0xff] %vm15908_vm5, %v1927_v10  ;;  %1948 = vrot.lane.b32.xlu1 %v8610_v3, %s9012_s27 }
 0x3f0   :  { %v2311_v8 = vpop.permute.xlu0 %2310 }
 0x3f1   :  { %2453 = vst.msk [vmem:[#allocation2 + $0x190] sm:$0xff] %vm15907_vm6, %v2311_v8  ;;  %v2313_v9 = vpop.permute.xlu1 %2312 }
 0x3f2   :  { %2454 = vst.msk [vmem:[#allocation2 + $0x198] sm:$0xff] %vm15907_vm6, %v2313_v9  ;;  %3102 = vrot.lane.b32.xlu0 %v8611_v5, %s9015_s23 }
 0x3f3   :  { %1950 = vrot.lane.b32.xlu1 %v8611_v5, %s9012_s27 }
 0x3f4   :  { %v2696_v1 = vpop.permute.xlu0 %2695  ;;  %v3286_v34 = vld [vmem:[#allocation2 + $0x188] sm:$0xff] }
 0x3f5   :  { %2838 = vst.msk [vmem:[#allocation2 + $0x190] sm:$0xff] %vm15906_vm7, %v2696_v1  ;;  %v1544_v36 = vpop.permute.xlu1 %1543  ;;  %8887 = vmatmul.mubr.msk.f32.gmra.mrb[8].mxu1 %vm15897_vm9, %v3286_v34 }
 0x3f6   :  { %1684 = vst.msk [vmem:[#allocation2 + $0x1a0] sm:$0xff] %vm15909_vm4, %v1544_v36  ;;  %2334 = vrot.lane.b32.xlu0 %v8484_v0, %s9013_s15 }
 0x3f7   :  { %2336 = vrot.lane.b32.xlu1 %v8485_v12, %s9013_s15 }
 0x3f8   :  { %v2698_v35 = vpop.permute.xlu0 %2697 }
 0x3f9   :  { %2839 = vst.msk [vmem:[#allocation2 + $0x198] sm:$0xff] %vm15906_vm7, %v2698_v35  ;;  %v3081_v50 = vpop.permute.xlu1 %3080 }
 0x3fa   :  { %3223 = vst.msk [vmem:[#allocation2 + $0x190] sm:$0xff] %vm15898_vm8, %v3081_v50  ;;  %2719 = vrot.lane.b32.xlu0 %v8548_v22, %s9014_s16 }
 0x3fb   :  { %2721 = vrot.lane.b32.xlu1 %v8549_v37, %s9014_s16 }
 0x3fc   :  { %v1546_v58 = vpop.permute.xlu0 %1545 }
 0x3fd   :  { %1685 = vst.msk [vmem:[#allocation2 + $0x1a8] sm:$0xff] %vm15909_vm4, %v1546_v58  ;;  %v1929_v62 = vpop.permute.xlu1 %1928 }
 0x3fe   :  { %2069 = vst.msk [vmem:[#allocation2 + $0x1a0] sm:$0xff] %vm15908_vm5, %v1929_v62  ;;  %3104 = vrot.lane.b32.xlu0 %v8612_v51, %s9015_s23 }
 0x3ff   :  { %3106 = vrot.lane.b32.xlu1 %v8613_v59, %s9015_s23 }
 0x400   :  { %v3083_v63 = vpop.permute.xlu0 %3082  ;;  %v8858_v14 = vpop.f32.mrb[28].mxu0 }
 0x401   :  { %3224 = vst.msk [vmem:[#allocation2 + $0x198] sm:$0xff] %vm15898_vm8, %v3083_v63  ;;  %v1931_v21 = vpop.permute.xlu1 %1930  ;;  %v3709_v40 = vpop.f32.mrb[29].mxu0  ;;  %v3287_v6 = vld [vmem:[#allocation2 + $0x190] sm:$0xff] }
 0x402   :  { %3917 = vst.msk [vmem:[#allocation3 + $0xe8] sm:$0xff] %vm15931_vm0, %v8858_v14  ;;  %3916 = vst.msk [vmem:[#allocation3 + $0xe0] sm:$0xff] %vm15931_vm0, %v3709_v40  ;;  %8889 = vmatprep.mubr.msk.f32.mxu1 %vm15897_vm9, %v3287_v6 }
 0x403   :  { %2070 = vst.msk [vmem:[#allocation2 + $0x1a8] sm:$0xff] %vm15908_vm5, %v1931_v21 }
 0x404   :  { %v2315_v41 = vpop.permute.xlu0 %2314 }
 0x405   :  { %2455 = vst.msk [vmem:[#allocation2 + $0x1a0] sm:$0xff] %vm15907_vm6, %v2315_v41  ;;  %v2317_v7 = vpop.permute.xlu1 %2316 }
 0x406   :  { %2456 = vst.msk [vmem:[#allocation2 + $0x1a8] sm:$0xff] %vm15907_vm6, %v2317_v7 }
 0x408   :  { %v2700_v15 = vpop.permute.xlu0 %2699  ;;  %v3288_v16 = vld [vmem:[#allocation2 + $0x198] sm:$0xff] }
 0x409   :  { %2840 = vst.msk [vmem:[#allocation2 + $0x1a0] sm:$0xff] %vm15906_vm7, %v2700_v15  ;;  %v1548_v44 = vpop.permute.xlu1 %1547  ;;  %8890 = vmatmul.mubr.msk.f32.gmra.mrb[10].mxu1 %vm15897_vm9, %v3288_v16 }
 0x40a   :  { %1686 = vst.msk [vmem:[#allocation2 + $0x1b0] sm:$0xff] %vm15909_vm4, %v1548_v44 }
 0x40c   :  { %v2702_v45 = vpop.permute.xlu0 %2701 }
 0x40d   :  { %2841 = vst.msk [vmem:[#allocation2 + $0x1a8] sm:$0xff] %vm15906_vm7, %v2702_v45  ;;  %v3085_v28 = vpop.permute.xlu1 %3084 }
 0x40e   :  { %3225 = vst.msk [vmem:[#allocation2 + $0x1a0] sm:$0xff] %vm15898_vm8, %v3085_v28 }
 0x410   :  { %v1550_v29 = vpop.permute.xlu0 %1549 }
 0x411   :  { %1687 = vst.msk [vmem:[#allocation2 + $0x1b8] sm:$0xff] %vm15909_vm4, %v1550_v29  ;;  %v1933_v60 = vpop.permute.xlu1 %1932 }
 0x412   :  { %2071 = vst.msk [vmem:[#allocation2 + $0x1b0] sm:$0xff] %vm15908_vm5, %v1933_v60 }
 0x414   :  { %v3087_v61 = vpop.permute.xlu0 %3086  ;;  %v8861_v46 = vpop.f32.mrb[30].mxu0 }
 0x415   :  { %3226 = vst.msk [vmem:[#allocation2 + $0x1a8] sm:$0xff] %vm15898_vm8, %v3087_v61  ;;  %v1935_v47 = vpop.permute.xlu1 %1934  ;;  %v3719_v11 = vpop.f32.mrb[31].mxu0  ;;  %v3289_v54 = vld [vmem:[#allocation2 + $0x1a0] sm:$0xff] }
 0x416   :  { %3919 = vst.msk [vmem:[#allocation3 + $0xf8] sm:$0xff] %vm15931_vm0, %v8861_v46  ;;  %3918 = vst.msk [vmem:[#allocation3 + $0xf0] sm:$0xff] %vm15931_vm0, %v3719_v11  ;;  %8892 = vmatprep.mubr.msk.f32.mxu1 %vm15897_vm9, %v3289_v54 }
 0x417   :  { %2072 = vst.msk [vmem:[#allocation2 + $0x1b8] sm:$0xff] %vm15908_vm5, %v1935_v47 }
 0x418   :  { %v2319_v13 = vpop.permute.xlu0 %2318 }
 0x419   :  { %2457 = vst.msk [vmem:[#allocation2 + $0x1b0] sm:$0xff] %vm15907_vm6, %v2319_v13  ;;  %v2321_v17 = vpop.permute.xlu1 %2320 }
 0x41a   :  { %2458 = vst.msk [vmem:[#allocation2 + $0x1b8] sm:$0xff] %vm15907_vm6, %v2321_v17 }
 0x41c   :  { %v2704_v18 = vpop.permute.xlu0 %2703  ;;  %v3290_v19 = vld [vmem:[#allocation2 + $0x1a8] sm:$0xff] }
 0x41d   :  { %2842 = vst.msk [vmem:[#allocation2 + $0x1b0] sm:$0xff] %vm15906_vm7, %v2704_v18  ;;  %v1552_v20 = vpop.permute.xlu1 %1551  ;;  %8893 = vmatmul.mubr.msk.f32.gmra.mrb[12].mxu1 %vm15897_vm9, %v3290_v19 }
 0x41e   :  { %1688 = vst.msk [vmem:[#allocation2 + $0x1c0] sm:$0xff] %vm15909_vm4, %v1552_v20 }
 0x420   :  { %v2706_v23 = vpop.permute.xlu0 %2705 }
 0x421   :  { %2843 = vst.msk [vmem:[#allocation2 + $0x1b8] sm:$0xff] %vm15906_vm7, %v2706_v23  ;;  %v3089_v24 = vpop.permute.xlu1 %3088  ;;  %v11781_v23 = vld [vmem:[#allocation3 + $0x8] sm:$0xff] }
 0x422   :  { %3227 = vst.msk [vmem:[#allocation2 + $0x1b0] sm:$0xff] %vm15898_vm8, %v3089_v24  ;;  %v11783_v24 = vld [vmem:[#allocation3] sm:$0xff] }
 0x424   :  { %v1554_v25 = vpop.permute.xlu0 %1553 }
 0x425   :  { %1689 = vst.msk [vmem:[#allocation2 + $0x1c8] sm:$0xff] %vm15909_vm4, %v1554_v25  ;;  %v1937_v52 = vpop.permute.xlu1 %1936  ;;  %v11785_v25 = vld [vmem:[#allocation3 + $0x10] sm:$0xff] }
 0x426   :  { %2073 = vst.msk [vmem:[#allocation2 + $0x1c0] sm:$0xff] %vm15908_vm5, %v1937_v52  ;;  %v4150_v52 = vmul.f32 %v11781_v23, %v11781_v23 }
 0x428   :  { %v3091_v26 = vpop.permute.xlu0 %3090  ;;  %v8864_v53 = vpop.f32.mrb[32].mxu0 }
 0x429   :  { %3228 = vst.msk [vmem:[#allocation2 + $0x1b8] sm:$0xff] %vm15898_vm8, %v3091_v26  ;;  %v1939_v27 = vpop.permute.xlu1 %1938  ;;  %v3729_v32 = vpop.f32.mrb[33].mxu0  ;;  %v3291_v33 = vld [vmem:[#allocation2 + $0x1b0] sm:$0xff]  ;;  %v4149_v26 = vmul.f32 %v11783_v24, %v11783_v24 }
 0x42a   :  { %3921 = vst.msk [vmem:[#allocation3 + $0x108] sm:$0xff] %vm15931_vm0, %v8864_v53  ;;  %3920 = vst.msk [vmem:[#allocation3 + $0x100] sm:$0xff] %vm15931_vm0, %v3729_v32  ;;  %8895 = vmatprep.mubr.msk.f32.mxu1 %vm15897_vm9, %v3291_v33  ;;  %v4017_v53 = vsel %vm15931_vm0, %v11781_v23, 0.0  ;;  %v4151_v32 = vmul.f32 %v11785_v25, %v11785_v25 }
 0x42b   :  { %2074 = vst.msk [vmem:[#allocation2 + $0x1c8] sm:$0xff] %vm15908_vm5, %v1939_v27  ;;  %v4016_v27 = vsel %vm15931_vm0, %v11783_v24, 0.0 }
 0x42c   :  { %v2323_v38 = vpop.permute.xlu0 %2322 }
 0x42d   :  { %2459 = vst.msk [vmem:[#allocation2 + $0x1c0] sm:$0xff] %vm15907_vm6, %v2323_v38  ;;  %v2325_v39 = vpop.permute.xlu1 %2324  ;;  %v4214_v38 = vsel %vm15931_vm0, %v4150_v52, 0.0  ;;  %v11862_v52 = vld [vmem:[#allocation3 + $0x60] sm:$0xff] }
 0x42e   :  { %2460 = vst.msk [vmem:[#allocation2 + $0x1c8] sm:$0xff] %vm15907_vm6, %v2325_v39  ;;  %v4213_v39 = vsel %vm15931_vm0, %v4149_v26, 0.0 }
 0x430   :  { %v2708_v42 = vpop.permute.xlu0 %2707  ;;  %v3292_v43 = vld [vmem:[#allocation2 + $0x1b8] sm:$0xff] }
 0x431   :  { %2844 = vst.msk [vmem:[#allocation2 + $0x1c0] sm:$0xff] %vm15906_vm7, %v2708_v42  ;;  %v1556_v30 = vpop.permute.xlu1 %1555  ;;  %8896 = vmatmul.mubr.msk.f32.gmra.mrb[14].mxu1 %vm15897_vm9, %v3292_v43  ;;  %v4019_v42 = vsel %vm15931_vm0, %v11785_v25, 0.0 }
 0x432   :  { %1690 = vst.msk [vmem:[#allocation2 + $0x1d0] sm:$0xff] %vm15909_vm4, %v1556_v30  ;;  %v4018_v30 = vadd.f32 %v4017_v53, %v4016_v27 }
 0x434   :  { %v2710_v48 = vpop.permute.xlu0 %2709 }
 0x435   :  { %2845 = vst.msk [vmem:[#allocation2 + $0x1c8] sm:$0xff] %vm15906_vm7, %v2710_v48  ;;  %v3093_v2 = vpop.permute.xlu1 %3092  ;;  %v11802_v48 = vld [vmem:[#allocation3 + $0x18] sm:$0xff] }
 0x436   :  { %3229 = vst.msk [vmem:[#allocation2 + $0x1c0] sm:$0xff] %vm15898_vm8, %v3093_v2  ;;  %v11804_v2 = vld [vmem:[#allocation3 + $0x20] sm:$0xff] }
 0x438   :  { %v1558_v31 = vpop.permute.xlu0 %1557 }
 0x439   :  { %1691 = vst.msk [vmem:[#allocation2 + $0x1d8] sm:$0xff] %vm15909_vm4, %v1558_v31  ;;  %v1941_v3 = vpop.permute.xlu1 %1940  ;;  %v4216_v31 = vsel %vm15931_vm0, %v4151_v32, 0.0 }
 0x43a   :  { %2075 = vst.msk [vmem:[#allocation2 + $0x1d0] sm:$0xff] %vm15908_vm5, %v1941_v3  ;;  %v4215_v3 = vadd.f32 %v4214_v38, %v4213_v39  ;;  %v4161_v38 = vmul.f32 %v11862_v52, %v11862_v52 }
 0x43c   :  { %v3095_v49 = vpop.permute.xlu0 %3094  ;;  %v8867_v56 = vpop.f32.mrb[34].mxu0 }
 0x43d   :  { %3230 = vst.msk [vmem:[#allocation2 + $0x1c8] sm:$0xff] %vm15898_vm8, %v3095_v49  ;;  %v1943_v57 = vpop.permute.xlu1 %1942  ;;  %v3739_v10 = vpop.f32.mrb[35].mxu0  ;;  %v3293_v55 = vld [vmem:[#allocation2 + $0x1c0] sm:$0xff]  ;;  %v4020_v49 = vadd.f32 %v4019_v42, %v4018_v30  ;;  %v11874_v30 = vld [vmem:[#allocation3 + $0x68] sm:$0xff] }
 0x43e   :  { %3923 = vst.msk [vmem:[#allocation3 + $0x118] sm:$0xff] %vm15931_vm0, %v8867_v56  ;;  %3922 = vst.msk [vmem:[#allocation3 + $0x110] sm:$0xff] %vm15931_vm0, %v3739_v10  ;;  %8898 = vmatprep.mubr.msk.f32.mxu1 %vm15897_vm9, %v3293_v55  ;;  %v4152_v56 = vmul.f32 %v11802_v48, %v11802_v48  ;;  %v4217_v10 = vadd.f32 %v4216_v31, %v4215_v3  ;;  %v4021_v55 = vsel %vm15931_vm0, %v11802_v48, 0.0  ;;  %v11876_v3 = vld [vmem:[#allocation3 + $0x70] sm:$0xff] }
 0x43f   :  { %2076 = vst.msk [vmem:[#allocation2 + $0x1d8] sm:$0xff] %vm15908_vm5, %v1943_v57  ;;  %v4153_v57 = vmul.f32 %v11804_v2, %v11804_v2 }
 0x440   :  { %v2327_v4 = vpop.permute.xlu0 %2326 }
 0x441   :  { %2461 = vst.msk [vmem:[#allocation2 + $0x1d0] sm:$0xff] %vm15907_vm6, %v2327_v4  ;;  %v2329_v5 = vpop.permute.xlu1 %2328  ;;  %v4023_v4 = vsel %vm15931_vm0, %v11804_v2, 0.0 }
 0x442   :  { %2462 = vst.msk [vmem:[#allocation2 + $0x1d8] sm:$0xff] %vm15907_vm6, %v2329_v5  ;;  %v4022_v5 = vadd.f32 %v4021_v55, %v4020_v49  ;;  %v4162_v55 = vmul.f32 %v11874_v30, %v11874_v30 }
 0x444   :  { %v2712_v8 = vpop.permute.xlu0 %2711  ;;  %v3294_v9 = vld [vmem:[#allocation2 + $0x1c8] sm:$0xff] }
 0x445   :  { %2846 = vst.msk [vmem:[#allocation2 + $0x1d0] sm:$0xff] %vm15906_vm7, %v2712_v8  ;;  %v1560_v0 = vpop.permute.xlu1 %1559  ;;  %8899 = vmatmul.mubr.msk.f32.gmra.mrb[16].mxu1 %vm15897_vm9, %v3294_v9  ;;  %v11816_v8 = vld [vmem:[#allocation3 + $0x28] sm:$0xff]  ;;  %v11818_v9 = vld [vmem:[#allocation3 + $0x30] sm:$0xff] }
 0x446   :  { %1692 = vst.msk [vmem:[#allocation2 + $0x1e0] sm:$0xff] %vm15909_vm4, %v1560_v0  ;;  %v4218_v0 = vsel %vm15931_vm0, %v4152_v56, 0.0  ;;  %v4236_v56 = vsel %vm15931_vm0, %v4161_v38, 0.0 }
 0x448   :  { %v2714_v1 = vpop.permute.xlu0 %2713 }
 0x449   :  { %2847 = vst.msk [vmem:[#allocation2 + $0x1d8] sm:$0xff] %vm15906_vm7, %v2714_v1  ;;  %v3097_v34 = vpop.permute.xlu1 %3096  ;;  %v4220_v1 = vsel %vm15931_vm0, %v4153_v57, 0.0 }
 0x44a   :  { %3231 = vst.msk [vmem:[#allocation2 + $0x1d0] sm:$0xff] %vm15898_vm8, %v3097_v34  ;;  %v4219_v34 = vadd.f32 %v4218_v0, %v4217_v10  ;;  %v4041_v0 = vsel %vm15931_vm0, %v11874_v30, 0.0 }
 0x44c   :  { %v1562_v12 = vpop.permute.xlu0 %1561 }
 0x44d   :  { %1693 = vst.msk [vmem:[#allocation2 + $0x1e8] sm:$0xff] %vm15909_vm4, %v1562_v12  ;;  %v1945_v36 = vpop.permute.xlu1 %1944  ;;  %v4024_v12 = vadd.f32 %v4023_v4, %v4022_v5  ;;  %v4163_v4 = vmul.f32 %v11876_v3, %v11876_v3 }
 0x44e   :  { %2077 = vst.msk [vmem:[#allocation2 + $0x1e0] sm:$0xff] %vm15908_vm5, %v1945_v36  ;;  %v4154_v36 = vmul.f32 %v11816_v8, %v11816_v8 }
 0x450   :  { %v3099_v22 = vpop.permute.xlu0 %3098  ;;  %v8870_v35 = vpop.f32.mrb[36].mxu0 }
 0x451   :  { %3232 = vst.msk [vmem:[#allocation2 + $0x1d8] sm:$0xff] %vm15898_vm8, %v3099_v22  ;;  %v1947_v37 = vpop.permute.xlu1 %1946  ;;  %v3749_v50 = vpop.f32.mrb[37].mxu0  ;;  %v3295_v51 = vld [vmem:[#allocation2 + $0x1d0] sm:$0xff]  ;;  %v4155_v22 = vmul.f32 %v11818_v9, %v11818_v9 }
 0x452   :  { %3925 = vst.msk [vmem:[#allocation3 + $0x128] sm:$0xff] %vm15931_vm0, %v8870_v35  ;;  %3924 = vst.msk [vmem:[#allocation3 + $0x120] sm:$0xff] %vm15931_vm0, %v3749_v50  ;;  %8901 = vmatprep.mubr.msk.f32.mxu1 %vm15897_vm9, %v3295_v51  ;;  %v4221_v35 = vadd.f32 %v4220_v1, %v4219_v34  ;;  %v4027_v50 = vsel %vm15931_vm0, %v11818_v9, 0.0  ;;  %v11830_v51 = vld [vmem:[#allocation3 + $0x38] sm:$0xff]  ;;  %v4043_v1 = vsel %vm15931_vm0, %v11876_v3, 0.0 }
 0x453   :  { %2078 = vst.msk [vmem:[#allocation2 + $0x1e8] sm:$0xff] %vm15908_vm5, %v1947_v37  ;;  %v4025_v37 = vsel %vm15931_vm0, %v11816_v8, 0.0  ;;  %v11888_v34 = vld [vmem:[#allocation3 + $0x78] sm:$0xff] }
 0x454   :  { %v2331_v58 = vpop.permute.xlu0 %2330 }
 0x455   :  { %2463 = vst.msk [vmem:[#allocation2 + $0x1e0] sm:$0xff] %vm15907_vm6, %v2331_v58  ;;  %v2333_v59 = vpop.permute.xlu1 %2332  ;;  %v4026_v58 = vadd.f32 %v4025_v37, %v4024_v12 }
 0x456   :  { %2464 = vst.msk [vmem:[#allocation2 + $0x1e8] sm:$0xff] %vm15907_vm6, %v2333_v59  ;;  %v11832_v59 = vld [vmem:[#allocation3 + $0x40] sm:$0xff] }
 0x458   :  { %v2716_v62 = vpop.permute.xlu0 %2715  ;;  %v3296_v63 = vld [vmem:[#allocation2 + $0x1d8] sm:$0xff] }
 0x459   :  { %2848 = vst.msk [vmem:[#allocation2 + $0x1e0] sm:$0xff] %vm15906_vm7, %v2716_v62  ;;  %v1564_v14 = vpop.permute.xlu1 %1563  ;;  %8902 = vmatmul.mubr.msk.f32.gmra.mrb[18].mxu1 %vm15897_vm9, %v3296_v63  ;;  %v4222_v62 = vsel %vm15931_vm0, %v4154_v36, 0.0  ;;  %v4224_v63 = vsel %vm15931_vm0, %v4155_v22, 0.0  ;;  %v11890_v36 = vld [vmem:[#allocation3 + $0x80] sm:$0xff]  ;;  %v4238_v22 = vsel %vm15931_vm0, %v4162_v55, 0.0 }
 0x45a   :  { %1694 = vst.msk [vmem:[#allocation2 + $0x1f0] sm:$0xff] %vm15909_vm4, %v1564_v14  ;;  %v4028_v14 = vadd.f32 %v4027_v50, %v4026_v58 }
 0x45c   :  { %v2718_v21 = vpop.permute.xlu0 %2717 }
 0x45d   :  { %2849 = vst.msk [vmem:[#allocation2 + $0x1e8] sm:$0xff] %vm15906_vm7, %v2718_v21  ;;  %v3101_v40 = vpop.permute.xlu1 %3100  ;;  %v4223_v21 = vadd.f32 %v4222_v62, %v4221_v35  ;;  %v4240_v35 = vsel %vm15931_vm0, %v4163_v4, 0.0  ;;  %v4164_v62 = vmul.f32 %v11888_v34, %v11888_v34 }
 0x45e   :  { %3233 = vst.msk [vmem:[#allocation2 + $0x1e0] sm:$0xff] %vm15898_vm8, %v3101_v40  ;;  %v4156_v40 = vmul.f32 %v11830_v51, %v11830_v51 }
 0x460   :  { %v1566_v6 = vpop.permute.xlu0 %1565 }
 0x461   :  { %1695 = vst.msk [vmem:[#allocation2 + $0x1f8] sm:$0xff] %vm15909_vm4, %v1566_v6  ;;  %v1949_v41 = vpop.permute.xlu1 %1948  ;;  %v4157_v6 = vmul.f32 %v11832_v59, %v11832_v59 }
 0x462   :  { %2079 = vst.msk [vmem:[#allocation2 + $0x1f0] sm:$0xff] %vm15908_vm5, %v1949_v41  ;;  %v4225_v41 = vadd.f32 %v4224_v63, %v4223_v21  ;;  %v4165_v63 = vmul.f32 %v11890_v36, %v11890_v36 }
 0x464   :  { %v3103_v7 = vpop.permute.xlu0 %3102  ;;  %v8873_v15 = vpop.f32.mrb[38].mxu0 }
 0x465   :  { %3234 = vst.msk [vmem:[#allocation2 + $0x1e8] sm:$0xff] %vm15898_vm8, %v3103_v7  ;;  %v1951_v16 = vpop.permute.xlu1 %1950  ;;  %v3759_v44 = vpop.f32.mrb[39].mxu0  ;;  %v3297_v45 = vld [vmem:[#allocation2 + $0x1e0] sm:$0xff]  ;;  %v4029_v7 = vsel %vm15931_vm0, %v11830_v51, 0.0 }
 0x466   :  { %3927 = vst.msk [vmem:[#allocation3 + $0x138] sm:$0xff] %vm15931_vm0, %v8873_v15  ;;  %3926 = vst.msk [vmem:[#allocation3 + $0x130] sm:$0xff] %vm15931_vm0, %v3759_v44  ;;  %8904 = vmatprep.mubr.msk.f32.mxu1 %vm15897_vm9, %v3297_v45  ;;  %v4031_v15 = vsel %vm15931_vm0, %v11832_v59, 0.0  ;;  %v4030_v44 = vadd.f32 %v4029_v7, %v4028_v14  ;;  %v11846_v45 = vld [vmem:[#allocation3 + $0x50] sm:$0xff] }
 0x467   :  { %2080 = vst.msk [vmem:[#allocation2 + $0x1f8] sm:$0xff] %vm15908_vm5, %v1951_v16  ;;  %v11844_v16 = vld [vmem:[#allocation3 + $0x48] sm:$0xff] }
 0x468   :  { %v2335_v28 = vpop.permute.xlu0 %2334 }
 0x469   :  { %2465 = vst.msk [vmem:[#allocation2 + $0x1f0] sm:$0xff] %vm15907_vm6, %v2335_v28  ;;  %v2337_v29 = vpop.permute.xlu1 %2336 }
 0x46a   :  { %2466 = vst.msk [vmem:[#allocation2 + $0x1f8] sm:$0xff] %vm15907_vm6, %v2337_v29  ;;  %v4226_v29 = vsel %vm15931_vm0, %v4156_v40, 0.0  ;;  %v4045_v40 = vsel %vm15931_vm0, %v11888_v34, 0.0 }
 0x46c   :  { %v2720_v60 = vpop.permute.xlu0 %2719  ;;  %v3298_v61 = vld [vmem:[#allocation2 + $0x1e8] sm:$0xff] }
 0x46d   :  { %2850 = vst.msk [vmem:[#allocation2 + $0x1f0] sm:$0xff] %vm15906_vm7, %v2720_v60  ;;  %v2722_v46 = vpop.permute.xlu1 %2721  ;;  %8905 = vmatmul.mubr.msk.f32.gmra.mrb[20].mxu1 %vm15897_vm9, %v3298_v61  ;;  %v4228_v60 = vsel %vm15931_vm0, %v4157_v6, 0.0  ;;  %v4047_v6 = vsel %vm15931_vm0, %v11890_v36, 0.0 }
 0x46e   :  { %2851 = vst.msk [vmem:[#allocation2 + $0x1f8] sm:$0xff] %vm15906_vm7, %v2722_v46  ;;  %v4032_v46 = vadd.f32 %v4031_v15, %v4030_v44  ;;  %v11906_v15 = vld [vmem:[#allocation3 + $0x90] sm:$0xff]  ;;  %v4242_v44 = vsel %vm15931_vm0, %v4164_v62, 0.0 }
 0x470   :  { %v3105_v47 = vpop.permute.xlu0 %3104 }
 0x471   :  { %3235 = vst.msk [vmem:[#allocation2 + $0x1f0] sm:$0xff] %vm15898_vm8, %v3105_v47  ;;  %v3107_v11 = vpop.permute.xlu1 %3106  ;;  %v4227_v47 = vadd.f32 %v4226_v29, %v4225_v41  ;;  %v11904_v41 = vld [vmem:[#allocation3 + $0x88] sm:$0xff] }
 0x472   :  { %3236 = vst.msk [vmem:[#allocation2 + $0x1f8] sm:$0xff] %vm15898_vm8, %v3107_v11  ;;  %v4158_v11 = vmul.f32 %v11844_v16, %v11844_v16  ;;  %vm15913_vm8 = vcmask 1047559  }
 0x474   :  { %v4230_v26 = vsel %vm15931_vm0, %v4158_v11, 0.0  ;;  %v4049_v11 = vsel %vm15931_vm0, %v11904_v41, 0.0 }
 0x478   :  { %v8876_v54 = vpop.f32.mrb[0].mxu1  ;;  %v3299_v13 = vld [vmem:[#allocation2 + $0x1f0] sm:$0xff] }
 0x479   :  { %3929 = vst.msk [vmem:[#allocation3 + $0x148] sm:$0xff] %vm15931_vm0, %v8876_v54  ;;  %v3769_v17 = vpop.f32.mrb[1].mxu1  ;;  %8907 = vmatprep.mubr.msk.f32.mxu1 %vm15897_vm9, %v3299_v13  ;;  %v3300_v18 = vld [vmem:[#allocation2 + $0x1f8] sm:$0xff]  ;;  %v4159_v54 = vmul.f32 %v11846_v45, %v11846_v45  ;;  %v4229_v13 = vadd.f32 %v4228_v60, %v4227_v47 }
 0x47a   :  { %3928 = vst.msk [vmem:[#allocation3 + $0x140] sm:$0xff] %vm15931_vm0, %v3769_v17  ;;  %8908 = vmatmul.mubr.msk.f32.gmra.mrb[22].mxu1 %vm15897_vm9, %v3300_v18  ;;  %v4033_v17 = vsel %vm15931_vm0, %v11844_v16, 0.0  ;;  %v4035_v18 = vsel %vm15931_vm0, %v11846_v45, 0.0  ;;  %vm15914_vm9 = vcmask 1046534  }
 0x47b   :  { %v4232_v53 = vsel %vm15931_vm0, %v4159_v54, 0.0  ;;  %v4231_v32 = vadd.f32 %v4230_v26, %v4229_v13  ;;  %v4051_v54 = vsel %vm15931_vm0, %v11906_v15, 0.0  ;;  %v11918_v13 = vld [vmem:[#allocation3 + $0x98] sm:$0xff] }
 0x47d   :  { %v4233_v39 = vadd.f32 %v4232_v53, %v4231_v32  ;;  %v4168_v32 = vmul.f32 %v11918_v13, %v11918_v13 }
 0x48c   :  { %v8879_v19 = vpop.f32.mrb[2].mxu1 }
 0x48d   :  { %3931 = vst.msk [vmem:[#allocation3 + $0x158] sm:$0xff] %vm15931_vm0, %v8879_v19  ;;  %v3779_v20 = vpop.f32.mrb[3].mxu1  ;;  %v11860_v19 = vld [vmem:[#allocation3 + $0x58] sm:$0xff] }
 0x48e   :  { %3930 = vst.msk [vmem:[#allocation3 + $0x150] sm:$0xff] %vm15931_vm0, %v3779_v20  ;;  %v4034_v20 = vadd.f32 %v4033_v17, %v4032_v46  ;;  %v4037_v42 = vsel %vm15931_vm0, %v11860_v19, 0.0  ;;  %v4167_v46 = vmul.f32 %v11906_v15, %v11906_v15 }
 0x490   :  { %v4036_v27 = vadd.f32 %v4035_v18, %v4034_v20  ;;  %v11920_v18 = vld [vmem:[#allocation3 + $0xa0] sm:$0xff]  ;;  %v4248_v26 = vsel %vm15931_vm0, %v4167_v46, 0.0 }
 0x492   :  { %v4038_v31 = vadd.f32 %v4037_v42, %v4036_v27  ;;  %v4055_v42 = vsel %vm15931_vm0, %v11920_v18, 0.0 }
 0x4a0   :  { %v8882_v33 = vpop.f32.mrb[4].mxu1 }
 0x4a1   :  { %3933 = vst.msk [vmem:[#allocation3 + $0x168] sm:$0xff] %vm15931_vm0, %v8882_v33  ;;  %v3789_v43 = vpop.f32.mrb[5].mxu1  ;;  %v4160_v33 = vmul.f32 %v11860_v19, %v11860_v19 }
 0x4a2   :  { %3932 = vst.msk [vmem:[#allocation3 + $0x160] sm:$0xff] %vm15931_vm0, %v3789_v43  ;;  %v4039_v43 = vsel %vm15931_vm0, %v11862_v52, 0.0 }
 0x4a3   :  { %v4234_v49 = vsel %vm15931_vm0, %v4160_v33, 0.0  ;;  %v4040_v57 = vadd.f32 %v4039_v43, %v4038_v31  ;;  %v4169_v33 = vmul.f32 %v11920_v18, %v11920_v18  ;;  %v11932_v43 = vld [vmem:[#allocation3 + $0xa8] sm:$0xff] }
 0x4a4   :  { %v4235_v10 = vadd.f32 %v4234_v49, %v4233_v39  ;;  %v4053_v39 = vsel %vm15931_vm0, %v11918_v13, 0.0  ;;  %v11934_v49 = vld [vmem:[#allocation3 + $0xb0] sm:$0xff]  ;;  %v4170_v4 = vmul.f32 %v11932_v43, %v11932_v43 }
 0x4a5   :  { %v4042_v12 = vadd.f32 %v4041_v0, %v4040_v57  ;;  %v4252_v57 = vsel %vm15931_vm0, %v4169_v33, 0.0 }
 0x4a6   :  { %v4237_v5 = vadd.f32 %v4236_v56, %v4235_v10  ;;  %v4250_v56 = vsel %vm15931_vm0, %v4168_v32, 0.0  ;;  %v4254_v62 = vsel %vm15931_vm0, %v4170_v4, 0.0  ;;  %v11976_v32 = vld [vmem:[#allocation3 + $0xd8] sm:$0xff] }
 0x4a7   :  { %v4044_v37 = vadd.f32 %v4043_v1, %v4042_v12  ;;  %v4057_v12 = vsel %vm15931_vm0, %v11932_v43, 0.0  ;;  %v4069_v4 = vsel %vm15931_vm0, %v11976_v32, 0.0 }
 0x4a8   :  { %v4239_v50 = vadd.f32 %v4238_v22, %v4237_v5  ;;  %v4171_v5 = vmul.f32 %v11934_v49, %v11934_v49  ;;  %v4059_v22 = vsel %vm15931_vm0, %v11934_v49, 0.0 }
 0x4a9   :  { %v4046_v7 = vadd.f32 %v4045_v40, %v4044_v37  ;;  %v11947_v37 = vld [vmem:[#allocation3 + $0xb8] sm:$0xff] }
 0x4aa   :  { %v4241_v21 = vadd.f32 %v4240_v35, %v4239_v50  ;;  %v4172_v40 = vmul.f32 %v11947_v37, %v11947_v37 }
 0x4ab   :  { %v4048_v29 = vadd.f32 %v4047_v6, %v4046_v7 }
 0x4ac   :  { %v4243_v60 = vadd.f32 %v4242_v44, %v4241_v21  ;;  %v4061_v44 = vsel %vm15931_vm0, %v11947_v37, 0.0  ;;  %v4258_v46 = vsel %vm15931_vm0, %v4172_v40, 0.0 }
 0x4ad   :  { %v4050_v17 = vadd.f32 %v4049_v11, %v4048_v29  ;;  %v11962_v29 = vld [vmem:[#allocation3 + $0xc8] sm:$0xff] }
 0x4af   :  { %v4052_v53 = vadd.f32 %v4051_v54, %v4050_v17  ;;  %v4174_v17 = vmul.f32 %v11962_v29, %v11962_v29 }
 0x4b1   :  { %v4054_v31 = vadd.f32 %v4053_v39, %v4052_v53  ;;  %v4065_v53 = vsel %vm15931_vm0, %v11962_v29, 0.0  ;;  %v4262_v39 = vsel %vm15931_vm0, %v4174_v17, 0.0 }
 0x4b3   :  { %v4056_v10 = vadd.f32 %v4055_v42, %v4054_v31 }
 0x4b4   :  { %v8885_v28 = vpop.f32.mrb[6].mxu1 }
 0x4b5   :  { %3935 = vst.msk [vmem:[#allocation3 + $0x178] sm:$0xff] %vm15931_vm0, %v8885_v28  ;;  %v3799_v61 = vpop.f32.mrb[7].mxu1  ;;  %v4244_v28 = vsel %vm15931_vm0, %v4165_v63, 0.0  ;;  %v4058_v50 = vadd.f32 %v4057_v12, %v4056_v10  ;;  %v4256_v63 = vsel %vm15931_vm0, %v4171_v5, 0.0  ;;  %v11992_v12 = vld [vmem:[#allocation3 + $0xf0] sm:$0xff] }
 0x4b6   :  { %3934 = vst.msk [vmem:[#allocation3 + $0x170] sm:$0xff] %vm15931_vm0, %v3799_v61  ;;  %v4166_v61 = vmul.f32 %v11904_v41, %v11904_v41  ;;  %v4245_v47 = vadd.f32 %v4244_v28, %v4243_v60  ;;  %v4179_v40 = vmul.f32 %v11992_v12, %v11992_v12 }
 0x4b8   :  { %v4246_v20 = vsel %vm15931_vm0, %v4166_v61, 0.0  ;;  %v11964_v61 = vld [vmem:[#allocation3 + $0xd0] sm:$0xff] }
 0x4b9   :  { %v4247_v27 = vadd.f32 %v4246_v20, %v4245_v47  ;;  %v4175_v20 = vmul.f32 %v11964_v61, %v11964_v61 }
 0x4bb   :  { %v4249_v38 = vadd.f32 %v4248_v26, %v4247_v27  ;;  %v4067_v27 = vsel %vm15931_vm0, %v11964_v61, 0.0  ;;  %v4264_v42 = vsel %vm15931_vm0, %v4175_v20, 0.0 }
 0x4bd   :  { %v4251_v55 = vadd.f32 %v4250_v56, %v4249_v38  ;;  %v11978_v38 = vld [vmem:[#allocation3 + $0xe0] sm:$0xff] }
 0x4be   :  { %v4177_v10 = vmul.f32 %v11978_v38, %v11978_v38  ;;  %v4071_v5 = vsel %vm15931_vm0, %v11978_v38, 0.0 }
 0x4bf   :  { %v4253_v0 = vadd.f32 %v4252_v57, %v4251_v55  ;;  %v4176_v57 = vmul.f32 %v11976_v32, %v11976_v32 }
 0x4c1   :  { %v4255_v21 = vadd.f32 %v4254_v62, %v4253_v0  ;;  %v11990_v0 = vld [vmem:[#allocation3 + $0xe8] sm:$0xff] }
 0x4c3   :  { %v4257_v7 = vadd.f32 %v4256_v63, %v4255_v21  ;;  %v4178_v21 = vmul.f32 %v11990_v0, %v11990_v0 }
 0x4c5   :  { %v4259_v54 = vadd.f32 %v4258_v46, %v4257_v7  ;;  %v4073_v7 = vsel %vm15931_vm0, %v11990_v0, 0.0  ;;  %v12008_v46 = vld [vmem:[#allocation3 + $0x100] sm:$0xff] }
 0x4c8   :  { %v8888_v58 = vpop.f32.mrb[8].mxu1 }
 0x4c9   :  { %3937 = vst.msk [vmem:[#allocation3 + $0x188] sm:$0xff] %vm15931_vm0, %v8888_v58  ;;  %v3809_v14 = vpop.f32.mrb[9].mxu1  ;;  %v11949_v58 = vld [vmem:[#allocation3 + $0xc0] sm:$0xff] }
 0x4ca   :  { %3936 = vst.msk [vmem:[#allocation3 + $0x180] sm:$0xff] %vm15931_vm0, %v3809_v14  ;;  %v4060_v14 = vadd.f32 %v4059_v22, %v4058_v50  ;;  %v4173_v6 = vmul.f32 %v11949_v58, %v11949_v58  ;;  %v4063_v28 = vsel %vm15931_vm0, %v11949_v58, 0.0  ;;  %v4268_v50 = vsel %vm15931_vm0, %v4177_v10, 0.0 }
 0x4cc   :  { %v4062_v60 = vadd.f32 %v4061_v44, %v4060_v14  ;;  %v4260_v47 = vsel %vm15931_vm0, %v4173_v6, 0.0  ;;  %v4075_v44 = vsel %vm15931_vm0, %v11992_v12, 0.0 }
 0x4cd   :  { %v4261_v26 = vadd.f32 %v4260_v47, %v4259_v54  ;;  %v4270_v47 = vsel %vm15931_vm0, %v4178_v21, 0.0 }
 0x4ce   :  { %v4064_v11 = vadd.f32 %v4063_v28, %v4062_v60  ;;  %v12006_v28 = vld [vmem:[#allocation3 + $0xf8] sm:$0xff] }
 0x4cf   :  { %v4263_v56 = vadd.f32 %v4262_v39, %v4261_v26  ;;  %v4180_v20 = vmul.f32 %v12006_v28, %v12006_v28  ;;  %v4181_v26 = vmul.f32 %v12008_v46, %v12008_v46  ;;  %v12020_v39 = vld [vmem:[#allocation3 + $0x108] sm:$0xff] }
 0x4d0   :  { %v4066_v33 = vadd.f32 %v4065_v53, %v4064_v11  ;;  %v4272_v11 = vsel %vm15931_vm0, %v4179_v40, 0.0 }
 0x4d1   :  { %v4265_v55 = vadd.f32 %v4264_v42, %v4263_v56  ;;  %v4274_v56 = vsel %vm15931_vm0, %v4180_v20, 0.0  ;;  %v12050_v20 = vld [vmem:[#allocation3 + $0x128] sm:$0xff] }
 0x4d2   :  { %v4068_v31 = vadd.f32 %v4067_v27, %v4066_v33  ;;  %v4077_v27 = vsel %vm15931_vm0, %v12006_v28, 0.0  ;;  %v4079_v33 = vsel %vm15931_vm0, %v12008_v46, 0.0 }
 0x4dc   :  { %v8891_v1 = vpop.f32.mrb[10].mxu1 }
 0x4dd   :  { %3939 = vst.msk [vmem:[#allocation3 + $0x198] sm:$0xff] %vm15931_vm0, %v8891_v1  ;;  %v3819_v35 = vpop.f32.mrb[11].mxu1  ;;  %v4070_v1 = vadd.f32 %v4069_v4, %v4068_v31  ;;  %v12022_v31 = vld [vmem:[#allocation3 + $0x110] sm:$0xff]  ;;  %v4182_v4 = vmul.f32 %v12020_v39, %v12020_v39 }
 0x4de   :  { %3938 = vst.msk [vmem:[#allocation3 + $0x190] sm:$0xff] %vm15931_vm0, %v3819_v35  ;;  %v4266_v35 = vsel %vm15931_vm0, %v4176_v57, 0.0  ;;  %v4276_v57 = vsel %vm15931_vm0, %v4181_v26, 0.0 }
 0x4df   :  { %v4072_v63 = vadd.f32 %v4071_v5, %v4070_v1  ;;  %v4267_v14 = vadd.f32 %v4266_v35, %v4265_v55  ;;  %v4183_v5 = vmul.f32 %v12022_v31, %v12022_v31  ;;  %v4083_v35 = vsel %vm15931_vm0, %v12022_v31, 0.0 }
 0x4e1   :  { %v4269_v6 = vadd.f32 %v4268_v50, %v4267_v14  ;;  %v4074_v60 = vadd.f32 %v4073_v7, %v4072_v63  ;;  %v12034_v50 = vld [vmem:[#allocation3 + $0x118] sm:$0xff]  ;;  %v12036_v63 = vld [vmem:[#allocation3 + $0x120] sm:$0xff]  ;;  %v4278_v14 = vsel %vm15931_vm0, %v4182_v4, 0.0  ;;  %v4280_v21 = vsel %vm15931_vm0, %v4183_v5, 0.0 }
 0x4e2   :  { %v4089_v4 = vsel %vm15931_vm0, %v12050_v20, 0.0 }
 0x4e3   :  { %v4076_v54 = vadd.f32 %v4075_v44, %v4074_v60  ;;  %v4271_v17 = vadd.f32 %v4270_v47, %v4269_v6  ;;  %v4184_v44 = vmul.f32 %v12034_v50, %v12034_v50  ;;  %v4185_v60 = vmul.f32 %v12036_v63, %v12036_v63 }
 0x4e5   :  { %v4273_v53 = vadd.f32 %v4272_v11, %v4271_v17  ;;  %v4078_v42 = vadd.f32 %v4077_v27, %v4076_v54  ;;  %v4085_v54 = vsel %vm15931_vm0, %v12034_v50, 0.0  ;;  %v4087_v17 = vsel %vm15931_vm0, %v12036_v63, 0.0 }
 0x4e6   :  { %v4282_v27 = vsel %vm15931_vm0, %v4184_v44, 0.0 }
 0x4e7   :  { %v4080_v10 = vadd.f32 %v4079_v33, %v4078_v42  ;;  %v4275_v55 = vadd.f32 %v4274_v56, %v4273_v53  ;;  %v12052_v53 = vld [vmem:[#allocation3 + $0x130] sm:$0xff]  ;;  %v4284_v33 = vsel %vm15931_vm0, %v4185_v60, 0.0 }
 0x4e8   :  { %v4091_v5 = vsel %vm15931_vm0, %v12052_v53, 0.0 }
 0x4e9   :  { %v4277_v1 = vadd.f32 %v4276_v57, %v4275_v55  ;;  %v4186_v57 = vmul.f32 %v12050_v20, %v12050_v20 }
 0x4eb   :  { %v4279_v6 = vadd.f32 %v4278_v14, %v4277_v1  ;;  %v12064_v1 = vld [vmem:[#allocation3 + $0x138] sm:$0xff] }
 0x4ec   :  { %16104 = vst [vmem:[#allocation6_spill] sm:$0xff] %v12064_v1  ;;  %v4093_v60 = vsel %vm15931_vm0, %v12064_v1, 0.0 }
 0x4ed   :  { %v4281_v11 = vadd.f32 %v4280_v21, %v4279_v6  ;;  %v4188_v6 = vmul.f32 %v12064_v1, %v12064_v1 }
 0x4ef   :  { %v4283_v56 = vadd.f32 %v4282_v27, %v4281_v11  ;;  %v9016_v11 = vmov 0.0   ;;  %v4290_v27 = vsel %vm15931_vm0, %v4188_v6, 0.0 }
 0x4f0   :  { %v8894_v22 = vpop.f32.mrb[12].mxu1  ;;  %6639 = vst.msk [vmem:[#allocation4] sm:$0xff] %vm15931_vm0, %v9016_v11  ;;  %6641 = vst.msk [vmem:[#allocation4 + $0xa0] sm:$0xff] %vm15931_vm0, %v9016_v11 }
 0x4f1   :  { %3941 = vst.msk [vmem:[#allocation3 + $0x1a8] sm:$0xff] %vm15931_vm0, %v8894_v22  ;;  %v3829_v62 = vpop.f32.mrb[13].mxu1  ;;  %v4081_v22 = vsel %vm15931_vm0, %v12020_v39, 0.0  ;;  %v4285_v55 = vadd.f32 %v4284_v33, %v4283_v56  ;;  %6644 = vst.msk [vmem:[#allocation4 + $0x90] sm:$0xff] %vm15931_vm0, %v9016_v11 }
 0x4f2   :  { %3940 = vst.msk [vmem:[#allocation3 + $0x1a0] sm:$0xff] %vm15931_vm0, %v3829_v62  ;;  %v4082_v62 = vadd.f32 %v4081_v22, %v4080_v10  ;;  %v4187_v10 = vmul.f32 %v12052_v53, %v12052_v53  ;;  %6646 = vst.msk [vmem:[#allocation4 + $0x130] sm:$0xff] %vm15931_vm0, %v9016_v11 }
 0x4f3   :  { %6640 = vst.msk [vmem:[#allocation4 + $0x8] sm:$0x3] %vm15930_vm10, %v9016_v11  ;;  %6642 = vst.msk [vmem:[#allocation4 + $0xa8] sm:$0x3] %vm15930_vm10, %v9016_v11 }
 0x4f4   :  { %v4084_v40 = vadd.f32 %v4083_v35, %v4082_v62  ;;  %v12066_v35 = vld [vmem:[#allocation3 + $0x140] sm:$0xff]  ;;  %v4286_v62 = vsel %vm15931_vm0, %v4186_v57, 0.0  ;;  %v4288_v14 = vsel %vm15931_vm0, %v4187_v10, 0.0  ;;  %6645 = vst.msk [vmem:[#allocation4 + $0x98] sm:$0x3] %vm15930_vm10, %v9016_v11 }
 0x4f5   :  { %16105 = vst [vmem:[#allocation7_spill] sm:$0xff] %v12066_v35  ;;  %6647 = vst.msk [vmem:[#allocation4 + $0x138] sm:$0x3] %vm15930_vm10, %v9016_v11 }
 0x4f6   :  { %v4086_v26 = vadd.f32 %v4085_v54, %v4084_v40  ;;  %v4287_v40 = vadd.f32 %v4286_v62, %v4285_v55  ;;  %v12086_v54 = vld [vmem:[#allocation3 + $0x148] sm:$0xff]  ;;  %6669 = vst.msk [vmem:[#allocation4 + $0x9] sm:$0x1] %vm6648_vm11, %v9016_v11  ;;  %6649 = vst.msk [vmem:[#allocation4] sm:$0x1] %vm6648_vm11, %v9016_v11 }
 0x4f7   :  { %16106 = vst [vmem:[#allocation8_spill] sm:$0xff] %v12086_v54  ;;  %6650 = vst.msk [vmem:[#allocation4 + $0x10] sm:$0x1] %vm6648_vm11, %v9016_v11  ;;  %v4190_v57 = vmul.f32 %v12086_v54, %v12086_v54 }
 0x4f8   :  { %v4088_v42 = vadd.f32 %v4087_v17, %v4086_v26  ;;  %v4289_v44 = vadd.f32 %v4288_v14, %v4287_v40  ;;  %v12088_v26 = vld [vmem:[#allocation3 + $0x150] sm:$0xff]  ;;  %6651 = vst.msk [vmem:[#allocation4 + $0x20] sm:$0x1] %vm6648_vm11, %v9016_v11  ;;  %6652 = vst.msk [vmem:[#allocation4 + $0x30] sm:$0x1] %vm6648_vm11, %v9016_v11  ;;  %v12141_v14 = vld [vmem:[#allocation3 + $0x158] sm:$0xff] }
 0x4f9   :  { %16107 = vst [vmem:[#allocation9_spill] sm:$0xff] %v12088_v26  ;;  %6653 = vst.msk [vmem:[#allocation4 + $0x40] sm:$0x1] %vm6648_vm11, %v9016_v11  ;;  %v4191_v10 = vmul.f32 %v12088_v26, %v12088_v26  ;;  %v12143_v40 = vld [vmem:[#allocation3 + $0x160] sm:$0xff] }
 0x4fa   :  { %v4090_v22 = vadd.f32 %v4089_v4, %v4088_v42  ;;  %6654 = vst.msk [vmem:[#allocation4 + $0x50] sm:$0x1] %vm6648_vm11, %v9016_v11  ;;  %6655 = vst.msk [vmem:[#allocation4 + $0x60] sm:$0x1] %vm6648_vm11, %v9016_v11  ;;  %v4291_v56 = vadd.f32 %v4290_v27, %v4289_v44  ;;  %v7001_v6 = vld [vmem:[#allocation4 + $0x1] sm:$0xff]  ;;  %v4193_v27 = vmul.f32 %v12143_v40, %v12143_v40 }
 0x4fb   :  { %6656 = vst.msk [vmem:[#allocation4 + $0x70] sm:$0x1] %vm6648_vm11, %v9016_v11  ;;  %6657 = vst.msk [vmem:[#allocation4 + $0x80] sm:$0x1] %vm6648_vm11, %v9016_v11  ;;  %v4296_v44 = vsel %vm15931_vm0, %v4191_v10, 0.0  ;;  %7033 = vrot.lane.b32.xlu0 %v7001_v6, %s9008_s28 }
 0x4fc   :  { %v4092_v21 = vadd.f32 %v4091_v5, %v4090_v22  ;;  %6658 = vst.msk [vmem:[#allocation4 + $0x90] sm:$0x1] %vm6648_vm11, %v9016_v11  ;;  %6659 = vst.msk [vmem:[#allocation4 + $0xa0] sm:$0x1] %vm6648_vm11, %v9016_v11  ;;  %v4097_v5 = vsel %vm15931_vm0, %v12086_v54, 0.0  ;;  %v4099_v22 = vsel %vm15931_vm0, %v12088_v26, 0.0 }
 0x4fd   :  { %6660 = vst.msk [vmem:[#allocation4 + $0xb0] sm:$0x1] %vm6648_vm11, %v9016_v11  ;;  %6661 = vst.msk [vmem:[#allocation4 + $0xc0] sm:$0x1] %vm6648_vm11, %v9016_v11 }
 0x4fe   :  { %v4094_v17 = vadd.f32 %v4093_v60, %v4092_v21  ;;  %6662 = vst.msk [vmem:[#allocation4 + $0xd0] sm:$0x1] %vm6648_vm11, %v9016_v11  ;;  %6663 = vst.msk [vmem:[#allocation4 + $0xe0] sm:$0x1] %vm6648_vm11, %v9016_v11 }
 0x4ff   :  { %6664 = vst.msk [vmem:[#allocation4 + $0xf0] sm:$0x1] %vm6648_vm11, %v9016_v11  ;;  %6665 = vst.msk [vmem:[#allocation4 + $0x100] sm:$0x1] %vm6648_vm11, %v9016_v11 }
 0x500   :  { %6666 = vst.msk [vmem:[#allocation4 + $0x110] sm:$0x1] %vm6648_vm11, %v9016_v11  ;;  %6667 = vst.msk [vmem:[#allocation4 + $0x120] sm:$0x1] %vm6648_vm11, %v9016_v11 }
 0x501   :  { %6668 = vst.msk [vmem:[#allocation4 + $0x130] sm:$0x1] %vm6648_vm11, %v9016_v11  ;;  %6670 = vst.msk [vmem:[#allocation4 + $0x19] sm:$0x1] %vm6648_vm11, %v9016_v11 }
 0x502   :  { %6671 = vst.msk [vmem:[#allocation4 + $0x29] sm:$0x1] %vm6648_vm11, %v9016_v11  ;;  %6672 = vst.msk [vmem:[#allocation4 + $0x39] sm:$0x1] %vm6648_vm11, %v9016_v11 }
 0x503   :  { %6673 = vst.msk [vmem:[#allocation4 + $0x49] sm:$0x1] %vm6648_vm11, %v9016_v11  ;;  %6674 = vst.msk [vmem:[#allocation4 + $0x59] sm:$0x1] %vm6648_vm11, %v9016_v11 }
 0x504   :  { %v8897_v7 = vpop.f32.mrb[14].mxu1  ;;  %6675 = vst.msk [vmem:[#allocation4 + $0x69] sm:$0x1] %vm6648_vm11, %v9016_v11  ;;  %6676 = vst.msk [vmem:[#allocation4 + $0x79] sm:$0x1] %vm6648_vm11, %v9016_v11 }
 0x505   :  { %3943 = vst.msk [vmem:[#allocation3 + $0x1b8] sm:$0xff] %vm15931_vm0, %v8897_v7  ;;  %v3839_v47 = vpop.f32.mrb[15].mxu1  ;;  %v4189_v7 = vmul.f32 %v12066_v35, %v12066_v35  ;;  %16108 = vst [vmem:[#allocation10_spill] sm:$0xff] %v12141_v14 }
 0x506   :  { %3942 = vst.msk [vmem:[#allocation3 + $0x1b0] sm:$0xff] %vm15931_vm0, %v3839_v47  ;;  %v4095_v47 = vsel %vm15931_vm0, %v12066_v35, 0.0  ;;  %16109 = vst [vmem:[#allocation11_spill] sm:$0xff] %v12143_v40 }
 0x507   :  { %6677 = vst.msk [vmem:[#allocation4 + $0x89] sm:$0x1] %vm6648_vm11, %v9016_v11  ;;  %6678 = vst.msk [vmem:[#allocation4 + $0x99] sm:$0x1] %vm6648_vm11, %v9016_v11  ;;  %v4292_v33 = vsel %vm15931_vm0, %v4189_v7, 0.0  ;;  %v4096_v42 = vadd.f32 %v4095_v47, %v4094_v17  ;;  %v4294_v7 = vsel %vm15931_vm0, %v4190_v57, 0.0  ;;  %v4192_v17 = vmul.f32 %v12141_v14, %v12141_v14 }
 0x508   :  { %6679 = vst.msk [vmem:[#allocation4 + $0xa9] sm:$0x1] %vm6648_vm11, %v9016_v11  ;;  %6680 = vst.msk [vmem:[#allocation4 + $0xb9] sm:$0x1] %vm6648_vm11, %v9016_v11  ;;  %v4293_v55 = vadd.f32 %v4292_v33, %v4291_v56  ;;  %v4103_v56 = vsel %vm15931_vm0, %v12143_v40, 0.0  ;;  %v12158_v57 = vld [vmem:[#allocation3 + $0x168] sm:$0xff] }
 0x509   :  { %6681 = vst.msk [vmem:[#allocation4 + $0xc9] sm:$0x1] %vm6648_vm11, %v9016_v11  ;;  %6682 = vst.msk [vmem:[#allocation4 + $0xd9] sm:$0x1] %vm6648_vm11, %v9016_v11  ;;  %v4098_v21 = vadd.f32 %v4097_v5, %v4096_v42  ;;  %v4101_v42 = vsel %vm15931_vm0, %v12141_v14, 0.0  ;;  %v4300_v5 = vsel %vm15931_vm0, %v4193_v27, 0.0 }
 0x50a   :  { %6683 = vst.msk [vmem:[#allocation4 + $0xe9] sm:$0x1] %vm6648_vm11, %v9016_v11  ;;  %6684 = vst.msk [vmem:[#allocation4 + $0xf9] sm:$0x1] %vm6648_vm11, %v9016_v11  ;;  %v4295_v47 = vadd.f32 %v4294_v7, %v4293_v55  ;;  %v12160_v55 = vld [vmem:[#allocation3 + $0x170] sm:$0xff] }
 0x50b   :  { %6685 = vst.msk [vmem:[#allocation4 + $0x109] sm:$0x1] %vm6648_vm11, %v9016_v11  ;;  %6686 = vst.msk [vmem:[#allocation4 + $0x119] sm:$0x1] %vm6648_vm11, %v9016_v11  ;;  %v4100_v60 = vadd.f32 %v4099_v22, %v4098_v21  ;;  %v4194_v21 = vmul.f32 %v12158_v57, %v12158_v57  ;;  %v4195_v6 = vmul.f32 %v12160_v55, %v12160_v55 }
 0x50c   :  { %6687 = vst.msk [vmem:[#allocation4 + $0x129] sm:$0x1] %vm6648_vm11, %v9016_v11  ;;  %6688 = vst.msk [vmem:[#allocation4 + $0x139] sm:$0x1] %vm6648_vm11, %v9016_v11  ;;  %v7097_v11 = vld [vmem:[#allocation4 + $0x2] sm:$0xff]  ;;  %v4297_v33 = vadd.f32 %v4296_v44, %v4295_v47  ;;  %v4105_v44 = vsel %vm15931_vm0, %v12158_v57, 0.0 }
 0x50d   :  { %7129 = vrot.lane.b32.xlu0 %v7097_v11, %s9009_s20  ;;  %16110 = vst [vmem:[#allocation12_spill] sm:$0xff] %v12158_v57  ;;  %v4102_v10 = vadd.f32 %v4101_v42, %v4100_v60  ;;  %16111 = vst [vmem:[#allocation13_spill] sm:$0xff] %v12160_v55  ;;  %v4107_v60 = vsel %vm15931_vm0, %v12160_v55, 0.0  ;;  %v12172_v47 = vld [vmem:[#allocation3 + $0x178] sm:$0xff]  ;;  %v4302_v27 = vsel %vm15931_vm0, %v4194_v21, 0.0  ;;  %v12188_v55 = vld [vmem:[#allocation3 + $0x190] sm:$0xff] }
 0x50e   :  { %16112 = vst [vmem:[#allocation14_spill] sm:$0xff] %v12172_v47  ;;  %16115 = vst [vmem:[#allocation17_spill] sm:$0xff] %v12188_v55 }
 0x50f   :  { %v4104_v22 = vadd.f32 %v4103_v56, %v4102_v10  ;;  %v4196_v10 = vmul.f32 %v12172_v47, %v12172_v47 }
 0x511   :  { %v4106_v11 = vadd.f32 %v4105_v44, %v4104_v22  ;;  %v12186_v44 = vld [vmem:[#allocation3 + $0x188] sm:$0xff] }
 0x512   :  { %16114 = vst [vmem:[#allocation16_spill] sm:$0xff] %v12186_v44 }
 0x513   :  { %v4108_v42 = vadd.f32 %v4107_v60, %v4106_v11 }
 0x518   :  { %v8900_v4 = vpop.f32.mrb[16].mxu1 }
 0x519   :  { %3945 = vst.msk [vmem:[#allocation3 + $0x1c8] sm:$0xff] %vm15931_vm0, %v8900_v4  ;;  %v3849_v62 = vpop.f32.mrb[17].mxu1  ;;  %v4298_v4 = vsel %vm15931_vm0, %v4192_v17, 0.0  ;;  %v12174_v17 = vld [vmem:[#allocation3 + $0x180] sm:$0xff] }
 0x51a   :  { %3944 = vst.msk [vmem:[#allocation3 + $0x1c0] sm:$0xff] %vm15931_vm0, %v3849_v62  ;;  %v4299_v62 = vadd.f32 %v4298_v4, %v4297_v33  ;;  %16113 = vst [vmem:[#allocation15_spill] sm:$0xff] %v12174_v17  ;;  %v4304_v33 = vsel %vm15931_vm0, %v4195_v6, 0.0  ;;  %v4197_v4 = vmul.f32 %v12174_v17, %v12174_v17  ;;  %v4111_v22 = vsel %vm15931_vm0, %v12174_v17, 0.0 }
 0x51b   :  { %v4113_v17 = vsel %vm15931_vm0, %v12186_v44, 0.0 }
 0x51c   :  { %v4301_v7 = vadd.f32 %v4300_v5, %v4299_v62  ;;  %v4109_v62 = vsel %vm15931_vm0, %v12172_v47, 0.0  ;;  %v4308_v60 = vsel %vm15931_vm0, %v4197_v4, 0.0  ;;  %v12202_v4 = vld [vmem:[#allocation3 + $0x198] sm:$0xff]  ;;  %v12218_v47 = vld [vmem:[#allocation3 + $0x1b0] sm:$0xff] }
 0x51d   :  { %v4110_v21 = vadd.f32 %v4109_v62, %v4108_v42  ;;  %v4199_v42 = vmul.f32 %v12188_v55, %v12188_v55  ;;  %16116 = vst [vmem:[#allocation18_spill] sm:$0xff] %v12202_v4  ;;  %16119 = vst [vmem:[#allocation21_spill] sm:$0xff] %v12218_v47 }
 0x51e   :  { %v4303_v56 = vadd.f32 %v4302_v27, %v4301_v7  ;;  %v4306_v7 = vsel %vm15931_vm0, %v4196_v10, 0.0  ;;  %v4115_v10 = vsel %vm15931_vm0, %v12188_v55, 0.0  ;;  %v4117_v55 = vsel %vm15931_vm0, %v12202_v4, 0.0 }
 0x51f   :  { %v4112_v27 = vadd.f32 %v4111_v22, %v4110_v21  ;;  %v12204_v22 = vld [vmem:[#allocation3 + $0x1a0] sm:$0xff]  ;;  %v4312_v21 = vsel %vm15931_vm0, %v4199_v42, 0.0 }
 0x520   :  { %v4305_v5 = vadd.f32 %v4304_v33, %v4303_v56  ;;  %v4198_v56 = vmul.f32 %v12186_v44, %v12186_v44  ;;  %16117 = vst [vmem:[#allocation19_spill] sm:$0xff] %v12204_v22 }
 0x522   :  { %v4307_v33 = vadd.f32 %v4306_v7, %v4305_v5  ;;  %v4310_v5 = vsel %vm15931_vm0, %v4198_v56, 0.0 }
 0x524   :  { %v4309_v62 = vadd.f32 %v4308_v60, %v4307_v33  ;;  %v4200_v60 = vmul.f32 %v12202_v4, %v12202_v4  ;;  %v4201_v33 = vmul.f32 %v12204_v22, %v12204_v22  ;;  %v12232_v4 = vld [vmem:[#allocation3 + $0x1c0] sm:$0xff] }
 0x525   :  { %16121 = vst [vmem:[#allocation23_spill] sm:$0xff] %v12232_v4 }
 0x526   :  { %v4314_v42 = vsel %vm15931_vm0, %v4200_v60, 0.0 }
 0x52c   :  { %v8903_v6 = vpop.f32.mrb[18].mxu1 }
 0x52d   :  { %3947 = vst.msk [vmem:[#allocation3 + $0x1d8] sm:$0xff] %vm15931_vm0, %v8903_v6  ;;  %v3859_v11 = vpop.f32.mrb[19].mxu1  ;;  %v4114_v6 = vadd.f32 %v4113_v17, %v4112_v27  ;;  %v4119_v17 = vsel %vm15931_vm0, %v12204_v22, 0.0  ;;  %v12216_v27 = vld [vmem:[#allocation3 + $0x1a8] sm:$0xff] }
 0x52e   :  { %3946 = vst.msk [vmem:[#allocation3 + $0x1d0] sm:$0xff] %vm15931_vm0, %v3859_v11  ;;  %v4311_v11 = vadd.f32 %v4310_v5, %v4309_v62  ;;  %16118 = vst [vmem:[#allocation20_spill] sm:$0xff] %v12216_v27  ;;  %v4316_v62 = vsel %vm15931_vm0, %v4201_v33, 0.0  ;;  %v4202_v5 = vmul.f32 %v12216_v27, %v12216_v27  ;;  %v4121_v22 = vsel %vm15931_vm0, %v12216_v27, 0.0 }
 0x52f   :  { %v4116_v7 = vadd.f32 %v4115_v10, %v4114_v6 }
 0x530   :  { %v4313_v44 = vadd.f32 %v4312_v21, %v4311_v11  ;;  %v4203_v21 = vmul.f32 %v12218_v47, %v12218_v47 }
 0x531   :  { %v4118_v56 = vadd.f32 %v4117_v55, %v4116_v7  ;;  %v4123_v55 = vsel %vm15931_vm0, %v12218_v47, 0.0  ;;  %v12230_v7 = vld [vmem:[#allocation3 + $0x1b8] sm:$0xff] }
 0x532   :  { %v4315_v6 = vadd.f32 %v4314_v42, %v4313_v44  ;;  %16120 = vst [vmem:[#allocation22_spill] sm:$0xff] %v12230_v7  ;;  %v4318_v44 = vsel %vm15931_vm0, %v4202_v5, 0.0  ;;  %v4320_v33 = vsel %vm15931_vm0, %v4203_v21, 0.0  ;;  %v12246_v5 = vld [vmem:[#allocation3 + $0x1c8] sm:$0xff] }
 0x533   :  { %v4120_v10 = vadd.f32 %v4119_v17, %v4118_v56  ;;  %16122 = vst [vmem:[#allocation24_spill] sm:$0xff] %v12246_v5 }
 0x534   :  { %v4317_v11 = vadd.f32 %v4316_v62, %v4315_v6  ;;  %v4204_v62 = vmul.f32 %v12230_v7, %v12230_v7  ;;  %v4205_v6 = vmul.f32 %v12232_v4, %v12232_v4 }
 0x535   :  { %v4122_v60 = vadd.f32 %v4121_v22, %v4120_v10  ;;  %v4125_v22 = vsel %vm15931_vm0, %v12230_v7, 0.0  ;;  %v4127_v10 = vsel %vm15931_vm0, %v12232_v4, 0.0  ;;  %v4129_v4 = vsel %vm15931_vm0, %v12246_v5, 0.0 }
 0x536   :  { %v4319_v56 = vadd.f32 %v4318_v44, %v4317_v11  ;;  %v12248_v11 = vld [vmem:[#allocation3 + $0x1d0] sm:$0xff] }
 0x537   :  { %v4124_v17 = vadd.f32 %v4123_v55, %v4122_v60  ;;  %16123 = vst [vmem:[#allocation25_spill] sm:$0xff] %v12248_v11  ;;  %v4322_v55 = vsel %vm15931_vm0, %v4204_v62, 0.0  ;;  %v4324_v60 = vsel %vm15931_vm0, %v4205_v6, 0.0 }
 0x538   :  { %v4321_v27 = vadd.f32 %v4320_v33, %v4319_v56  ;;  %v4207_v33 = vmul.f32 %v12248_v11, %v12248_v11 }
 0x539   :  { %v4126_v21 = vadd.f32 %v4125_v22, %v4124_v17  ;;  %v4131_v17 = vsel %vm15931_vm0, %v12248_v11, 0.0  ;;  %v12260_v22 = vld [vmem:[#allocation3 + $0x1d8] sm:$0xff] }
 0x53a   :  { %16124 = vst [vmem:[#allocation26_spill] sm:$0xff] %v12260_v22  ;;  %v4328_v6 = vsel %vm15931_vm0, %v4207_v33, 0.0 }
 0x53b   :  { %v4128_v44 = vadd.f32 %v4127_v10, %v4126_v21 }
 0x53d   :  { %v4130_v62 = vadd.f32 %v4129_v4, %v4128_v44  ;;  %v4133_v4 = vsel %vm15931_vm0, %v12260_v22, 0.0 }
 0x53f   :  { %v4132_v10 = vadd.f32 %v4131_v17, %v4130_v62 }
 0x540   :  { %v8906_v42 = vpop.f32.mrb[20].mxu1 }
 0x541   :  { %3949 = vst.msk [vmem:[#allocation3 + $0x1e8] sm:$0xff] %vm15931_vm0, %v8906_v42  ;;  %v3869_v47 = vpop.f32.mrb[21].mxu1  ;;  %v4323_v42 = vadd.f32 %v4322_v55, %v4321_v27  ;;  %v4208_v55 = vmul.f32 %v12260_v22, %v12260_v22  ;;  %v4134_v33 = vadd.f32 %v4133_v4, %v4132_v10 }
 0x542   :  { %3948 = vst.msk [vmem:[#allocation3 + $0x1e0] sm:$0xff] %vm15931_vm0, %v3869_v47  ;;  %v4206_v47 = vmul.f32 %v12246_v5, %v12246_v5 }
 0x543   :  { %v4325_v56 = vadd.f32 %v4324_v60, %v4323_v42 }
 0x544   :  { %v4326_v27 = vsel %vm15931_vm0, %v4206_v47, 0.0 }
 0x545   :  { %v4327_v21 = vadd.f32 %v4326_v27, %v4325_v56  ;;  %v4330_v56 = vsel %vm15931_vm0, %v4208_v55, 0.0 }
 0x547   :  { %v4329_v5 = vadd.f32 %v4328_v6, %v4327_v21 }
 0x548   :  { %v12276_v47 = vld [vmem:[#allocation3 + $0x1e8] sm:$0xff] }
 0x549   :  { %v12262_v7 = vld [vmem:[#allocation3 + $0x1e0] sm:$0xff]  ;;  %16125 = vst [vmem:[#allocation27_spill] sm:$0xff] %v12276_v47  ;;  %v4331_v27 = vadd.f32 %v4330_v56, %v4329_v5  ;;  %v4210_v6 = vmul.f32 %v12276_v47, %v12276_v47 }
 0x54a   :  { %v4209_v60 = vmul.f32 %v12262_v7, %v12262_v7  ;;  %v4135_v44 = vsel %vm15931_vm0, %v12262_v7, 0.0 }
 0x54b   :  { %v4136_v62 = vadd.f32 %v4135_v44, %v4134_v33  ;;  %v4334_v10 = vsel %vm15931_vm0, %v4210_v6, 0.0 }
 0x54c   :  { %v4332_v17 = vsel %vm15931_vm0, %v4209_v60, 0.0 }
 0x54d   :  { %v8909_v42 = vpop.f32.mrb[22].mxu1  ;;  %v4333_v21 = vadd.f32 %v4332_v17, %v4331_v27 }
 0x54e   :  { %3951 = vst.msk [vmem:[#allocation3 + $0x1f8] sm:$0xff] %vm15931_vm0, %v8909_v42  ;;  %v3879_v11 = vpop.f32.mrb[23].mxu1  ;;  %v4137_v42 = vsel %vm15931_vm0, %v12276_v47, 0.0 }
 0x54f   :  { %3950 = vst.msk [vmem:[#allocation3 + $0x1f0] sm:$0xff] %vm15931_vm0, %v3879_v11  ;;  %v4138_v11 = vadd.f32 %v4137_v42, %v4136_v62  ;;  %v4335_v44 = vadd.f32 %v4334_v10, %v4333_v21 }
 0x555   :  { %v12284_v22 = vld [vmem:[#allocation3 + $0x1f8] sm:$0xff] }
 0x556   :  { %16126 = vst [vmem:[#allocation28_spill] sm:$0xff] %v12284_v22  ;;  %v12286_v57 = vld [vmem:[#allocation3 + $0x1f0] sm:$0xff]  ;;  %v4212_v55 = vmul.f32 %v12284_v22, %v12284_v22  ;;  %v4141_v33 = vsel %vm15931_vm0, %v12284_v22, 0.0 }
 0x557   :  { %v4139_v5 = vsel %vm15931_vm0, %v12286_v57, 0.0  ;;  %v4211_v60 = vmul.f32 %v12286_v57, %v12286_v57 }
 0x558   :  { %v4140_v4 = vadd.f32 %v4139_v5, %v4138_v11  ;;  %v4338_v27 = vsel %vm15931_vm0, %v4212_v55, 0.0 }
 0x559   :  { %v4336_v56 = vsel %vm15931_vm0, %v4211_v60, 0.0 }
 0x55a   :  { %v4142_v17 = vadd.f32 %v4141_v33, %v4140_v4  ;;  %v4337_v62 = vadd.f32 %v4336_v56, %v4335_v44 }
 0x55c   :  { %v4143_v6 = vrot.slane %v4142_v17, 4  ;;  %v4339_v42 = vadd.f32 %v4338_v27, %v4337_v62 }
 0x55e   :  { %v4144_v40 = vadd.f32 %v4143_v6, %v4142_v17  ;;  %v4340_v14 = vrot.slane %v4339_v42, 4 }
 0x560   :  { %v4145_v26 = vrot.slane %v4144_v40, 2  ;;  %v4341_v54 = vadd.f32 %v4340_v14, %v4339_v42  ;;  %v9017_v14 = vmov 1983009808  }
 0x562   :  { %v4146_v35 = vadd.f32 %v4145_v26, %v4144_v40  ;;  %v4342_v47 = vrot.slane %v4341_v54, 2  ;;  %v12307_v26 = vunpack.c.l.s4 %v9017_v14  ;;  %v4946_v40 = vlaneseq  ;;  %v16129_v14 = vld [vmem:[#allocation7_spill] sm:$0xff] }
 0x564   :  { %v4147_v1 = vrot.slane %v4146_v35, 1  ;;  %v4343_v11 = vadd.f32 %v4342_v47, %v4341_v54  ;;  %v12310_v47 = vshrl.u32 %v4946_v40, 7 }
 0x566   :  { %v4148_v21 = vadd.f32 %v4147_v1, %v4146_v35  ;;  %v4344_v10 = vrot.slane %v4343_v11, 1  ;;  %v16132_v35 = vld [vmem:[#allocation8_spill] sm:$0xff] }
 0x568   :  { %v4345_v5 = vadd.f32 %v4344_v10, %v4343_v11  ;;  %v12299_v22 = vmul.f32 0.001953125, %v4148_v21 }
 0x56a   :  { %v4347_v60 = vmul.f32 0.001953125, %v4345_v5  ;;  %v4348_v4 = vmul.f32 %v12299_v22, %v12299_v22  ;;  %v4412_v55 = vsub.f32 %v12262_v7, %v12299_v22  ;;  %v4414_v44 = vsub.f32 %v12286_v57, %v12299_v22 }
 0x56b   :  { %v4356_v17 = vsub.f32 %v11804_v2, %v12299_v22  ;;  %v4357_v62 = vsub.f32 %v11816_v8, %v12299_v22  ;;  %v4358_v27 = vsub.f32 %v11818_v9, %v12299_v22  ;;  %v4359_v6 = vsub.f32 %v11830_v51, %v12299_v22 }
 0x56c   :  { %v4349_v54 = vsub.f32 %v4347_v60, %v4348_v4  ;;  %v4360_v42 = vsub.f32 %v11832_v59, %v12299_v22  ;;  %v4361_v11 = vsub.f32 %v11844_v16, %v12299_v22  ;;  %v4362_v21 = vsub.f32 %v11846_v45, %v12299_v22  ;;  %v16133_v60 = vld [vmem:[#allocation9_spill] sm:$0xff] }
 0x56d   :  { %v4363_v2 = vsub.f32 %v11860_v19, %v12299_v22  ;;  %v4364_v8 = vsub.f32 %v11862_v52, %v12299_v22  ;;  %v4365_v9 = vsub.f32 %v11874_v30, %v12299_v22  ;;  %v4366_v51 = vsub.f32 %v11876_v3, %v12299_v22 }
 0x56e   :  { %v4350_v1 = vadd.f32 1e-05, %v4349_v54  ;;  %v4367_v59 = vsub.f32 %v11888_v34, %v12299_v22  ;;  %v4368_v16 = vsub.f32 %v11890_v36, %v12299_v22  ;;  %v4369_v45 = vsub.f32 %v11904_v41, %v12299_v22  ;;  %v16130_v54 = vld [vmem:[#allocation28_spill] sm:$0xff] }
 0x56f   :  { %v4370_v19 = vsub.f32 %v11906_v15, %v12299_v22  ;;  %v4371_v52 = vsub.f32 %v11918_v13, %v12299_v22  ;;  %v4372_v30 = vsub.f32 %v11920_v18, %v12299_v22  ;;  %v4373_v3 = vsub.f32 %v11932_v43, %v12299_v22 }
 0x570   :  { %9004 = vrsqrt.f32 %v4350_v1  ;;  %v4374_v34 = vsub.f32 %v11934_v49, %v12299_v22  ;;  %v4375_v36 = vsub.f32 %v11947_v37, %v12299_v22  ;;  %v4376_v41 = vsub.f32 %v11949_v58, %v12299_v22 }
 0x571   :  { %v4377_v15 = vsub.f32 %v11962_v29, %v12299_v22  ;;  %v4378_v13 = vsub.f32 %v11964_v61, %v12299_v22  ;;  %v4379_v18 = vsub.f32 %v11976_v32, %v12299_v22  ;;  %v4380_v43 = vsub.f32 %v11978_v38, %v12299_v22 }
 0x572   :  { %v4381_v49 = vsub.f32 %v11990_v0, %v12299_v22  ;;  %v4382_v37 = vsub.f32 %v11992_v12, %v12299_v22  ;;  %v4383_v58 = vsub.f32 %v12006_v28, %v12299_v22  ;;  %v4385_v61 = vsub.f32 %v12020_v39, %v12299_v22  ;;  %v12391_v12 = vld [vmem:[%s15855_s2] ss:$0 sm:$0xff] }
 0x573   :  { %v4386_v32 = vsub.f32 %v12022_v31, %v12299_v22  ;;  %v4387_v38 = vsub.f32 %v12034_v50, %v12299_v22  ;;  %v4388_v0 = vsub.f32 %v12036_v63, %v12299_v22  ;;  %v4389_v28 = vsub.f32 %v12050_v20, %v12299_v22  ;;  %v16127_v31 = vld [vmem:[#allocation6_spill] sm:$0xff]  ;;  %v16128_v50 = vld [vmem:[#allocation27_spill] sm:$0xff] }
 0x574   :  { %v4392_v40 = vsub.f32 %v16129_v14, %v12299_v22  ;;  %v12410_v20 = vld [vmem:[%s15856_s3] ss:$0 sm:$0xff]  ;;  %v4393_v56 = vsub.f32 %v16132_v35, %v12299_v22  ;;  %v4394_v57 = vsub.f32 %v16133_v60, %v12299_v22 }
 0x575   :  { %16131 = vst [vmem:[#allocation6_spill] sm:$0xff] %v12410_v20 }
 0x57a   :  { %v12386_v10 = vpop.eup %9004 }
 0x57b   :  { %v4476_v63 = vmul.f32 %v12386_v10, %v4412_v55  ;;  %v4478_v4 = vmul.f32 %v12386_v10, %v4414_v44  ;;  %v16134_v55 = vld [vmem:[#allocation10_spill] sm:$0xff]  ;;  %v12419_v7 = vmul.f32 %v12386_v10, %v4356_v17  ;;  %v12424_v33 = vmul.f32 %v12386_v10, %v4357_v62 }
 0x57c   :  { %v12427_v5 = vmul.f32 %v12386_v10, %v4358_v27  ;;  %v12430_v35 = vmul.f32 %v12386_v10, %v4359_v6  ;;  %v12433_v60 = vmul.f32 %v12386_v10, %v4360_v42  ;;  %v12436_v44 = vmul.f32 %v12386_v10, %v4361_v11 }
 0x57d   :  { %v4547_v14 = vmul.f32 %v12391_v12, %v4476_v63  ;;  %v4549_v1 = vmul.f32 %v12391_v12, %v4478_v4  ;;  %v12439_v17 = vmul.f32 %v12386_v10, %v4362_v21  ;;  %v12444_v4 = vmul.f32 %v12386_v10, %v4363_v2 }
 0x57e   :  { %v12447_v27 = vmul.f32 %v12386_v10, %v4364_v8  ;;  %v12450_v6 = vmul.f32 %v12386_v10, %v4365_v9  ;;  %v12453_v42 = vmul.f32 %v12386_v10, %v4366_v51  ;;  %v12456_v11 = vmul.f32 %v12386_v10, %v4367_v59 }
 0x57f   :  { %v4618_v63 = vadd.f32 %v12410_v20, %v4547_v14  ;;  %v4620_v62 = vadd.f32 %v12410_v20, %v4549_v1  ;;  %v12459_v21 = vmul.f32 %v12386_v10, %v4368_v16  ;;  %v12462_v14 = vmul.f32 %v12386_v10, %v4369_v45 }
 0x580   :  { %v12465_v8 = vmul.f32 %v12386_v10, %v4370_v19  ;;  %v12468_v9 = vmul.f32 %v12386_v10, %v4371_v52  ;;  %v12471_v51 = vmul.f32 %v12386_v10, %v4372_v30  ;;  %v12474_v16 = vmul.f32 %v12386_v10, %v4373_v3 }
 0x581   :  { %vm4682_vm12 = vcmp.ge.f32.partialorder %v4618_v63, 0.0  ;;  %vm4684_vm13 = vcmp.ge.f32.partialorder %v4620_v62, 0.0  ;;  %v4746_v1 = vmul.f32 0.01, %v4618_v63  ;;  %v4748_v2 = vmul.f32 0.01, %v4620_v62 }
 0x582   :  { %v12477_v29 = vmul.f32 %v12386_v10, %v4374_v34  ;;  %v12482_v19 = vmul.f32 %v12386_v10, %v4375_v36  ;;  %v12485_v52 = vmul.f32 %v12386_v10, %v4376_v41  ;;  %v12493_v3 = vmul.f32 %v12386_v10, %v4378_v13  ;;  %v16137_v13 = vld [vmem:[#allocation12_spill] sm:$0xff] }
 0x583   :  { %v4810_v59 = vsel %vm4682_vm12, %v4618_v63, %v4746_v1  ;;  %v4812_v39 = vsel %vm4684_vm13, %v4620_v62, %v4748_v2  ;;  %v12490_v63 = vmul.f32 %v12386_v10, %v4377_v15  ;;  %v12496_v34 = vmul.f32 %v12386_v10, %v4379_v18  ;;  %v16136_v15 = vld [vmem:[#allocation11_spill] sm:$0xff] }
 0x584   :  { %v4904_v45 = vsel %vm15931_vm0, %v4810_v59, 0.0  ;;  %v4905_v20 = vsel %vm15931_vm0, %v4812_v39, 0.0  ;;  %v12499_v62 = vmul.f32 %v12386_v10, %v4380_v43  ;;  %v12502_v36 = vmul.f32 %v12386_v10, %v4381_v49 }
 0x585   :  { %v12487_v30 = vadd.f32 %v4905_v20, %v4904_v45  ;;  %v12505_v41 = vmul.f32 %v12386_v10, %v4382_v37  ;;  %v12508_v39 = vmul.f32 %v12386_v10, %v4383_v58  ;;  %v4396_v20 = vsub.f32 %v16136_v15, %v12299_v22  ;;  %v16144_v15 = vld [vmem:[#allocation14_spill] sm:$0xff] }
 0x586   :  { %v4397_v1 = vsub.f32 %v16137_v13, %v12299_v22  ;;  %v16138_v18 = vsub.f32 %v12008_v46, %v12299_v22  ;;  %v12521_v49 = vmul.f32 %v12386_v10, %v4385_v61  ;;  %v12524_v37 = vmul.f32 %v12386_v10, %v4386_v32  ;;  %v16143_v46 = vld [vmem:[#allocation13_spill] sm:$0xff]  ;;  %v16145_v61 = vld [vmem:[#allocation15_spill] sm:$0xff] }
 0x587   :  { %16135 = vst [vmem:[#allocation27_spill] sm:$0xff] %v12487_v30  ;;  %v12527_v58 = vmul.f32 %v12386_v10, %v4387_v38  ;;  %v12530_v2 = vmul.f32 %v12386_v10, %v4388_v0  ;;  %v12533_v59 = vmul.f32 %v12386_v10, %v4389_v28  ;;  %v4398_v45 = vsub.f32 %v16143_v46, %v12299_v22  ;;  %v16148_v0 = vld [vmem:[#allocation16_spill] sm:$0xff] }
 0x588   :  { %v12518_v43 = vmul.f32 %v12386_v10, %v16138_v18  ;;  %16139 = vst [vmem:[#allocation7_spill] sm:$0xff] %v12524_v37  ;;  %v4399_v13 = vsub.f32 %v16144_v15, %v12299_v22  ;;  %v4400_v18 = vsub.f32 %v16145_v61, %v12299_v22  ;;  %v16146_v32 = vsub.f32 %v12052_v53, %v12299_v22  ;;  %v16153_v53 = vld [vmem:[#allocation17_spill] sm:$0xff] }
 0x589   :  { %16140 = vst [vmem:[#allocation28_spill] sm:$0xff] %v12527_v58  ;;  %16141 = vst [vmem:[#allocation8_spill] sm:$0xff] %v12530_v2  ;;  %v4401_v30 = vsub.f32 %v16148_v0, %v12299_v22  ;;  %v16149_v28 = vsub.f32 %v16127_v31, %v12299_v22  ;;  %v12556_v15 = vmul.f32 %v12386_v10, %v4392_v40  ;;  %v16155_v0 = vld [vmem:[#allocation19_spill] sm:$0xff]  ;;  %v16158_v40 = vld [vmem:[#allocation21_spill] sm:$0xff]  ;;  %vm15927_vm13 = vcmask 1041409  }
 0x58a   :  { %16142 = vst [vmem:[#allocation9_spill] sm:$0xff] %v12533_v59  ;;  %v12545_v38 = vmul.f32 %v12386_v10, %v16146_v32  ;;  %v12559_v61 = vmul.f32 %v12386_v10, %v4393_v56  ;;  %v4402_v59 = vsub.f32 %v16153_v53, %v12299_v22  ;;  %v16154_v32 = vld [vmem:[#allocation18_spill] sm:$0xff]  ;;  %v4404_v2 = vsub.f32 %v16155_v0, %v12299_v22  ;;  %v16162_v0 = vld [vmem:[#allocation23_spill] sm:$0xff] }
 0x58b   :  { %v12553_v46 = vmul.f32 %v12386_v10, %v16149_v28  ;;  %16151 = vst [vmem:[#allocation12_spill] sm:$0xff] %v12556_v15  ;;  %v12568_v31 = vmul.f32 %v12386_v10, %v4394_v57  ;;  %v16157_v28 = vld [vmem:[#allocation20_spill] sm:$0xff]  ;;  %v4406_v15 = vsub.f32 %v16158_v40, %v12299_v22  ;;  %v16159_v56 = vld [vmem:[#allocation22_spill] sm:$0xff]  ;;  %v16160_v53 = vsub.f32 %v16134_v55, %v12299_v22  ;;  %v16165_v55 = vld [vmem:[#allocation25_spill] sm:$0xff] }
 0x58c   :  { %16147 = vst [vmem:[#allocation10_spill] sm:$0xff] %v12545_v38  ;;  %16152 = vst [vmem:[#allocation13_spill] sm:$0xff] %v12559_v61  ;;  %v4403_v38 = vsub.f32 %v16154_v32, %v12299_v22  ;;  %v4407_v61 = vsub.f32 %v16159_v56, %v12299_v22  ;;  %v4408_v58 = vsub.f32 %v16162_v0, %v12299_v22  ;;  %v16164_v56 = vld [vmem:[#allocation24_spill] sm:$0xff] }
 0x58d   :  { %16150 = vst [vmem:[#allocation11_spill] sm:$0xff] %v12553_v46  ;;  %16156 = vst [vmem:[#allocation14_spill] sm:$0xff] %v12568_v31  ;;  %v4405_v46 = vsub.f32 %v16157_v28, %v12299_v22  ;;  %v12580_v32 = vmul.f32 %v12386_v10, %v16160_v53  ;;  %v12585_v57 = vmul.f32 %v12386_v10, %v4396_v20  ;;  %v16166_v53 = vld [vmem:[#allocation26_spill] sm:$0xff] }
 0x58e   :  { %v12588_v28 = vmul.f32 %v12386_v10, %v4397_v1  ;;  %v12591_v40 = vmul.f32 %v12386_v10, %v4398_v45  ;;  %v4409_v31 = vsub.f32 %v16164_v56, %v12299_v22  ;;  %v4410_v37 = vsub.f32 %v16165_v55, %v12299_v22 }
 0x58f   :  { %16161 = vst [vmem:[#allocation15_spill] sm:$0xff] %v12580_v32  ;;  %v4411_v32 = vsub.f32 %v16166_v53, %v12299_v22  ;;  %v16167_v0 = vsub.f32 %v11783_v24, %v12299_v22  ;;  %v12604_v1 = vmul.f32 %v12386_v10, %v4399_v13  ;;  %v12607_v45 = vmul.f32 %v12386_v10, %v4400_v18 }
 0x590   :  { %16163 = vst [vmem:[#allocation16_spill] sm:$0xff] %v12591_v40  ;;  %v12610_v40 = vmul.f32 %v12386_v10, %v4401_v30  ;;  %v12613_v56 = vmul.f32 %v12386_v10, %v4402_v59  ;;  %v16168_v55 = vsub.f32 %v11781_v23, %v12299_v22  ;;  %v16169_v24 = vsub.f32 %v11785_v25, %v12299_v22 }
 0x591   :  { %v4416_v20 = vmul.f32 %v12386_v10, %v16167_v0  ;;  %v16170_v18 = vsub.f32 %v11802_v48, %v12299_v22  ;;  %v12628_v30 = vmul.f32 %v12386_v10, %v4403_v38  ;;  %v12631_v59 = vmul.f32 %v12386_v10, %v4404_v2 }
 0x592   :  { %v4417_v53 = vmul.f32 %v12386_v10, %v16168_v55  ;;  %v4418_v13 = vmul.f32 %v12386_v10, %v16169_v24  ;;  %v12634_v23 = vmul.f32 %v12386_v10, %v4405_v46  ;;  %v12637_v55 = vmul.f32 %v12386_v10, %v4406_v15 }
 0x593   :  { %v4419_v0 = vmul.f32 %v12386_v10, %v16170_v18  ;;  %v12640_v25 = vmul.f32 %v12386_v10, %v4407_v61  ;;  %v16172_v48 = vunpack.c.0.s8 %v12307_v26  ;;  %v4472_v38 = vmul.f32 %v12386_v10, %v4408_v58 }
 0x594   :  { %16171 = vst [vmem:[#allocation17_spill] sm:$0xff] %v12637_v55  ;;  %v4473_v18 = vmul.f32 %v12386_v10, %v4409_v31  ;;  %v4474_v2 = vmul.f32 %v12386_v10, %v4410_v37  ;;  %v4475_v46 = vmul.f32 %v12386_v10, %v4411_v32  ;;  %v16174_v15 = vsub.f32 %v16128_v50, %v12299_v22 }
 0x595   :  { %v12645_v24 = vsub.s32 %v16172_v48, %v12310_v47  ;;  %v16175_v61 = vsub.f32 %v16130_v54, %v12299_v22  ;;  %v4487_v47 = vmul.f32 %v12391_v12, %v4416_v20  ;;  %v4488_v58 = vmul.f32 %v12391_v12, %v4417_v53  ;;  %v16178_v20 = vld [vmem:[#allocation7_spill] sm:$0xff]  ;;  %v16180_v53 = vld [vmem:[#allocation28_spill] sm:$0xff]  ;;  %v16186_v48 = vld [vmem:[#allocation10_spill] sm:$0xff] }
 0x596   :  { %v4477_v55 = vmul.f32 %v12386_v10, %v16174_v15  ;;  %v4489_v31 = vmul.f32 %v12391_v12, %v4418_v13  ;;  %v4490_v37 = vmul.f32 %v12391_v12, %v4419_v0  ;;  %v12665_v32 = vmul.f32 %v12391_v12, %v12419_v7  ;;  %v16182_v13 = vld [vmem:[#allocation8_spill] sm:$0xff]  ;;  %v16184_v0 = vld [vmem:[#allocation9_spill] sm:$0xff]  ;;  %v16188_v15 = vld [vmem:[#allocation11_spill] sm:$0xff] }
 0x597   :  { %16173 = vst [vmem:[#allocation18_spill] sm:$0xff] %v12645_v24  ;;  %v4479_v26 = vmul.f32 %v12386_v10, %v16175_v61  ;;  %v12669_v50 = vmul.f32 %v12391_v12, %v12424_v33  ;;  %v12673_v22 = vmul.f32 %v12391_v12, %v12427_v5  ;;  %v12677_v10 = vmul.f32 %v12391_v12, %v12430_v35 }
 0x598   :  { %v12681_v54 = vmul.f32 %v12391_v12, %v12433_v60  ;;  %v12685_v7 = vmul.f32 %v12391_v12, %v12436_v44  ;;  %v12689_v33 = vmul.f32 %v12391_v12, %v12439_v17  ;;  %v12693_v5 = vmul.f32 %v12391_v12, %v12444_v4 }
 0x599   :  { %v12697_v35 = vmul.f32 %v12391_v12, %v12447_v27  ;;  %v12701_v60 = vmul.f32 %v12391_v12, %v12450_v6  ;;  %v12705_v44 = vmul.f32 %v12391_v12, %v12453_v42  ;;  %v12709_v17 = vmul.f32 %v12391_v12, %v12456_v11 }
 0x59a   :  { %v12713_v4 = vmul.f32 %v12391_v12, %v12459_v21  ;;  %v12717_v27 = vmul.f32 %v12391_v12, %v12462_v14  ;;  %v12721_v6 = vmul.f32 %v12391_v12, %v12465_v8  ;;  %v12725_v42 = vmul.f32 %v12391_v12, %v12468_v9 }
 0x59b   :  { %v12729_v11 = vmul.f32 %v12391_v12, %v12471_v51  ;;  %v12733_v21 = vmul.f32 %v12391_v12, %v12474_v16  ;;  %v12737_v14 = vmul.f32 %v12391_v12, %v12477_v29  ;;  %v12741_v8 = vmul.f32 %v12391_v12, %v12482_v19 }
 0x59c   :  { %v12745_v9 = vmul.f32 %v12391_v12, %v12485_v52  ;;  %v12749_v51 = vmul.f32 %v12391_v12, %v12490_v63  ;;  %v12753_v16 = vmul.f32 %v12391_v12, %v12493_v3  ;;  %v12757_v29 = vmul.f32 %v12391_v12, %v12496_v34 }
 0x59d   :  { %v12761_v19 = vmul.f32 %v12391_v12, %v12499_v62  ;;  %v12765_v52 = vmul.f32 %v12391_v12, %v12502_v36  ;;  %v12769_v63 = vmul.f32 %v12391_v12, %v12505_v41  ;;  %v12773_v3 = vmul.f32 %v12391_v12, %v12508_v39 }
 0x59e   :  { %v12777_v34 = vmul.f32 %v12391_v12, %v12518_v43  ;;  %v12781_v62 = vmul.f32 %v12391_v12, %v12521_v49  ;;  %v12785_v36 = vmul.f32 %v12391_v12, %v16178_v20  ;;  %v12789_v41 = vmul.f32 %v12391_v12, %v16180_v53  ;;  %v16190_v20 = vld [vmem:[#allocation12_spill] sm:$0xff] }
 0x59f   :  { %v12793_v39 = vmul.f32 %v12391_v12, %v16182_v13  ;;  %v12797_v43 = vmul.f32 %v12391_v12, %v16184_v0  ;;  %v12801_v49 = vmul.f32 %v12391_v12, %v16186_v48  ;;  %v12805_v61 = vmul.f32 %v12391_v12, %v16188_v15 }
 0x5a0   :  { %16176 = vst [vmem:[#allocation19_spill] sm:$0xff] %v12777_v34  ;;  %16177 = vst [vmem:[#allocation20_spill] sm:$0xff] %v12781_v62  ;;  %v12809_v53 = vmul.f32 %v12391_v12, %v16190_v20  ;;  %v12825_v15 = vmul.f32 %v12391_v12, %v12585_v57  ;;  %v12829_v20 = vmul.f32 %v12391_v12, %v12588_v28 }
 0x5a1   :  { %16179 = vst [vmem:[#allocation21_spill] sm:$0xff] %v12785_v36  ;;  %16181 = vst [vmem:[#allocation22_spill] sm:$0xff] %v12789_v41  ;;  %v16192_v41 = vld [vmem:[#allocation13_spill] sm:$0xff]  ;;  %v12845_v57 = vmul.f32 %v12391_v12, %v12610_v40  ;;  %v12849_v28 = vmul.f32 %v12391_v12, %v12613_v56  ;;  %v12869_v56 = vmul.f32 %v12391_v12, %v12640_v25  ;;  %v16218_v25 = vld [vmem:[#allocation6_spill] sm:$0xff] }
 0x5a2   :  { %16183 = vst [vmem:[#allocation23_spill] sm:$0xff] %v12793_v39  ;;  %16185 = vst [vmem:[#allocation24_spill] sm:$0xff] %v12797_v43  ;;  %v12813_v13 = vmul.f32 %v12391_v12, %v16192_v41  ;;  %v16194_v39 = vld [vmem:[#allocation14_spill] sm:$0xff]  ;;  %v16196_v43 = vld [vmem:[#allocation15_spill] sm:$0xff] }
 0x5a3   :  { %16187 = vst [vmem:[#allocation25_spill] sm:$0xff] %v12801_v49  ;;  %16189 = vst [vmem:[#allocation26_spill] sm:$0xff] %v12805_v61  ;;  %v12817_v0 = vmul.f32 %v12391_v12, %v16194_v39  ;;  %v12821_v48 = vmul.f32 %v12391_v12, %v16196_v43  ;;  %v12837_v39 = vmul.f32 %v12391_v12, %v12604_v1 }
 0x5a4   :  { %16191 = vst [vmem:[#allocation7_spill] sm:$0xff] %v12809_v53  ;;  %16193 = vst [vmem:[#allocation28_spill] sm:$0xff] %v12813_v13  ;;  %v16200_v53 = vld [vmem:[#allocation16_spill] sm:$0xff]  ;;  %v12841_v43 = vmul.f32 %v12391_v12, %v12607_v45  ;;  %v12857_v1 = vmul.f32 %v12391_v12, %v12631_v59  ;;  %v12861_v45 = vmul.f32 %v12391_v12, %v12634_v23 }
 0x5a5   :  { %16195 = vst [vmem:[#allocation8_spill] sm:$0xff] %v12817_v0  ;;  %16197 = vst [vmem:[#allocation9_spill] sm:$0xff] %v12821_v48  ;;  %v12833_v41 = vmul.f32 %v12391_v12, %v16200_v53  ;;  %v12853_v53 = vmul.f32 %v12391_v12, %v12628_v30  ;;  %v12875_v30 = vmul.f32 %v12391_v12, %v4473_v18 }
 0x5a6   :  { %16198 = vst [vmem:[#allocation10_spill] sm:$0xff] %v12825_v15  ;;  %16199 = vst [vmem:[#allocation11_spill] sm:$0xff] %v12829_v20  ;;  %v12878_v59 = vmul.f32 %v12391_v12, %v4474_v2  ;;  %v12881_v23 = vmul.f32 %v12391_v12, %v4475_v46  ;;  %v4561_v18 = vadd.f32 %v16218_v25, %v4490_v37 }
 0x5a7   :  { %16201 = vst [vmem:[#allocation12_spill] sm:$0xff] %v12833_v41  ;;  %16202 = vst [vmem:[#allocation13_spill] sm:$0xff] %v12837_v39 }
 0x5a8   :  { %16203 = vst [vmem:[#allocation14_spill] sm:$0xff] %v12841_v43  ;;  %16204 = vst [vmem:[#allocation15_spill] sm:$0xff] %v12845_v57  ;;  %v16209_v43 = vld [vmem:[#allocation17_spill] sm:$0xff]  ;;  %vm4625_vm12 = vcmp.ge.f32.partialorder %v4561_v18, 0.0 }
 0x5a9   :  { %16205 = vst [vmem:[#allocation16_spill] sm:$0xff] %v12849_v28  ;;  %16206 = vst [vmem:[#allocation29_spill] sm:$0xff] %v12853_v53  ;;  %v12865_v40 = vmul.f32 %v12391_v12, %v16209_v43  ;;  %v12872_v28 = vmul.f32 %v12391_v12, %v4472_v38  ;;  %v12887_v43 = vmul.f32 %v12391_v12, %v4479_v26 }
 0x5aa   :  { %16207 = vst [vmem:[#allocation30_spill] sm:$0xff] %v12857_v1  ;;  %16208 = vst [vmem:[#allocation31_spill] sm:$0xff] %v12861_v45  ;;  %v12884_v45 = vmul.f32 %v12391_v12, %v4477_v55  ;;  %v4559_v38 = vadd.f32 %v16218_v25, %v4488_v58  ;;  %v4689_v55 = vmul.f32 0.01, %v4561_v18 }
 0x5ab   :  { %16210 = vst [vmem:[#allocation17_spill] sm:$0xff] %v12865_v40  ;;  %16211 = vst [vmem:[#allocation32_spill] sm:$0xff] %v12869_v56  ;;  %v4558_v56 = vadd.f32 %v16218_v25, %v4487_v47 }
 0x5ac   :  { %16212 = vst [vmem:[#allocation33_spill] sm:$0xff] %v12872_v28  ;;  %16213 = vst [vmem:[#allocation34_spill] sm:$0xff] %v12875_v30  ;;  %v4560_v28 = vadd.f32 %v16218_v25, %v4489_v31  ;;  %vm4623_vm15 = vcmp.ge.f32.partialorder %v4559_v38, 0.0 }
 0x5ad   :  { %16214 = vst [vmem:[#allocation35_spill] sm:$0xff] %v12878_v59  ;;  %16215 = vst [vmem:[#allocation36_spill] sm:$0xff] %v12881_v23  ;;  %vm4622_vm14 = vcmp.ge.f32.partialorder %v4558_v56, 0.0  ;;  %v4686_v2 = vmul.f32 0.01, %v4558_v56  ;;  %v4753_v23 = vsel %vm4625_vm12, %v4561_v18, %v4689_v55  ;;  %vm15915_vm12 = vcmask 1045509  }
 0x5ae   :  { %16216 = vst [vmem:[#allocation37_spill] sm:$0xff] %v12884_v45  ;;  %16217 = vst [vmem:[#allocation38_spill] sm:$0xff] %v12887_v43  ;;  %v4687_v59 = vmul.f32 0.01, %v4559_v38  ;;  %vm4624_vm11 = vcmp.ge.f32.partialorder %v4560_v28, 0.0  ;;  %v16219_v45 = vld [vmem:[#allocation27_spill] sm:$0xff] }
 0x5af   :  { %v4688_v46 = vmul.f32 0.01, %v4560_v28  ;;  %v5459_v12 = vrot.slane %v16219_v45, %v12645_v24  ;;  %v4750_v26 = vsel %vm4622_vm14, %v4558_v56, %v4686_v2  ;;  %v5452_v37 = vcombine.high %v16219_v45, %v16219_v45 }
 0x5b0   :  { %v4751_v43 = vsel %vm4623_vm15, %v4559_v38, %v4687_v59  ;;  %v4814_v58 = vsel %vm15931_vm0, %v4750_v26, 0.0  ;;  %v4818_v40 = vsel %vm15931_vm0, %v4753_v23, 0.0  ;;  %vm15923_vm14 = vcmask 1042434  }
 0x5b1   :  { %v4752_v47 = vsel %vm4624_vm11, %v4560_v28, %v4688_v46  ;;  %v4817_v31 = vsel %vm15931_vm0, %v4751_v43, 0.0  ;;  %v5467_v57 = vcombine.high %v5459_v12, %v5459_v12  ;;  %v12902_v39 = vsel %vm15930_vm10, %v5459_v12, 0.0 }
 0x5b2   :  { %v4815_v30 = vsel %vm15931_vm0, %v4752_v47, 0.0  ;;  %v4819_v53 = vadd.f32 %v4818_v40, %v4817_v31  ;;  %v12907_v43 = vrot.slane %v5452_v37, %v12645_v24  ;;  %vm15919_vm15 = vcmask 1043459  }
 0x5b3   :  { %v4816_v1 = vadd.f32 %v4815_v30, %v4814_v58  ;;  %v12913_v2 = vsel %vm15930_vm10, %v5467_v57, 0.0  ;;  %vm15916_vm11 = vcmask 1044484  }
 0x5b4   :  { %v4959_v59 = vcombine.high %v4819_v53, %v4819_v53  ;;  %v4966_v38 = vrot.slane %v4819_v53, %v12645_v24 }
 0x5b5   :  { %v4942_v56 = vcombine.high %v4816_v1, %v4816_v1  ;;  %v4949_v28 = vrot.slane %v4816_v1, %v12645_v24 }
 0x5b6   :  { %v4973_v23 = vrot.slane %v4959_v59, %v12645_v24  ;;  %v4974_v30 = vcombine.high %v4966_v38, %v4966_v38  ;;  %v5643_v1 = vsel %vm15930_vm10, %v4966_v38, 0.0 }
 0x5b7   :  { %v4956_v45 = vrot.slane %v4942_v56, %v12645_v24  ;;  %v4957_v18 = vcombine.high %v4949_v28, %v4949_v28  ;;  %v5615_v46 = vsel %vm15930_vm10, %v4949_v28, 0.0  ;;  %v5644_v31 = vrot.slane %v5643_v1, 4 }
 0x5b8   :  { %v4975_v53 = vcombine.high %v4973_v23, %v4973_v23  ;;  %v5616_v12 = vrot.slane %v5615_v46, 4  ;;  %v5650_v37 = vsel %vm15930_vm10, %v4974_v30, 0.0  ;;  %v5657_v38 = vsel %vm15930_vm10, %v4973_v23, 0.0 }
 0x5b9   :  { %v4958_v55 = vcombine.high %v4956_v45, %v4956_v45  ;;  %v5622_v26 = vsel %vm15930_vm10, %v4957_v18, 0.0  ;;  %v5629_v58 = vsel %vm15930_vm10, %v4956_v45, 0.0  ;;  %v5651_v40 = vrot.slane %v5650_v37, 4 }
 0x5ba   :  { %v5623_v47 = vrot.slane %v5622_v26, 4  ;;  %v5617_v56 = vadd.f32 %v5616_v12, %v5615_v46  ;;  %v5630_v59 = vrot.slane %v5629_v58, 4  ;;  %v5645_v41 = vadd.f32 %v5644_v31, %v5643_v1 }
 0x5bb   :  { %v5636_v57 = vsel %vm15930_vm10, %v4958_v55, 0.0  ;;  %v5652_v48 = vadd.f32 %v5651_v40, %v5650_v37  ;;  %v5658_v18 = vrot.slane %v5657_v38, 4  ;;  %v5664_v30 = vsel %vm15930_vm10, %v4975_v53, 0.0 }
 0x5bc   :  { %v5624_v24 = vadd.f32 %v5623_v47, %v5622_v26  ;;  %v5637_v28 = vrot.slane %v5636_v57, 4  ;;  %v5618_v20 = vrot.slane %v5617_v56, 2  ;;  %v5631_v15 = vadd.f32 %v5630_v59, %v5629_v58 }
 0x5bd   :  { %v5646_v13 = vrot.slane %v5645_v41, 2  ;;  %v5653_v55 = vrot.slane %v5652_v48, 2  ;;  %v5659_v61 = vadd.f32 %v5658_v18, %v5657_v38  ;;  %v5665_v23 = vrot.slane %v5664_v30, 4 }
 0x5be   :  { %v5625_v0 = vrot.slane %v5624_v24, 2  ;;  %v5638_v45 = vadd.f32 %v5637_v28, %v5636_v57  ;;  %v5619_v46 = vadd.f32 %v5618_v20, %v5617_v56  ;;  %v5632_v12 = vrot.slane %v5631_v15, 2 }
 0x5bf   :  { %v5647_v47 = vadd.f32 %v5646_v13, %v5645_v41  ;;  %v5654_v31 = vadd.f32 %v5653_v55, %v5652_v48  ;;  %v5660_v37 = vrot.slane %v5659_v61, 2  ;;  %v5666_v49 = vadd.f32 %v5665_v23, %v5664_v30 }
 0x5c0   :  { %v5626_v26 = vadd.f32 %v5625_v0, %v5624_v24  ;;  %v5639_v1 = vrot.slane %v5638_v45, 2  ;;  %v5620_v58 = vrot.slane %v5619_v46, 1  ;;  %v5633_v40 = vadd.f32 %v5632_v12, %v5631_v15 }
 0x5c1   :  { %v5648_v28 = vrot.slane %v5647_v47, 1  ;;  %v5655_v20 = vrot.slane %v5654_v31, 1  ;;  %v5661_v56 = vadd.f32 %v5660_v37, %v5659_v61  ;;  %v6463_v38 = vrot.slane %v12913_v2, 4 }
 0x5c2   :  { %v5627_v59 = vrot.slane %v5626_v26, 1  ;;  %v5640_v57 = vadd.f32 %v5639_v1, %v5638_v45  ;;  %v5621_v53 = vadd.f32 %v5620_v58, %v5619_v46  ;;  %v5634_v36 = vrot.slane %v5633_v40, 1 }
 0x5c3   :  { %v5667_v0 = vrot.slane %v5666_v49, 2  ;;  %v5649_v41 = vadd.f32 %v5648_v28, %v5647_v47  ;;  %v5656_v62 = vadd.f32 %v5655_v20, %v5654_v31  ;;  %v5662_v34 = vrot.slane %v5661_v56, 1 }
 0x5c4   :  { %v5628_v18 = vadd.f32 %v5627_v59, %v5626_v26  ;;  %v5641_v24 = vrot.slane %v5640_v57, 1  ;;  %v5635_v13 = vadd.f32 %v5634_v36, %v5633_v40  ;;  %v6511_v12 = vmul.f32 0.25, %v5621_v53 }
 0x5c5   :  { %v5668_v48 = vadd.f32 %v5667_v0, %v5666_v49  ;;  %v5663_v45 = vadd.f32 %v5662_v34, %v5661_v56  ;;  %v5468_v61 = vcombine.high %v12907_v43, %v12907_v43  ;;  %v16220_v36 = vrot.slane %v12902_v39, 4 }
 0x5c6   :  { %v5642_v15 = vadd.f32 %v5641_v24, %v5640_v57  ;;  %v6512_v55 = vmul.f32 0.25, %v5628_v18  ;;  %v6513_v1 = vmul.f32 0.25, %v5635_v13  ;;  %v6469_v49 = vsel %vm15930_vm10, %v12907_v43, 0.0  ;;  %v16259_v24 = vld [vmem:[#allocation17_spill] sm:$0xff] }
 0x5c7   :  { %v5669_v30 = vrot.slane %v5668_v48, 1  ;;  %v6457_v47 = vadd.f32 %v16220_v36, %v12902_v39  ;;  %v6515_v23 = vmul.f32 0.25, %v5649_v41  ;;  %v6464_v58 = vadd.f32 %v6463_v38, %v12913_v2  ;;  %v16229_v36 = vld [vmem:[#allocation23_spill] sm:$0xff] }
 0x5c8   :  { %v6514_v46 = vmul.f32 0.25, %v5642_v15  ;;  %v6818_v26 = vsel %vm15927_vm13, %v6512_v55, %v6511_v12  ;;  %v6516_v31 = vmul.f32 0.25, %v5656_v62  ;;  %v6517_v59 = vmul.f32 0.25, %v5663_v45 }
 0x5c9   :  { %v6820_v34 = vsel %vm15923_vm14, %v6513_v1, %v6818_v26  ;;  %v5670_v40 = vadd.f32 %v5669_v30, %v5668_v48  ;;  %v6458_v39 = vrot.slane %v6457_v47, 2  ;;  %v6470_v20 = vrot.slane %v6469_v49, 4  ;;  %v16226_v30 = vld [vmem:[#allocation20_spill] sm:$0xff]  ;;  %v16228_v26 = vld [vmem:[#allocation22_spill] sm:$0xff] }
 0x5ca   :  { %v6822_v37 = vsel %vm15919_vm15, %v6514_v46, %v6820_v34  ;;  %v6465_v56 = vrot.slane %v6464_v58, 2  ;;  %v12939_v18 = vsel %vm15930_vm10, %v5468_v61, 0.0  ;;  %v12952_v13 = vadd.f32 %v16218_v25, %v12665_v32  ;;  %v16225_v61 = vld [vmem:[#allocation19_spill] sm:$0xff]  ;;  %v16227_v46 = vld [vmem:[#allocation21_spill] sm:$0xff] }
 0x5cb   :  { %v6824_v57 = vsel %vm15916_vm11, %v6515_v23, %v6822_v37  ;;  %v6518_v28 = vmul.f32 0.25, %v5670_v40  ;;  %16221 = vst [vmem:[#allocation6_spill] sm:$0xff] %v12939_v18  ;;  %v12943_v62 = vadd.f32 %v6458_v39, %v6457_v47  ;;  %v12945_v38 = vadd.f32 %v6470_v20, %v6469_v49  ;;  %v16230_v47 = vld [vmem:[#allocation24_spill] sm:$0xff]  ;;  %v16263_v34 = vld [vmem:[#allocation33_spill] sm:$0xff]  ;;  %v16265_v18 = vld [vmem:[#allocation34_spill] sm:$0xff] }
 0x5cc   :  { %v6826_v53 = vsel %vm15915_vm12, %v6516_v31, %v6824_v57  ;;  %v12948_v0 = vadd.f32 %v6465_v56, %v6464_v58  ;;  %v12956_v41 = vadd.f32 %v16218_v25, %v12669_v50  ;;  %v12960_v15 = vadd.f32 %v16218_v25, %v12673_v22  ;;  %v16232_v58 = vld [vmem:[#allocation25_spill] sm:$0xff]  ;;  %v16233_v31 = vld [vmem:[#allocation26_spill] sm:$0xff]  ;;  %v16236_v39 = vld [vmem:[#allocation8_spill] sm:$0xff] }
 0x5cd   :  { %v6828_v43 = vsel %vm15914_vm9, %v6517_v59, %v6826_v53  ;;  %16222 = vst [vmem:[#allocation27_spill] sm:$0xff] %v12943_v62  ;;  %16223 = vst [vmem:[#allocation39_spill] sm:$0xff] %v12945_v38  ;;  %v12964_v48 = vadd.f32 %v16218_v25, %v12677_v10  ;;  %v12968_v12 = vadd.f32 %v16218_v25, %v12681_v54  ;;  %v16234_v59 = vld [vmem:[#allocation7_spill] sm:$0xff]  ;;  %v16271_v62 = vld [vmem:[#allocation37_spill] sm:$0xff]  ;;  %vm4626_vm7 = vcmp.ge.f32.partialorder %v12952_v13, 0.0 }
 0x5ce   :  { %v6830_v2 = vsel %vm15913_vm8, %v6518_v28, %v6828_v43  ;;  %16224 = vst [vmem:[#allocation40_spill] sm:$0xff] %v12948_v0  ;;  %v12972_v32 = vadd.f32 %v16218_v25, %v12685_v7  ;;  %v12976_v50 = vadd.f32 %v16218_v25, %v12689_v33  ;;  %v12980_v22 = vadd.f32 %v16218_v25, %v12693_v5  ;;  %v16235_v28 = vld [vmem:[#allocation28_spill] sm:$0xff]  ;;  %v16237_v43 = vld [vmem:[#allocation9_spill] sm:$0xff]  ;;  %v16267_v38 = vld [vmem:[#allocation35_spill] sm:$0xff] }
 0x5cf   :  { %6953 = vst.msk [vmem:[#allocation4 + $0x11] sm:$0xff] %vm15931_vm0, %v6830_v2  ;;  %v12984_v10 = vadd.f32 %v16218_v25, %v12697_v35  ;;  %v12988_v54 = vadd.f32 %v16218_v25, %v12701_v60  ;;  %v12992_v7 = vadd.f32 %v16218_v25, %v12705_v44  ;;  %v12996_v33 = vadd.f32 %v16218_v25, %v12709_v17  ;;  %v16239_v2 = vld [vmem:[#allocation10_spill] sm:$0xff]  ;;  %v16269_v0 = vld [vmem:[#allocation36_spill] sm:$0xff] }
 0x5d0   :  { %v13000_v5 = vadd.f32 %v16218_v25, %v12713_v4  ;;  %v13004_v35 = vadd.f32 %v16218_v25, %v12717_v27  ;;  %v13008_v60 = vadd.f32 %v16218_v25, %v12721_v6  ;;  %v13012_v44 = vadd.f32 %v16218_v25, %v12725_v42  ;;  %v16261_v6 = vld [vmem:[#allocation32_spill] sm:$0xff] }
 0x5d1   :  { %v13016_v17 = vadd.f32 %v16218_v25, %v12729_v11  ;;  %v13020_v4 = vadd.f32 %v16218_v25, %v12733_v21  ;;  %v13024_v27 = vadd.f32 %v16218_v25, %v12737_v14  ;;  %v13030_v42 = vadd.f32 %v16218_v25, %v12741_v8 }
 0x5d2   :  { %v13034_v11 = vadd.f32 %v16218_v25, %v12745_v9  ;;  %v13038_v21 = vadd.f32 %v16218_v25, %v12749_v51  ;;  %v13043_v14 = vadd.f32 %v16218_v25, %v12753_v16  ;;  %v13047_v1 = vadd.f32 %v16218_v25, %v12757_v29 }
 0x5d3   :  { %v13051_v8 = vadd.f32 %v16218_v25, %v12761_v19  ;;  %v13055_v9 = vadd.f32 %v16218_v25, %v12765_v52  ;;  %v13059_v51 = vadd.f32 %v16218_v25, %v12769_v63  ;;  %v13063_v16 = vadd.f32 %v16218_v25, %v12773_v3 }
 0x5d4   :  { %v13067_v29 = vadd.f32 %v16218_v25, %v16225_v61  ;;  %v13071_v19 = vadd.f32 %v16218_v25, %v16226_v30  ;;  %v13075_v52 = vadd.f32 %v16218_v25, %v16227_v46  ;;  %v13079_v63 = vadd.f32 %v16218_v25, %v16228_v26  ;;  %v16243_v30 = vld [vmem:[#allocation12_spill] sm:$0xff]  ;;  %v16245_v26 = vld [vmem:[#allocation13_spill] sm:$0xff] }
 0x5d5   :  { %v13083_v3 = vadd.f32 %v16218_v25, %v16229_v36  ;;  %v13087_v49 = vadd.f32 %v16218_v25, %v16230_v47  ;;  %v13094_v40 = vadd.f32 %v16218_v25, %v16232_v58  ;;  %v13098_v37 = vadd.f32 %v16218_v25, %v16233_v31  ;;  %v16247_v47 = vld [vmem:[#allocation14_spill] sm:$0xff]  ;;  %v16249_v31 = vld [vmem:[#allocation15_spill] sm:$0xff] }
 0x5d6   :  { %v7193_v55 = vld [vmem:[#allocation4 + $0x10] sm:$0xff]  ;;  %v13102_v57 = vadd.f32 %v16218_v25, %v16234_v59  ;;  %v13109_v53 = vadd.f32 %v16218_v25, %v16235_v28  ;;  %v13113_v20 = vadd.f32 %v16218_v25, %v16236_v39  ;;  %v13117_v56 = vadd.f32 %v16218_v25, %v16237_v43  ;;  %v16253_v43 = vld [vmem:[#allocation29_spill] sm:$0xff] }
 0x5d7   :  { %v7002_v45 = vld [vmem:[#allocation4 + $0x11] sm:$0xff]  ;;  %7225 = vrot.lane.b32.xlu0 %v7193_v55, %s9010_s18  ;;  %v13121_v55 = vadd.f32 %v16218_v25, %v16239_v2  ;;  %v13129_v46 = vadd.f32 %v16218_v25, %v16243_v30  ;;  %v13133_v36 = vadd.f32 %v16218_v25, %v16245_v26  ;;  %v13137_v58 = vadd.f32 %v16218_v25, %v16247_v47  ;;  %v16257_v26 = vld [vmem:[#allocation31_spill] sm:$0xff] }
 0x5d8   :  { %7035 = vrot.lane.b32.xlu1 %v7002_v45, %s9008_s28  ;;  %v13089_v23 = vld [vmem:[#allocation4 + $0x12] sm:$0xff]  ;;  %16238 = vst [vmem:[#allocation20_spill] sm:$0xff] %v13117_v56  ;;  %v13141_v59 = vadd.f32 %v16218_v25, %v16249_v31  ;;  %v13149_v2 = vadd.f32 %v16218_v25, %v16253_v43  ;;  %v13157_v47 = vadd.f32 %v16218_v25, %v16257_v26  ;;  %vm4627_vm6 = vcmp.ge.f32.partialorder %v12956_v41, 0.0 }
 0x5d9   :  { %16231 = vst [vmem:[#allocation19_spill] sm:$0xff] %v13089_v23  ;;  %16240 = vst [vmem:[#allocation21_spill] sm:$0xff] %v13121_v55  ;;  %v16251_v28 = vld [vmem:[#allocation16_spill] sm:$0xff]  ;;  %v13161_v31 = vadd.f32 %v16218_v25, %v16259_v24  ;;  %v13169_v43 = vadd.f32 %v16218_v25, %v16263_v34  ;;  %v13177_v26 = vadd.f32 %v16218_v25, %v16267_v38  ;;  %vm4628_vm5 = vcmp.ge.f32.partialorder %v12960_v15, 0.0  ;;  %v16273_v38 = vld [vmem:[#allocation38_spill] sm:$0xff] }
 0x5da   :  { %16244 = vst [vmem:[#allocation23_spill] sm:$0xff] %v13129_v46  ;;  %16246 = vst [vmem:[#allocation24_spill] sm:$0xff] %v13133_v36  ;;  %v13145_v39 = vadd.f32 %v16218_v25, %v16251_v28  ;;  %v13165_v28 = vadd.f32 %v16218_v25, %v16261_v6  ;;  %v13181_v24 = vadd.f32 %v16218_v25, %v16269_v0  ;;  %vm4629_vm4 = vcmp.ge.f32.partialorder %v12964_v48, 0.0 }
 0x5db   :  { %7321 = vrot.lane.b32.xlu0 %v7002_v45, %s9011_s10  ;;  %v16241_v45 = vld [vmem:[#allocation11_spill] sm:$0xff]  ;;  %16248 = vst [vmem:[#allocation25_spill] sm:$0xff] %v13137_v58  ;;  %16250 = vst [vmem:[#allocation26_spill] sm:$0xff] %v13141_v59  ;;  %v13185_v6 = vadd.f32 %v16218_v25, %v16271_v62  ;;  %vm4630_vm3 = vcmp.ge.f32.partialorder %v12968_v12, 0.0  ;;  %vm4631_vm2 = vcmp.ge.f32.partialorder %v12972_v32, 0.0  ;;  %vm4632_vm1 = vcmp.ge.f32.partialorder %v12976_v50, 0.0 }
 0x5dc   :  { %7131 = vrot.lane.b32.xlu1 %v13089_v23, %s9009_s20  ;;  %v13125_v61 = vadd.f32 %v16218_v25, %v16241_v45  ;;  %16252 = vst [vmem:[#allocation7_spill] sm:$0xff] %v13145_v39  ;;  %16254 = vst [vmem:[#allocation28_spill] sm:$0xff] %v13149_v2  ;;  %v16255_v45 = vld [vmem:[#allocation30_spill] sm:$0xff]  ;;  %vm4633_vm8 = vcmp.ge.f32.partialorder %v12980_v22, 0.0  ;;  %vm4634_vm9 = vcmp.ge.f32.partialorder %v12984_v10, 0.0  ;;  %vm4635_vm12 = vcmp.ge.f32.partialorder %v12988_v54, 0.0 }
 0x5dd   :  { %v13153_v30 = vadd.f32 %v16218_v25, %v16255_v45  ;;  %16258 = vst [vmem:[#allocation9_spill] sm:$0xff] %v13157_v47  ;;  %16260 = vst [vmem:[#allocation10_spill] sm:$0xff] %v13161_v31  ;;  %v13173_v45 = vadd.f32 %v16218_v25, %v16265_v18  ;;  %v4690_v18 = vmul.f32 0.01, %v12952_v13  ;;  %v4691_v62 = vmul.f32 0.01, %v12956_v41 }
 0x5de   :  { %16242 = vst [vmem:[#allocation22_spill] sm:$0xff] %v13125_v61  ;;  %16262 = vst [vmem:[#allocation11_spill] sm:$0xff] %v13165_v28  ;;  %v13201_v0 = vadd.f32 %v16218_v25, %v16273_v38  ;;  %vm4636_vm11 = vcmp.ge.f32.partialorder %v12992_v7, 0.0  ;;  %v4692_v34 = vmul.f32 0.01, %v12960_v15  ;;  %vm4637_vm15 = vcmp.ge.f32.partialorder %v12996_v33, 0.0 }
 0x5df   :  { %16256 = vst [vmem:[#allocation8_spill] sm:$0xff] %v13153_v30  ;;  %16264 = vst [vmem:[#allocation12_spill] sm:$0xff] %v13169_v43  ;;  %v4693_v23 = vmul.f32 0.01, %v12964_v48  ;;  %v13214_v25 = vsel %vm4626_vm7, %v12952_v13, %v4690_v18  ;;  %vm4638_vm14 = vcmp.ge.f32.partialorder %v13000_v5, 0.0  ;;  %v13223_v28 = vsel %vm4627_vm6, %v12956_v41, %v4691_v62 }
 0x5e0   :  { %16266 = vst [vmem:[#allocation13_spill] sm:$0xff] %v13173_v45  ;;  %16268 = vst [vmem:[#allocation14_spill] sm:$0xff] %v13177_v26  ;;  %v4696_v26 = vmul.f32 0.01, %v12976_v50  ;;  %v4697_v45 = vmul.f32 0.01, %v12980_v22 }
 0x5e1   :  { %16270 = vst [vmem:[#allocation15_spill] sm:$0xff] %v13181_v24  ;;  %16272 = vst [vmem:[#allocation16_spill] sm:$0xff] %v13185_v6  ;;  %v4694_v6 = vmul.f32 0.01, %v12968_v12  ;;  %v4695_v24 = vmul.f32 0.01, %v12972_v32  ;;  %v13253_v47 = vsel %vm4629_vm4, %v12964_v48, %v4693_v23 }
 0x5e2   :  { %16274 = vst [vmem:[#allocation29_spill] sm:$0xff] %v13201_v0  ;;  %16275 = vst [vmem:[#allocation30_spill] sm:$0xff] %v13214_v25  ;;  %v4698_v38 = vmul.f32 0.01, %v12984_v10  ;;  %v4699_v0 = vmul.f32 0.01, %v12988_v54  ;;  %v13238_v25 = vsel %vm4628_vm5, %v12960_v15, %v4692_v34 }
 0x5e3   :  { %v4700_v43 = vmul.f32 0.01, %v12992_v7  ;;  %16276 = vst [vmem:[#allocation31_spill] sm:$0xff] %v13223_v28  ;;  %vm4639_vm13 = vcmp.ge.f32.partialorder %v13004_v35, 0.0  ;;  %v13227_v31 = vmul.f32 0.01, %v12996_v33 }
 0x5e4   :  { %v13230_v13 = vmul.f32 0.01, %v13000_v5  ;;  %v13233_v18 = vmul.f32 0.01, %v13004_v35  ;;  %16277 = vst [vmem:[#allocation17_spill] sm:$0xff] %v13238_v25  ;;  %vm4640_vm7 = vcmp.ge.f32.partialorder %v13008_v60, 0.0 }
 0x5e5   :  { %v13242_v41 = vmul.f32 0.01, %v13008_v60  ;;  %v13245_v62 = vmul.f32 0.01, %v13012_v44  ;;  %v13248_v28 = vmul.f32 0.01, %v13016_v17 }
 0x5e6   :  { %16279 = vst [vmem:[#allocation33_spill] sm:$0xff] %v13253_v47  ;;  %vm4641_vm6 = vcmp.ge.f32.partialorder %v13012_v44, 0.0  ;;  %v13257_v15 = vmul.f32 0.01, %v13020_v4  ;;  %v13260_v34 = vmul.f32 0.01, %v13024_v27 }
 0x5e7   :  { %16278 = vst [vmem:[#allocation32_spill] sm:$0xff] %v13248_v28  ;;  %v13263_v25 = vmul.f32 0.01, %v13030_v42  ;;  %v13268_v28 = vsel %vm4630_vm3, %v12968_v12, %v4694_v6  ;;  %vm4642_vm5 = vcmp.ge.f32.partialorder %v13016_v17, 0.0  ;;  %v13272_v48 = vmul.f32 0.01, %v13034_v11 }
 0x5e8   :  { %16281 = vst [vmem:[#allocation35_spill] sm:$0xff] %v13268_v28  ;;  %v13275_v23 = vmul.f32 0.01, %v13038_v21  ;;  %v13278_v47 = vmul.f32 0.01, %v13043_v14  ;;  %vm4643_vm4 = vcmp.ge.f32.partialorder %v13020_v4, 0.0 }
 0x5e9   :  { %16280 = vst [vmem:[#allocation34_spill] sm:$0xff] %v13263_v25  ;;  %v13283_v25 = vsel %vm4631_vm2, %v12972_v32, %v4695_v24  ;;  %v13288_v12 = vmul.f32 0.01, %v13047_v1  ;;  %v13291_v6 = vmul.f32 0.01, %v13051_v8  ;;  %vm4645_vm2 = vcmp.ge.f32.partialorder %v13030_v42, 0.0 }
 0x5ea   :  { %16282 = vst [vmem:[#allocation36_spill] sm:$0xff] %v13278_v47  ;;  %16283 = vst [vmem:[#allocation37_spill] sm:$0xff] %v13283_v25  ;;  %v13294_v28 = vmul.f32 0.01, %v13055_v9  ;;  %v13299_v47 = vsel %vm4632_vm1, %v12976_v50, %v4696_v26  ;;  %v13306_v32 = vmul.f32 0.01, %v13059_v51  ;;  %v13317_v50 = vsel %vm4633_vm8, %v12980_v22, %v4697_v45 }
 0x5eb   :  { %16284 = vst [vmem:[#allocation38_spill] sm:$0xff] %v13299_v47  ;;  %v13309_v24 = vmul.f32 0.01, %v13063_v16  ;;  %v13312_v25 = vmul.f32 0.01, %v13067_v29  ;;  %16286 = vst [vmem:[#allocation42_spill] sm:$0xff] %v13317_v50  ;;  %v13335_v22 = vsel %vm4634_vm9, %v12984_v10, %v4698_v38  ;;  %v13353_v10 = vsel %vm4635_vm12, %v12988_v54, %v4699_v0 }
 0x5ec   :  { %vm4649_vm1 = vcmp.ge.f32.partialorder %v13047_v1, 0.0  ;;  %v13324_v26 = vmul.f32 0.01, %v13071_v19  ;;  %v13327_v47 = vmul.f32 0.01, %v13075_v52  ;;  %16288 = vst [vmem:[#allocation44_spill] sm:$0xff] %v13335_v22  ;;  %v13371_v54 = vsel %vm4636_vm11, %v12992_v7, %v4700_v43 }
 0x5ed   :  { %16285 = vst [vmem:[#allocation41_spill] sm:$0xff] %v13312_v25  ;;  %v13330_v25 = vmul.f32 0.01, %v13079_v63  ;;  %vm4653_vm8 = vcmp.ge.f32.partialorder %v13063_v16, 0.0  ;;  %v13342_v45 = vmul.f32 0.01, %v13083_v3  ;;  %v13390_v7 = vsel %vm4637_vm15, %v12996_v33, %v13227_v31 }
 0x5ee   :  { %v13345_v50 = vmul.f32 0.01, %v13087_v49  ;;  %16290 = vst [vmem:[#allocation46_spill] sm:$0xff] %v13353_v10  ;;  %vm4657_vm9 = vcmp.ge.f32.partialorder %v13079_v63, 0.0  ;;  %v13360_v38 = vmul.f32 0.01, %v13098_v37  ;;  %v13403_v33 = vsel %vm4638_vm14, %v13000_v5, %v13230_v13 }
 0x5ef   :  { %16287 = vst [vmem:[#allocation43_spill] sm:$0xff] %v13330_v25  ;;  %v13348_v25 = vmul.f32 0.01, %v13094_v40  ;;  %v13363_v22 = vmul.f32 0.01, %v13102_v57  ;;  %16292 = vst [vmem:[#allocation48_spill] sm:$0xff] %v13371_v54  ;;  %v13416_v5 = vsel %vm4639_vm13, %v13004_v35, %v13233_v18  ;;  %v13429_v35 = vsel %vm4640_vm7, %v13008_v60, %v13242_v41 }
 0x5f0   :  { %vm4661_vm12 = vcmp.ge.f32.partialorder %v13098_v37, 0.0  ;;  %v13378_v0 = vmul.f32 0.01, %v13113_v20  ;;  %v13381_v10 = vmul.f32 0.01, %v13117_v56  ;;  %16295 = vst [vmem:[#allocation51_spill] sm:$0xff] %v13390_v7  ;;  %v13442_v60 = vsel %vm4641_vm6, %v13012_v44, %v13245_v62 }
 0x5f1   :  { %16289 = vst [vmem:[#allocation45_spill] sm:$0xff] %v13348_v25  ;;  %v13366_v25 = vmul.f32 0.01, %v13109_v53  ;;  %vm4665_vm11 = vcmp.ge.f32.partialorder %v13117_v56, 0.0  ;;  %v4731_v43 = vmul.f32 0.01, %v13125_v61 }
 0x5f2   :  { %16293 = vst [vmem:[#allocation49_spill] sm:$0xff] %v13381_v10  ;;  %v4732_v54 = vmul.f32 0.01, %v13129_v46  ;;  %16296 = vst [vmem:[#allocation52_spill] sm:$0xff] %v13403_v33  ;;  %vm4669_vm15 = vcmp.ge.f32.partialorder %v13133_v36, 0.0  ;;  %vm4673_vm14 = vcmp.ge.f32.partialorder %v13149_v2, 0.0 }
 0x5f3   :  { %16291 = vst [vmem:[#allocation47_spill] sm:$0xff] %v13366_v25  ;;  %v13384_v25 = vmul.f32 0.01, %v13121_v55  ;;  %v4734_v31 = vmul.f32 0.01, %v13137_v58  ;;  %16297 = vst [vmem:[#allocation53_spill] sm:$0xff] %v13416_v5 }
 0x5f4   :  { %v4735_v7 = vmul.f32 0.01, %v13141_v59  ;;  %v4736_v46 = vmul.f32 0.01, %v13145_v39  ;;  %v16298_v13 = vld [vmem:[#allocation9_spill] sm:$0xff]  ;;  %v16299_v33 = vld [vmem:[#allocation10_spill] sm:$0xff] }
 0x5f5   :  { %16294 = vst [vmem:[#allocation50_spill] sm:$0xff] %v13384_v25  ;;  %v4733_v25 = vmul.f32 0.01, %v13133_v36  ;;  %v4737_v58 = vmul.f32 0.01, %v13149_v2  ;;  %16300 = vst [vmem:[#allocation54_spill] sm:$0xff] %v13429_v35 }
 0x5f6   :  { %v4738_v59 = vmul.f32 0.01, %v13153_v30  ;;  %v4739_v39 = vmul.f32 0.01, %v16298_v13  ;;  %v16301_v18 = vld [vmem:[#allocation11_spill] sm:$0xff]  ;;  %v16302_v5 = vld [vmem:[#allocation12_spill] sm:$0xff] }
 0x5f7   :  { %vm4677_vm13 = vcmp.ge.f32.partialorder %v16301_v18, 0.0  ;;  %v16303_v36 = vld [vmem:[#allocation13_spill] sm:$0xff]  ;;  %v16304_v61 = vld [vmem:[#allocation14_spill] sm:$0xff]  ;;  %v4740_v2 = vmul.f32 0.01, %v16299_v33  ;;  %16305 = vst [vmem:[#allocation55_spill] sm:$0xff] %v13442_v60  ;;  %v4771_v60 = vsel %vm4643_vm4, %v13020_v4, %v13257_v15 }
 0x5f8   :  { %vm4680_vm0 = vcmp.ge.f32.partialorder %v16304_v61, 0.0  ;;  %v4741_v30 = vmul.f32 0.01, %v16301_v18  ;;  %v4742_v13 = vmul.f32 0.01, %v16302_v5  ;;  %v16306_v41 = vld [vmem:[#allocation15_spill] sm:$0xff] }
 0x5f9   :  { %vm4681_vm7 = vcmp.ge.f32.partialorder %v16306_v41, 0.0  ;;  %v16307_v35 = vld [vmem:[#allocation16_spill] sm:$0xff]  ;;  %v16308_v55 = vld [vmem:[#allocation29_spill] sm:$0xff]  ;;  %v4743_v56 = vmul.f32 0.01, %v16303_v36  ;;  %vm16310_vm6 = vcmp.ge.f32.partialorder %v13024_v27, 0.0 }
 0x5fa   :  { %vm4683_vm3 = vcmp.ge.f32.partialorder %v16307_v35, 0.0  ;;  %v4744_v33 = vmul.f32 0.01, %v16304_v61  ;;  %v4745_v18 = vmul.f32 0.01, %v16306_v41  ;;  %v16309_v10 = vld [vmem:[#allocation32_spill] sm:$0xff]  ;;  %v4772_v61 = vsel %vm16310_vm6, %v13024_v27, %v13260_v34 }
 0x5fb   :  { %v4770_v5 = vsel %vm4642_vm5, %v13016_v17, %v16309_v10  ;;  %v4747_v44 = vmul.f32 0.01, %v16307_v35  ;;  %v4749_v62 = vmul.f32 0.01, %v16308_v55  ;;  %v16311_v41 = vld [vmem:[#allocation34_spill] sm:$0xff]  ;;  %vm16312_vm5 = vcmp.ge.f32.partialorder %v13034_v11, 0.0 }
 0x5fc   :  { %v4773_v36 = vsel %vm4645_vm2, %v13030_v42, %v16311_v41  ;;  %v4774_v17 = vsel %vm16312_vm5, %v13034_v11, %v13272_v48  ;;  %vm16313_vm10 = vcmp.ge.f32.partialorder %v13038_v21, 0.0  ;;  %v16314_v15 = vld [vmem:[#allocation36_spill] sm:$0xff]  ;;  %vm16315_vm4 = vcmp.ge.f32.partialorder %v13043_v14, 0.0  ;;  %v16319_v34 = vld [vmem:[#allocation41_spill] sm:$0xff]  ;;  %v16346_v41 = vld [vmem:[#allocation7_spill] sm:$0xff] }
 0x5fd   :  { %v4775_v4 = vsel %vm16313_vm10, %v13038_v21, %v13275_v23  ;;  %v4776_v27 = vsel %vm16315_vm4, %v13043_v14, %v16314_v15  ;;  %v4777_v42 = vsel %vm4649_vm1, %v13047_v1, %v13288_v12  ;;  %vm16316_vm2 = vcmp.ge.f32.partialorder %v13051_v8, 0.0  ;;  %v16326_v48 = vld [vmem:[#allocation45_spill] sm:$0xff]  ;;  %v16333_v12 = vld [vmem:[#allocation20_spill] sm:$0xff] }
 0x5fe   :  { %v4778_v11 = vsel %vm16316_vm2, %v13051_v8, %v13291_v6  ;;  %vm16317_vm6 = vcmp.ge.f32.partialorder %v13055_v9, 0.0  ;;  %vm16318_vm10 = vcmp.ge.f32.partialorder %v13059_v51, 0.0  ;;  %v4781_v1 = vsel %vm4653_vm8, %v13063_v16, %v13309_v24  ;;  %v16332_v23 = vld [vmem:[#allocation49_spill] sm:$0xff]  ;;  %v16334_v6 = vld [vmem:[#allocation50_spill] sm:$0xff]  ;;  %v16348_v15 = vld [vmem:[#allocation28_spill] sm:$0xff] }
 0x5ff   :  { %v4779_v21 = vsel %vm16317_vm6, %v13055_v9, %v13294_v28  ;;  %v4780_v14 = vsel %vm16318_vm10, %v13059_v51, %v13306_v32  ;;  %vm16320_vm1 = vcmp.ge.f32.partialorder %v13067_v29, 0.0  ;;  %vm16321_vm5 = vcmp.ge.f32.partialorder %v13071_v19, 0.0  ;;  %v16323_v28 = vld [vmem:[#allocation43_spill] sm:$0xff]  ;;  %v16335_v32 = vld [vmem:[#allocation21_spill] sm:$0xff]  ;;  %v16337_v24 = vld [vmem:[#allocation22_spill] sm:$0xff] }
 0x600   :  { %v4782_v8 = vsel %vm16320_vm1, %v13067_v29, %v16319_v34  ;;  %v4783_v9 = vsel %vm16321_vm5, %v13071_v19, %v13324_v26  ;;  %vm16322_vm4 = vcmp.ge.f32.partialorder %v13075_v52, 0.0  ;;  %v4785_v16 = vsel %vm4657_vm9, %v13079_v63, %v16323_v28  ;;  %v16349_v34 = vld [vmem:[#allocation8_spill] sm:$0xff]  ;;  %v16351_v28 = vld [vmem:[#allocation9_spill] sm:$0xff] }
 0x601   :  { %v4784_v51 = vsel %vm16322_vm4, %v13075_v52, %v13327_v47  ;;  %vm16324_vm8 = vcmp.ge.f32.partialorder %v13083_v3, 0.0  ;;  %vm16325_vm2 = vcmp.ge.f32.partialorder %v13087_v49, 0.0  ;;  %vm16327_vm6 = vcmp.ge.f32.partialorder %v13094_v40, 0.0  ;;  %v16329_v47 = vld [vmem:[#allocation47_spill] sm:$0xff] }
 0x602   :  { %v4786_v29 = vsel %vm16324_vm8, %v13083_v3, %v13342_v45  ;;  %v4787_v19 = vsel %vm16325_vm2, %v13087_v49, %v13345_v50  ;;  %v4788_v52 = vsel %vm16327_vm6, %v13094_v40, %v16326_v48  ;;  %v4789_v63 = vsel %vm4661_vm12, %v13098_v37, %v13360_v38  ;;  %v16342_v45 = vld [vmem:[#allocation25_spill] sm:$0xff]  ;;  %v16344_v38 = vld [vmem:[#allocation26_spill] sm:$0xff] }
 0x603   :  { %vm16328_vm9 = vcmp.ge.f32.partialorder %v13102_v57, 0.0  ;;  %vm16330_vm10 = vcmp.ge.f32.partialorder %v13109_v53, 0.0  ;;  %vm16331_vm1 = vcmp.ge.f32.partialorder %v13113_v20, 0.0  ;;  %v4793_v37 = vsel %vm4665_vm11, %v16333_v12, %v16332_v23  ;;  %v16353_v48 = vld [vmem:[#allocation10_spill] sm:$0xff]  ;;  %v16356_v23 = vld [vmem:[#allocation12_spill] sm:$0xff]  ;;  %v16358_v12 = vld [vmem:[#allocation13_spill] sm:$0xff] }
 0x604   :  { %v4790_v3 = vsel %vm16328_vm9, %v13102_v57, %v13363_v22  ;;  %v4791_v49 = vsel %vm16330_vm10, %v13109_v53, %v16329_v47  ;;  %v4792_v40 = vsel %vm16331_vm1, %v13113_v20, %v13378_v0  ;;  %vm16336_vm12 = vcmp.ge.f32.partialorder %v16335_v32, 0.0  ;;  %v16339_v53 = vld [vmem:[#allocation23_spill] sm:$0xff]  ;;  %v16341_v22 = vld [vmem:[#allocation24_spill] sm:$0xff] }
 0x605   :  { %v4794_v57 = vsel %vm16336_vm12, %v16335_v32, %v16334_v6  ;;  %vm16338_vm5 = vcmp.ge.f32.partialorder %v16337_v24, 0.0  ;;  %vm16340_vm4 = vcmp.ge.f32.partialorder %v16339_v53, 0.0  ;;  %v4797_v20 = vsel %vm4669_vm15, %v16341_v22, %v4733_v25  ;;  %v16355_v47 = vld [vmem:[#allocation11_spill] sm:$0xff]  ;;  %v16360_v6 = vld [vmem:[#allocation14_spill] sm:$0xff] }
 0x606   :  { %v4795_v50 = vsel %vm16338_vm5, %v16337_v24, %v4731_v43  ;;  %v4796_v26 = vsel %vm16340_vm4, %v16339_v53, %v4732_v54  ;;  %vm16343_vm11 = vcmp.ge.f32.partialorder %v16342_v45, 0.0  ;;  %vm16345_vm8 = vcmp.ge.f32.partialorder %v16344_v38, 0.0  ;;  %v16361_v32 = vld [vmem:[#allocation15_spill] sm:$0xff]  ;;  %v16363_v24 = vld [vmem:[#allocation30_spill] sm:$0xff] }
 0x607   :  { %v4798_v10 = vsel %vm16343_vm11, %v16342_v45, %v4734_v31  ;;  %v4799_v0 = vsel %vm16345_vm8, %v16344_v38, %v4735_v7  ;;  %vm16347_vm2 = vcmp.ge.f32.partialorder %v16346_v41, 0.0  ;;  %v4801_v54 = vsel %vm4673_vm14, %v16348_v15, %v4737_v58  ;;  %v16367_v45 = vld [vmem:[#allocation31_spill] sm:$0xff]  ;;  %v16369_v38 = vld [vmem:[#allocation33_spill] sm:$0xff] }
 0x608   :  { %v4800_v43 = vsel %vm16347_vm2, %v16346_v41, %v4736_v46  ;;  %vm16350_vm6 = vcmp.ge.f32.partialorder %v16349_v34, 0.0  ;;  %vm16352_vm15 = vcmp.ge.f32.partialorder %v16351_v28, 0.0  ;;  %vm16354_vm9 = vcmp.ge.f32.partialorder %v16353_v48, 0.0  ;;  %v16371_v41 = vld [vmem:[#allocation35_spill] sm:$0xff] }
 0x609   :  { %v4802_v25 = vsel %vm16350_vm6, %v16349_v34, %v4738_v59  ;;  %v4803_v31 = vsel %vm16352_vm15, %v16351_v28, %v4739_v39  ;;  %v4804_v7 = vsel %vm16354_vm9, %v16353_v48, %v4740_v2  ;;  %v4805_v46 = vsel %vm4677_vm13, %v16355_v47, %v4741_v30  ;;  %v16375_v34 = vld [vmem:[#allocation37_spill] sm:$0xff]  ;;  %v16379_v48 = vld [vmem:[#allocation44_spill] sm:$0xff] }
 0x60a   :  { %vm16357_vm10 = vcmp.ge.f32.partialorder %v16356_v23, 0.0  ;;  %vm16359_vm14 = vcmp.ge.f32.partialorder %v16358_v12, 0.0  ;;  %v4808_v39 = vsel %vm4680_vm0, %v16360_v6, %v4744_v33  ;;  %v4809_v2 = vsel %vm4681_vm7, %v16361_v32, %v4745_v18  ;;  %v16383_v6 = vld [vmem:[#allocation46_spill] sm:$0xff] }
 0x60b   :  { %v4806_v58 = vsel %vm16357_vm10, %v16356_v23, %v4742_v13  ;;  %v4807_v59 = vsel %vm16359_vm14, %v16358_v12, %v4743_v56  ;;  %v4811_v30 = vsel %vm4683_vm3, %v16307_v35, %v4747_v44  ;;  %vm16362_vm13 = vcmp.ge.f32.partialorder %v16308_v55, 0.0  ;;  %v16365_v56 = vld [vmem:[#allocation17_spill] sm:$0xff]  ;;  %v16373_v35 = vld [vmem:[#allocation38_spill] sm:$0xff]  ;;  %v16381_v23 = vld [vmem:[#allocation48_spill] sm:$0xff] }
 0x60c   :  { %v4813_v13 = vsel %vm16362_vm13, %v16308_v55, %v4749_v62  ;;  %vm16364_vm1 = vcmask 64512   ;;  %v16377_v62 = vld [vmem:[#allocation42_spill] sm:$0xff] }
 0x60d   :  { %v4820_v53 = vsel %vm16364_vm1, %v16363_v24, 0.0  ;;  %vm16366_vm12 = vmmov %vm16364_vm1  ;;  %v16385_v24 = vld [vmem:[#allocation51_spill] sm:$0xff] }
 0x60e   :  { %v4821_v22 = vsel %vm16366_vm12, %v16365_v56, 0.0  ;;  %vm16368_vm0 = vmmov %vm16364_vm1 }
 0x60f   :  { %v4823_v33 = vsel %vm16368_vm0, %v16367_v45, 0.0  ;;  %vm16370_vm5 = vmmov %vm16368_vm0  ;;  %v16387_v45 = vld [vmem:[#allocation52_spill] sm:$0xff] }
 0x610   :  { %v4824_v18 = vsel %vm16370_vm5, %v16369_v38, 0.0  ;;  %vm16372_vm7 = vmmov %vm16368_vm0 }
 0x611   :  { %v4826_v15 = vsel %vm16372_vm7, %v16371_v41, 0.0  ;;  %vm16374_vm3 = vmmov %vm16368_vm0  ;;  %v16389_v41 = vld [vmem:[#allocation54_spill] sm:$0xff] }
 0x612   :  { %v4827_v44 = vsel %vm16374_vm3, %v16373_v35, 0.0  ;;  %vm16376_vm4 = vmmov %vm16368_vm0 }
 0x613   :  { %v4829_v55 = vsel %vm16376_vm4, %v16375_v34, 0.0  ;;  %vm16378_vm11 = vmmov %vm16368_vm0  ;;  %v16391_v34 = vld [vmem:[#allocation53_spill] sm:$0xff] }
 0x614   :  { %v4830_v28 = vsel %vm16378_vm11, %v16377_v62, 0.0  ;;  %vm16380_vm8 = vmmov %vm16368_vm0 }
 0x615   :  { %v4832_v47 = vsel %vm16380_vm8, %v16379_v48, 0.0  ;;  %vm16382_vm2 = vmmov %vm16368_vm0  ;;  %v16393_v48 = vld [vmem:[#allocation55_spill] sm:$0xff] }
 0x616   :  { %v4833_v12 = vsel %vm16382_vm2, %v16381_v23, 0.0  ;;  %vm16384_vm6 = vmmov %vm16368_vm0 }
 0x617   :  { %v4835_v32 = vsel %vm16384_vm6, %v16383_v6, 0.0  ;;  %vm16386_vm15 = vmmov %vm16368_vm0 }
 0x618   :  { %v4836_v56 = vsel %vm16386_vm15, %v16385_v24, 0.0  ;;  %vm16388_vm9 = vmmov %vm16368_vm0 }
 0x619   :  { %v4838_v38 = vsel %vm16388_vm9, %v16387_v45, 0.0  ;;  %vm16390_vm10 = vmmov %vm16368_vm0  ;;  %v4847_v45 = vsel %vm16368_vm0, %v4771_v60, 0.0 }
 0x61a   :  { %v4839_v35 = vsel %vm16390_vm10, %v16389_v41, 0.0  ;;  %vm16392_vm14 = vmmov %vm16368_vm0 }
 0x61b   :  { %v4841_v62 = vsel %vm16392_vm14, %v16391_v34, 0.0  ;;  %vm16394_vm13 = vmmov %vm16368_vm0 }
 0x61c   :  { %v4842_v23 = vsel %vm16394_vm13, %v16393_v48, 0.0  ;;  %vm16395_vm1 = vmmov %vm16368_vm0 }
 0x61d   :  { %v4844_v6 = vsel %vm16395_vm1, %v4770_v5, 0.0  ;;  %vm16396_vm12 = vmmov %vm16368_vm0 }
 0x61e   :  { %v4845_v24 = vsel %vm16396_vm12, %v4772_v61, 0.0  ;;  %vm16397_vm5 = vmmov %vm16368_vm0 }
 0x61f   :  { %v4848_v41 = vsel %vm16397_vm5, %v4773_v36, 0.0  ;;  %vm16398_vm7 = vmmov %vm16368_vm0 }
 0x620   :  { %v4850_v34 = vsel %vm16398_vm7, %v4774_v17, 0.0  ;;  %vm16399_vm3 = vmmov %vm16368_vm0 }
 0x621   :  { %v4851_v48 = vsel %vm16399_vm3, %v4776_v27, 0.0  ;;  %vm16400_vm4 = vmmov %vm16368_vm0 }
 0x622   :  { %v4853_v5 = vsel %vm16400_vm4, %v4775_v4, 0.0  ;;  %vm16401_vm11 = vmmov %vm16368_vm0 }
 0x623   :  { %v4854_v61 = vsel %vm16401_vm11, %v4777_v42, 0.0  ;;  %vm16402_vm8 = vmmov %vm16368_vm0 }
 0x624   :  { %v4856_v60 = vsel %vm16402_vm8, %v4778_v11, 0.0  ;;  %vm16403_vm2 = vmmov %vm16368_vm0 }
 0x625   :  { %v4857_v36 = vsel %vm16403_vm2, %v4780_v14, 0.0  ;;  %vm16404_vm6 = vmmov %vm16368_vm0 }
 0x626   :  { %v13646_v17 = vsel %vm16404_vm6, %v4779_v21, 0.0  ;;  %vm16406_vm15 = vmmov %vm16368_vm0 }
 0x627   :  { %16405 = vst [vmem:[#allocation16_spill] sm:$0xff] %v13646_v17  ;;  %v13649_v27 = vsel %vm16406_vm15, %v4781_v1, 0.0  ;;  %vm16407_vm9 = vmmov %vm16368_vm0  ;;  %v13670_v1 = vsel %vm16368_vm0, %v4787_v19, 0.0 }
 0x628   :  { %v13652_v4 = vsel %vm16407_vm9, %v4782_v8, 0.0  ;;  %vm16408_vm10 = vmmov %vm16368_vm0 }
 0x629   :  { %v13655_v42 = vsel %vm16408_vm10, %v4784_v51, 0.0  ;;  %vm16409_vm14 = vmmov %vm16368_vm0 }
 0x62a   :  { %v13658_v11 = vsel %vm16409_vm14, %v4783_v9, 0.0  ;;  %vm16410_vm13 = vmmov %vm16368_vm0 }
 0x62b   :  { %v13661_v14 = vsel %vm16410_vm13, %v4785_v16, 0.0  ;;  %vm16411_vm1 = vmmov %vm16368_vm0 }
 0x62c   :  { %v13664_v21 = vsel %vm16411_vm1, %v4786_v29, 0.0  ;;  %vm16412_vm12 = vmmov %vm16368_vm0 }
 0x62d   :  { %v13667_v17 = vsel %vm16412_vm12, %v4788_v52, 0.0  ;;  %vm16413_vm5 = vmmov %vm16368_vm0 }
 0x62e   :  { %v13673_v8 = vsel %vm16413_vm5, %v4789_v63, 0.0  ;;  %vm16414_vm7 = vmmov %vm16368_vm0 }
 0x62f   :  { %v13676_v51 = vsel %vm16414_vm7, %v4790_v3, 0.0  ;;  %vm16415_vm3 = vmmov %vm16368_vm0 }
 0x630   :  { %v13679_v9 = vsel %vm16415_vm3, %v4792_v40, 0.0  ;;  %vm16416_vm4 = vmmov %vm16368_vm0 }
 0x631   :  { %v13682_v16 = vsel %vm16416_vm4, %v4791_v49, 0.0  ;;  %vm16417_vm11 = vmmov %vm16368_vm0 }
 0x632   :  { %v13685_v29 = vsel %vm16417_vm11, %v4793_v37, 0.0  ;;  %vm16418_vm8 = vmmov %vm16368_vm0 }
 0x633   :  { %v13688_v52 = vsel %vm16418_vm8, %v4794_v57, 0.0  ;;  %vm16419_vm2 = vmmov %vm16368_vm0 }
 0x634   :  { %v13691_v19 = vsel %vm16419_vm2, %v4796_v26, 0.0  ;;  %vm16420_vm6 = vmmov %vm16368_vm0 }
 0x635   :  { %v13694_v63 = vsel %vm16420_vm6, %v4795_v50, 0.0  ;;  %vm16421_vm15 = vmmov %vm16368_vm0  ;;  %vm16447_vm6 = vcmask 58368  }
 0x636   :  { %v13697_v3 = vsel %vm16421_vm15, %v4797_v20, 0.0  ;;  %vm16422_vm9 = vmmov %vm16368_vm0  ;;  %v13718_v20 = vsel %vm16368_vm0, %v4803_v31, 0.0 }
 0x637   :  { %v13700_v40 = vsel %vm16422_vm9, %v4798_v10, 0.0  ;;  %vm16423_vm10 = vmmov %vm16368_vm0  ;;  %16428 = vst [vmem:[#allocation29_spill] sm:$0xff] %v13718_v20  ;;  %v13741_v20 = vadd.f32 %v4827_v44, %v4826_v15 }
 0x638   :  { %v13703_v49 = vsel %vm16423_vm10, %v4800_v43, 0.0  ;;  %vm16424_vm14 = vmmov %vm16368_vm0 }
 0x639   :  { %v13706_v37 = vsel %vm16424_vm14, %v4799_v0, 0.0  ;;  %vm16425_vm13 = vmmov %vm16368_vm0 }
 0x63a   :  { %v13709_v57 = vsel %vm16425_vm13, %v4801_v54, 0.0  ;;  %vm16426_vm1 = vmmov %vm16368_vm0 }
 0x63b   :  { %v13712_v26 = vsel %vm16426_vm1, %v4802_v25, 0.0  ;;  %vm16427_vm12 = vmmov %vm16368_vm0 }
 0x63c   :  { %v13715_v50 = vsel %vm16427_vm12, %v4804_v7, 0.0  ;;  %vm16429_vm5 = vmmov %vm16368_vm0 }
 0x63d   :  { %v13721_v10 = vsel %vm16429_vm5, %v4805_v46, 0.0  ;;  %vm16431_vm7 = vmmov %vm16368_vm0  ;;  %v4822_v46 = vadd.f32 %v4821_v22, %v4820_v53  ;;  %v13755_v53 = vadd.f32 %v4845_v24, %v4844_v6  ;;  %v13757_v22 = vadd.f32 %v4848_v41, %v4847_v45 }
 0x63e   :  { %16430 = vst [vmem:[#allocation32_spill] sm:$0xff] %v13721_v10  ;;  %v13724_v43 = vsel %vm16431_vm7, %v4806_v58, 0.0  ;;  %vm16432_vm3 = vmmov %vm16368_vm0  ;;  %v4825_v10 = vadd.f32 %v4824_v18, %v4823_v33  ;;  %v13743_v58 = vadd.f32 %v4830_v28, %v4829_v55  ;;  %v13759_v33 = vadd.f32 %v4851_v48, %v4850_v34 }
 0x63f   :  { %v13727_v0 = vsel %vm16432_vm3, %v4808_v39, 0.0  ;;  %vm16434_vm4 = vmmov %vm16368_vm0  ;;  %v13745_v39 = vadd.f32 %v4833_v12, %v4832_v47  ;;  %16444 = vst [vmem:[#allocation49_spill] sm:$0xff] %v13755_v53  ;;  %v13765_v12 = vadd.f32 %v4854_v61, %v4853_v5  ;;  %vm16460_vm5 = vcmask 1042434  }
 0x640   :  { %16433 = vst [vmem:[#allocation34_spill] sm:$0xff] %v13727_v0  ;;  %v13730_v54 = vsel %vm16434_vm4, %v4807_v59, 0.0  ;;  %vm16436_vm11 = vmmov %vm16368_vm0  ;;  %v13747_v0 = vadd.f32 %v4836_v56, %v4835_v32  ;;  %v13749_v59 = vadd.f32 %v4839_v35, %v4838_v38  ;;  %v13767_v32 = vadd.f32 %v4857_v36, %v4856_v60 }
 0x641   :  { %16435 = vst [vmem:[#allocation36_spill] sm:$0xff] %v13730_v54  ;;  %v13733_v25 = vsel %vm16436_vm11, %v4809_v2, 0.0  ;;  %vm16438_vm8 = vmmov %vm16368_vm0  ;;  %v4976_v2 = vcombine.high %v4822_v46, %v4822_v46  ;;  %vm16462_vm7 = vcmask 1043459   ;;  %vm16464_vm3 = vcmask 1044484  }
 0x642   :  { %16437 = vst [vmem:[#allocation41_spill] sm:$0xff] %v13733_v25  ;;  %v13736_v7 = vsel %vm16438_vm8, %v4811_v30, 0.0  ;;  %vm16440_vm2 = vmmov %vm16368_vm0  ;;  %v16442_v25 = vld [vmem:[#allocation18_spill] sm:$0xff]  ;;  %v4993_v30 = vcombine.high %v4825_v10, %v4825_v10  ;;  %vm16459_vm0 = vcmask 1041409   ;;  %vm16467_vm4 = vcmask 1045509  }
 0x643   :  { %16439 = vst [vmem:[#allocation43_spill] sm:$0xff] %v13736_v7  ;;  %v13739_v31 = vsel %vm16440_vm2, %v4813_v13, 0.0  ;;  %16441 = vst [vmem:[#allocation45_spill] sm:$0xff] %v13747_v0  ;;  %v4983_v54 = vrot.slane %v4822_v46, %v16442_v25  ;;  %v5000_v7 = vrot.slane %v4825_v10, %v16442_v25  ;;  %v13753_v13 = vadd.f32 %v4842_v23, %v4841_v62 }
 0x644   :  { %16445 = vst [vmem:[#allocation20_spill] sm:$0xff] %v13757_v22  ;;  %16446 = vst [vmem:[#allocation50_spill] sm:$0xff] %v13759_v33  ;;  %v4990_v18 = vrot.slane %v4976_v2, %v16442_v25  ;;  %v5007_v44 = vrot.slane %v4993_v30, %v16442_v25  ;;  %vm16469_vm11 = vcmask 1046534   ;;  %vm16476_vm8 = vcmask 1047559  }
 0x645   :  { %16443 = vst [vmem:[#allocation47_spill] sm:$0xff] %v13753_v13  ;;  %v4991_v15 = vcombine.high %v4983_v54, %v4983_v54  ;;  %v5008_v55 = vcombine.high %v5000_v7, %v5000_v7  ;;  %v5671_v28 = vsel %vm16447_vm6, %v4983_v54, 0.0  ;;  %vm16448_vm15 = vmmov %vm16447_vm6 }
 0x646   :  { %v5699_v47 = vsel %vm16448_vm15, %v5000_v7, 0.0  ;;  %16449 = vst [vmem:[#allocation21_spill] sm:$0xff] %v13765_v12  ;;  %16450 = vst [vmem:[#allocation22_spill] sm:$0xff] %v13767_v32  ;;  %v4992_v56 = vcombine.high %v4990_v18, %v4990_v18  ;;  %v5009_v38 = vcombine.high %v5007_v44, %v5007_v44  ;;  %v5672_v35 = vrot.slane %v5671_v28, 4 }
 0x647   :  { %vm16451_vm9 = vmmov %vm16447_vm6  ;;  %v5700_v24 = vrot.slane %v5699_v47, 4 }
 0x648   :  { %v5678_v62 = vsel %vm16451_vm9, %v4991_v15, 0.0  ;;  %vm16452_vm10 = vmmov %vm16447_vm6  ;;  %v5673_v41 = vadd.f32 %v5672_v35, %v5671_v28 }
 0x649   :  { %v5679_v23 = vrot.slane %v5678_v62, 4  ;;  %v5685_v6 = vsel %vm16452_vm10, %v4990_v18, 0.0  ;;  %vm16453_vm14 = vmmov %vm16447_vm6  ;;  %v5701_v60 = vadd.f32 %v5700_v24, %v5699_v47 }
 0x64a   :  { %v5706_v45 = vsel %vm16453_vm14, %v5008_v55, 0.0  ;;  %v5686_v34 = vrot.slane %v5685_v6, 4  ;;  %vm16454_vm13 = vmmov %vm16447_vm6  ;;  %v5674_v54 = vrot.slane %v5673_v41, 2 }
 0x64b   :  { %v5692_v48 = vsel %vm16454_vm13, %v4992_v56, 0.0  ;;  %v5707_v10 = vrot.slane %v5706_v45, 4  ;;  %v5680_v5 = vadd.f32 %v5679_v23, %v5678_v62  ;;  %vm16455_vm1 = vmmov %vm16447_vm6  ;;  %v5702_v18 = vrot.slane %v5701_v60, 2 }
 0x64c   :  { %v5693_v61 = vrot.slane %v5692_v48, 4  ;;  %v5713_v36 = vsel %vm16455_vm1, %v5007_v44, 0.0  ;;  %v5687_v7 = vadd.f32 %v5686_v34, %v5685_v6  ;;  %vm16456_vm12 = vmmov %vm16455_vm1  ;;  %v5675_v55 = vadd.f32 %v5674_v54, %v5673_v41 }
 0x64d   :  { %v5708_v46 = vadd.f32 %v5707_v10, %v5706_v45  ;;  %v5714_v2 = vrot.slane %v5713_v36, 4  ;;  %v5681_v30 = vrot.slane %v5680_v5, 2  ;;  %v5720_v32 = vsel %vm16456_vm12, %v5009_v38, 0.0  ;;  %vm16496_vm6 = vmmov %vm16455_vm1 }
 0x64e   :  { %v5694_v15 = vadd.f32 %v5693_v61, %v5692_v48  ;;  %v5688_v28 = vrot.slane %v5687_v7, 2  ;;  %v5703_v62 = vadd.f32 %v5702_v18, %v5701_v60  ;;  %v5721_v23 = vrot.slane %v5720_v32, 4  ;;  %vm16504_vm15 = vmmov %vm16455_vm1 }
 0x64f   :  { %v5709_v35 = vrot.slane %v5708_v46, 2  ;;  %v5715_v12 = vadd.f32 %v5714_v2, %v5713_v36  ;;  %v5682_v56 = vadd.f32 %v5681_v30, %v5680_v5  ;;  %v5676_v47 = vrot.slane %v5675_v55, 1  ;;  %vm16505_vm9 = vmmov %vm16455_vm1 }
 0x650   :  { %v5695_v33 = vrot.slane %v5694_v15, 2  ;;  %v5689_v24 = vadd.f32 %v5688_v28, %v5687_v7  ;;  %v5704_v34 = vrot.slane %v5703_v62, 1  ;;  %v5722_v10 = vadd.f32 %v5721_v23, %v5720_v32  ;;  %v16457_v32 = vld [vmem:[#allocation16_spill] sm:$0xff]  ;;  %vm16506_vm10 = vmmov %vm16455_vm1 }
 0x651   :  { %v5710_v44 = vadd.f32 %v5709_v35, %v5708_v46  ;;  %v5716_v22 = vrot.slane %v5715_v12, 2  ;;  %v5683_v6 = vrot.slane %v5682_v56, 1  ;;  %v5677_v48 = vadd.f32 %v5676_v47, %v5675_v55  ;;  %vm16508_vm14 = vmmov %vm16455_vm1 }
 0x652   :  { %v5696_v45 = vadd.f32 %v5695_v33, %v5694_v15  ;;  %v5690_v61 = vrot.slane %v5689_v24, 1  ;;  %v5705_v13 = vadd.f32 %v5704_v34, %v5703_v62  ;;  %v5723_v36 = vrot.slane %v5722_v10, 2  ;;  %vm16509_vm13 = vmmov %vm16455_vm1 }
 0x653   :  { %v5711_v53 = vrot.slane %v5710_v44, 1  ;;  %v5717_v38 = vadd.f32 %v5716_v22, %v5715_v12  ;;  %v5684_v41 = vadd.f32 %v5683_v6, %v5682_v56  ;;  %v6519_v30 = vmul.f32 0.25, %v5677_v48  ;;  %v16478_v6 = vld [vmem:[#allocation41_spill] sm:$0xff]  ;;  %vm16510_vm12 = vmmov %vm16455_vm1 }
 0x654   :  { %v5697_v54 = vrot.slane %v5696_v45, 1  ;;  %v5691_v5 = vadd.f32 %v5690_v61, %v5689_v24  ;;  %v5724_v7 = vadd.f32 %v5723_v36, %v5722_v10  ;;  %v6523_v28 = vmul.f32 0.25, %v5705_v13  ;;  %v16485_v36 = vld [vmem:[#allocation49_spill] sm:$0xff] }
 0x655   :  { %v5712_v2 = vadd.f32 %v5711_v53, %v5710_v44  ;;  %v5718_v60 = vrot.slane %v5717_v38, 1  ;;  %v6520_v46 = vmul.f32 0.25, %v5684_v41  ;;  %v13777_v55 = vadd.f32 %v13649_v27, %v16457_v32  ;;  %v16491_v32 = vld [vmem:[#allocation22_spill] sm:$0xff] }
 0x656   :  { %v5698_v18 = vadd.f32 %v5697_v54, %v5696_v45  ;;  %v6521_v33 = vmul.f32 0.25, %v5691_v5  ;;  %v5725_v22 = vrot.slane %v5724_v7, 1  ;;  %v13782_v53 = vadd.f32 %v13655_v42, %v13652_v4 }
 0x657   :  { %v5719_v35 = vadd.f32 %v5718_v60, %v5717_v38  ;;  %v6524_v15 = vmul.f32 0.25, %v5712_v2  ;;  %16458 = vst [vmem:[#allocation23_spill] sm:$0xff] %v13777_v55  ;;  %v6831_v56 = vsel %vm16459_vm0, %v6520_v46, %v6519_v30  ;;  %v13787_v13 = vadd.f32 %v13661_v14, %v13658_v11  ;;  %v16483_v38 = vld [vmem:[#allocation47_spill] sm:$0xff]  ;;  %v16486_v60 = vld [vmem:[#allocation20_spill] sm:$0xff] }
 0x658   :  { %v6522_v12 = vmul.f32 0.25, %v5698_v18  ;;  %v6832_v23 = vsel %vm16460_vm5, %v6521_v33, %v6831_v56  ;;  %v13791_v47 = vadd.f32 %v13667_v17, %v13664_v21  ;;  %v5726_v27 = vadd.f32 %v5725_v22, %v5724_v7  ;;  %v16488_v7 = vld [vmem:[#allocation50_spill] sm:$0xff] }
 0x659   :  { %v6525_v62 = vmul.f32 0.25, %v5719_v35  ;;  %16461 = vst [vmem:[#allocation24_spill] sm:$0xff] %v13787_v13  ;;  %v13796_v44 = vadd.f32 %v13673_v8, %v13670_v1  ;;  %v13800_v4 = vadd.f32 %v13679_v9, %v13676_v51  ;;  %v13805_v11 = vadd.f32 %v13685_v29, %v13682_v16  ;;  %v16471_v29 = vld [vmem:[#allocation29_spill] sm:$0xff] }
 0x65a   :  { %v6833_v24 = vsel %vm16462_vm7, %v6522_v12, %v6832_v23  ;;  %v13809_v17 = vadd.f32 %v13691_v19, %v13688_v52  ;;  %v13813_v14 = vadd.f32 %v13697_v3, %v13694_v63  ;;  %v6526_v21 = vmul.f32 0.25, %v5726_v27  ;;  %v16472_v52 = vld [vmem:[#allocation32_spill] sm:$0xff]  ;;  %v16474_v63 = vld [vmem:[#allocation34_spill] sm:$0xff]  ;;  %v16489_v35 = vld [vmem:[#allocation21_spill] sm:$0xff] }
 0x65b   :  { %16463 = vst [vmem:[#allocation25_spill] sm:$0xff] %v13796_v44  ;;  %v6834_v42 = vsel %vm16464_vm3, %v6523_v28, %v6833_v24  ;;  %16465 = vst [vmem:[#allocation26_spill] sm:$0xff] %v13805_v11  ;;  %v13818_v8 = vadd.f32 %v13703_v49, %v13700_v40  ;;  %v13822_v51 = vadd.f32 %v13709_v57, %v13706_v37  ;;  %v16477_v49 = vld [vmem:[#allocation36_spill] sm:$0xff]  ;;  %v16480_v57 = vld [vmem:[#allocation43_spill] sm:$0xff] }
 0x65c   :  { %16466 = vst [vmem:[#allocation7_spill] sm:$0xff] %v13813_v14  ;;  %v6835_v1 = vsel %vm16467_vm4, %v6524_v15, %v6834_v42  ;;  %v13827_v16 = vadd.f32 %v13715_v50, %v13712_v26  ;;  %v13831_v19 = vadd.f32 %v16472_v52, %v16471_v29  ;;  %v13835_v3 = vadd.f32 %v16474_v63, %v13724_v43 }
 0x65d   :  { %16468 = vst [vmem:[#allocation28_spill] sm:$0xff] %v13822_v51  ;;  %v6836_v9 = vsel %vm16469_vm11, %v6525_v62, %v6835_v1  ;;  %v13840_v37 = vadd.f32 %v16478_v6, %v16477_v49  ;;  %v13844_v45 = vadd.f32 %v13739_v31, %v16480_v57  ;;  %v5010_v26 = vcombine.high %v13741_v20, %v13741_v20 }
 0x65e   :  { %16470 = vst [vmem:[#allocation8_spill] sm:$0xff] %v13827_v16  ;;  %16473 = vst [vmem:[#allocation9_spill] sm:$0xff] %v13831_v19  ;;  %v6837_v40 = vsel %vm16476_vm8, %v6526_v21, %v6836_v9  ;;  %v13851_v50 = vrot.slane %v13741_v20, %v16442_v25  ;;  %v5027_v43 = vcombine.high %v13743_v58, %v13743_v58 }
 0x65f   :  { %16475 = vst [vmem:[#allocation10_spill] sm:$0xff] %v13835_v3  ;;  %16479 = vst [vmem:[#allocation11_spill] sm:$0xff] %v13840_v37  ;;  %v13857_v34 = vrot.slane %v13743_v58, %v16442_v25  ;;  %v13863_v10 = vrot.slane %v13745_v39, %v16442_v25  ;;  %v13869_v20 = vrot.slane %v13747_v0, %v16442_v25 }
 0x660   :  { %16481 = vst [vmem:[#allocation12_spill] sm:$0xff] %v13844_v45  ;;  %6954 = vst.msk [vmem:[#allocation4 + $0x21] sm:$0xff] %vm16440_vm2, %v6837_v40  ;;  %v13875_v58 = vrot.slane %v13749_v59, %v16442_v25  ;;  %v13881_v54 = vrot.slane %v16483_v38, %v16442_v25  ;;  %v13887_v2 = vrot.slane %v16485_v36, %v16442_v25  ;;  %v5727_v52 = vsel %vm16496_vm6, %v13851_v50, 0.0 }
 0x661   :  { %16482 = vst [vmem:[#allocation13_spill] sm:$0xff] %v13869_v20  ;;  %v13893_v18 = vrot.slane %v16486_v60, %v16442_v25  ;;  %v13899_v28 = vrot.slane %v16488_v7, %v16442_v25  ;;  %v13905_v15 = vrot.slane %v16489_v35, %v16442_v25  ;;  %v13911_v12 = vrot.slane %v16491_v32, %v16442_v25  ;;  %vm16536_vm6 = vmmov %vm16455_vm1 }
 0x662   :  { %16484 = vst [vmem:[#allocation14_spill] sm:$0xff] %v13881_v54  ;;  %v13917_v62 = vrot.slane %v13777_v55, %v16442_v25  ;;  %v13923_v27 = vrot.slane %v13782_v53, %v16442_v25  ;;  %v13929_v42 = vrot.slane %v13787_v13, %v16442_v25  ;;  %v13937_v29 = vrot.slane %v13791_v47, %v16442_v25 }
 0x663   :  { %16487 = vst [vmem:[#allocation15_spill] sm:$0xff] %v13893_v18  ;;  %16490 = vst [vmem:[#allocation30_spill] sm:$0xff] %v13905_v15  ;;  %v13943_v63 = vrot.slane %v13796_v44, %v16442_v25  ;;  %v13952_v49 = vrot.slane %v13800_v4, %v16442_v25  ;;  %v13958_v57 = vrot.slane %v13805_v11, %v16442_v25  ;;  %v5728_v31 = vrot.slane %v5727_v52, 4 }
 0x664   :  { %16492 = vst [vmem:[#allocation17_spill] sm:$0xff] %v13917_v62  ;;  %16493 = vst [vmem:[#allocation31_spill] sm:$0xff] %v13929_v42  ;;  %v13966_v56 = vrot.slane %v13809_v17, %v16442_v25  ;;  %v13972_v6 = vrot.slane %v13813_v14, %v16442_v25  ;;  %v13978_v41 = vrot.slane %v13818_v8, %v16442_v25 }
 0x665   :  { %16494 = vst [vmem:[#allocation33_spill] sm:$0xff] %v13943_v63  ;;  %16495 = vst [vmem:[#allocation35_spill] sm:$0xff] %v13958_v57  ;;  %v13984_v24 = vrot.slane %v13822_v51, %v16442_v25  ;;  %v13990_v40 = vrot.slane %v13827_v16, %v16442_v25  ;;  %v13996_v21 = vrot.slane %v13831_v19, %v16442_v25 }
 0x666   :  { %16497 = vst [vmem:[#allocation38_spill] sm:$0xff] %v13972_v6  ;;  %v14002_v23 = vrot.slane %v13835_v3, %v16442_v25  ;;  %v14008_v22 = vrot.slane %v13840_v37, %v16442_v25  ;;  %v14015_v46 = vrot.slane %v13844_v45, %v16442_v25  ;;  %v5024_v48 = vrot.slane %v5010_v26, %v16442_v25 }
 0x667   :  { %v7290_v1 = vld [vmem:[#allocation4 + $0x21] sm:$0xff]  ;;  %16498 = vst [vmem:[#allocation37_spill] sm:$0xff] %v13984_v24  ;;  %16499 = vst [vmem:[#allocation42_spill] sm:$0xff] %v13990_v40  ;;  %v5025_v5 = vcombine.high %v13851_v50, %v13851_v50  ;;  %v5041_v33 = vrot.slane %v5027_v43, %v16442_v25  ;;  %v5042_v61 = vcombine.high %v13857_v34, %v13857_v34 }
 0x668   :  { %v13933_v9 = vld [vmem:[#allocation4 + $0x20] sm:$0xff]  ;;  %7323 = vrot.lane.b32.xlu0 %v7290_v1, %s9011_s10  ;;  %16500 = vst [vmem:[#allocation44_spill] sm:$0xff] %v13996_v21  ;;  %16501 = vst [vmem:[#allocation48_spill] sm:$0xff] %v14002_v23  ;;  %v5026_v37 = vcombine.high %v5024_v48, %v5024_v48  ;;  %v5741_v45 = vsel %vm16506_vm10, %v5024_v48, 0.0  ;;  %v5729_v26 = vadd.f32 %v5728_v31, %v5727_v52  ;;  %v16507_v50 = vld [vmem:[#allocation19_spill] sm:$0xff] }
 0x669   :  { %7227 = vrot.lane.b32.xlu1 %v13933_v9, %s9010_s18  ;;  %16502 = vst [vmem:[#allocation46_spill] sm:$0xff] %v14008_v22  ;;  %16503 = vst [vmem:[#allocation51_spill] sm:$0xff] %v14015_v46  ;;  %v5734_v30 = vsel %vm16505_vm9, %v5025_v5, 0.0  ;;  %v5043_v51 = vcombine.high %v5041_v33, %v5041_v33  ;;  %v5742_v11 = vrot.slane %v5741_v45, 4  ;;  %v5762_v13 = vsel %vm16509_vm13, %v5042_v61, 0.0  ;;  %v14033_v52 = vld [vmem:[#allocation4 + $0x22] sm:$0xff] }
 0x66a   :  { %v5735_v14 = vrot.slane %v5734_v30, 4  ;;  %v5748_v43 = vsel %vm16508_vm14, %v5026_v37, 0.0  ;;  %v5730_v55 = vrot.slane %v5729_v26, 2  ;;  %v5763_v38 = vrot.slane %v5762_v13, 4  ;;  %vm16539_vm9 = vmmov %vm16455_vm1 }
 0x66b   :  { %v5743_v5 = vadd.f32 %v5742_v11, %v5741_v45  ;;  %v5749_v60 = vrot.slane %v5748_v43, 4  ;;  %v5776_v31 = vsel %vm16510_vm12, %v5043_v51, 0.0  ;;  %vm16540_vm10 = vmmov %vm16455_vm1 }
 0x66c   :  { %v5736_v35 = vadd.f32 %v5735_v14, %v5734_v30  ;;  %v5731_v46 = vadd.f32 %v5730_v55, %v5729_v26  ;;  %v5764_v61 = vadd.f32 %v5763_v38, %v5762_v13  ;;  %v5777_v14 = vrot.slane %v5776_v31, 4  ;;  %vm16542_vm14 = vmmov %vm16455_vm1 }
 0x66d   :  { %7037 = vrot.lane.b32.xlu1 %v7290_v1, %s9008_s28  ;;  %v5755_v1 = vsel %vm16504_vm15, %v13857_v34, 0.0  ;;  %v5769_v34 = vsel %vm16455_vm1, %v5041_v33, 0.0  ;;  %v5744_v22 = vrot.slane %v5743_v5, 2  ;;  %v5750_v37 = vadd.f32 %v5749_v60, %v5748_v43  ;;  %vm16537_vm15 = vmmov %vm16455_vm1 }
 0x66e   :  { %v5756_v19 = vrot.slane %v5755_v1, 4  ;;  %v5770_v0 = vrot.slane %v5769_v34, 4  ;;  %v5732_v11 = vrot.slane %v5731_v46, 1  ;;  %v5765_v3 = vrot.slane %v5764_v61, 2  ;;  %vm16543_vm13 = vmmov %vm16455_vm1 }
 0x66f   :  { %v5745_v30 = vadd.f32 %v5744_v22, %v5743_v5  ;;  %v5778_v21 = vadd.f32 %v5777_v14, %v5776_v31  ;;  %vm16545_vm12 = vmmov %vm16455_vm1 }
 0x670   :  { %v5757_v44 = vadd.f32 %v5756_v19, %v5755_v1  ;;  %v5771_v33 = vadd.f32 %v5770_v0, %v5769_v34  ;;  %v5751_v1 = vrot.slane %v5750_v37, 2  ;;  %v5733_v40 = vadd.f32 %v5732_v11, %v5731_v46 }
 0x671   :  { %7417 = vrot.lane.b32.xlu1 %v16507_v50, %s9012_s27  ;;  %v5737_v50 = vrot.slane %v5736_v35, 2  ;;  %v5746_v26 = vrot.slane %v5745_v30, 1  ;;  %v5779_v0 = vrot.slane %v5778_v21, 2 }
 0x672   :  { %v5758_v48 = vrot.slane %v5757_v44, 2  ;;  %v5772_v51 = vrot.slane %v5771_v33, 2  ;;  %v5752_v16 = vadd.f32 %v5751_v1, %v5750_v37  ;;  %v6527_v22 = vmul.f32 0.25, %v5733_v40 }
 0x673   :  { %v5738_v45 = vadd.f32 %v5737_v50, %v5736_v35  ;;  %v5747_v43 = vadd.f32 %v5746_v26, %v5745_v30  ;;  %v16511_v37 = vcombine.high %v13745_v39, %v13745_v39 }
 0x674   :  { %v5759_v19 = vadd.f32 %v5758_v48, %v5757_v44  ;;  %v5766_v44 = vadd.f32 %v5765_v3, %v5764_v61  ;;  %v5773_v13 = vadd.f32 %v5772_v51, %v5771_v33  ;;  %v5753_v35 = vrot.slane %v5752_v16, 1 }
 0x675   :  { %7133 = vrot.lane.b32.xlu1 %v14033_v52, %s9009_s20  ;;  %v5739_v55 = vrot.slane %v5738_v45, 1  ;;  %v5780_v48 = vadd.f32 %v5779_v0, %v5778_v21  ;;  %v6529_v14 = vmul.f32 0.25, %v5747_v43  ;;  %v16512_v21 = vcombine.high %v13749_v59, %v13749_v59 }
 0x676   :  { %v5760_v23 = vrot.slane %v5759_v19, 1  ;;  %v5767_v34 = vrot.slane %v5766_v44, 1  ;;  %v5774_v5 = vrot.slane %v5773_v13, 1  ;;  %v5754_v31 = vadd.f32 %v5753_v35, %v5752_v16 }
 0x677   :  { %v5740_v38 = vadd.f32 %v5739_v55, %v5738_v45  ;;  %v14054_v11 = vrot.slane %v16512_v21, %v16442_v25  ;;  %v16514_v35 = vcombine.high %v16488_v7, %v16488_v7 }
 0x678   :  { %v5761_v60 = vadd.f32 %v5760_v23, %v5759_v19  ;;  %v5768_v3 = vadd.f32 %v5767_v34, %v5766_v44  ;;  %v5775_v23 = vadd.f32 %v5774_v5, %v5773_v13  ;;  %v5781_v19 = vrot.slane %v5780_v48, 1 }
 0x679   :  { %7514 = vrot.lane.b32.xlu1 %v13933_v9, %s9013_s15  ;;  %v6528_v46 = vmul.f32 0.25, %v5740_v38  ;;  %v14043_v9 = vrot.slane %v16511_v37, %v16442_v25  ;;  %v6530_v40 = vmul.f32 0.25, %v5754_v31 }
 0x67a   :  { %v6531_v50 = vmul.f32 0.25, %v5761_v60  ;;  %v5782_v39 = vadd.f32 %v5781_v19, %v5780_v48  ;;  %v6532_v45 = vmul.f32 0.25, %v5768_v3  ;;  %v6533_v30 = vmul.f32 0.25, %v5775_v23 }
 0x67b   :  { %v6838_v33 = vsel %vm16459_vm0, %v6528_v46, %v6527_v22  ;;  %v16513_v60 = vcombine.high %v16485_v36, %v16485_v36  ;;  %v14078_v22 = vrot.slane %v16514_v35, %v16442_v25  ;;  %v16515_v48 = vcombine.high %v16491_v32, %v16491_v32  ;;  %vm16547_vm0 = vmmov %vm16455_vm1 }
 0x67c   :  { %v6839_v1 = vsel %vm16460_vm5, %v6529_v14, %v6838_v33  ;;  %v6534_v44 = vmul.f32 0.25, %v5782_v39  ;;  %v16517_v14 = vcombine.high %v13782_v53, %v13782_v53  ;;  %v16518_v23 = vcombine.high %v13791_v47, %v13791_v47  ;;  %vm16549_vm5 = vmmov %vm16547_vm0 }
 0x67d   :  { %v6840_v51 = vsel %vm16462_vm7, %v6530_v40, %v6839_v1  ;;  %v14066_v59 = vrot.slane %v16513_v60, %v16442_v25  ;;  %v16519_v33 = vcombine.high %v13800_v4, %v13800_v4  ;;  %v14171_v47 = vsel %vm16536_vm6, %v13863_v10, 0.0  ;;  %vm16551_vm7 = vmmov %vm16547_vm0 }
 0x67e   :  { %v6841_v13 = vsel %vm16464_vm3, %v6531_v50, %v6840_v51  ;;  %v14089_v50 = vrot.slane %v16515_v48, %v16442_v25  ;;  %v14100_v37 = vrot.slane %v16517_v14, %v16442_v25  ;;  %v14111_v19 = vrot.slane %v16518_v23, %v16442_v25  ;;  %v16530_v14 = vld [vmem:[#allocation10_spill] sm:$0xff]  ;;  %vm16552_vm3 = vmmov %vm16547_vm0 }
 0x67f   :  { %v6842_v43 = vsel %vm16467_vm4, %v6532_v45, %v6841_v13  ;;  %v14121_v21 = vrot.slane %v16519_v33, %v16442_v25  ;;  %v16521_v45 = vcombine.high %v13809_v17, %v13809_v17  ;;  %v16523_v51 = vcombine.high %v13818_v8, %v13818_v8  ;;  %v16525_v13 = vld [vmem:[#allocation8_spill] sm:$0xff]  ;;  %v16534_v17 = vld [vmem:[#allocation46_spill] sm:$0xff]  ;;  %vm16554_vm4 = vmmov %vm16547_vm0 }
 0x680   :  { %v6843_v5 = vsel %vm16469_vm11, %v6533_v30, %v6842_v43  ;;  %16516 = vst [vmem:[#allocation52_spill] sm:$0xff] %v14089_v50  ;;  %v16526_v43 = vcombine.high %v16525_v13, %v16525_v13  ;;  %v16531_v23 = vcombine.high %v16530_v14, %v16530_v14  ;;  %v14175_v8 = vsel %vm16537_vm15, %v13869_v20, 0.0  ;;  %vm16555_vm11 = vmmov %vm16547_vm0 }
 0x681   :  { %v6844_v46 = vsel %vm16476_vm8, %v6534_v44, %v6843_v5  ;;  %16520 = vst [vmem:[#allocation54_spill] sm:$0xff] %v14121_v21  ;;  %v14131_v30 = vrot.slane %v16521_v45, %v16442_v25  ;;  %v14141_v60 = vrot.slane %v16523_v51, %v16442_v25  ;;  %v16528_v5 = vld [vmem:[#allocation42_spill] sm:$0xff]  ;;  %v16533_v45 = vld [vmem:[#allocation48_spill] sm:$0xff]  ;;  %16538 = vst [vmem:[#allocation32_spill] sm:$0xff] %v14175_v8  ;;  %v14179_v14 = vsel %vm16539_vm9, %v13875_v58, 0.0 }
 0x682   :  { %6955 = vst.msk [vmem:[#allocation4 + $0x31] sm:$0xff] %vm16440_vm2, %v6844_v46  ;;  %v14151_v35 = vrot.slane %v16526_v43, %v16442_v25  ;;  %v16529_v46 = vld [vmem:[#allocation44_spill] sm:$0xff]  ;;  %v14161_v33 = vrot.slane %v16531_v23, %v16442_v25  ;;  %v16535_v43 = vld [vmem:[#allocation51_spill] sm:$0xff]  ;;  %v14183_v23 = vsel %vm16540_vm10, %v13881_v54, 0.0  ;;  %v14187_v13 = vsel %vm16542_vm14, %v13887_v2, 0.0  ;;  %vm16557_vm8 = vmmov %vm16547_vm0 }
 0x683   :  { %16522 = vst [vmem:[#allocation53_spill] sm:$0xff] %v14131_v30  ;;  %16524 = vst [vmem:[#allocation55_spill] sm:$0xff] %v14141_v60  ;;  %v14191_v4 = vsel %vm16543_vm13, %v13893_v18, 0.0  ;;  %v14195_v53 = vsel %vm16455_vm1, %v13899_v28, 0.0  ;;  %v14199_v32 = vsel %vm16545_vm12, %v13905_v15, 0.0  ;;  %v14203_v7 = vsel %vm16547_vm0, %v13911_v12, 0.0 }
 0x684   :  { %16527 = vst [vmem:[#allocation16_spill] sm:$0xff] %v14151_v35  ;;  %16532 = vst [vmem:[#allocation29_spill] sm:$0xff] %v14161_v33  ;;  %v14209_v38 = vsel %vm16549_vm5, %v13917_v62, 0.0  ;;  %v14213_v26 = vsel %vm16551_vm7, %v13923_v27, 0.0  ;;  %v14217_v16 = vsel %vm16552_vm3, %v13929_v42, 0.0  ;;  %v14221_v51 = vsel %vm16554_vm4, %v13937_v29, 0.0 }
 0x685   :  { %16541 = vst [vmem:[#allocation34_spill] sm:$0xff] %v14183_v23  ;;  %16544 = vst [vmem:[#allocation36_spill] sm:$0xff] %v14191_v4  ;;  %v14227_v48 = vsel %vm16555_vm11, %v13943_v63, 0.0  ;;  %v14231_v44 = vsel %vm16557_vm8, %v13952_v49, 0.0  ;;  %vm16567_vm13 = vcmask 64512   ;;  %v7578_v63 = vld [vmem:[#allocation4 + $0x21] sm:$0xff]  ;;  %v16577_v62 = vcombine.high %v13875_v58, %v13875_v58 }
 0x686   :  { %16546 = vst [vmem:[#allocation41_spill] sm:$0xff] %v14199_v32  ;;  %16550 = vst [vmem:[#allocation49_spill] sm:$0xff] %v14209_v38  ;;  %v5896_v54 = vrot.slane %v14187_v13, 4  ;;  %v16581_v42 = vcombine.high %v13887_v2, %v13887_v2  ;;  %v16585_v23 = vcombine.high %v13899_v28, %v13899_v28  ;;  %v6064_v25 = vrot.slane %v14213_v26, 4 }
 0x687   :  { %16553 = vst [vmem:[#allocation50_spill] sm:$0xff] %v14217_v16  ;;  %16556 = vst [vmem:[#allocation22_spill] sm:$0xff] %v14227_v48  ;;  %v6176_v38 = vrot.slane %v14231_v44, 4 }
 0x688   :  { %vm16558_vm2 = vmmov %vm16547_vm0 }
 0x689   :  { %v14205_v34 = vld [vmem:[#allocation4 + $0x31] sm:$0xff]  ;;  %v14235_v1 = vsel %vm16558_vm2, %v13958_v57, 0.0  ;;  %vm16560_vm6 = vmmov %vm16547_vm0  ;;  %v5784_v57 = vrot.slane %v14171_v47, 4 }
 0x68a   :  { %16548 = vst [vmem:[#allocation43_spill] sm:$0xff] %v14205_v34  ;;  %7039 = vrot.lane.b32.xlu0 %v14205_v34, %s9008_s28  ;;  %16559 = vst [vmem:[#allocation19_spill] sm:$0xff] %v14235_v1  ;;  %v14239_v39 = vsel %vm16560_vm6, %v13966_v56, 0.0  ;;  %v7483_v40 = vld [vmem:[#allocation4 + $0x30] sm:$0xff] }
 0x68b   :  { %vm16561_vm15 = vmmov %vm16547_vm0  ;;  %7229 = vrot.lane.b32.xlu1 %v7483_v40, %s9010_s18  ;;  %6988 = vst.msk [vmem:[#allocation5 + $0x18] sm:$0xff] %vm16567_vm13, %v7483_v40  ;;  %v14326_v18 = vld [vmem:[#allocation4 + $0x32] sm:$0xff] }
 0x68c   :  { %v14243_v3 = vsel %vm16561_vm15, %v13972_v6, 0.0  ;;  %vm16563_vm9 = vmmov %vm16547_vm0  ;;  %16580 = vst [vmem:[#allocation57_spill] sm:$0xff] %v14326_v18 }
 0x68d   :  { %16562 = vst [vmem:[#allocation8_spill] sm:$0xff] %v14243_v3  ;;  %v14247_v31 = vsel %vm16563_vm9, %v13978_v41, 0.0  ;;  %vm16564_vm10 = vmmov %vm16547_vm0 }
 0x68e   :  { %v14251_v36 = vsel %vm16564_vm10, %v13984_v24, 0.0  ;;  %vm16566_vm14 = vmmov %vm16547_vm0  ;;  %v14269_v24 = vsel %vm16547_vm0, %v16534_v17, 0.0  ;;  %7419 = vrot.lane.b32.xlu0 %v14033_v52, %s9012_s27  ;;  %v5840_v17 = vrot.slane %v14179_v14, 4 }
 0x68f   :  { %16565 = vst [vmem:[#allocation42_spill] sm:$0xff] %v14251_v36  ;;  %v14255_v0 = vsel %vm16566_vm14, %v16528_v5, 0.0  ;;  %vm16568_vm1 = vmmov %vm16547_vm0  ;;  %7610 = vrot.lane.b32.xlu1 %v7578_v63, %s9014_s16 }
 0x690   :  { %v14261_v55 = vsel %vm16568_vm1, %v16529_v46, 0.0  ;;  %vm16570_vm12 = vmmov %vm16547_vm0  ;;  %16571 = vst [vmem:[#allocation48_spill] sm:$0xff] %v14269_v24  ;;  %v6344_v1 = vrot.slane %v14255_v0, 4 }
 0x691   :  { %16569 = vst [vmem:[#allocation10_spill] sm:$0xff] %v14261_v55  ;;  %v14265_v61 = vsel %vm16570_vm12, %v16533_v45, 0.0  ;;  %vm16572_vm5 = vmmov %vm16547_vm0 }
 0x692   :  { %v14273_v6 = vsel %vm16572_vm5, %v16535_v43, 0.0  ;;  %v16574_v43 = vcombine.high %v13863_v10, %v13863_v10  ;;  %vm16575_vm7 = vmmov %vm16547_vm0  ;;  %7135 = vrot.lane.b32.xlu0 %v14326_v18, %s9009_s20  ;;  %v16589_v18 = vcombine.high %v13911_v12, %v13911_v12  ;;  %v6400_v3 = vrot.slane %v14265_v61, 4 }
 0x693   :  { %16573 = vst [vmem:[#allocation56_spill] sm:$0xff] %v14273_v6  ;;  %vm16576_vm3 = vmmov %vm16547_vm0  ;;  %7325 = vrot.lane.b32.xlu1 %v14205_v34, %s9011_s10  ;;  %v6120_v34 = vrot.slane %v14221_v51, 4  ;;  %v14479_v6 = vadd.f32 %v5896_v54, %v14187_v13  ;;  %v16630_v54 = vcombine.high %v14078_v22, %v14078_v22 }
 0x694   :  { %v14307_v15 = vsel %vm16575_vm7, %v16574_v43, 0.0  ;;  %v14311_v46 = vsel %vm16576_vm3, %v14043_v9, 0.0  ;;  %vm16578_vm4 = vmmov %vm16547_vm0  ;;  %v5952_v43 = vrot.slane %v14195_v53, 4 }
 0x695   :  { %v14319_v63 = vsel %vm16578_vm4, %v16577_v62, 0.0  ;;  %vm16579_vm11 = vmmov %vm16547_vm0  ;;  %v6008_v62 = vrot.slane %v14203_v7, 4  ;;  %v5798_v55 = vrot.slane %v14311_v46, 4 }
 0x696   :  { %v14323_v10 = vsel %vm16579_vm11, %v14054_v11, 0.0  ;;  %vm16582_vm8 = vmmov %vm16547_vm0  ;;  %7516 = vrot.lane.b32.xlu0 %v7483_v40, %s9013_s15  ;;  %v16604_v40 = vcombine.high %v13966_v56, %v13966_v56  ;;  %v14490_v24 = vadd.f32 %v5952_v43, %v14195_v53 }
 0x697   :  { %v14333_v20 = vsel %vm16582_vm8, %v16581_v42, 0.0  ;;  %vm16583_vm2 = vmmov %vm16547_vm0  ;;  %v16593_v42 = vcombine.high %v13923_v27, %v13923_v27  ;;  %7706 = vrot.lane.b32.xlu1 %v14033_v52, %s9015_s23  ;;  %v5854_v36 = vrot.slane %v14323_v10, 4 }
 0x698   :  { %v14337_v58 = vsel %vm16583_vm2, %v14066_v59, 0.0  ;;  %vm16586_vm6 = vmmov %vm16547_vm0 }
 0x699   :  { %16584 = vst [vmem:[#allocation58_spill] sm:$0xff] %v14337_v58  ;;  %v14347_v8 = vsel %vm16586_vm6, %v16585_v23, 0.0  ;;  %vm16587_vm15 = vmmov %vm16547_vm0 }
 0x69a   :  { %v14351_v2 = vsel %vm16587_vm15, %v14078_v22, 0.0  ;;  %vm16590_vm9 = vmmov %vm16547_vm0 }
 0x69b   :  { %16588 = vst [vmem:[#allocation59_spill] sm:$0xff] %v14351_v2  ;;  %v14361_v4 = vsel %vm16590_vm9, %v16589_v18, 0.0  ;;  %vm16591_vm10 = vmmov %vm16547_vm0  ;;  %v16601_v18 = vcombine.high %v13952_v49, %v13952_v49 }
 0x69c   :  { %v14365_v28 = vsel %vm16591_vm10, %v14089_v50, 0.0  ;;  %vm16594_vm14 = vmmov %vm16547_vm0  ;;  %v16597_v50 = vcombine.high %v13937_v29, %v13937_v29 }
 0x69d   :  { %16592 = vst [vmem:[#allocation60_spill] sm:$0xff] %v14365_v28  ;;  %v14373_v32 = vsel %vm16594_vm14, %v16593_v42, 0.0  ;;  %vm16595_vm13 = vmmov %vm16547_vm0  ;;  %v14398_v16 = vsel %vm16547_vm0, %v16601_v18, 0.0  ;;  %v6232_v42 = vrot.slane %v14239_v39, 4 }
 0x69e   :  { %v14377_v12 = vsel %vm16595_vm13, %v14100_v37, 0.0  ;;  %vm16598_vm1 = vmmov %vm16547_vm0  ;;  %v6071_v22 = vrot.slane %v14373_v32, 4 }
 0x69f   :  { %16596 = vst [vmem:[#allocation61_spill] sm:$0xff] %v14377_v12  ;;  %v14385_v23 = vsel %vm16598_vm1, %v16597_v50, 0.0  ;;  %vm16599_vm12 = vmmov %vm16547_vm0  ;;  %v16608_v50 = vcombine.high %v13978_v41, %v13978_v41 }
 0x6a0   :  { %v14389_v27 = vsel %vm16599_vm12, %v14111_v19, 0.0  ;;  %vm16602_vm5 = vmmov %vm16547_vm0 }
 0x6a1   :  { %16600 = vst [vmem:[#allocation62_spill] sm:$0xff] %v14389_v27  ;;  %v14402_v29 = vsel %vm16602_vm5, %v14121_v21, 0.0  ;;  %vm16605_vm7 = vmmov %vm16547_vm0  ;;  %v6288_v21 = vrot.slane %v14247_v31, 4 }
 0x6a2   :  { %16603 = vst [vmem:[#allocation63_spill] sm:$0xff] %v14402_v29  ;;  %v14412_v48 = vsel %vm16605_vm7, %v16604_v40, 0.0  ;;  %vm16606_vm3 = vmmov %vm16547_vm0 }
 0x6a3   :  { %v14416_v49 = vsel %vm16606_vm3, %v14131_v30, 0.0  ;;  %vm16609_vm4 = vmmov %vm16547_vm0  ;;  %v16613_v30 = vcombine.high %v16528_v5, %v16528_v5 }
 0x6a4   :  { %16607 = vst [vmem:[#allocation64_spill] sm:$0xff] %v14416_v49  ;;  %v14424_v52 = vsel %vm16609_vm4, %v16608_v50, 0.0  ;;  %vm16611_vm11 = vmmov %vm16547_vm0  ;;  %v5791_v50 = vrot.slane %v14307_v15, 4 }
 0x6a5   :  { %16610 = vst [vmem:[#allocation65_spill] sm:$0xff] %v14424_v52  ;;  %v14428_v56 = vsel %vm16611_vm11, %v14141_v60, 0.0  ;;  %vm16614_vm8 = vmmov %vm16547_vm0  ;;  %v16617_v60 = vcombine.high %v16533_v45, %v16533_v45  ;;  %v16622_v45 = vcombine.high %v14043_v9, %v14043_v9  ;;  %v5903_v9 = vrot.slane %v14333_v20, 4 }
 0x6a6   :  { %16612 = vst [vmem:[#allocation66_spill] sm:$0xff] %v14428_v56  ;;  %v14436_v18 = vsel %vm16614_vm8, %v16613_v30, 0.0  ;;  %vm16615_vm2 = vmmov %vm16547_vm0  ;;  %v5847_v30 = vrot.slane %v14319_v63, 4  ;;  %vm16658_vm11 = vcmask 64512  }
 0x6a7   :  { %v14440_v41 = vsel %vm16615_vm2, %v14151_v35, 0.0  ;;  %vm16618_vm6 = vmmov %vm16547_vm0  ;;  %v14457_v35 = vadd.f32 %v5784_v57, %v14171_v47  ;;  %v16625_v57 = vcombine.high %v14054_v11, %v14054_v11  ;;  %v5959_v11 = vrot.slane %v14347_v8, 4 }
 0x6a8   :  { %16616 = vst [vmem:[#allocation67_spill] sm:$0xff] %v14440_v41  ;;  %v14448_v40 = vsel %vm16618_vm6, %v16617_v60, 0.0  ;;  %vm16619_vm15 = vmmov %vm16547_vm0  ;;  %vm16671_vm6 = vcmask 130112  }
 0x6a9   :  { %v14452_v5 = vsel %vm16619_vm15, %v14161_v33, 0.0  ;;  %16621 = vst [vmem:[#allocation69_spill] sm:$0xff] %v14457_v35  ;;  %vm16623_vm9 = vmmov %vm16547_vm0  ;;  %v14468_v33 = vadd.f32 %v5840_v17, %v14179_v14  ;;  %v16627_v17 = vcombine.high %v14066_v59, %v14066_v59  ;;  %v6015_v59 = vrot.slane %v14361_v4, 4 }
 0x6aa   :  { %16620 = vst [vmem:[#allocation68_spill] sm:$0xff] %v14452_v5  ;;  %v14465_v60 = vsel %vm16623_vm9, %v16622_v45, 0.0  ;;  %vm16626_vm10 = vmmov %vm16547_vm0  ;;  %v5910_v45 = vrot.slane %v14337_v58, 4  ;;  %v14501_v58 = vadd.f32 %v6008_v62, %v14203_v7  ;;  %v16637_v7 = vcombine.high %v14100_v37, %v14100_v37 }
 0x6ab   :  { %16624 = vst [vmem:[#allocation70_spill] sm:$0xff] %v14465_v60  ;;  %v14476_v47 = vsel %vm16626_vm10, %v16625_v57, 0.0  ;;  %vm16628_vm14 = vmmov %vm16547_vm0  ;;  %v5966_v57 = vrot.slane %v14351_v2, 4  ;;  %v14512_v2 = vadd.f32 %v6064_v25, %v14213_v26  ;;  %v16640_v25 = vcombine.high %v14111_v19, %v14111_v19 }
 0x6ac   :  { %v14487_v14 = vsel %vm16628_vm14, %v16627_v17, 0.0  ;;  %vm16631_vm13 = vmmov %vm16547_vm0  ;;  %v6022_v17 = vrot.slane %v14365_v28, 4  ;;  %v14523_v28 = vadd.f32 %v6120_v34, %v14221_v51  ;;  %v6183_v37 = vrot.slane %v14398_v16, 4 }
 0x6ad   :  { %16629 = vst [vmem:[#allocation71_spill] sm:$0xff] %v14487_v14  ;;  %v14498_v13 = vsel %vm16631_vm13, %v16630_v54, 0.0  ;;  %v16633_v14 = vld [vmem:[#allocation52_spill] sm:$0xff]  ;;  %vm16635_vm1 = vmmov %vm16547_vm0  ;;  %v6078_v54 = vrot.slane %v14377_v12, 4  ;;  %v14531_v26 = vsel %vm16547_vm0, %v16640_v25, 0.0  ;;  %v14534_v12 = vadd.f32 %v6176_v38, %v14231_v44 }
 0x6ae   :  { %16632 = vst [vmem:[#allocation72_spill] sm:$0xff] %v14498_v13  ;;  %v16634_v53 = vcombine.high %v16633_v14, %v16633_v14  ;;  %vm16638_vm12 = vmmov %vm16547_vm0  ;;  %v6127_v14 = vrot.slane %v14385_v23, 4  ;;  %v6239_v19 = vrot.slane %v14412_v48, 4  ;;  %v6246_v25 = vrot.slane %v14416_v49, 4 }
 0x6af   :  { %v14520_v62 = vsel %vm16638_vm12, %v16637_v7, 0.0  ;;  %16641 = vst [vmem:[#allocation74_spill] sm:$0xff] %v14531_v26  ;;  %v6190_v7 = vrot.slane %v14402_v29, 4  ;;  %vm16644_vm5 = vmmov %vm16547_vm0  ;;  %v16646_v26 = vld [vmem:[#allocation53_spill] sm:$0xff]  ;;  %v14556_v29 = vadd.f32 %v6288_v21, %v14247_v31  ;;  %v14567_v49 = vadd.f32 %v6344_v1, %v14255_v0  ;;  %v16654_v31 = vld [vmem:[#allocation16_spill] sm:$0xff] }
 0x6b0   :  { %v14509_v43 = vsel %vm16635_vm1, %v16634_v53, 0.0  ;;  %16639 = vst [vmem:[#allocation73_spill] sm:$0xff] %v14520_v62  ;;  %v6134_v53 = vrot.slane %v14389_v27, 4  ;;  %v16642_v62 = vld [vmem:[#allocation54_spill] sm:$0xff]  ;;  %v14545_v27 = vadd.f32 %v6232_v42, %v14239_v39  ;;  %v16647_v38 = vcombine.high %v16646_v26, %v16646_v26  ;;  %vm16648_vm7 = vmmov %vm16547_vm0  ;;  %v16659_v0 = vld [vmem:[#allocation29_spill] sm:$0xff] }
 0x6b1   :  { %16636 = vst [vmem:[#allocation52_spill] sm:$0xff] %v14509_v43  ;;  %v16643_v34 = vcombine.high %v16642_v62, %v16642_v62  ;;  %v6295_v62 = vrot.slane %v14424_v52, 4  ;;  %vm16652_vm3 = vmmov %vm16547_vm0  ;;  %v6351_v26 = vrot.slane %v14436_v18, 4  ;;  %v16655_v21 = vcombine.high %v16654_v31, %v16654_v31 }
 0x6b2   :  { %v14553_v44 = vsel %vm16648_vm7, %v16647_v38, 0.0  ;;  %v6358_v38 = vrot.slane %v14440_v41, 4  ;;  %vm16656_vm4 = vmmov %vm16547_vm0  ;;  %v16660_v1 = vcombine.high %v16659_v0, %v16659_v0  ;;  %v5786_v31 = vrot.slane %v14457_v35, 2 }
 0x6b3   :  { %v14542_v51 = vsel %vm16644_vm5, %v16643_v34, 0.0  ;;  %16649 = vst [vmem:[#allocation53_spill] sm:$0xff] %v14553_v44  ;;  %v6302_v34 = vrot.slane %v14428_v56, 4  ;;  %v6970_v44 = vld [vmem:[#allocation4 + $0x10] sm:$0xff]  ;;  %v14575_v52 = vsel %vm16656_vm4, %v16655_v21, 0.0  ;;  %v14578_v56 = vadd.f32 %v6400_v3, %v14265_v61  ;;  %vm16661_vm8 = vmmov %vm16547_vm0  ;;  %v7034_v3 = vpop.permute.xlu0 %7033 }
 0x6b4   :  { %16645 = vst [vmem:[#allocation54_spill] sm:$0xff] %v14542_v51  ;;  %v16650_v51 = vld [vmem:[#allocation55_spill] sm:$0xff]  ;;  %16657 = vst [vmem:[#allocation16_spill] sm:$0xff] %v14575_v52  ;;  %v14587_v41 = vsel %vm16661_vm8, %v16660_v1, 0.0  ;;  %v14591_v21 = vadd.f32 %v5791_v50, %v14307_v15  ;;  %v14594_v61 = vadd.f32 %v5798_v55, %v14311_v46  ;;  %v14602_v0 = vadd.f32 %v5854_v36, %v14323_v10  ;;  %v16663_v50 = vld [vmem:[#allocation58_spill] sm:$0xff] }
 0x6b5   :  { %v16651_v39 = vcombine.high %v16650_v51, %v16650_v51  ;;  %v6407_v51 = vrot.slane %v14448_v40, 4  ;;  %6986 = vst.msk [vmem:[#allocation5 + $0x8] sm:$0xff] %vm16658_vm11, %v6970_v44  ;;  %16662 = vst [vmem:[#allocation29_spill] sm:$0xff] %v14587_v41  ;;  %v14599_v44 = vadd.f32 %v5847_v30, %v14319_v63  ;;  %v5898_v35 = vrot.slane %v14479_v6, 2  ;;  %v16665_v30 = vld [vmem:[#allocation59_spill] sm:$0xff]  ;;  %v16683_v10 = vld [vmem:[#allocation69_spill] sm:$0xff] }
 0x6b6   :  { %v14607_v15 = vadd.f32 %v5903_v9, %v14333_v20  ;;  %v14610_v55 = vadd.f32 %v5910_v45, %v16663_v50  ;;  %v5954_v60 = vrot.slane %v14490_v24, 2  ;;  %v14615_v63 = vadd.f32 %v5959_v11, %v14347_v8  ;;  %v16666_v9 = vld [vmem:[#allocation60_spill] sm:$0xff]  ;;  %v6969_v50 = vld [vmem:[#allocation4] sm:$0xff]  ;;  %vm16668_vm2 = vmmov %vm16658_vm11 }
 0x6b7   :  { %v14564_v42 = vsel %vm16652_vm3, %v16651_v39, 0.0  ;;  %v6414_v39 = vrot.slane %v14452_v5, 4  ;;  %v5842_v5 = vrot.slane %v14468_v33, 2  ;;  %v14618_v36 = vadd.f32 %v5966_v57, %v16665_v30  ;;  %v16667_v57 = vld [vmem:[#allocation61_spill] sm:$0xff]  ;;  %6985 = vst.msk [vmem:[#allocation5] sm:$0xff] %vm16668_vm2, %v6969_v50  ;;  %v16673_v50 = vld [vmem:[#allocation63_spill] sm:$0xff]  ;;  %vm16685_vm10 = vmmov %vm16671_vm6 }
 0x6b8   :  { %16653 = vst [vmem:[#allocation55_spill] sm:$0xff] %v14564_v42  ;;  %v6010_v1 = vrot.slane %v14501_v58, 2  ;;  %v14623_v20 = vadd.f32 %v6015_v59, %v14361_v4  ;;  %v14626_v45 = vadd.f32 %v6022_v17, %v16666_v9  ;;  %v6066_v8 = vrot.slane %v14512_v2, 2  ;;  %v16670_v9 = vld [vmem:[#allocation62_spill] sm:$0xff]  ;;  %7081 = vst.msk [vmem:[#allocation5] sm:$0xff] %vm16671_vm6, %v7034_v3  ;;  %v7130_v3 = vpop.permute.xlu0 %7129 }
 0x6b9   :  { %v14631_v11 = vadd.f32 %v6071_v22, %v14373_v32  ;;  %v14634_v30 = vadd.f32 %v6078_v54, %v16667_v57  ;;  %v6122_v59 = vrot.slane %v14523_v28, 2  ;;  %v14640_v17 = vadd.f32 %v6127_v14, %v14385_v23  ;;  %v6971_v46 = vld [vmem:[#allocation4 + $0x20] sm:$0xff]  ;;  %vm16686_vm14 = vmmov %vm16668_vm2 }
 0x6ba   :  { %v14643_v13 = vadd.f32 %v6134_v53, %v16670_v9  ;;  %v6178_v22 = vrot.slane %v14534_v12, 2  ;;  %v14649_v54 = vadd.f32 %v6183_v37, %v14398_v16  ;;  %v14652_v57 = vadd.f32 %v6190_v7, %v16673_v50  ;;  %v16675_v53 = vld [vmem:[#allocation64_spill] sm:$0xff]  ;;  %v16676_v32 = vld [vmem:[#allocation53_spill] sm:$0xff]  ;;  %v16678_v7 = vld [vmem:[#allocation66_spill] sm:$0xff]  ;;  %6987 = vst.msk [vmem:[#allocation5 + $0x10] sm:$0xff] %vm16686_vm14, %v6971_v46 }
 0x6bb   :  { %v16674_v4 = vld [vmem:[#allocation54_spill] sm:$0xff]  ;;  %v6234_v23 = vrot.slane %v14545_v27, 2  ;;  %v14657_v14 = vadd.f32 %v6239_v19, %v14412_v48  ;;  %v14660_v9 = vadd.f32 %v6246_v25, %v16675_v53  ;;  %v6290_v43 = vrot.slane %v14556_v29, 2  ;;  %v16677_v16 = vld [vmem:[#allocation65_spill] sm:$0xff]  ;;  %v16680_v25 = vld [vmem:[#allocation67_spill] sm:$0xff] }
 0x6bc   :  { %v14665_v37 = vadd.f32 %v6295_v62, %v16677_v16  ;;  %v14668_v50 = vadd.f32 %v6302_v34, %v16678_v7  ;;  %vm16679_vm15 = vcmask 195712   ;;  %v6346_v48 = vrot.slane %v14567_v49, 2  ;;  %v16681_v34 = vld [vmem:[#allocation68_spill] sm:$0xff]  ;;  %vm16700_vm12 = vmmov %vm16547_vm0 }
 0x6bd   :  { %7177 = vst.msk [vmem:[#allocation5] sm:$0xff] %vm16679_vm15, %v7130_v3  ;;  %v14674_v19 = vadd.f32 %v6351_v26, %v14436_v18  ;;  %v14677_v53 = vadd.f32 %v6358_v38, %v16680_v25  ;;  %v6402_v62 = vrot.slane %v14578_v56, 2  ;;  %v14682_v16 = vadd.f32 %v6407_v51, %v14448_v40  ;;  %v7226_v38 = vpop.permute.xlu0 %7225  ;;  %v7036_v25 = vpop.permute.xlu1 %7035  ;;  %vm16688_vm1 = vmmov %vm16679_vm15 }
 0x6be   :  { %v14685_v7 = vadd.f32 %v6414_v39, %v16681_v34  ;;  %v14689_v42 = vadd.f32 %v5786_v31, %v16683_v10  ;;  %v5793_v18 = vrot.slane %v14591_v21, 2  ;;  %v5800_v26 = vrot.slane %v14594_v61, 2  ;;  %7082 = vst.msk [vmem:[#allocation5 + $0x8] sm:$0xff] %vm16685_vm10, %v7036_v25  ;;  %vm16701_vm5 = vmmov %vm16547_vm0 }
 0x6bf   :  { %v14694_v52 = vadd.f32 %v5842_v5, %v14468_v33  ;;  %v5849_v40 = vrot.slane %v14599_v44, 2  ;;  %v14699_v39 = vadd.f32 %v5898_v35, %v14479_v6  ;;  %vm16684_vm9 = vcmask 261312   ;;  %vm16714_vm8 = vmmov %vm16547_vm0 }
 0x6c0   :  { %16682 = vst [vmem:[#allocation58_spill] sm:$0xff] %v14685_v7  ;;  %7273 = vst.msk [vmem:[#allocation5] sm:$0xff] %vm16684_vm9, %v7226_v38  ;;  %v5905_v31 = vrot.slane %v14607_v15, 2  ;;  %v14707_v33 = vadd.f32 %v5954_v60, %v14490_v24  ;;  %v5961_v5 = vrot.slane %v14615_v63, 2  ;;  %v14712_v6 = vadd.f32 %v6010_v1, %v14501_v58 }
 0x6c1   :  { %v6017_v35 = vrot.slane %v14623_v20, 2  ;;  %v14717_v46 = vadd.f32 %v6066_v8, %v14512_v2  ;;  %v6073_v25 = vrot.slane %v14631_v11, 2  ;;  %v14722_v24 = vadd.f32 %v6122_v59, %v14523_v28  ;;  %v7322_v60 = vpop.permute.xlu0 %7321  ;;  %v7132_v10 = vpop.permute.xlu1 %7131  ;;  %vm16716_vm6 = vmmov %vm16547_vm0 }
 0x6c2   :  { %v6129_v34 = vrot.slane %v14640_v17, 2  ;;  %v14727_v1 = vadd.f32 %v6178_v22, %v14534_v12  ;;  %v6185_v38 = vrot.slane %v14649_v54, 2  ;;  %vm16687_vm13 = vcmask 326912   ;;  %7178 = vst.msk [vmem:[#allocation5 + $0x8] sm:$0xff] %vm16688_vm1, %v7132_v10  ;;  %vm16718_vm9 = vmmov %vm16547_vm0 }
 0x6c3   :  { %7369 = vst.msk [vmem:[#allocation5] sm:$0xff] %vm16687_vm13, %v7322_v60  ;;  %v14734_v28 = vadd.f32 %v6234_v23, %v14545_v27  ;;  %v6241_v8 = vrot.slane %v14657_v14, 2  ;;  %v14739_v58 = vadd.f32 %v6290_v43, %v14556_v29  ;;  %v6297_v12 = vrot.slane %v14665_v37, 2 }
 0x6c4   :  { %v14744_v60 = vadd.f32 %v6346_v48, %v14567_v49  ;;  %v6353_v10 = vrot.slane %v14674_v19, 2  ;;  %v14749_v27 = vadd.f32 %v6402_v62, %v14578_v56  ;;  %v6409_v23 = vrot.slane %v14682_v16, 2 }
 0x6c5   :  { %v5788_v29 = vrot.slane %v14689_v42, 1  ;;  %v5794_v43 = vadd.f32 %v5793_v18, %v14591_v21  ;;  %v5844_v22 = vrot.slane %v14694_v52, 1  ;;  %v14757_v49 = vadd.f32 %v5849_v40, %v14599_v44 }
 0x6c6   :  { %16689 = vst [vmem:[#allocation59_spill] sm:$0xff] %v14749_v27  ;;  %v14761_v2 = vadd.f32 %v5905_v31, %v14607_v15  ;;  %v14765_v62 = vadd.f32 %v5961_v5, %v14615_v63  ;;  %v14769_v3 = vadd.f32 %v6017_v35, %v14623_v20  ;;  %v14773_v44 = vadd.f32 %v6073_v25, %v14631_v11  ;;  %v16692_v25 = vld [vmem:[#allocation45_spill] sm:$0xff] }
 0x6c7   :  { %v14777_v15 = vadd.f32 %v6129_v34, %v14640_v17  ;;  %v14781_v63 = vadd.f32 %v6185_v38, %v14649_v54  ;;  %v14785_v20 = vadd.f32 %v6241_v8, %v14657_v14  ;;  %v14789_v11 = vadd.f32 %v6297_v12, %v14665_v37  ;;  %v16691_v38 = vld [vmem:[#allocation18_spill] sm:$0xff]  ;;  %v16696_v34 = vld [vmem:[#allocation32_spill] sm:$0xff]  ;;  %v16698_v35 = vld [vmem:[#allocation13_spill] sm:$0xff] }
 0x6c8   :  { %v14793_v17 = vadd.f32 %v6353_v10, %v14674_v19  ;;  %v14797_v54 = vadd.f32 %v6409_v23, %v14682_v16  ;;  %v16693_v14 = vcombine.high %v16692_v25, %v16692_v25  ;;  %v5789_v5 = vadd.f32 %v5788_v29, %v14689_v42  ;;  %v16694_v12 = vld [vmem:[#allocation70_spill] sm:$0xff] }
 0x6c9   :  { %v5795_v31 = vrot.slane %v5794_v43, 1  ;;  %v5801_v37 = vadd.f32 %v5800_v26, %v14594_v61  ;;  %v16695_v19 = vrot.slane %v16694_v12, 4  ;;  %v16697_v16 = vrot.slane %v16696_v34, 4 }
 0x6ca   :  { %16690 = vst [vmem:[#allocation60_spill] sm:$0xff] %v14797_v54  ;;  %v5075_v8 = vrot.slane %v16693_v14, %v16691_v38  ;;  %v16699_v40 = vcombine.high %v16698_v35, %v16698_v35  ;;  %vm16702_vm7 = vcmask 1041409   ;;  %vm16705_vm3 = vcmask 1042434  }
 0x6cb   :  { %v5806_v10 = vadd.f32 %v16695_v19, %v16694_v12  ;;  %v5813_v23 = vadd.f32 %v16697_v16, %v16696_v34  ;;  %v5796_v42 = vadd.f32 %v5795_v31, %v5794_v43  ;;  %v5802_v21 = vrot.slane %v5801_v37, 1  ;;  %v16703_v31 = vld [vmem:[#allocation47_spill] sm:$0xff]  ;;  %vm16721_vm1 = vmmov %vm16702_vm7 }
 0x6cc   :  { %v5818_v25 = vsel %vm16700_vm12, %v16699_v40, 0.0  ;;  %v5077_v14 = vcombine.high %v5075_v8, %v5075_v8  ;;  %v5825_v18 = vsel %vm16547_vm0, %v5075_v8, 0.0  ;;  %v6535_v19 = vmul.f32 0.25, %v5789_v5  ;;  %vm16726_vm0 = vmmov %vm16705_vm3 }
 0x6cd   :  { %v5819_v29 = vrot.slane %v5818_v25, 4  ;;  %v5807_v61 = vrot.slane %v5806_v10, 2  ;;  %v5814_v26 = vrot.slane %v5813_v23, 2  ;;  %v5826_v59 = vrot.slane %v5825_v18, 4 }
 0x6ce   :  { %v5832_v12 = vsel %vm16701_vm5, %v5077_v14, 0.0  ;;  %v6536_v48 = vmul.f32 0.25, %v5796_v42  ;;  %v5803_v34 = vadd.f32 %v5802_v21, %v5801_v37  ;;  %v16704_v8 = vcombine.high %v16703_v31, %v16703_v31 }
 0x6cf   :  { %v5820_v56 = vadd.f32 %v5819_v29, %v5818_v25  ;;  %v5808_v16 = vadd.f32 %v5807_v61, %v5806_v10  ;;  %v5815_v51 = vadd.f32 %v5814_v26, %v5813_v23  ;;  %v5827_v35 = vadd.f32 %v5826_v59, %v5825_v18 }
 0x6d0   :  { %v5833_v40 = vrot.slane %v5832_v12, 4  ;;  %v6845_v43 = vsel %vm16702_vm7, %v6536_v48, %v6535_v19  ;;  %v5109_v7 = vrot.slane %v16704_v8, %v16691_v38  ;;  %v6537_v29 = vmul.f32 0.25, %v5803_v34 }
 0x6d1   :  { %v5821_v41 = vrot.slane %v5820_v56, 2  ;;  %v5809_v54 = vrot.slane %v5808_v16, 1  ;;  %v5816_v27 = vrot.slane %v5815_v51, 1  ;;  %v5828_v25 = vrot.slane %v5827_v35, 2 }
 0x6d2   :  { %v5834_v5 = vadd.f32 %v5833_v40, %v5832_v12  ;;  %v5111_v42 = vcombine.high %v5109_v7, %v5109_v7  ;;  %v5845_v21 = vadd.f32 %v5844_v22, %v14694_v52  ;;  %v6846_v10 = vsel %vm16705_vm3, %v6537_v29, %v6845_v43  ;;  %v16709_v40 = vld [vmem:[#allocation34_spill] sm:$0xff] }
 0x6d3   :  { %v5822_v14 = vadd.f32 %v5821_v41, %v5820_v56  ;;  %v5810_v37 = vadd.f32 %v5809_v54, %v5808_v16  ;;  %v5817_v59 = vadd.f32 %v5816_v27, %v5815_v51  ;;  %v5829_v18 = vadd.f32 %v5828_v25, %v5827_v35 }
 0x6d4   :  { %v5835_v23 = vrot.slane %v5834_v5, 2  ;;  %v5851_v61 = vrot.slane %v14757_v49, 1  ;;  %v16706_v26 = vrot.slane %v14602_v0, 2  ;;  %v16707_v56 = vrot.slane %v14476_v47, 4 }
 0x6d5   :  { %v5823_v48 = vrot.slane %v5822_v14, 1  ;;  %v5830_v31 = vrot.slane %v5829_v18, 1  ;;  %v6538_v34 = vmul.f32 0.25, %v5810_v37  ;;  %v6539_v41 = vmul.f32 0.25, %v5817_v59 }
 0x6d6   :  { %v5857_v19 = vadd.f32 %v16706_v26, %v14602_v0  ;;  %v5862_v52 = vadd.f32 %v16707_v56, %v14476_v47  ;;  %v5836_v51 = vadd.f32 %v5835_v23, %v5834_v5  ;;  %v5852_v27 = vadd.f32 %v5851_v61, %v14757_v49  ;;  %v16712_v5 = vld [vmem:[#allocation14_spill] sm:$0xff] }
 0x6d7   :  { %v5824_v22 = vadd.f32 %v5823_v48, %v5822_v14  ;;  %v5831_v12 = vadd.f32 %v5830_v31, %v5829_v18  ;;  %vm16708_vm4 = vcmask 1043459   ;;  %v16710_v43 = vrot.slane %v16709_v40, 4 }
 0x6d8   :  { %v5858_v54 = vrot.slane %v5857_v19, 1  ;;  %v6847_v16 = vsel %vm16708_vm4, %v6538_v34, %v6846_v10  ;;  %v5863_v35 = vrot.slane %v5862_v52, 2  ;;  %v5837_v8 = vrot.slane %v5836_v51, 1  ;;  %vm16727_vm5 = vmmov %vm16708_vm4 }
 0x6d9   :  { %v5869_v0 = vadd.f32 %v16710_v43, %v16709_v40  ;;  %v6540_v25 = vmul.f32 0.25, %v5824_v22  ;;  %vm16711_vm11 = vcmask 1044484   ;;  %v6541_v59 = vmul.f32 0.25, %v5831_v12  ;;  %vm16737_vm4 = vmmov %vm16716_vm6 }
 0x6da   :  { %v6848_v29 = vsel %vm16711_vm11, %v6539_v41, %v6847_v16  ;;  %v5859_v37 = vadd.f32 %v5858_v54, %v5857_v19  ;;  %v5864_v47 = vadd.f32 %v5863_v35, %v5862_v52  ;;  %v16713_v49 = vcombine.high %v16712_v5, %v16712_v5  ;;  %vm16728_vm7 = vmmov %vm16711_vm11 }
 0x6db   :  { %v5870_v14 = vrot.slane %v5869_v0, 2  ;;  %v5838_v48 = vadd.f32 %v5837_v8, %v5836_v51  ;;  %vm16715_vm2 = vcmask 1045509   ;;  %v5881_v61 = vsel %vm16716_vm6, %v5109_v7, 0.0  ;;  %v7324_v7 = vpop.permute.xlu0 %7323  ;;  %vm16743_vm6 = vmmov %vm16686_vm14 }
 0x6dc   :  { %v5874_v18 = vsel %vm16714_vm8, %v16713_v49, 0.0  ;;  %v6849_v10 = vsel %vm16715_vm2, %v6540_v25, %v6848_v29  ;;  %vm16717_vm15 = vcmask 1046534   ;;  %v5865_v31 = vrot.slane %v5864_v47, 1  ;;  %v7228_v25 = vpop.permute.xlu1 %7227  ;;  %vm16741_vm8 = vmmov %vm16715_vm2 }
 0x6dd   :  { %v5875_v23 = vrot.slane %v5874_v18, 4  ;;  %v6850_v26 = vsel %vm16717_vm15, %v6541_v59, %v6849_v10  ;;  %v5871_v34 = vadd.f32 %v5870_v14, %v5869_v0  ;;  %v5882_v41 = vrot.slane %v5881_v61, 4  ;;  %vm16742_vm2 = vmmov %vm16737_vm4 }
 0x6de   :  { %v6542_v19 = vmul.f32 0.25, %v5838_v48  ;;  %v5888_v52 = vsel %vm16718_vm9, %v5111_v42, 0.0  ;;  %v6543_v22 = vmul.f32 0.25, %v5845_v21  ;;  %v5866_v54 = vadd.f32 %v5865_v31, %v5864_v47  ;;  %v16722_v47 = vld [vmem:[#allocation20_spill] sm:$0xff]  ;;  %vm16744_vm9 = vmmov %vm16742_vm2 }
 0x6df   :  { %v5876_v56 = vadd.f32 %v5875_v23, %v5874_v18  ;;  %v5872_v12 = vrot.slane %v5871_v34, 1  ;;  %v5883_v16 = vadd.f32 %v5882_v41, %v5881_v61  ;;  %v5889_v35 = vrot.slane %v5888_v52, 4 }
 0x6e0   :  { %vm16719_vm10 = vcmask 1047559   ;;  %v6544_v43 = vmul.f32 0.25, %v5852_v27  ;;  %v6545_v8 = vmul.f32 0.25, %v5859_v37  ;;  %v6546_v14 = vmul.f32 0.25, %v5866_v54  ;;  %v7038_v41 = vpop.permute.xlu1 %7037 }
 0x6e1   :  { %v6851_v51 = vsel %vm16719_vm10, %v6542_v19, %v6850_v26  ;;  %v5877_v40 = vrot.slane %v5876_v56, 2  ;;  %v5873_v0 = vadd.f32 %v5872_v12, %v5871_v34  ;;  %v5884_v29 = vrot.slane %v5883_v16, 2 }
 0x6e2   :  { %6956 = vst.msk [vmem:[#allocation4 + $0x41] sm:$0xff] %vm16686_vm14, %v6851_v51  ;;  %v5890_v59 = vadd.f32 %v5889_v35, %v5888_v52  ;;  %vm16720_vm13 = vcmask 261312   ;;  %v6852_v21 = vsel %vm16721_vm1, %v6544_v43, %v6543_v22  ;;  %v16723_v5 = vcombine.high %v16722_v47, %v16722_v47 }
 0x6e3   :  { %7274 = vst.msk [vmem:[#allocation5 + $0x8] sm:$0xff] %vm16720_vm13, %v7228_v25  ;;  %v5878_v42 = vadd.f32 %v5877_v40, %v5876_v56  ;;  %v16724_v27 = vrot.slane %v14699_v39, 1  ;;  %vm16725_vm12 = vcmask 326912   ;;  %v5885_v18 = vadd.f32 %v5884_v29, %v5883_v16  ;;  %v16731_v16 = vld [vmem:[#allocation71_spill] sm:$0xff]  ;;  %v16733_v40 = vld [vmem:[#allocation36_spill] sm:$0xff]  ;;  %vm16748_vm13 = vmmov %vm16743_vm6 }
 0x6e4   :  { %v5143_v49 = vrot.slane %v16723_v5, %v16691_v38  ;;  %7370 = vst.msk [vmem:[#allocation5 + $0x8] sm:$0xff] %vm16725_vm12, %v7324_v7  ;;  %v5891_v48 = vrot.slane %v5890_v59, 2  ;;  %v6547_v10 = vmul.f32 0.25, %v5873_v0  ;;  %v6853_v23 = vsel %vm16726_vm0, %v6545_v8, %v6852_v21  ;;  %v16735_v29 = vld [vmem:[#allocation15_spill] sm:$0xff]  ;;  %v16738_v5 = vld [vmem:[#allocation21_spill] sm:$0xff]  ;;  %vm16750_vm12 = vmmov %vm16726_vm0 }
 0x6e5   :  { %v5901_v37 = vadd.f32 %v16724_v27, %v14699_v39  ;;  %v5879_v61 = vrot.slane %v5878_v42, 1  ;;  %v6854_v26 = vsel %vm16727_vm5, %v6546_v14, %v6853_v23  ;;  %v5907_v34 = vrot.slane %v14761_v2, 1 }
 0x6e6   :  { %v5145_v31 = vcombine.high %v5143_v49, %v5143_v49  ;;  %v5886_v19 = vrot.slane %v5885_v18, 1  ;;  %v5892_v56 = vadd.f32 %v5891_v48, %v5890_v59  ;;  %v6855_v52 = vsel %vm16728_vm7, %v6547_v10, %v6854_v26 }
 0x6e7   :  { %v16729_v39 = vrot.slane %v14610_v55, 2  ;;  %vm16730_vm3 = vcmask 130112   ;;  %v5880_v54 = vadd.f32 %v5879_v61, %v5878_v42  ;;  %v5908_v12 = vadd.f32 %v5907_v34, %v14761_v2 }
 0x6e8   :  { %7083 = vst.msk [vmem:[#allocation5 + $0x10] sm:$0xff] %vm16730_vm3, %v7038_v41  ;;  %v16732_v35 = vrot.slane %v16731_v16, 4  ;;  %v16734_v43 = vrot.slane %v16733_v40, 4  ;;  %v5887_v7 = vadd.f32 %v5886_v19, %v5885_v18  ;;  %v5893_v25 = vrot.slane %v5892_v56, 1  ;;  %v7418_v18 = vpop.permute.xlu1 %7417  ;;  %vm16759_vm3 = vmmov %vm16742_vm2 }
 0x6e9   :  { %v5913_v22 = vadd.f32 %v16729_v39, %v14610_v55  ;;  %v16736_v59 = vcombine.high %v16735_v29, %v16735_v29  ;;  %v14878_v14 = vld [vmem:[#allocation4 + $0x40] sm:$0xff]  ;;  %v6548_v2 = vmul.f32 0.25, %v5880_v54  ;;  %v16739_v27 = vcombine.high %v16738_v5, %v16738_v5  ;;  %v16745_v29 = vld [vmem:[#allocation43_spill] sm:$0xff] }
 0x6ea   :  { %v5918_v51 = vadd.f32 %v16732_v35, %v16731_v16  ;;  %v5925_v8 = vadd.f32 %v16734_v43, %v16733_v40  ;;  %v14880_v42 = vld [vmem:[#allocation4 + $0x41] sm:$0xff]  ;;  %7231 = vrot.lane.b32.xlu0 %v14878_v14, %s9010_s18  ;;  %v5894_v10 = vadd.f32 %v5893_v25, %v5892_v56  ;;  %v6549_v23 = vmul.f32 0.25, %v5887_v7 }
 0x6eb   :  { %v5914_v0 = vrot.slane %v5913_v22, 1  ;;  %v5930_v55 = vsel %vm16737_vm4, %v16736_v59, 0.0  ;;  %v14886_v48 = vrot.slane %v16739_v27, %v16691_v38  ;;  %7327 = vrot.lane.b32.xlu1 %v14880_v42, %s9011_s10  ;;  %vm16740_vm11 = vcmask 392512   ;;  %v6973_v34 = vld [vmem:[#allocation4 + $0x40] sm:$0xff]  ;;  %vm16760_vm4 = vmmov %vm16741_vm8 }
 0x6ec   :  { %v5919_v21 = vrot.slane %v5918_v51, 2  ;;  %v5926_v47 = vrot.slane %v5925_v8, 2  ;;  %v5931_v26 = vrot.slane %v5930_v55, 4  ;;  %7465 = vst.msk [vmem:[#allocation5] sm:$0xff] %vm16740_vm11, %v7418_v18  ;;  %v6856_v41 = vsel %vm16741_vm8, %v6548_v2, %v6855_v52  ;;  %v14907_v18 = vld [vmem:[#allocation4 + $0x42] sm:$0xff]  ;;  %vm16761_vm11 = vmmov %vm16742_vm2 }
 0x6ed   :  { %v5915_v61 = vadd.f32 %v5914_v0, %v5913_v22  ;;  %v5937_v54 = vsel %vm16742_vm2, %v5143_v49, 0.0  ;;  %6989 = vst.msk [vmem:[#allocation5 + $0x20] sm:$0xff] %vm16743_vm6, %v6973_v34  ;;  %v6550_v16 = vmul.f32 0.25, %v5894_v10  ;;  %v6857_v56 = vsel %vm16717_vm15, %v6549_v23, %v6856_v41  ;;  %v7134_v0 = vpop.permute.xlu1 %7133  ;;  %v16746_v49 = vld [vmem:[#allocation57_spill] sm:$0xff]  ;;  %vm16762_vm8 = vmmov %vm16743_vm6 }
 0x6ee   :  { %v5920_v19 = vadd.f32 %v5919_v21, %v5918_v51  ;;  %v5927_v39 = vadd.f32 %v5926_v47, %v5925_v8  ;;  %v5932_v35 = vadd.f32 %v5931_v26, %v5930_v55  ;;  %v5938_v40 = vrot.slane %v5937_v54, 4  ;;  %7612 = vrot.lane.b32.xlu0 %v16745_v29, %s9014_s16  ;;  %vm16763_vm2 = vmmov %vm16717_vm15 }
 0x6ef   :  { %v5944_v22 = vsel %vm16744_vm9, %v5145_v31, 0.0  ;;  %v6551_v25 = vmul.f32 0.25, %v5901_v37  ;;  %v6858_v52 = vsel %vm16719_vm10, %v6550_v16, %v6857_v56  ;;  %7708 = vrot.lane.b32.xlu1 %v16746_v49, %s9015_s23  ;;  %vm16747_vm14 = vcmask 195712   ;;  %vm16764_vm6 = vmmov %vm16759_vm3 }
 0x6f0   :  { %v5921_v43 = vrot.slane %v5920_v19, 1  ;;  %v5928_v7 = vrot.slane %v5927_v39, 1  ;;  %v5933_v51 = vrot.slane %v5932_v35, 2  ;;  %v5939_v8 = vadd.f32 %v5938_v40, %v5937_v54  ;;  %7179 = vst.msk [vmem:[#allocation5 + $0x10] sm:$0xff] %vm16747_vm14, %v7134_v0  ;;  %v16753_v40 = vld [vmem:[#allocation72_spill] sm:$0xff]  ;;  %vm16765_vm15 = vmmov %vm16719_vm10 }
 0x6f1   :  { %v5945_v59 = vrot.slane %v5944_v22, 4  ;;  %6957 = vst.msk [vmem:[#allocation4 + $0x51] sm:$0xff] %vm16748_vm13, %v6858_v52  ;;  %v6552_v31 = vmul.f32 0.25, %v5908_v12  ;;  %v6553_v37 = vmul.f32 0.25, %v5915_v61  ;;  %v5179_v27 = vcombine.high %v14886_v48, %v14886_v48  ;;  %vm16766_vm9 = vmmov %vm16762_vm8 }
 0x6f2   :  { %v5922_v55 = vadd.f32 %v5921_v43, %v5920_v19  ;;  %v5929_v2 = vadd.f32 %v5928_v7, %v5927_v39  ;;  %v5934_v21 = vadd.f32 %v5933_v51, %v5932_v35  ;;  %v5940_v47 = vrot.slane %v5939_v8, 2  ;;  %v7515_v19 = vpop.permute.xlu1 %7514  ;;  %7041 = vrot.lane.b32.xlu0 %v14880_v42, %s9008_s28  ;;  %vm16767_vm10 = vmmov %vm16721_vm1 }
 0x6f3   :  { %v5946_v5 = vadd.f32 %v5945_v59, %v5944_v22  ;;  %v6859_v26 = vsel %vm16721_vm1, %v6552_v31, %v6551_v25  ;;  %v16749_v34 = vrot.slane %v14707_v33, 1  ;;  %7137 = vrot.lane.b32.xlu1 %v14907_v18, %s9009_s20  ;;  %vm16751_vm0 = vcmask 458112   ;;  %v16755_v59 = vld [vmem:[#allocation41_spill] sm:$0xff]  ;;  %vm16770_vm14 = vmmov %vm16750_vm12 }
 0x6f4   :  { %v6554_v10 = vmul.f32 0.25, %v5922_v55  ;;  %v6555_v23 = vmul.f32 0.25, %v5929_v2  ;;  %v5935_v12 = vrot.slane %v5934_v21, 1  ;;  %v5941_v61 = vadd.f32 %v5940_v47, %v5939_v8  ;;  %7562 = vst.msk [vmem:[#allocation5] sm:$0xff] %vm16751_vm0, %v7515_v19  ;;  %vm16771_vm13 = vmmov %vm16727_vm5 }
 0x6f5   :  { %v5957_v41 = vadd.f32 %v16749_v34, %v14707_v33  ;;  %v5947_v39 = vrot.slane %v5946_v5, 2  ;;  %v6860_v54 = vsel %vm16750_vm12, %v6553_v37, %v6859_v26  ;;  %v5963_v56 = vrot.slane %v14765_v62, 1  ;;  %vm16773_vm1 = vmmov %vm16728_vm7 }
 0x6f6   :  { %v6861_v16 = vsel %vm16727_vm5, %v6554_v10, %v6860_v54  ;;  %v16752_v33 = vrot.slane %v14618_v36, 2  ;;  %v16754_v43 = vrot.slane %v16753_v40, 4  ;;  %v5936_v22 = vadd.f32 %v5935_v12, %v5934_v21  ;;  %7421 = vrot.lane.b32.xlu0 %v16746_v49, %s9012_s27  ;;  %v16757_v21 = vld [vmem:[#allocation30_spill] sm:$0xff]  ;;  %vm16779_vm12 = vmmov %vm16759_vm3 }
 0x6f7   :  { %v5942_v25 = vrot.slane %v5941_v61, 1  ;;  %v5948_v0 = vadd.f32 %v5947_v39, %v5946_v5  ;;  %v6862_v29 = vsel %vm16728_vm7, %v6555_v23, %v6861_v16  ;;  %v5964_v52 = vadd.f32 %v5963_v56, %v14765_v62  ;;  %7518 = vrot.lane.b32.xlu1 %v14878_v14, %s9013_s15  ;;  %vm16784_vm0 = vmmov %vm16760_vm4 }
 0x6f8   :  { %v5969_v35 = vadd.f32 %v16752_v33, %v14618_v36  ;;  %v5974_v7 = vadd.f32 %v16754_v43, %v16753_v40  ;;  %v16756_v55 = vrot.slane %v16755_v59, 4  ;;  %v6556_v37 = vmul.f32 0.25, %v5936_v22  ;;  %v6974_v34 = vld [vmem:[#allocation4 + $0x50] sm:$0xff]  ;;  %vm16785_vm5 = vmmov %vm16759_vm3 }
 0x6f9   :  { %v5943_v36 = vadd.f32 %v5942_v25, %v5941_v61  ;;  %v5949_v31 = vrot.slane %v5948_v0, 1  ;;  %v16758_v47 = vcombine.high %v16757_v21, %v16757_v21  ;;  %v5993_v14 = vsel %vm16761_vm11, %v14886_v48, 0.0  ;;  %6990 = vst.msk [vmem:[#allocation5 + $0x28] sm:$0xff] %vm16762_vm8, %v6974_v34  ;;  %v14944_v61 = vld [vmem:[#allocation4 + $0x51] sm:$0xff]  ;;  %vm16786_vm7 = vmmov %vm16762_vm8 }
 0x6fa   :  { %v5970_v51 = vrot.slane %v5969_v35, 1  ;;  %v5975_v8 = vrot.slane %v5974_v7, 2  ;;  %v5981_v2 = vadd.f32 %v16756_v55, %v16755_v59  ;;  %v6863_v49 = vsel %vm16760_vm4, %v6556_v37, %v6862_v29  ;;  %v7485_v39 = vld [vmem:[#allocation4 + $0x50] sm:$0xff]  ;;  %7043 = vrot.lane.b32.xlu0 %v14944_v61, %s9008_s28  ;;  %v16768_v37 = vld [vmem:[#allocation23_spill] sm:$0xff]  ;;  %vm16789_vm11 = vmmov %vm16785_vm5 }
 0x6fb   :  { %v5986_v62 = vsel %vm16759_vm3, %v16758_v47, 0.0  ;;  %v5950_v19 = vadd.f32 %v5949_v31, %v5948_v0  ;;  %v6557_v12 = vmul.f32 0.25, %v5943_v36  ;;  %v5994_v33 = vrot.slane %v5993_v14, 4  ;;  %7233 = vrot.lane.b32.xlu1 %v7485_v39, %s9010_s18  ;;  %vm16787_vm3 = vmmov %vm16763_vm2 }
 0x6fc   :  { %v5971_v5 = vadd.f32 %v5970_v51, %v5969_v35  ;;  %v5976_v10 = vadd.f32 %v5975_v8, %v5974_v7  ;;  %v5982_v23 = vrot.slane %v5981_v2, 2  ;;  %v5987_v26 = vrot.slane %v5986_v62, 4 }
 0x6fd   :  { %v6558_v35 = vmul.f32 0.25, %v5950_v19  ;;  %v6864_v40 = vsel %vm16763_vm2, %v6557_v12, %v6863_v49  ;;  %v6000_v43 = vsel %vm16764_vm6, %v5179_v27, 0.0  ;;  %v6559_v48 = vmul.f32 0.25, %v5957_v41  ;;  %v14968_v49 = vld [vmem:[#allocation4 + $0x52] sm:$0xff]  ;;  %vm16791_vm2 = vmmov %vm16765_vm15 }
 0x6fe   :  { %v5977_v54 = vrot.slane %v5976_v10, 1  ;;  %v5983_v16 = vadd.f32 %v5982_v23, %v5981_v2  ;;  %v5988_v56 = vadd.f32 %v5987_v26, %v5986_v62  ;;  %v5995_v0 = vadd.f32 %v5994_v33, %v5993_v14  ;;  %7423 = vrot.lane.b32.xlu0 %v14907_v18, %s9012_s27  ;;  %vm16792_vm6 = vmmov %vm16786_vm7 }
 0x6ff   :  { %v6865_v29 = vsel %vm16765_vm15, %v6558_v35, %v6864_v40  ;;  %v6001_v51 = vrot.slane %v6000_v43, 4  ;;  %v6560_v8 = vmul.f32 0.25, %v5964_v52  ;;  %v6561_v59 = vmul.f32 0.25, %v5971_v5  ;;  %7614 = vrot.lane.b32.xlu1 %v14880_v42, %s9014_s16 }
 0x700   :  { %v5978_v7 = vadd.f32 %v5977_v54, %v5976_v10  ;;  %v5984_v22 = vrot.slane %v5983_v16, 1  ;;  %v5989_v25 = vrot.slane %v5988_v56, 2  ;;  %6958 = vst.msk [vmem:[#allocation4 + $0x61] sm:$0xff] %vm16766_vm9, %v6865_v29  ;;  %v5996_v36 = vrot.slane %v5995_v0, 2  ;;  %v16780_v29 = vld [vmem:[#allocation49_spill] sm:$0xff]  ;;  %vm16794_vm9 = vmmov %vm16767_vm10 }
 0x701   :  { %v6002_v27 = vadd.f32 %v6001_v51, %v6000_v43  ;;  %v6866_v41 = vsel %vm16767_vm10, %v6560_v8, %v6559_v48  ;;  %v16769_v52 = vcombine.high %v16768_v37, %v16768_v37  ;;  %v6019_v47 = vrot.slane %v14769_v3, 1 }
 0x702   :  { %v5985_v55 = vadd.f32 %v5984_v22, %v5983_v16  ;;  %v5990_v2 = vadd.f32 %v5989_v25, %v5988_v56  ;;  %v6562_v31 = vmul.f32 0.25, %v5978_v7  ;;  %v5997_v5 = vadd.f32 %v5996_v36, %v5995_v0  ;;  %7139 = vrot.lane.b32.xlu0 %v14968_v49, %s9009_s20  ;;  %v16777_v7 = vld [vmem:[#allocation17_spill] sm:$0xff] }
 0x703   :  { %v5211_v21 = vrot.slane %v16769_v52, %v16691_v38  ;;  %v6867_v23 = vsel %vm16770_vm14, %v6561_v59, %v6866_v41  ;;  %v6003_v26 = vrot.slane %v6002_v27, 2  ;;  %v16772_v42 = vrot.slane %v14712_v6, 1  ;;  %7329 = vrot.lane.b32.xlu1 %v14944_v61, %s9011_s10 }
 0x704   :  { %v5991_v62 = vrot.slane %v5990_v2, 1  ;;  %v6563_v10 = vmul.f32 0.25, %v5985_v55  ;;  %v6868_v34 = vsel %vm16771_vm13, %v6562_v31, %v6867_v23  ;;  %v5998_v54 = vrot.slane %v5997_v5, 1 }
 0x705   :  { %v5213_v19 = vcombine.high %v5211_v21, %v5211_v21  ;;  %v6013_v12 = vadd.f32 %v16772_v42, %v14712_v6  ;;  %v6020_v56 = vadd.f32 %v6019_v47, %v14769_v3  ;;  %v6004_v33 = vadd.f32 %v6003_v26, %v6002_v27  ;;  %v16775_v6 = vld [vmem:[#allocation52_spill] sm:$0xff] }
 0x706   :  { %v5992_v14 = vadd.f32 %v5991_v62, %v5990_v2  ;;  %v6869_v16 = vsel %vm16773_vm1, %v6563_v10, %v6868_v34  ;;  %v16774_v35 = vrot.slane %v14626_v45, 2  ;;  %v16776_v43 = vrot.slane %v16775_v6, 4  ;;  %7520 = vrot.lane.b32.xlu0 %v7485_v39, %s9013_s15  ;;  %v7040_v34 = vpop.permute.xlu0 %7039 }
 0x707   :  { %v16778_v22 = vcombine.high %v16777_v7, %v16777_v7  ;;  %v5999_v25 = vadd.f32 %v5998_v54, %v5997_v5  ;;  %v16781_v51 = vrot.slane %v16780_v29, 4  ;;  %v6005_v55 = vrot.slane %v6004_v33, 1  ;;  %v6975_v62 = vld [vmem:[#allocation4 + $0x60] sm:$0xff]  ;;  %7710 = vrot.lane.b32.xlu1 %v14907_v18, %s9015_s23 }
 0x708   :  { %v6025_v40 = vadd.f32 %v16774_v35, %v14626_v45  ;;  %v6030_v48 = vadd.f32 %v16776_v43, %v16775_v6  ;;  %v6564_v0 = vmul.f32 0.25, %v5992_v14  ;;  %v16782_v45 = vld [vmem:[#allocation24_spill] sm:$0xff]  ;;  %v6049_v26 = vsel %vm16785_vm5, %v5211_v21, 0.0  ;;  %6991 = vst.msk [vmem:[#allocation5 + $0x30] sm:$0xff] %vm16786_vm7, %v6975_v62  ;;  %v7230_v35 = vpop.permute.xlu1 %7229  ;;  %v15007_v21 = vld [vmem:[#allocation4 + $0x61] sm:$0xff]  ;;  %vm16808_vm7 = vmmov %vm16789_vm11 }
 0x709   :  { %v6042_v3 = vsel %vm16779_vm12, %v16778_v22, 0.0  ;;  %v6037_v8 = vadd.f32 %v16781_v51, %v16780_v29  ;;  %v16783_v31 = vcombine.high %v16782_v45, %v16782_v45  ;;  %v6565_v41 = vmul.f32 0.25, %v5999_v25 }
 0x70a   :  { %v6043_v59 = vrot.slane %v6042_v3, 4  ;;  %v6026_v2 = vrot.slane %v6025_v40, 1  ;;  %v6031_v36 = vrot.slane %v6030_v48, 2  ;;  %v6870_v37 = vsel %vm16784_vm0, %v6564_v0, %v6869_v16  ;;  %v7420_v0 = vpop.permute.xlu0 %7419 }
 0x70b   :  { %v14993_v27 = vrot.slane %v16783_v31, %v16691_v38  ;;  %v6038_v52 = vrot.slane %v6037_v8, 2  ;;  %v6006_v5 = vadd.f32 %v6005_v55, %v6004_v33  ;;  %v6871_v42 = vsel %vm16787_vm3, %v6565_v41, %v6870_v37  ;;  %7331 = vrot.lane.b32.xlu1 %v15007_v21, %s9011_s10  ;;  %vm16809_vm3 = vmmov %vm16808_vm7 }
 0x70c   :  { %v6044_v47 = vadd.f32 %v6043_v59, %v6042_v3  ;;  %v6027_v10 = vadd.f32 %v6026_v2, %v6025_v40  ;;  %v6032_v23 = vadd.f32 %v6031_v36, %v6030_v48  ;;  %v6050_v16 = vrot.slane %v6049_v26, 4  ;;  %v15005_v40 = vld [vmem:[#allocation4 + $0x60] sm:$0xff]  ;;  %v7611_v55 = vpop.permute.xlu1 %7610 }
 0x70d   :  { %v6039_v14 = vadd.f32 %v6038_v52, %v6037_v8  ;;  %vm16788_vm4 = vcmask 130112   ;;  %v6566_v39 = vmul.f32 0.25, %v6006_v5  ;;  %v6056_v18 = vsel %vm16789_vm11, %v5213_v19, 0.0  ;;  %7235 = vrot.lane.b32.xlu0 %v15005_v40, %s9010_s18  ;;  %vm16811_vm11 = vmmov %vm16809_vm3 }
 0x70e   :  { %v6045_v54 = vrot.slane %v6044_v47, 2  ;;  %7084 = vst.msk [vmem:[#allocation5 + $0x18] sm:$0xff] %vm16788_vm4, %v7040_v34  ;;  %v6033_v6 = vrot.slane %v6032_v23, 1  ;;  %v6567_v33 = vmul.f32 0.25, %v6013_v12  ;;  %vm16790_vm8 = vcmask 261312  }
 0x70f   :  { %7275 = vst.msk [vmem:[#allocation5 + $0x10] sm:$0xff] %vm16790_vm8, %v7230_v35  ;;  %v6040_v43 = vrot.slane %v6039_v14, 1  ;;  %v6051_v7 = vadd.f32 %v6050_v16, %v6049_v26  ;;  %v6057_v22 = vrot.slane %v6056_v18, 4  ;;  %v6872_v3 = vsel %vm16791_vm2, %v6566_v39, %v6871_v42  ;;  %7712 = vrot.lane.b32.xlu1 %v14968_v49, %s9015_s23  ;;  %v7136_v42 = vpop.permute.xlu0 %7135  ;;  %vm16813_vm2 = vmmov %vm16792_vm6 }
 0x710   :  { %v6046_v48 = vadd.f32 %v6045_v54, %v6044_v47  ;;  %v6034_v19 = vadd.f32 %v6033_v6, %v6032_v23  ;;  %v6568_v12 = vmul.f32 0.25, %v6020_v56  ;;  %v6569_v25 = vmul.f32 0.25, %v6027_v10  ;;  %6959 = vst.msk [vmem:[#allocation4 + $0x71] sm:$0xff] %vm16792_vm6, %v6872_v3  ;;  %v16798_v23 = vld [vmem:[#allocation73_spill] sm:$0xff]  ;;  %v7326_v35 = vpop.permute.xlu1 %7325 }
 0x711   :  { %v6041_v29 = vadd.f32 %v6040_v43, %v6039_v14  ;;  %v6052_v8 = vrot.slane %v6051_v7, 2  ;;  %v6058_v59 = vadd.f32 %v6057_v22, %v6056_v18  ;;  %vm16793_vm15 = vcmask 392512   ;;  %7616 = vrot.lane.b32.xlu0 %v14944_v61, %s9014_s16  ;;  %v16804_v22 = vld [vmem:[#allocation50_spill] sm:$0xff] }
 0x712   :  { %v6047_v51 = vrot.slane %v6046_v48, 1  ;;  %7466 = vst.msk [vmem:[#allocation5 + $0x8] sm:$0xff] %vm16793_vm15, %v7420_v0  ;;  %v6570_v2 = vmul.f32 0.25, %v6034_v19  ;;  %v6873_v36 = vsel %vm16794_vm9, %v6568_v12, %v6567_v33  ;;  %v5247_v45 = vcombine.high %v14993_v27, %v14993_v27  ;;  %vm16816_vm9 = vmmov %vm16813_vm2 }
 0x713   :  { %v16795_v56 = vrot.slane %v14717_v46, 1  ;;  %vm16796_vm10 = vcmask 523712   ;;  %v6053_v37 = vadd.f32 %v6052_v8, %v6051_v7  ;;  %v6059_v52 = vrot.slane %v6058_v59, 2  ;;  %v7517_v8 = vpop.permute.xlu0 %7516 }
 0x714   :  { %7658 = vst.msk [vmem:[#allocation5] sm:$0xff] %vm16796_vm10, %v7611_v55  ;;  %v6048_v41 = vadd.f32 %v6047_v51, %v6046_v48  ;;  %v6571_v47 = vmul.f32 0.25, %v6041_v29  ;;  %v6874_v62 = vsel %vm16770_vm14, %v6569_v25, %v6873_v36  ;;  %v6075_v5 = vrot.slane %v14773_v44, 1  ;;  %v16806_v25 = vld [vmem:[#allocation31_spill] sm:$0xff] }
 0x715   :  { %v6069_v31 = vadd.f32 %v16795_v56, %v14717_v46  ;;  %v16797_v10 = vrot.slane %v14634_v30, 2  ;;  %v16799_v26 = vrot.slane %v16798_v23, 4  ;;  %v6054_v14 = vrot.slane %v6053_v37, 1  ;;  %7045 = vrot.lane.b32.xlu0 %v15007_v21, %s9008_s28  ;;  %v7707_v56 = vpop.permute.xlu1 %7706 }
 0x716   :  { %v6060_v54 = vadd.f32 %v6059_v52, %v6058_v59  ;;  %v6572_v16 = vmul.f32 0.25, %v6048_v41  ;;  %v6875_v61 = vsel %vm16771_vm13, %v6570_v2, %v6874_v62  ;;  %vm16800_vm1 = vcmask 195712  }
 0x717   :  { %v6081_v46 = vadd.f32 %v16797_v10, %v14634_v30  ;;  %v6086_v34 = vadd.f32 %v16799_v26, %v16798_v23  ;;  %7180 = vst.msk [vmem:[#allocation5 + $0x18] sm:$0xff] %vm16800_vm1, %v7136_v42  ;;  %vm16801_vm12 = vcmask 1044484   ;;  %v6076_v6 = vadd.f32 %v6075_v5, %v14773_v44  ;;  %v15040_v30 = vld [vmem:[#allocation4 + $0x62] sm:$0xff]  ;;  %v6976_v41 = vld [vmem:[#allocation4 + $0x70] sm:$0xff] }
 0x718   :  { %v6876_v39 = vsel %vm16801_vm12, %v6571_v47, %v6875_v61  ;;  %vm16802_vm0 = vcmask 326912   ;;  %v6055_v43 = vadd.f32 %v6054_v14, %v6053_v37  ;;  %v6061_v48 = vrot.slane %v6060_v54, 1  ;;  %7141 = vrot.lane.b32.xlu1 %v15040_v30, %s9009_s20  ;;  %6992 = vst.msk [vmem:[#allocation5 + $0x38] sm:$0xff] %vm16813_vm2, %v6976_v41 }
 0x719   :  { %v6082_v18 = vrot.slane %v6081_v46, 1  ;;  %v6087_v33 = vrot.slane %v6086_v34, 2  ;;  %7371 = vst.msk [vmem:[#allocation5 + $0x10] sm:$0xff] %vm16802_vm0, %v7326_v35  ;;  %vm16803_vm5 = vcmask 1045509   ;;  %v16805_v3 = vrot.slane %v16804_v22, 4  ;;  %7425 = vrot.lane.b32.xlu0 %v14968_v49, %s9012_s27  ;;  %v15068_v49 = vld [vmem:[#allocation4 + $0x71] sm:$0xff]  ;;  %vm16829_vm0 = vmmov %vm16809_vm3 }
 0x71a   :  { %v6877_v7 = vsel %vm16803_vm5, %v6572_v16, %v6876_v39  ;;  %v16807_v0 = vcombine.high %v16806_v25, %v16806_v25  ;;  %v6105_v51 = vsel %vm16809_vm3, %v14993_v27, 0.0  ;;  %v6062_v59 = vadd.f32 %v6061_v48, %v6060_v54 }
 0x71b   :  { %v6093_v19 = vadd.f32 %v16805_v3, %v16804_v22  ;;  %v6083_v44 = vadd.f32 %v6082_v18, %v6081_v46  ;;  %v6088_v12 = vadd.f32 %v6087_v33, %v6086_v34  ;;  %v6573_v55 = vmul.f32 0.25, %v6055_v43  ;;  %v15070_v18 = vld [vmem:[#allocation4 + $0x70] sm:$0xff]  ;;  %v16818_v43 = vld [vmem:[#allocation25_spill] sm:$0xff] }
 0x71c   :  { %v6098_v29 = vsel %vm16808_vm7, %v16807_v0, 0.0  ;;  %vm16810_vm4 = vcmask 458112   ;;  %v6106_v52 = vrot.slane %v6105_v51, 4  ;;  %v6112_v47 = vsel %vm16811_vm11, %v5247_v45, 0.0  ;;  %7522 = vrot.lane.b32.xlu1 %v15005_v40, %s9013_s15  ;;  %vm16832_vm7 = vmmov %vm16829_vm0 }
 0x71d   :  { %v6094_v2 = vrot.slane %v6093_v19, 2  ;;  %v6099_v36 = vrot.slane %v6098_v29, 4  ;;  %7563 = vst.msk [vmem:[#allocation5 + $0x8] sm:$0xff] %vm16810_vm4, %v7517_v8  ;;  %v6089_v37 = vrot.slane %v6088_v12, 1  ;;  %v6575_v62 = vmul.f32 0.25, %v6069_v31  ;;  %7047 = vrot.lane.b32.xlu0 %v15068_v49, %s9008_s28  ;;  %vm16834_vm4 = vmmov %vm16829_vm0 }
 0x71e   :  { %vm16812_vm8 = vcmask 589312   ;;  %v6574_v5 = vmul.f32 0.25, %v6062_v59  ;;  %vm16814_vm6 = vcmask 1046534   ;;  %v6107_v26 = vadd.f32 %v6106_v52, %v6105_v51  ;;  %vm16835_vm11 = vmmov %vm16813_vm2 }
 0x71f   :  { %7754 = vst.msk [vmem:[#allocation5] sm:$0xff] %vm16812_vm8, %v7707_v56  ;;  %v6878_v27 = vsel %vm16814_vm6, %v6573_v55, %v6877_v7  ;;  %v6095_v10 = vadd.f32 %v6094_v2, %v6093_v19  ;;  %v6100_v46 = vadd.f32 %v6099_v36, %v6098_v29  ;;  %v6090_v23 = vadd.f32 %v6089_v37, %v6088_v12  ;;  %v16822_v56 = vld [vmem:[#allocation74_spill] sm:$0xff]  ;;  %vm16833_vm3 = vmmov %vm16814_vm6 }
 0x720   :  { %v6113_v34 = vrot.slane %v6112_v47, 4  ;;  %v6576_v45 = vmul.f32 0.25, %v6076_v6  ;;  %vm16815_vm15 = vcmask 1047559   ;;  %v6577_v54 = vmul.f32 0.25, %v6083_v44  ;;  %7237 = vrot.lane.b32.xlu1 %v15070_v18, %s9010_s18 }
 0x721   :  { %v6879_v31 = vsel %vm16815_vm15, %v6574_v5, %v6878_v27  ;;  %v6096_v42 = vrot.slane %v6095_v10, 1  ;;  %v6101_v14 = vrot.slane %v6100_v46, 2  ;;  %v6108_v16 = vrot.slane %v6107_v26, 2  ;;  %7427 = vrot.lane.b32.xlu0 %v15040_v30, %s9012_s27  ;;  %vm16836_vm8 = vmmov %vm16815_vm15 }
 0x722   :  { %6960 = vst.msk [vmem:[#allocation4 + $0x81] sm:$0xff] %vm16816_vm9, %v6879_v31  ;;  %v6114_v61 = vadd.f32 %v6113_v34, %v6112_v47  ;;  %v6578_v35 = vmul.f32 0.25, %v6090_v23  ;;  %vm16817_vm10 = vcmask 1041409   ;;  %v16819_v48 = vcombine.high %v16818_v43, %v16818_v43  ;;  %vm16839_vm15 = vmmov %vm16770_vm14 }
 0x723   :  { %v6880_v39 = vsel %vm16817_vm10, %v6576_v45, %v6575_v62  ;;  %v6097_v40 = vadd.f32 %v6096_v42, %v6095_v10  ;;  %v6102_v33 = vadd.f32 %v6101_v14, %v6100_v46  ;;  %v6109_v22 = vadd.f32 %v6108_v16, %v6107_v26  ;;  %v16825_v62 = vld [vmem:[#allocation22_spill] sm:$0xff]  ;;  %v16827_v45 = vld [vmem:[#allocation33_spill] sm:$0xff]  ;;  %vm16837_vm6 = vmmov %vm16817_vm10 }
 0x724   :  { %v6881_v6 = vsel %vm16770_vm14, %v6577_v54, %v6880_v39  ;;  %v5279_v7 = vrot.slane %v16819_v48, %v16691_v38  ;;  %v6115_v3 = vrot.slane %v6114_v61, 2  ;;  %v16820_v44 = vrot.slane %v14722_v24, 1  ;;  %7618 = vrot.lane.b32.xlu1 %v15007_v21, %s9014_s16  ;;  %v16830_v42 = vld [vmem:[#allocation26_spill] sm:$0xff]  ;;  %v15112_v39 = vld [vmem:[#allocation4 + $0x72] sm:$0xff]  ;;  %vm16840_vm9 = vmmov %vm16771_vm13 }
 0x725   :  { %v6882_v19 = vsel %vm16771_vm13, %v6578_v35, %v6881_v6  ;;  %v6103_v25 = vrot.slane %v6102_v33, 1  ;;  %v6579_v0 = vmul.f32 0.25, %v6097_v40  ;;  %v6131_v51 = vrot.slane %v14777_v15, 1  ;;  %7143 = vrot.lane.b32.xlu0 %v15112_v39, %s9009_s20  ;;  %vm16843_vm10 = vmmov %vm16801_vm12 }
 0x726   :  { %v6125_v12 = vadd.f32 %v16820_v44, %v14722_v24  ;;  %v5281_v29 = vcombine.high %v5279_v7, %v5279_v7  ;;  %v7770_v8 = vld [vmem:[#allocation5] sm:$0xff]  ;;  %v6110_v59 = vrot.slane %v6109_v22, 1  ;;  %v6116_v55 = vadd.f32 %v6115_v3, %v6114_v61  ;;  %vm16848_vm14 = vmmov %vm16829_vm0 }
 0x727   :  { %v16821_v2 = vrot.slane %v14643_v13, 2  ;;  %v16823_v41 = vrot.slane %v16822_v56, 4  ;;  %vm16824_vm1 = vcmask 588800   ;;  %v6104_v52 = vadd.f32 %v6103_v25, %v6102_v33  ;;  %v6977_v44 = vld [vmem:[#allocation4 + $0xa0] sm:$0xff]  ;;  %vm16849_vm13 = vmmov %vm16829_vm0 }
 0x728   :  { %8928 = vmatprep.mubr.msk.f32.mxu1 %vm16824_vm1, %v7770_v8  ;;  %v6883_v24 = vsel %vm16801_vm12, %v6579_v0, %v6882_v19  ;;  %v6132_v47 = vadd.f32 %v6131_v51, %v14777_v15  ;;  %v16826_v5 = vrot.slane %v16825_v62, 4  ;;  %v6117_v10 = vrot.slane %v6116_v55, 1  ;;  %7333 = vrot.lane.b32.xlu1 %v15068_v49, %s9011_s10  ;;  %6993 = vst.msk [vmem:[#allocation5 + $0x40] sm:$0xff] %vm16835_vm11, %v6977_v44  ;;  %vm16850_vm1 = vmmov %vm16813_vm2 }
 0x729   :  { %v6137_v36 = vadd.f32 %v16821_v2, %v14643_v13  ;;  %v6142_v37 = vadd.f32 %v16823_v41, %v16822_v56  ;;  %v6111_v13 = vadd.f32 %v6110_v59, %v6109_v22  ;;  %v6580_v26 = vmul.f32 0.25, %v6104_v52  ;;  %7524 = vrot.lane.b32.xlu0 %v15070_v18, %s9013_s15  ;;  %vm16851_vm12 = vmmov %vm16803_vm5 }
 0x72a   :  { %v6149_v27 = vadd.f32 %v16826_v5, %v16825_v62  ;;  %v16828_v31 = vcombine.high %v16827_v45, %v16827_v45  ;;  %v16831_v14 = vcombine.high %v16830_v42, %v16830_v42  ;;  %v6118_v16 = vadd.f32 %v6117_v10, %v6116_v55  ;;  %vm16856_vm11 = vmmov %vm16839_vm15 }
 0x72b   :  { %v6138_v46 = vrot.slane %v6137_v36, 1  ;;  %v6143_v23 = vrot.slane %v6142_v37, 2  ;;  %v6581_v61 = vmul.f32 0.25, %v6111_v13  ;;  %v6884_v40 = vsel %vm16803_vm5, %v6580_v26, %v6883_v24  ;;  %v15139_v26 = vld [vmem:[#allocation4 + $0x81] sm:$0xff]  ;;  %vm16852_vm5 = vmmov %vm16833_vm3 }
 0x72c   :  { %v6150_v34 = vrot.slane %v6149_v27, 2  ;;  %v6154_v15 = vsel %vm16829_vm0, %v16828_v31, 0.0  ;;  %v15110_v54 = vrot.slane %v16831_v14, %v16691_v38  ;;  %v6161_v43 = vsel %vm16832_vm7, %v5279_v7, 0.0  ;;  %7714 = vrot.lane.b32.xlu1 %v15040_v30, %s9015_s23  ;;  %vm16853_vm7 = vmmov %vm16836_vm8 }
 0x72d   :  { %v6139_v21 = vadd.f32 %v6138_v46, %v6137_v36  ;;  %v6144_v35 = vadd.f32 %v6143_v23, %v6142_v37  ;;  %v6155_v6 = vrot.slane %v6154_v15, 4  ;;  %v6582_v48 = vmul.f32 0.25, %v6118_v16  ;;  %v15137_v23 = vld [vmem:[#allocation4 + $0x80] sm:$0xff] }
 0x72e   :  { %v6151_v33 = vadd.f32 %v6150_v34, %v6149_v27  ;;  %v6885_v22 = vsel %vm16833_vm3, %v6581_v61, %v6884_v40  ;;  %v6162_v19 = vrot.slane %v6161_v43, 4  ;;  %v6168_v51 = vsel %vm16834_vm4, %v5281_v29, 0.0  ;;  %7239 = vrot.lane.b32.xlu0 %v15137_v23, %s9010_s18  ;;  %vm16854_vm3 = vmmov %vm16850_vm1 }
 0x72f   :  { %v6145_v3 = vrot.slane %v6144_v35, 1  ;;  %v6156_v0 = vadd.f32 %v6155_v6, %v6154_v15  ;;  %v6583_v8 = vmul.f32 0.25, %v6125_v12  ;;  %v6886_v7 = vsel %vm16836_vm8, %v6582_v48, %v6885_v22  ;;  %v16846_v22 = vld [vmem:[#allocation35_spill] sm:$0xff]  ;;  %vm16855_vm4 = vmmov %vm16837_vm6 }
 0x730   :  { %v6152_v25 = vrot.slane %v6151_v33, 1  ;;  %v6163_v55 = vadd.f32 %v6162_v19, %v6161_v43  ;;  %v6169_v2 = vrot.slane %v6168_v51, 4  ;;  %6961 = vst.msk [vmem:[#allocation4 + $0xb1] sm:$0xff] %vm16813_vm2, %v6886_v7  ;;  %v6584_v41 = vmul.f32 0.25, %v6132_v47  ;;  %7335 = vrot.lane.b32.xlu1 %v15139_v26, %s9011_s10  ;;  %vm16859_vm8 = vmmov %vm16840_vm9 }
 0x731   :  { %v6146_v59 = vadd.f32 %v6145_v3, %v6144_v35  ;;  %v6157_v56 = vrot.slane %v6156_v0, 2  ;;  %v6585_v37 = vmul.f32 0.25, %v6139_v21  ;;  %v5315_v24 = vcombine.high %v15110_v54, %v15110_v54  ;;  %vm16861_vm2 = vmmov %vm16843_vm10 }
 0x732   :  { %v6153_v36 = vadd.f32 %v6152_v25, %v6151_v33  ;;  %v6164_v12 = vrot.slane %v6163_v55, 2  ;;  %v6170_v29 = vadd.f32 %v6169_v2, %v6168_v51  ;;  %v6887_v27 = vsel %vm16837_vm6, %v6584_v41, %v6583_v8  ;;  %7620 = vrot.lane.b32.xlu0 %v15068_v49, %s9014_s16  ;;  %vm16868_vm6 = vmmov %vm16829_vm0 }
 0x733   :  { %v6586_v52 = vmul.f32 0.25, %v6146_v59  ;;  %v6158_v62 = vadd.f32 %v6157_v56, %v6156_v0  ;;  %v16838_v47 = vrot.slane %v14727_v1, 1  ;;  %v6888_v18 = vsel %vm16839_vm15, %v6585_v37, %v6887_v27  ;;  %v7105_v56 = vld [vmem:[#allocation4 + $0xa2] sm:$0xff]  ;;  %vm16869_vm15 = vmmov %vm16851_vm12 }
 0x734   :  { %v6587_v5 = vmul.f32 0.25, %v6153_v36  ;;  %v6165_v10 = vadd.f32 %v6164_v12, %v6163_v55  ;;  %v6171_v46 = vrot.slane %v6170_v29, 2  ;;  %v6187_v30 = vrot.slane %v14781_v63, 1  ;;  %7716 = vrot.lane.b32.xlu1 %v15112_v39, %s9015_s23  ;;  %v7009_v36 = vld [vmem:[#allocation4 + $0xa1] sm:$0xff] }
 0x735   :  { %v6181_v13 = vadd.f32 %v16838_v47, %v14727_v1  ;;  %v6159_v34 = vrot.slane %v6158_v62, 1  ;;  %v6889_v45 = vsel %vm16840_vm9, %v6586_v52, %v6888_v18  ;;  %v16841_v31 = vrot.slane %v14652_v57, 2  ;;  %v7787_v18 = vld [vmem:[%s15857_s4 + $0x8] sm:$0xff]  ;;  %vm16870_vm9 = vmmov %vm16829_vm0 }
 0x736   :  { %v16842_v1 = vrot.slane %v16674_v4, 4  ;;  %v6166_v14 = vrot.slane %v6165_v10, 1  ;;  %v6172_v16 = vadd.f32 %v6171_v46, %v6170_v29  ;;  %v6890_v61 = vsel %vm16843_vm10, %v6587_v5, %v6889_v45  ;;  %v7786_v46 = vld [vmem:[%s15857_s4] sm:$0xff]  ;;  %7049 = vrot.lane.b32.xlu0 %v7009_v36, %s9008_s28  ;;  %vm16871_vm10 = vmmov %vm16829_vm0 }
 0x737   :  { %v6193_v15 = vadd.f32 %v16841_v31, %v14652_v57  ;;  %v6188_v21 = vadd.f32 %v6187_v30, %v14781_v63  ;;  %v6160_v35 = vadd.f32 %v6159_v34, %v6158_v62  ;;  %v16844_v57 = vld [vmem:[#allocation19_spill] sm:$0xff]  ;;  %v16847_v3 = vcombine.high %v16846_v22, %v16846_v22  ;;  %v6978_v8 = vld [vmem:[#allocation4 + $0xb0] sm:$0xff] }
 0x738   :  { %v6198_v42 = vadd.f32 %v16842_v1, %v16674_v4  ;;  %v16845_v6 = vrot.slane %v16844_v57, 4  ;;  %v6167_v4 = vadd.f32 %v6166_v14, %v6165_v10  ;;  %v6173_v48 = vrot.slane %v6172_v16, 1  ;;  %6994 = vst.msk [vmem:[#allocation5 + $0x48] sm:$0xff] %vm16850_vm1, %v6978_v8  ;;  %7145 = vrot.lane.b32.xlu1 %v7105_v56, %s9009_s20 }
 0x739   :  { %v6194_v40 = vrot.slane %v6193_v15, 1  ;;  %v6210_v19 = vsel %vm16848_vm14, %v16847_v3, 0.0  ;;  %v6217_v44 = vsel %vm16849_vm13, %v15110_v54, 0.0  ;;  %v6588_v25 = vmul.f32 0.25, %v6160_v35  ;;  %vm16872_vm14 = vmmov %vm16850_vm1 }
 0x73a   :  { %v6199_v33 = vrot.slane %v6198_v42, 2  ;;  %v6205_v43 = vadd.f32 %v16845_v6, %v16844_v57  ;;  %v6174_v7 = vadd.f32 %v6173_v48, %v6172_v16  ;;  %v6589_v59 = vmul.f32 0.25, %v6167_v4  ;;  %v16857_v57 = vld [vmem:[#allocation7_spill] sm:$0xff]  ;;  %7429 = vrot.lane.b32.xlu0 %v15112_v39, %s9012_s27  ;;  %v7788_v39 = vld [vmem:[%s15857_s4 + $0x10] sm:$0xff]  ;;  %vm16873_vm13 = vmmov %vm16852_vm5 }
 0x73b   :  { %v6195_v0 = vadd.f32 %v6194_v40, %v6193_v15  ;;  %v6211_v55 = vrot.slane %v6210_v19, 4  ;;  %v6218_v2 = vrot.slane %v6217_v44, 4  ;;  %v6891_v54 = vsel %vm16851_vm12, %v6588_v25, %v6890_v61  ;;  %vm16874_vm1 = vmmov %vm16853_vm7 }
 0x73c   :  { %v6200_v63 = vadd.f32 %v6199_v33, %v6198_v42  ;;  %v6206_v51 = vrot.slane %v6205_v43, 2  ;;  %v6224_v12 = vsel %vm16829_vm0, %v5315_v24, 0.0  ;;  %v6590_v29 = vmul.f32 0.25, %v6174_v7  ;;  %7526 = vrot.lane.b32.xlu1 %v15137_v23, %s9013_s15  ;;  %v7789_v23 = vld [vmem:[%s15857_s4 + $0x18] sm:$0xff]  ;;  %vm16875_vm12 = vmmov %vm16854_vm3 }
 0x73d   :  { %v6892_v49 = vsel %vm16852_vm5, %v6589_v59, %v6891_v54  ;;  %v6212_v52 = vadd.f32 %v6211_v55, %v6210_v19  ;;  %v6219_v62 = vadd.f32 %v6218_v2, %v6217_v44  ;;  %v6225_v47 = vrot.slane %v6224_v12, 4  ;;  %v7010_v55 = vld [vmem:[#allocation4 + $0xb1] sm:$0xff]  ;;  %vm16876_vm0 = vmmov %vm16855_vm4 }
 0x73e   :  { %v6201_v41 = vrot.slane %v6200_v63, 1  ;;  %v6207_v37 = vadd.f32 %v6206_v51, %v6205_v43  ;;  %v6591_v10 = vmul.f32 0.25, %v6181_v13  ;;  %v6893_v24 = vsel %vm16853_vm7, %v6590_v29, %v6892_v49  ;;  %v7201_v2 = vld [vmem:[#allocation4 + $0xb0] sm:$0xff]  ;;  %7051 = vrot.lane.b32.xlu0 %v7010_v55, %s9008_s28  ;;  %vm16877_vm5 = vmmov %vm16856_vm11 }
 0x73f   :  { %v6213_v30 = vrot.slane %v6212_v52, 2  ;;  %v6220_v34 = vrot.slane %v6219_v62, 2  ;;  %v6592_v45 = vmul.f32 0.25, %v6188_v21  ;;  %6962 = vst.msk [vmem:[#allocation4 + $0xc1] sm:$0xff] %vm16854_vm3, %v6893_v24  ;;  %v6226_v31 = vadd.f32 %v6225_v47, %v6224_v12  ;;  %v16864_v54 = vld [vmem:[#allocation8_spill] sm:$0xff]  ;;  %v16866_v12 = vld [vmem:[#allocation38_spill] sm:$0xff]  ;;  %vm16881_vm7 = vmmov %vm16859_vm8 }
 0x740   :  { %v6202_v5 = vadd.f32 %v6201_v41, %v6200_v63  ;;  %v6208_v27 = vrot.slane %v6207_v37, 1  ;;  %v6593_v15 = vmul.f32 0.25, %v6195_v0  ;;  %v8968_v61 = vpack.c.bf16 %v7787_v18, %v7786_v46  ;;  %7241 = vrot.lane.b32.xlu1 %v7201_v2, %s9010_s18  ;;  %v16878_v2 = vld [vmem:[#allocation28_spill] sm:$0xff]  ;;  %vm16883_vm3 = vmmov %vm16861_vm2 }
 0x741   :  { %v6214_v42 = vadd.f32 %v6213_v30, %v6212_v52  ;;  %v6221_v14 = vadd.f32 %v6220_v34, %v6219_v62  ;;  %v6894_v16 = vsel %vm16855_vm4, %v6592_v45, %v6591_v10  ;;  %v6227_v35 = vrot.slane %v6226_v31, 2  ;;  %v7392_v34 = vld [vmem:[#allocation4 + $0x82] sm:$0xff]  ;;  %vm16890_vm4 = vmmov %vm16868_vm6 }
 0x742   :  { %v6209_v13 = vadd.f32 %v6208_v27, %v6207_v37  ;;  %v6594_v1 = vmul.f32 0.25, %v6202_v5  ;;  %v6895_v33 = vsel %vm16856_vm11, %v6593_v15, %v6894_v16  ;;  %v16858_v6 = vcombine.high %v16857_v57, %v16857_v57  ;;  %8969 = vmatprep.subr.bf16.mxu1 %v8968_v61  ;;  %7431 = vrot.lane.b32.xlu0 %v7392_v34, %s9012_s27  ;;  %vm16891_vm11 = vmmov %vm16875_vm12 }
 0x743   :  { %v6215_v43 = vrot.slane %v6214_v42, 1  ;;  %v6222_v4 = vrot.slane %v6221_v14, 1  ;;  %v16860_v22 = vrot.slane %v14734_v28, 1  ;;  %v6228_v19 = vadd.f32 %v6227_v35, %v6226_v31  ;;  %8971 = vmatpush3.bf16.msra.mxu1 %v8968_v61  ;;  %v7790_v61 = vld [vmem:[%s15857_s4 + $0x20] sm:$0xff]  ;;  %v7791_v35 = vld [vmem:[%s15857_s4 + $0x28] sm:$0xff] }
 0x744   :  { %v6595_v40 = vmul.f32 0.25, %v6209_v13  ;;  %v5347_v21 = vrot.slane %v16858_v6, %v16691_v38  ;;  %v6896_v48 = vsel %vm16859_vm8, %v6594_v1, %v6895_v33  ;;  %v6243_v0 = vrot.slane %v14785_v20, 1  ;;  %7622 = vrot.lane.b32.xlu1 %v15139_v26, %s9014_s16  ;;  %vm16892_vm8 = vmmov %vm16869_vm15 }
 0x745   :  { %v6237_v3 = vadd.f32 %v16860_v22, %v14734_v28  ;;  %v6216_v63 = vadd.f32 %v6215_v43, %v6214_v42  ;;  %v6223_v51 = vadd.f32 %v6222_v4, %v6221_v14  ;;  %v16862_v28 = vrot.slane %v14660_v9, 2  ;;  %v7793_v22 = vld [vmem:[%s15857_s4 + $0x38] sm:$0xff] }
 0x746   :  { %v6897_v44 = vsel %vm16861_vm2, %v6595_v40, %v6896_v48  ;;  %v5349_v25 = vcombine.high %v5347_v21, %v5347_v21  ;;  %v16863_v7 = vrot.slane %v16676_v32, 4  ;;  %v6229_v36 = vrot.slane %v6228_v19, 1  ;;  %v6979_v10 = vld [vmem:[#allocation4 + $0xc0] sm:$0xff]  ;;  %v7792_v48 = vld [vmem:[%s15857_s4 + $0x30] sm:$0xff]  ;;  %vm16893_vm2 = vmmov %vm16890_vm4 }
 0x747   :  { %v6249_v8 = vadd.f32 %v16862_v28, %v14660_v9  ;;  %v6244_v56 = vadd.f32 %v6243_v0, %v14785_v20  ;;  %v16865_v41 = vrot.slane %v16864_v54, 4  ;;  %v16867_v29 = vcombine.high %v16866_v12, %v16866_v12  ;;  %6995 = vst.msk [vmem:[#allocation5 + $0x50] sm:$0xff] %vm16872_vm14, %v6979_v10  ;;  %v7489_v28 = vld [vmem:[#allocation4 + $0x90] sm:$0xff]  ;;  %vm16898_vm14 = vmmov %vm16876_vm0 }
 0x748   :  { %v6254_v59 = vadd.f32 %v16863_v7, %v16676_v32  ;;  %v6596_v9 = vmul.f32 0.25, %v6216_v63  ;;  %v6597_v32 = vmul.f32 0.25, %v6223_v51  ;;  %v8972_v62 = vpack.c.bf16 %v7789_v23, %v7788_v39  ;;  %7337 = vrot.lane.b32.xlu1 %v7010_v55, %s9011_s10 }
 0x749   :  { %v6261_v37 = vadd.f32 %v16865_v41, %v16864_v54  ;;  %v6266_v49 = vsel %vm16868_vm6, %v16867_v29, 0.0  ;;  %v6250_v52 = vrot.slane %v6249_v8, 1  ;;  %v6230_v5 = vadd.f32 %v6229_v36, %v6228_v19  ;;  %vm16894_vm6 = vmmov %vm16873_vm13 }
 0x74a   :  { %v6255_v27 = vrot.slane %v6254_v59, 2  ;;  %v6267_v47 = vrot.slane %v6266_v49, 4  ;;  %v6898_v46 = vsel %vm16869_vm15, %v6596_v9, %v6897_v44  ;;  %v6273_v24 = vsel %vm16870_vm9, %v5347_v21, 0.0  ;;  %8973 = vmatprep.subr.bf16.mxu1 %v8972_v62  ;;  %vm16895_vm15 = vmmov %vm16893_vm2 }
 0x74b   :  { %v6262_v20 = vrot.slane %v6261_v37, 2  ;;  %v6251_v18 = vadd.f32 %v6250_v52, %v6249_v8  ;;  %v6280_v30 = vsel %vm16871_vm10, %v5349_v25, 0.0  ;;  %v6598_v45 = vmul.f32 0.25, %v6230_v5  ;;  %8975 = vmatpush3.bf16.msra.mxu1 %v8972_v62  ;;  %vm16896_vm9 = vmmov %vm16874_vm1 }
 0x74c   :  { %v6899_v13 = vsel %vm16873_vm13, %v6597_v32, %v6898_v46  ;;  %v6256_v31 = vadd.f32 %v6255_v27, %v6254_v59  ;;  %v6268_v1 = vadd.f32 %v6267_v47, %v6266_v49  ;;  %v6274_v42 = vrot.slane %v6273_v24, 4  ;;  %7718 = vrot.lane.b32.xlu1 %v7392_v34, %s9015_s23  ;;  %v16884_v46 = vld [vmem:[#allocation55_spill] sm:$0xff]  ;;  %vm16897_vm10 = vmmov %vm16891_vm11 }
 0x74d   :  { %v6263_v15 = vadd.f32 %v6262_v20, %v6261_v37  ;;  %v6281_v14 = vrot.slane %v6280_v30, 4  ;;  %v6599_v16 = vmul.f32 0.25, %v6237_v3  ;;  %v6900_v40 = vsel %vm16874_vm1, %v6598_v45, %v6899_v13  ;;  %v15241_v3 = vld [vmem:[#allocation4 + $0xb2] sm:$0xff]  ;;  %vm16901_vm13 = vmmov %vm16877_vm5 }
 0x74e   :  { %v6257_v33 = vrot.slane %v6256_v31, 1  ;;  %v6600_v6 = vmul.f32 0.25, %v6244_v56  ;;  %6963 = vst.msk [vmem:[#allocation4 + $0xd1] sm:$0xff] %vm16875_vm12, %v6900_v40  ;;  %v6269_v26 = vrot.slane %v6268_v1, 2  ;;  %v6275_v21 = vadd.f32 %v6274_v42, %v6273_v24  ;;  %7147 = vrot.lane.b32.xlu0 %v15241_v3, %s9009_s20  ;;  %v16886_v24 = vld [vmem:[#allocation42_spill] sm:$0xff]  ;;  %vm16904_vm1 = vmmov %vm16881_vm7 }
 0x74f   :  { %v6264_v57 = vrot.slane %v6263_v15, 1  ;;  %v6282_v43 = vadd.f32 %v6281_v14, %v6280_v30  ;;  %v6601_v4 = vmul.f32 0.25, %v6251_v18  ;;  %v8976_v0 = vpack.c.bf16 %v7791_v35, %v7790_v61  ;;  %vm16909_vm12 = vmmov %vm16883_vm3 }
 0x750   :  { %v6258_v19 = vadd.f32 %v6257_v33, %v6256_v31  ;;  %v6901_v25 = vsel %vm16876_vm0, %v6600_v6, %v6599_v16  ;;  %v6270_v39 = vadd.f32 %v6269_v26, %v6268_v1  ;;  %v6276_v23 = vrot.slane %v6275_v21, 2  ;;  %v15279_v16 = vld [vmem:[#allocation4 + $0xc1] sm:$0xff]  ;;  %vm16914_vm0 = vmmov %vm16893_vm2 }
 0x751   :  { %v6265_v44 = vadd.f32 %v6264_v57, %v6263_v15  ;;  %v6283_v63 = vrot.slane %v6282_v43, 2  ;;  %v6902_v51 = vsel %vm16877_vm5, %v6601_v4, %v6901_v25  ;;  %8977 = vmatprep.subr.bf16.mxu1 %v8976_v0  ;;  %v8980_v59 = vpack.c.bf16 %v7793_v22, %v7792_v48  ;;  %v16888_v15 = vld [vmem:[#allocation37_spill] sm:$0xff]  ;;  %7339 = vrot.lane.b32.xlu1 %v15279_v16, %s9011_s10  ;;  %vm16915_vm5 = vmmov %vm16897_vm10 }
 0x752   :  { %v6602_v8 = vmul.f32 0.25, %v6258_v19  ;;  %v16879_v36 = vcombine.high %v16878_v2, %v16878_v2  ;;  %v6271_v54 = vrot.slane %v6270_v39, 1  ;;  %v6277_v41 = vadd.f32 %v6276_v23, %v6275_v21  ;;  %8979 = vmatpush3.bf16.msra.mxu1 %v8976_v0  ;;  %7528 = vrot.lane.b32.xlu0 %v7489_v28, %s9013_s15  ;;  %v7681_v4 = vld [vmem:[#allocation4 + $0x92] sm:$0xff] }
 0x753   :  { %v6603_v7 = vmul.f32 0.25, %v6265_v44  ;;  %v6284_v37 = vadd.f32 %v6283_v63, %v6282_v43  ;;  %v16880_v55 = vrot.slane %v14739_v58, 1  ;;  %8981 = vmatprep.subr.bf16.mxu1 %v8980_v59  ;;  %v6299_v9 = vrot.slane %v14789_v11, 1  ;;  %v7585_v43 = vld [vmem:[#allocation4 + $0x91] sm:$0xff] }
 0x754   :  { %v5381_v56 = vrot.slane %v16879_v36, %v16691_v38  ;;  %v6903_v29 = vsel %vm16881_vm7, %v6602_v8, %v6902_v51  ;;  %v16882_v32 = vrot.slane %v14668_v50, 2  ;;  %v6272_v62 = vadd.f32 %v6271_v54, %v6270_v39  ;;  %vm16916_vm7 = vmmov %vm16892_vm8 }
 0x755   :  { %v6293_v12 = vadd.f32 %v16880_v55, %v14739_v58  ;;  %v6278_v5 = vrot.slane %v6277_v41, 1  ;;  %v6285_v27 = vrot.slane %v6284_v37, 1  ;;  %v6904_v20 = vsel %vm16883_vm3, %v6603_v7, %v6903_v29  ;;  %v7794_v58 = vld [vmem:[%s15857_s4 + $0x40] sm:$0xff]  ;;  %v6980_v14 = vld [vmem:[#allocation4 + $0xd0] sm:$0xff]  ;;  %7720 = vrot.lane.b32.xlu1 %v7681_v4, %s9015_s23  ;;  %vm16917_vm3 = vmmov %vm16914_vm0 }
 0x756   :  { %v5383_v49 = vcombine.high %v5381_v56, %v5381_v56  ;;  %v6305_v52 = vadd.f32 %v16882_v32, %v14668_v50  ;;  %v6300_v47 = vadd.f32 %v6299_v9, %v14789_v11  ;;  %v16885_v18 = vrot.slane %v16884_v46, 4  ;;  %8983 = vmatpush3.bf16.msra.mxu1 %v8980_v59  ;;  %v15277_v11 = vld [vmem:[#allocation4 + $0xc0] sm:$0xff]  ;;  %6996 = vst.msk [vmem:[#allocation5 + $0x58] sm:$0xff] %vm16891_vm11, %v6980_v14  ;;  %v16912_v4 = vld [vmem:[#allocation44_spill] sm:$0xff]  ;;  %vm16919_vm11 = vmmov %vm16894_vm6 }
 0x757   :  { %v16887_v30 = vrot.slane %v16886_v24, 4  ;;  %v6279_v45 = vadd.f32 %v6278_v5, %v6277_v41  ;;  %v6286_v13 = vadd.f32 %v6285_v27, %v6284_v37  ;;  %v6604_v31 = vmul.f32 0.25, %v6272_v62  ;;  %8926 = vmatprep.subr.mxu1 %v7794_v58  ;;  %7243 = vrot.lane.b32.xlu0 %v15277_v11, %s9010_s18  ;;  %v16899_v37 = vld [vmem:[#allocation9_spill] sm:$0xff]  ;;  %v15303_v62 = vld [vmem:[#allocation4 + $0xc2] sm:$0xff] }
 0x758   :  { %v6306_v10 = vrot.slane %v6305_v52, 1  ;;  %v6310_v50 = vadd.f32 %v16885_v18, %v16884_v46  ;;  %v16889_v1 = vcombine.high %v16888_v15, %v16888_v15  ;;  %v6329_v21 = vsel %vm16893_vm2, %v5381_v56, 0.0 }
 0x759   :  { %v6317_v34 = vadd.f32 %v16887_v30, %v16886_v24  ;;  %v6605_v57 = vmul.f32 0.25, %v6279_v45  ;;  %v6606_v6 = vmul.f32 0.25, %v6286_v13  ;;  %v6905_v26 = vsel %vm16892_vm8, %v6604_v31, %v6904_v20  ;;  %7149 = vrot.lane.b32.xlu1 %v15303_v62, %s9009_s20  ;;  %v16905_v30 = vld [vmem:[#allocation16_spill] sm:$0xff]  ;;  %v16907_v13 = vld [vmem:[#allocation10_spill] sm:$0xff]  ;;  %vm16920_vm8 = vmmov %vm16896_vm9 }
 0x75a   :  { %v6322_v42 = vsel %vm16890_vm4, %v16889_v1, 0.0  ;;  %v6307_v61 = vadd.f32 %v6306_v10, %v6305_v52  ;;  %v6311_v35 = vrot.slane %v6310_v50, 2  ;;  %v6330_v44 = vrot.slane %v6329_v21, 4  ;;  %8927 = vmatpush3.msra.mxu1 %v7794_v58  ;;  %vm16918_vm4 = vmmov %vm16914_vm0 }
 0x75b   :  { %v6318_v40 = vrot.slane %v6317_v34, 2  ;;  %v6323_v33 = vrot.slane %v6322_v42, 4  ;;  %v6906_v25 = vsel %vm16894_vm6, %v6605_v57, %v6905_v26  ;;  %v6336_v0 = vsel %vm16895_vm15, %v5383_v49, 0.0  ;;  %7624 = vrot.lane.b32.xlu0 %v7585_v43, %s9014_s16  ;;  %v16910_v57 = vld [vmem:[#allocation11_spill] sm:$0xff]  ;;  %vm16922_vm6 = vmmov %vm16915_vm5 }
 0x75c   :  { %v6312_v48 = vadd.f32 %v6311_v35, %v6310_v50  ;;  %v6607_v39 = vmul.f32 0.25, %v6293_v12  ;;  %v6608_v23 = vmul.f32 0.25, %v6300_v47  ;;  %v6907_v63 = vsel %vm16896_vm9, %v6606_v6, %v6906_v25  ;;  %vm16924_vm9 = vmmov %vm16898_vm14 }
 0x75d   :  { %v6319_v22 = vadd.f32 %v6318_v40, %v6317_v34  ;;  %v6324_v19 = vadd.f32 %v6323_v33, %v6322_v42  ;;  %6964 = vst.msk [vmem:[#allocation4 + $0xe1] sm:$0xff] %vm16897_vm10, %v6907_v63  ;;  %v6331_v7 = vadd.f32 %v6330_v44, %v6329_v21  ;;  %v6337_v59 = vrot.slane %v6336_v0, 4  ;;  %7530 = vrot.lane.b32.xlu1 %v15277_v11, %s9013_s15  ;;  %v15342_v63 = vld [vmem:[#allocation4 + $0xd1] sm:$0xff]  ;;  %vm16925_vm10 = vmmov %vm16901_vm13 }
 0x75e   :  { %v6313_v51 = vrot.slane %v6312_v48, 1  ;;  %v6609_v2 = vmul.f32 0.25, %v6307_v61  ;;  %v6908_v36 = vsel %vm16898_vm14, %v6608_v23, %v6607_v39  ;;  %v16900_v55 = vcombine.high %v16899_v37, %v16899_v37  ;;  %vm16928_vm14 = vmmov %vm16904_vm1 }
 0x75f   :  { %v6320_v28 = vrot.slane %v6319_v22, 1  ;;  %v6325_v8 = vrot.slane %v6324_v19, 2  ;;  %v6332_v29 = vrot.slane %v6331_v7, 2  ;;  %v6338_v49 = vadd.f32 %v6337_v59, %v6336_v0  ;;  %7053 = vrot.lane.b32.xlu0 %v15279_v16, %s9008_s28 }
 0x760   :  { %v6314_v56 = vadd.f32 %v6313_v51, %v6312_v48  ;;  %v5415_v12 = vrot.slane %v16900_v55, %v16691_v38  ;;  %v6909_v9 = vsel %vm16901_vm13, %v6609_v2, %v6908_v36  ;;  %v16902_v32 = vrot.slane %v14744_v60, 1  ;;  %v15344_v51 = vld [vmem:[#allocation4 + $0xd0] sm:$0xff] }
 0x761   :  { %v6321_v54 = vadd.f32 %v6320_v28, %v6319_v22  ;;  %v6326_v41 = vadd.f32 %v6325_v8, %v6324_v19  ;;  %v6333_v47 = vadd.f32 %v6332_v29, %v6331_v7  ;;  %v6339_v10 = vrot.slane %v6338_v49, 2  ;;  %7245 = vrot.lane.b32.xlu1 %v15344_v51, %s9010_s18  ;;  %v7232_v29 = vpop.permute.xlu0 %7231 }
 0x762   :  { %v6349_v52 = vadd.f32 %v16902_v32, %v14744_v60  ;;  %v6610_v27 = vmul.f32 0.25, %v6314_v56  ;;  %v5417_v58 = vcombine.high %v5415_v12, %v5415_v12  ;;  %v6355_v46 = vrot.slane %v14793_v17, 1 }
 0x763   :  { %v6327_v5 = vrot.slane %v6326_v41, 1  ;;  %v6611_v20 = vmul.f32 0.25, %v6321_v54  ;;  %v16903_v18 = vrot.slane %v14677_v53, 2  ;;  %v16906_v34 = vrot.slane %v16905_v30, 4  ;;  %7433 = vrot.lane.b32.xlu0 %v15241_v3, %s9012_s27 }
 0x764   :  { %v6910_v24 = vsel %vm16904_vm1, %v6610_v27, %v6909_v9  ;;  %v16908_v31 = vrot.slane %v16907_v13, 4  ;;  %v6334_v1 = vrot.slane %v6333_v47, 1  ;;  %v6340_v42 = vadd.f32 %v6339_v10, %v6338_v49  ;;  %v15322_v35 = vld [vmem:[#allocation4 + $0xe0] sm:$0xff]  ;;  %v7328_v49 = vpop.permute.xlu1 %7327  ;;  %vm16933_vm1 = vmmov %vm16909_vm12 }
 0x765   :  { %v6361_v60 = vadd.f32 %v16903_v18, %v14677_v53  ;;  %v6328_v50 = vadd.f32 %v6327_v5, %v6326_v41  ;;  %v6366_v45 = vadd.f32 %v16906_v34, %v16905_v30  ;;  %v6911_v14 = vsel %vm16909_vm12, %v6611_v20, %v6910_v24  ;;  %6997 = vst.msk [vmem:[#allocation5 + $0x60] sm:$0xff] %vm16915_vm5, %v15322_v35  ;;  %v16926_v34 = vld [vmem:[#allocation59_spill] sm:$0xff] }
 0x766   :  { %v6373_v15 = vadd.f32 %v16908_v31, %v16907_v13  ;;  %v6356_v61 = vadd.f32 %v6355_v46, %v14793_v17  ;;  %v16911_v6 = vcombine.high %v16910_v57, %v16910_v57  ;;  %v6335_v21 = vadd.f32 %v6334_v1, %v6333_v47  ;;  %7626 = vrot.lane.b32.xlu1 %v15279_v16, %s9014_s16  ;;  %v7613_v31 = vpop.permute.xlu0 %7612 }
 0x767   :  { %v6612_v53 = vmul.f32 0.25, %v6328_v50  ;;  %v6362_v40 = vrot.slane %v6361_v60, 1  ;;  %v6367_v33 = vrot.slane %v6366_v45, 2  ;;  %v6341_v43 = vrot.slane %v6340_v42, 1  ;;  %7055 = vrot.lane.b32.xlu0 %v15342_v63, %s9008_s28 }
 0x768   :  { %v15328_v26 = vrot.slane %v16911_v6, %v16691_v38  ;;  %v6374_v17 = vrot.slane %v6373_v15, 2  ;;  %v16913_v48 = vcombine.high %v16912_v4, %v16912_v4  ;;  %v6613_v39 = vmul.f32 0.25, %v6335_v21 }
 0x769   :  { %v6912_v19 = vsel %vm16916_vm7, %v6612_v53, %v6911_v14  ;;  %v6363_v44 = vadd.f32 %v6362_v40, %v6361_v60  ;;  %v6368_v25 = vadd.f32 %v6367_v33, %v6366_v45  ;;  %v6342_v3 = vadd.f32 %v6341_v43, %v6340_v42  ;;  %v16929_v42 = vld [vmem:[#allocation60_spill] sm:$0xff]  ;;  %v16934_v43 = vld [vmem:[#allocation29_spill] sm:$0xff] }
 0x76a   :  { %v6378_v22 = vsel %vm16914_vm0, %v16913_v48, 0.0  ;;  %v6375_v23 = vadd.f32 %v6374_v17, %v6373_v15  ;;  %v6385_v11 = vsel %vm16917_vm3, %v5415_v12, 0.0  ;;  %v6392_v59 = vsel %vm16918_vm4, %v5417_v58, 0.0  ;;  %v7709_v15 = vpop.permute.xlu1 %7708  ;;  %v15373_v33 = vld [vmem:[#allocation4 + $0xd2] sm:$0xff]  ;;  %7341 = vrot.lane.b32.xlu1 %v15342_v63, %s9011_s10  ;;  %vm16942_vm3 = vmmov %vm16914_vm0 }
 0x76b   :  { %v6379_v0 = vrot.slane %v6378_v22, 4  ;;  %v6369_v28 = vrot.slane %v6368_v25, 1  ;;  %v6386_v7 = vrot.slane %v6385_v11, 4  ;;  %v6614_v2 = vmul.f32 0.25, %v6342_v3  ;;  %7435 = vrot.lane.b32.xlu0 %v15303_v62, %s9012_s27  ;;  %vm16943_vm4 = vmmov %vm16922_vm6 }
 0x76c   :  { %v6913_v36 = vsel %vm16919_vm11, %v6613_v39, %v6912_v19  ;;  %v6376_v56 = vrot.slane %v6375_v23, 1  ;;  %v6393_v54 = vrot.slane %v6392_v59, 4  ;;  %v6615_v12 = vmul.f32 0.25, %v6349_v52 }
 0x76d   :  { %v6380_v8 = vadd.f32 %v6379_v0, %v6378_v22  ;;  %v6370_v41 = vadd.f32 %v6369_v28, %v6368_v25  ;;  %v6387_v55 = vadd.f32 %v6386_v7, %v6385_v11  ;;  %v6914_v9 = vsel %vm16920_vm8, %v6614_v2, %v6913_v36  ;;  %v16939_v11 = vld [vmem:[#allocation46_spill] sm:$0xff]  ;;  %v7042_v7 = vpop.permute.xlu0 %7041 }
 0x76e   :  { %v6377_v32 = vadd.f32 %v6376_v56, %v6375_v23  ;;  %v6394_v5 = vadd.f32 %v6393_v54, %v6392_v59  ;;  %v6616_v27 = vmul.f32 0.25, %v6356_v61  ;;  %vm16921_vm2 = vcmask 261312   ;;  %6965 = vst.msk [vmem:[#allocation4 + $0xf1] sm:$0xff] %vm16922_vm6, %v6914_v9  ;;  %v16930_v61 = vld [vmem:[#allocation58_spill] sm:$0xff]  ;;  %v7138_v59 = vpop.permute.xlu1 %7137  ;;  %7722 = vrot.lane.b32.xlu1 %v15303_v62, %s9015_s23 }
 0x76f   :  { %v6381_v37 = vrot.slane %v6380_v8, 2  ;;  %7276 = vst.msk [vmem:[#allocation5 + $0x18] sm:$0xff] %vm16921_vm2, %v7232_v29  ;;  %v6388_v58 = vrot.slane %v6387_v55, 2  ;;  %v6617_v47 = vmul.f32 0.25, %v6363_v44  ;;  %v6618_v10 = vmul.f32 0.25, %v6370_v41  ;;  %7151 = vrot.lane.b32.xlu0 %v15373_v33, %s9009_s20  ;;  %v16937_v44 = vld [vmem:[#allocation48_spill] sm:$0xff]  ;;  %vm16946_vm2 = vmmov %vm16914_vm0 }
 0x770   :  { %vm16923_vm15 = vcmask 326912   ;;  %v6395_v52 = vrot.slane %v6394_v5, 2  ;;  %v6619_v46 = vmul.f32 0.25, %v6377_v32  ;;  %v6915_v18 = vsel %vm16924_vm9, %v6616_v27, %v6615_v12  ;;  %vm16949_vm9 = vmmov %vm16943_vm4 }
 0x771   :  { %v6382_v20 = vadd.f32 %v6381_v37, %v6380_v8  ;;  %7372 = vst.msk [vmem:[#allocation5 + $0x18] sm:$0xff] %vm16923_vm15, %v7328_v49  ;;  %v5451_v60 = vcombine.high %v15328_v26, %v15328_v26  ;;  %v6389_v24 = vadd.f32 %v6388_v58, %v6387_v55  ;;  %v6916_v30 = vsel %vm16925_vm10, %v6617_v47, %v6915_v18  ;;  %v7422_v47 = vpop.permute.xlu0 %7421 }
 0x772   :  { %v16927_v45 = vrot.slane %v16926_v34, 1  ;;  %v6396_v1 = vadd.f32 %v6395_v52, %v6394_v5  ;;  %v6917_v16 = vsel %vm16928_vm14, %v6618_v10, %v6916_v30  ;;  %v6411_v14 = vrot.slane %v16929_v42, 1  ;;  %v7519_v10 = vpop.permute.xlu1 %7518 }
 0x773   :  { %v6383_v50 = vrot.slane %v6382_v20, 1  ;;  %v16931_v53 = vrot.slane %v16930_v61, 2  ;;  %vm16932_vm13 = vcmask 523712   ;;  %v6390_v6 = vrot.slane %v6389_v24, 1  ;;  %7532 = vrot.lane.b32.xlu0 %v15344_v51, %s9013_s15 }
 0x774   :  { %v6405_v13 = vadd.f32 %v16927_v45, %v16926_v34  ;;  %7659 = vst.msk [vmem:[#allocation5 + $0x8] sm:$0xff] %vm16932_vm13, %v7613_v31  ;;  %v6918_v21 = vsel %vm16933_vm1, %v6619_v46, %v6917_v16  ;;  %v16935_v17 = vrot.slane %v16934_v43, 4  ;;  %vm16936_vm12 = vcmask 589312  }
 0x775   :  { %v6417_v40 = vadd.f32 %v16931_v53, %v16930_v61  ;;  %v6384_v57 = vadd.f32 %v6383_v50, %v6382_v20  ;;  %7755 = vst.msk [vmem:[#allocation5 + $0x8] sm:$0xff] %vm16936_vm12, %v7709_v15  ;;  %v6397_v48 = vrot.slane %v6396_v1, 1  ;;  %v6412_v22 = vadd.f32 %v6411_v14, %v16929_v42  ;;  %v15392_v2 = vld [vmem:[#allocation4 + $0xf0] sm:$0xff]  ;;  %v16955_v53 = vld [vmem:[#allocation27_spill] sm:$0xff] }
 0x776   :  { %v6422_v4 = vadd.f32 %v16935_v17, %v16934_v43  ;;  %v16938_v25 = vrot.slane %v16937_v44, 4  ;;  %v6391_v3 = vadd.f32 %v6390_v6, %v6389_v24  ;;  %v16940_v28 = vcombine.high %v16939_v11, %v16939_v11  ;;  %6998 = vst.msk [vmem:[#allocation5 + $0x68] sm:$0xff] %vm16943_vm4, %v15392_v2  ;;  %v16952_v15 = vld [vmem:[#allocation12_spill] sm:$0xff]  ;;  %v7044_v6 = vpop.permute.xlu0 %7043 }
 0x777   :  { %v6418_v19 = vrot.slane %v6417_v40, 1  ;;  %v6620_v39 = vmul.f32 0.25, %v6384_v57  ;;  %v6398_v36 = vadd.f32 %v6397_v48, %v6396_v1  ;;  %vm16941_vm5 = vcmask 130112   ;;  %7247 = vrot.lane.b32.xlu0 %v15322_v35, %s9010_s18 }
 0x778   :  { %v6429_v0 = vadd.f32 %v16938_v25, %v16937_v44  ;;  %v6423_v23 = vrot.slane %v6422_v4, 2  ;;  %v6434_v8 = vsel %vm16914_vm0, %v16940_v28, 0.0  ;;  %7085 = vst.msk [vmem:[#allocation5 + $0x20] sm:$0xff] %vm16941_vm5, %v7042_v7  ;;  %v6621_v37 = vmul.f32 0.25, %v6391_v3  ;;  %vm16958_vm12 = vmmov %vm16941_vm5  ;;  %v16961_v44 = vld [vmem:[#allocation40_spill] sm:$0xff] }
 0x779   :  { %v6419_v56 = vadd.f32 %v6418_v19, %v6417_v40  ;;  %v6435_v41 = vrot.slane %v6434_v8, 4  ;;  %v6919_v55 = vsel %vm16916_vm7, %v6620_v39, %v6918_v21  ;;  %v6441_v29 = vsel %vm16942_vm3, %v15328_v26, 0.0  ;;  %v7234_v21 = vpop.permute.xlu1 %7233  ;;  %7086 = vst.msk [vmem:[#allocation5 + $0x28] sm:$0xff] %vm16958_vm12, %v7044_v6  ;;  %vm16971_vm3 = vmmov %vm16946_vm2 }
 0x77a   :  { %v6430_v54 = vrot.slane %v6429_v0, 2  ;;  %v6424_v12 = vadd.f32 %v6423_v23, %v6422_v4  ;;  %vm16944_vm11 = vcmask 195712   ;;  %v6622_v49 = vmul.f32 0.25, %v6398_v36  ;;  %v16963_v23 = vld [vmem:[#allocation39_spill] sm:$0xff] }
 0x77b   :  { %7181 = vst.msk [vmem:[#allocation5 + $0x20] sm:$0xff] %vm16944_vm11, %v7138_v59  ;;  %v6436_v32 = vadd.f32 %v6435_v41, %v6434_v8  ;;  %v6442_v5 = vrot.slane %v6441_v29, 4  ;;  %vm16945_vm8 = vcmask 1046534   ;;  %v6448_v26 = vsel %vm16946_vm2, %v5451_v60, 0.0  ;;  %v15412_v60 = vld [vmem:[#allocation4 + $0xe1] sm:$0xff]  ;;  %7628 = vrot.lane.b32.xlu0 %v15342_v63, %s9014_s16 }
 0x77c   :  { %v6431_v9 = vadd.f32 %v6430_v54, %v6429_v0  ;;  %v6920_v27 = vsel %vm16945_vm8, %v6621_v37, %v6919_v55  ;;  %v6425_v20 = vrot.slane %v6424_v12, 1  ;;  %v6623_v58 = vmul.f32 0.25, %v6405_v13  ;;  %v7771_v62 = vld [vmem:[#allocation5 + $0x8] sm:$0xff]  ;;  %7343 = vrot.lane.b32.xlu1 %v15412_v60, %s9011_s10  ;;  %v16965_v59 = vld [vmem:[#allocation6_spill] sm:$0xff]  ;;  %v16967_v54 = vld [vmem:[#allocation56_spill] sm:$0xff]  ;;  %v7424_v37 = vpop.permute.xlu0 %7423 }
 0x77d   :  { %vm16947_vm6 = vcmask 1047559   ;;  %v6437_v46 = vrot.slane %v6436_v32, 2  ;;  %v6443_v18 = vadd.f32 %v6442_v5, %v6441_v29  ;;  %vm16948_vm15 = vcmask 392512   ;;  %v7615_v55 = vpop.permute.xlu1 %7614  ;;  %vm16974_vm8 = vmmov %vm16949_vm9 }
 0x77e   :  { %v6921_v52 = vsel %vm16947_vm6, %v6622_v49, %v6920_v27  ;;  %v6432_v51 = vrot.slane %v6431_v9, 1  ;;  %7467 = vst.msk [vmem:[#allocation5 + $0x10] sm:$0xff] %vm16948_vm15, %v7422_v47  ;;  %v6426_v50 = vadd.f32 %v6425_v20, %v6424_v12  ;;  %v6449_v24 = vrot.slane %v6448_v26, 4  ;;  %vm16972_vm4 = vmmov %vm16948_vm15 }
 0x77f   :  { %6966 = vst.msk [vmem:[#allocation4 + $0x101] sm:$0xff] %vm16949_vm9, %v6921_v52  ;;  %v6624_v30 = vmul.f32 0.25, %v6412_v22  ;;  %v6625_v34 = vmul.f32 0.25, %v6419_v56  ;;  %vm16950_vm10 = vcmask 458112   ;;  %vm16951_vm14 = vcmask 588800   ;;  %7057 = vrot.lane.b32.xlu0 %v15412_v60, %s9008_s28  ;;  %vm16976_vm6 = vmmov %vm16971_vm3 }
 0x780   :  { %7564 = vst.msk [vmem:[#allocation5 + $0x10] sm:$0xff] %vm16950_vm10, %v7519_v10  ;;  %8929 = vmatmul.mubr.msk.f32.vlgmr.msra.gmra.mrb[24].mxu1 %vm16951_vm14, %v7771_v62  ;;  %v6433_v45 = vadd.f32 %v6432_v51, %v6431_v9  ;;  %v6438_v13 = vadd.f32 %v6437_v46, %v6436_v32  ;;  %v6444_v31 = vrot.slane %v6443_v18, 2  ;;  %v16953_v1 = vcombine.high %v16952_v15, %v16952_v15  ;;  %v16969_v32 = vld [vmem:[#allocation51_spill] sm:$0xff]  ;;  %vm16978_vm9 = vmmov %vm16971_vm3 }
 0x781   :  { %v6450_v42 = vadd.f32 %v6449_v24, %v6448_v26  ;;  %v6626_v14 = vmul.f32 0.25, %v6426_v50  ;;  %vm16954_vm13 = vcmask 1041409   ;;  %v16956_v40 = vrot.slane %v16955_v53, 1  ;;  %7724 = vrot.lane.b32.xlu1 %v15373_v33, %s9015_s23  ;;  %7468 = vst.msk [vmem:[#allocation5 + $0x18] sm:$0xff] %vm16972_vm4, %v7424_v37  ;;  %v15458_v10 = vld [vmem:[#allocation4 + $0xe2] sm:$0xff] }
 0x782   :  { %v5483_v16 = vrot.slane %v16953_v1, %v16691_v38  ;;  %v6922_v61 = vsel %vm16954_vm13, %v6624_v30, %v6623_v58  ;;  %v6439_v43 = vrot.slane %v6438_v13, 1  ;;  %v6445_v17 = vadd.f32 %v6444_v31, %v6443_v18 }
 0x783   :  { %v6461_v57 = vadd.f32 %v16956_v40, %v16955_v53  ;;  %v6627_v4 = vmul.f32 0.25, %v6433_v45  ;;  %vm16957_vm1 = vcmask 1042434   ;;  %vm16959_vm0 = vcmask 261312   ;;  %v7330_v45 = vpop.permute.xlu1 %7329  ;;  %7437 = vrot.lane.b32.xlu0 %v15373_v33, %s9012_s27 }
 0x784   :  { %v6923_v48 = vsel %vm16957_vm1, %v6625_v34, %v6922_v61  ;;  %7277 = vst.msk [vmem:[#allocation5 + $0x20] sm:$0xff] %vm16959_vm0, %v7234_v21  ;;  %v6451_v38 = vrot.slane %v6450_v42, 2  ;;  %vm16960_vm5 = vcmask 1043459   ;;  %v5485_v19 = vcombine.high %v5483_v16, %v5483_v16  ;;  %v7140_v34 = vpop.permute.xlu0 %7139  ;;  %vm16982_vm1 = vmmov %vm16974_vm8 }
 0x785   :  { %v6924_v22 = vsel %vm16960_vm5, %v6626_v14, %v6923_v48  ;;  %v6467_v25 = vrot.slane %v16961_v44, 1  ;;  %v6440_v0 = vadd.f32 %v6439_v43, %v6438_v13  ;;  %v6446_v3 = vrot.slane %v6445_v17, 1  ;;  %7153 = vrot.lane.b32.xlu1 %v15458_v10, %s9009_s20 }
 0x786   :  { %vm16962_vm7 = vcmask 1044484   ;;  %v16964_v11 = vrot.slane %v16963_v23, 2  ;;  %v6452_v8 = vadd.f32 %v6451_v38, %v6450_v42  ;;  %v16966_v36 = vrot.slane %v16965_v59, 4  ;;  %v15446_v12 = vld [vmem:[#allocation4 + $0x100] sm:$0xff] }
 0x787   :  { %v6925_v39 = vsel %vm16962_vm7, %v6627_v4, %v6924_v22  ;;  %v6468_v7 = vadd.f32 %v6467_v25, %v16961_v44  ;;  %v16968_v63 = vrot.slane %v16967_v54, 4  ;;  %v6447_v29 = vadd.f32 %v6446_v3, %v6445_v17  ;;  %6999 = vst.msk [vmem:[#allocation5 + $0x70] sm:$0xff] %vm16974_vm8, %v15446_v12  ;;  %v7711_v38 = vpop.permute.xlu1 %7710  ;;  %v7014_v44 = vld [vmem:[#allocation4 + $0xf1] sm:$0xff] }
 0x788   :  { %v6473_v28 = vadd.f32 %v16964_v11, %v16963_v23  ;;  %v6478_v56 = vadd.f32 %v16966_v36, %v16965_v59  ;;  %v6628_v49 = vmul.f32 0.25, %v6440_v0  ;;  %v16970_v5 = vcombine.high %v16969_v32, %v16969_v32  ;;  %v7521_v48 = vpop.permute.xlu0 %7520  ;;  %7059 = vrot.lane.b32.xlu0 %v7014_v44, %s9008_s28 }
 0x789   :  { %v6485_v41 = vadd.f32 %v16968_v63, %v16967_v54  ;;  %vm16973_vm11 = vcmask 523712   ;;  %v6453_v20 = vrot.slane %v6452_v8, 1  ;;  %v6629_v52 = vmul.f32 0.25, %v6447_v29  ;;  %7534 = vrot.lane.b32.xlu1 %v15322_v35, %s9013_s15 }
 0x78a   :  { %v6474_v9 = vrot.slane %v6473_v28, 1  ;;  %v6490_v27 = vsel %vm16971_vm3, %v16970_v5, 0.0  ;;  %7660 = vst.msk [vmem:[#allocation5 + $0x10] sm:$0xff] %vm16973_vm11, %v7615_v55  ;;  %v6479_v26 = vrot.slane %v6478_v56, 2  ;;  %vm16975_vm2 = vcmask 1045509  }
 0x78b   :  { %v6486_v58 = vrot.slane %v6485_v41, 2  ;;  %v6491_v47 = vrot.slane %v6490_v27, 4  ;;  %v6926_v51 = vsel %vm16975_vm2, %v6628_v49, %v6925_v39  ;;  %v6497_v18 = vsel %vm16976_vm6, %v5483_v16, 0.0  ;;  %vm16991_vm6 = vmmov %vm16982_vm1 }
 0x78c   :  { %v6475_v46 = vadd.f32 %v6474_v9, %v6473_v28  ;;  %v6454_v62 = vadd.f32 %v6453_v20, %v6452_v8  ;;  %v6480_v50 = vadd.f32 %v6479_v26, %v6478_v56  ;;  %vm16977_vm15 = vcmask 1046534   ;;  %v7236_v8 = vpop.permute.xlu0 %7235  ;;  %7439 = vrot.lane.b32.xlu0 %v15458_v10, %s9012_s27 }
 0x78d   :  { %v6487_v24 = vadd.f32 %v6486_v58, %v6485_v41  ;;  %v6492_v30 = vadd.f32 %v6491_v47, %v6490_v27  ;;  %v6927_v13 = vsel %vm16977_vm15, %v6629_v52, %v6926_v51  ;;  %v6498_v31 = vrot.slane %v6497_v18, 4  ;;  %7249 = vrot.lane.b32.xlu1 %v15392_v2, %s9010_s18  ;;  %v7110_v27 = vld [vmem:[#allocation4 + $0xf2] sm:$0xff] }
 0x78e   :  { %v6504_v15 = vsel %vm16978_vm9, %v5485_v19, 0.0  ;;  %v6631_v1 = vmul.f32 0.25, %v6461_v57  ;;  %vm16979_vm10 = vcmask 195712   ;;  %vm16980_vm14 = vcmask 326912  }
 0x78f   :  { %7182 = vst.msk [vmem:[#allocation5 + $0x28] sm:$0xff] %vm16979_vm10, %v7140_v34  ;;  %v6630_v16 = vmul.f32 0.25, %v6454_v62  ;;  %v6481_v42 = vrot.slane %v6480_v50, 1  ;;  %v6488_v14 = vrot.slane %v6487_v24, 1  ;;  %v6493_v61 = vrot.slane %v6492_v30, 2  ;;  %vm16990_vm8 = vmmov %vm16980_vm14 }
 0x790   :  { %7373 = vst.msk [vmem:[#allocation5 + $0x20] sm:$0xff] %vm16980_vm14, %v7330_v45  ;;  %v6499_v53 = vadd.f32 %v6498_v31, %v6497_v18  ;;  %v6505_v40 = vrot.slane %v6504_v15, 4  ;;  %v6632_v6 = vmul.f32 0.25, %v6468_v7  ;;  %v6633_v21 = vmul.f32 0.25, %v6475_v46  ;;  %v7332_v7 = vpop.permute.xlu1 %7331  ;;  %v7617_v29 = vpop.permute.xlu0 %7616  ;;  %7155 = vrot.lane.b32.xlu0 %v7110_v27, %s9009_s20  ;;  %v7015_v18 = vld [vmem:[#allocation4 + $0x101] sm:$0xff] }
 0x791   :  { %vm16981_vm13 = vcmask 1047559   ;;  %v6482_v43 = vadd.f32 %v6481_v42, %v6480_v50  ;;  %v6489_v17 = vadd.f32 %v6488_v14, %v6487_v24  ;;  %v6494_v4 = vadd.f32 %v6493_v61, %v6492_v30  ;;  %7630 = vrot.lane.b32.xlu1 %v15412_v60, %s9014_s16  ;;  %v7398_v24 = vld [vmem:[#allocation4 + $0x102] sm:$0xff] }
 0x792   :  { %v6928_v57 = vsel %vm16981_vm13, %v6630_v16, %v6927_v13  ;;  %v6500_v22 = vrot.slane %v6499_v53, 2  ;;  %v6506_v19 = vadd.f32 %v6505_v40, %v6504_v15  ;;  %vm16983_vm12 = vcmask 1041409  }
 0x793   :  { %6967 = vst.msk [vmem:[#allocation4 + $0x111] sm:$0xff] %vm16982_vm1, %v6928_v57  ;;  %v6929_v33 = vsel %vm16983_vm12, %v6632_v6, %v6631_v1  ;;  %vm16984_vm0 = vcmask 458112   ;;  %vm16985_vm5 = vcmask 589312   ;;  %v6495_v25 = vrot.slane %v6494_v4, 1  ;;  %vm16997_vm12 = vmmov %vm16991_vm6 }
 0x794   :  { %7565 = vst.msk [vmem:[#allocation5 + $0x18] sm:$0xff] %vm16984_vm0, %v7521_v48  ;;  %v6634_v35 = vmul.f32 0.25, %v6482_v43  ;;  %vm16986_vm7 = vcmask 1042434   ;;  %v6501_v3 = vadd.f32 %v6500_v22, %v6499_v53  ;;  %v6507_v39 = vrot.slane %v6506_v19, 2  ;;  %v7713_v49 = vpop.permute.xlu1 %7712  ;;  %vm16994_vm10 = vmmov %vm16985_vm5  ;;  %v7046_v26 = vpop.permute.xlu0 %7045  ;;  %7536 = vrot.lane.b32.xlu0 %v15392_v2, %s9013_s15  ;;  %v7497_v22 = vld [vmem:[#allocation4 + $0x130] sm:$0xff] }
 0x795   :  { %7756 = vst.msk [vmem:[#allocation5 + $0x10] sm:$0xff] %vm16985_vm5, %v7711_v38  ;;  %v6930_v0 = vsel %vm16986_vm7, %v6633_v21, %v6929_v33  ;;  %v6635_v23 = vmul.f32 0.25, %v6489_v17  ;;  %v6496_v11 = vadd.f32 %v6495_v25, %v6494_v4  ;;  %vm16987_vm3 = vcmask 1043459   ;;  %7345 = vrot.lane.b32.xlu1 %v7014_v44, %s9011_s10  ;;  %v7593_v25 = vld [vmem:[#allocation4 + $0x131] sm:$0xff] }
 0x796   :  { %v6931_v28 = vsel %vm16987_vm3, %v6634_v35, %v6930_v0  ;;  %v6502_v59 = vrot.slane %v6501_v3, 1  ;;  %v6508_v36 = vadd.f32 %v6507_v39, %v6506_v19  ;;  %vm16988_vm4 = vcmask 1044484  }
 0x797   :  { %v6932_v56 = vsel %vm16988_vm4, %v6635_v23, %v6931_v28  ;;  %vm16989_vm11 = vcmask 261312   ;;  %v6636_v54 = vmul.f32 0.25, %v6496_v11  ;;  %vm16992_vm15 = vcmask 523712  }
 0x798   :  { %7278 = vst.msk [vmem:[#allocation5 + $0x28] sm:$0xff] %vm16989_vm11, %v7236_v8  ;;  %v6503_v63 = vadd.f32 %v6502_v59, %v6501_v3  ;;  %v6509_v41 = vrot.slane %v6508_v36, 1  ;;  %vm16993_vm9 = vcmask 588800   ;;  %vm16995_vm14 = vcmask 1046534   ;;  %v7142_v58 = vpop.permute.xlu1 %7141  ;;  %v7426_v52 = vpop.permute.xlu0 %7425  ;;  %7251 = vrot.lane.b32.xlu0 %v15446_v12, %s9010_s18  ;;  %v7689_v3 = vld [vmem:[#allocation4 + $0x132] sm:$0xff] }
 0x799   :  { %7374 = vst.msk [vmem:[#allocation5 + $0x28] sm:$0xff] %vm16990_vm8, %v7332_v7  ;;  %v6933_v55 = vsel %vm16975_vm2, %v6636_v54, %v6932_v56  ;;  %vm16996_vm1 = vcmask 130112   ;;  %vm16998_vm0 = vcmask 195712   ;;  %7726 = vrot.lane.b32.xlu1 %v15458_v10, %s9015_s23  ;;  %vm16999_vm5 = vcmask 392512   ;;  %vm17001_vm3 = vmmov %vm16993_vm9 }
 0x79a   :  { %v15489_v37 = vld [vmem:[#allocation4 + $0x110] sm:$0xff]  ;;  %v6510_v32 = vadd.f32 %v6509_v41, %v6508_v36  ;;  %v6637_v5 = vmul.f32 0.25, %v6503_v63  ;;  %7661 = vst.msk [vmem:[#allocation5 + $0x18] sm:$0xff] %vm16992_vm15, %v7617_v29  ;;  %vm17000_vm7 = vcmask 458112   ;;  %vm17002_vm4 = vmmov %vm16996_vm1 }
 0x79b   :  { %7000 = vst.msk [vmem:[#allocation5 + $0x78] sm:$0xff] %vm16991_vm6, %v15489_v37  ;;  %vm17003_vm8 = vmmov %vm16999_vm5  ;;  %v7016_v31 = vld [vmem:[#allocation4 + $0x111] sm:$0xff] }
 0x79c   :  { %v7772_v9 = vld [vmem:[#allocation5 + $0x10] sm:$0xff]  ;;  %7757 = vst.msk [vmem:[#allocation5 + $0x18] sm:$0xff] %vm16994_vm10, %v7713_v49  ;;  %v6638_v60 = vmul.f32 0.25, %v6510_v32  ;;  %v6934_v20 = vsel %vm16995_vm14, %v6637_v5, %v6933_v55  ;;  %v7523_v51 = vpop.permute.xlu1 %7522  ;;  %v7048_v2 = vpop.permute.xlu0 %7047  ;;  %7632 = vrot.lane.b32.xlu0 %v7014_v44, %s9014_s16  ;;  %vm17004_vm2 = vmmov %vm16992_vm15  ;;  %vm17006_vm15 = vcmask 326912  }
 0x79d   :  { %8931 = vmatprep.mubr.msk.f32.mxu1 %vm16993_vm9, %v7772_v9  ;;  %7087 = vst.msk [vmem:[#allocation5 + $0x30] sm:$0xff] %vm16996_vm1, %v7046_v26  ;;  %7347 = vrot.lane.b32.xlu1 %v7015_v18, %s9011_s10  ;;  %vm17005_vm6 = vmmov %vm16998_vm0  ;;  %v7112_v14 = vld [vmem:[#allocation4 + $0x112] sm:$0xff] }
 0x79e   :  { %v6935_v47 = vsel %vm16981_vm13, %v6638_v60, %v6934_v20  ;;  %7183 = vst.msk [vmem:[#allocation5 + $0x30] sm:$0xff] %vm16998_vm0, %v7142_v58  ;;  %vm17007_vm9 = vmmov %vm17000_vm7 }
 0x79f   :  { %6968 = vst.msk [vmem:[#allocation4 + $0x121] sm:$0xff] %vm16997_vm12, %v6935_v47  ;;  %vm17008_vm14 = vmmov %vm16989_vm11 }
 0x7a0   :  { %7469 = vst.msk [vmem:[#allocation5 + $0x20] sm:$0xff] %vm16999_vm5, %v7426_v52  ;;  %v7238_v62 = vpop.permute.xlu1 %7237  ;;  %v7428_v10 = vpop.permute.xlu0 %7427  ;;  %7061 = vrot.lane.b32.xlu0 %v7015_v18, %s9008_s28  ;;  %vm17009_vm13 = vmmov %vm17006_vm15 }
 0x7a1   :  { %7566 = vst.msk [vmem:[#allocation5 + $0x20] sm:$0xff] %vm17000_vm7, %v7523_v51  ;;  %7728 = vrot.lane.b32.xlu1 %v7110_v27, %s9015_s23  ;;  %vm17010_vm1 = vmmov %vm17004_vm2 }
 0x7a2   :  { %7088 = vst.msk [vmem:[#allocation5 + $0x38] sm:$0xff] %vm17002_vm4, %v7048_v2  ;;  %vm17011_vm12 = vmmov %vm17001_vm3 }
 0x7a3   :  { %v7773_v46 = vld [vmem:[#allocation5 + $0x18] sm:$0xff]  ;;  %7279 = vst.msk [vmem:[#allocation5 + $0x30] sm:$0xff] %vm16989_vm11, %v7238_v62  ;;  %vm17012_vm0 = vmmov %vm16994_vm10 }
 0x7a4   :  { %8932 = vmatmul.mubr.msk.f32.gmra.mrb[26].mxu1 %vm17001_vm3, %v7773_v46  ;;  %v7619_v50 = vpop.permute.xlu1 %7618  ;;  %7470 = vst.msk [vmem:[#allocation5 + $0x28] sm:$0xff] %vm17003_vm8, %v7428_v10  ;;  %v7144_v30 = vpop.permute.xlu0 %7143  ;;  %7441 = vrot.lane.b32.xlu0 %v7110_v27, %s9012_s27  ;;  %vm17013_vm5 = vmmov %vm17002_vm4 }
 0x7a5   :  { %7662 = vst.msk [vmem:[#allocation5 + $0x20] sm:$0xff] %vm17004_vm2, %v7619_v50  ;;  %7157 = vrot.lane.b32.xlu1 %v7398_v24, %s9009_s20  ;;  %vm17014_vm7 = vmmov %vm17005_vm6 }
 0x7a6   :  { %7184 = vst.msk [vmem:[#allocation5 + $0x38] sm:$0xff] %vm17005_vm6, %v7144_v30  ;;  %vm17015_vm3 = vmmov %vm17003_vm8  ;;  %v7208_v21 = vld [vmem:[#allocation4 + $0x120] sm:$0xff] }
 0x7a7   :  { %vm17016_vm4 = vmmov %vm17007_vm9  ;;  %v7400_v4 = vld [vmem:[#allocation4 + $0x122] sm:$0xff] }
 0x7a8   :  { %v7334_v34 = vpop.permute.xlu1 %7333  ;;  %v7525_v45 = vpop.permute.xlu0 %7524  ;;  %7063 = vrot.lane.b32.xlu0 %v7016_v31, %s9008_s28  ;;  %vm17017_vm11 = vmmov %vm17011_vm12  ;;  %v7304_v19 = vld [vmem:[#allocation4 + $0x121] sm:$0xff] }
 0x7a9   :  { %7375 = vst.msk [vmem:[#allocation5 + $0x30] sm:$0xff] %vm17006_vm15, %v7334_v34  ;;  %7538 = vrot.lane.b32.xlu1 %v15446_v12, %s9013_s15  ;;  %vm17018_vm8 = vmmov %vm17013_vm5 }
 0x7aa   :  { %7567 = vst.msk [vmem:[#allocation5 + $0x28] sm:$0xff] %vm17007_vm9, %v7525_v45  ;;  %vm17019_vm2 = vmmov %vm17008_vm14 }
 0x7ab   :  { %vm17020_vm6 = vmmov %vm17015_vm3 }
 0x7ac   :  { %v7715_v13 = vpop.permute.xlu1 %7714  ;;  %v7240_v15 = vpop.permute.xlu0 %7239  ;;  %7443 = vrot.lane.b32.xlu0 %v7398_v24, %s9012_s27  ;;  %vm17021_vm15 = vmmov %vm17010_vm1 }
 0x7ad   :  { %7758 = vst.msk [vmem:[#allocation5 + $0x20] sm:$0xff] %vm16994_vm10, %v7715_v13  ;;  %7253 = vrot.lane.b32.xlu1 %v15489_v37, %s9010_s18  ;;  %vm17022_vm9 = vmmov %vm17014_vm7 }
 0x7ae   :  { %7280 = vst.msk [vmem:[#allocation5 + $0x38] sm:$0xff] %vm17008_vm14, %v7240_v15  ;;  %vm17023_vm10 = vmmov %vm17009_vm13 }
 0x7af   :  { %vm17024_vm14 = vmmov %vm17016_vm4 }
 0x7b0   :  { %v7336_v1 = vpop.permute.xlu1 %7335  ;;  %v7621_v12 = vpop.permute.xlu0 %7620  ;;  %7159 = vrot.lane.b32.xlu0 %v7112_v14, %s9009_s20 }
 0x7b1   :  { %7376 = vst.msk [vmem:[#allocation5 + $0x38] sm:$0xff] %vm17009_vm13, %v7336_v1  ;;  %7634 = vrot.lane.b32.xlu1 %v7015_v18, %s9014_s16  ;;  %vm17025_vm13 = vmmov %vm17012_vm0 }
 0x7b2   :  { %7663 = vst.msk [vmem:[#allocation5 + $0x28] sm:$0xff] %vm17010_vm1, %v7621_v12  ;;  %vm17026_vm1 = vmmov %vm17019_vm2 }
 0x7b4   :  { %v7717_v16 = vpop.permute.xlu1 %7716  ;;  %v7774_v42 = vld [vmem:[#allocation5 + $0x20] sm:$0xff]  ;;  %v7050_v61 = vpop.permute.xlu0 %7049  ;;  %7540 = vrot.lane.b32.xlu0 %v15489_v37, %s9013_s15 }
 0x7b5   :  { %8934 = vmatprep.mubr.msk.f32.mxu1 %vm17011_vm12, %v7774_v42  ;;  %7759 = vst.msk [vmem:[#allocation5 + $0x28] sm:$0xff] %vm17012_vm0, %v7717_v16  ;;  %7349 = vrot.lane.b32.xlu1 %v7016_v31, %s9011_s10  ;;  %vm17027_vm12 = vmmov %vm17023_vm10 }
 0x7b6   :  { %7089 = vst.msk [vmem:[#allocation5 + $0x40] sm:$0xff] %vm17013_vm5, %v7050_v61  ;;  %vm17028_vm0 = vmmov %vm17021_vm15 }
 0x7b7   :  { %vm17029_vm5 = vmmov %vm17017_vm11 }
 0x7b8   :  { %v7146_v53 = vpop.permute.xlu1 %7145  ;;  %v7430_v40 = vpop.permute.xlu0 %7429  ;;  %7255 = vrot.lane.b32.xlu0 %v7208_v21, %s9010_s18 }
 0x7b9   :  { %7185 = vst.msk [vmem:[#allocation5 + $0x40] sm:$0xff] %vm17014_vm7, %v7146_v53  ;;  %7730 = vrot.lane.b32.xlu1 %v7398_v24, %s9015_s23  ;;  %vm17030_vm7 = vmmov %vm17025_vm13 }
 0x7ba   :  { %7471 = vst.msk [vmem:[#allocation5 + $0x30] sm:$0xff] %vm17015_vm3, %v7430_v40  ;;  %vm17031_vm3 = vmmov %vm17018_vm8 }
 0x7bc   :  { %v7527_v6 = vpop.permute.xlu1 %7526  ;;  %v7775_v57 = vld [vmem:[#allocation5 + $0x28] sm:$0xff]  ;;  %v7052_v43 = vpop.permute.xlu0 %7051  ;;  %7636 = vrot.lane.b32.xlu0 %v7016_v31, %s9014_s16 }
 0x7bd   :  { %7568 = vst.msk [vmem:[#allocation5 + $0x30] sm:$0xff] %vm17016_vm4, %v7527_v6  ;;  %8935 = vmatmul.mubr.msk.f32.gmra.mrb[28].mxu1 %vm17017_vm11, %v7775_v57  ;;  %7445 = vrot.lane.b32.xlu1 %v7112_v14, %s9012_s27  ;;  %vm17032_vm4 = vmmov %vm17022_vm9 }
 0x7be   :  { %7090 = vst.msk [vmem:[#allocation5 + $0x48] sm:$0xff] %vm17018_vm8, %v7052_v43  ;;  %vm17033_vm11 = vmmov %vm17020_vm6 }
 0x7bf   :  { %vm17034_vm8 = vmmov %vm17024_vm14 }
 0x7c0   :  { %v7242_v17 = vpop.permute.xlu1 %7241  ;;  %v7432_v48 = vpop.permute.xlu0 %7431  ;;  %7351 = vrot.lane.b32.xlu0 %v7304_v19, %s9011_s10 }
 0x7c1   :  { %7281 = vst.msk [vmem:[#allocation5 + $0x40] sm:$0xff] %vm17019_vm2, %v7242_v17  ;;  %7447 = vrot.lane.b32.xlu1 %v7400_v4, %s9012_s27  ;;  %vm17035_vm2 = vmmov %vm17029_vm5 }
 0x7c2   :  { %7472 = vst.msk [vmem:[#allocation5 + $0x38] sm:$0xff] %vm17020_vm6, %v7432_v48  ;;  %vm17036_vm6 = vmmov %vm17031_vm3 }
 0x7c4   :  { %v7623_v38 = vpop.permute.xlu1 %7622  ;;  %v7148_v33 = vpop.permute.xlu0 %7147  ;;  %7732 = vrot.lane.b32.xlu0 %v7112_v14, %s9015_s23 }
 0x7c5   :  { %7664 = vst.msk [vmem:[#allocation5 + $0x30] sm:$0xff] %vm17021_vm15, %v7623_v38  ;;  %7544 = vrot.lane.b32.xlu1 %v7497_v22, %s9013_s15  ;;  %vm17037_vm15 = vmmov %vm17026_vm1 }
 0x7c6   :  { %7186 = vst.msk [vmem:[#allocation5 + $0x48] sm:$0xff] %vm17022_vm9, %v7148_v33  ;;  %vm17038_vm9 = vmmov %vm17033_vm11 }
 0x7c8   :  { %v7338_v44 = vpop.permute.xlu1 %7337  ;;  %v7529_v35 = vpop.permute.xlu0 %7528  ;;  %7542 = vrot.lane.b32.xlu0 %v7208_v21, %s9013_s15 }
 0x7c9   :  { %7377 = vst.msk [vmem:[#allocation5 + $0x40] sm:$0xff] %vm17023_vm10, %v7338_v44  ;;  %7640 = vrot.lane.b32.xlu1 %v7593_v25, %s9014_s16  ;;  %vm17039_vm10 = vmmov %vm17028_vm0 }
 0x7ca   :  { %7569 = vst.msk [vmem:[#allocation5 + $0x38] sm:$0xff] %vm17024_vm14, %v7529_v35  ;;  %vm17040_vm14 = vmmov %vm17032_vm4 }
 0x7cc   :  { %v7719_v0 = vpop.permute.xlu1 %7718  ;;  %v7244_v39 = vpop.permute.xlu0 %7243  ;;  %7638 = vrot.lane.b32.xlu0 %v7304_v19, %s9014_s16 }
 0x7cd   :  { %7760 = vst.msk [vmem:[#allocation5 + $0x30] sm:$0xff] %vm17025_vm13, %v7719_v0  ;;  %7736 = vrot.lane.b32.xlu1 %v7689_v3, %s9015_s23  ;;  %vm17041_vm13 = vmmov %vm17027_vm12 }
 0x7ce   :  { %7282 = vst.msk [vmem:[#allocation5 + $0x48] sm:$0xff] %vm17026_vm1, %v7244_v39  ;;  %vm17042_vm1 = vmmov %vm17034_vm8 }
 0x7d0   :  { %v7340_v23 = vpop.permute.xlu1 %7339  ;;  %v7625_v11 = vpop.permute.xlu0 %7624  ;;  %7734 = vrot.lane.b32.xlu0 %v7400_v4, %s9015_s23 }
 0x7d1   :  { %7378 = vst.msk [vmem:[#allocation5 + $0x48] sm:$0xff] %vm17027_vm12, %v7340_v23  ;;  %vm17043_vm12 = vmmov %vm17030_vm7 }
 0x7d2   :  { %7665 = vst.msk [vmem:[#allocation5 + $0x38] sm:$0xff] %vm17028_vm0, %v7625_v11  ;;  %vm17044_vm0 = vmmov %vm17037_vm15 }
 0x7d4   :  { %v7721_v28 = vpop.permute.xlu1 %7720  ;;  %v7776_v8 = vld [vmem:[#allocation5 + $0x30] sm:$0xff]  ;;  %v7054_v7 = vpop.permute.xlu0 %7053 }
 0x7d5   :  { %8937 = vmatprep.mubr.msk.f32.mxu1 %vm17029_vm5, %v7776_v8  ;;  %7761 = vst.msk [vmem:[#allocation5 + $0x38] sm:$0xff] %vm17030_vm7, %v7721_v28  ;;  %vm17045_vm5 = vmmov %vm17041_vm13 }
 0x7d6   :  { %7091 = vst.msk [vmem:[#allocation5 + $0x50] sm:$0xff] %vm17031_vm3, %v7054_v7  ;;  %vm17046_vm7 = vmmov %vm17039_vm10 }
 0x7d7   :  { %vm17047_vm3 = vmmov %vm17035_vm2 }
 0x7d8   :  { %v7150_v59 = vpop.permute.xlu1 %7149  ;;  %v7434_v36 = vpop.permute.xlu0 %7433 }
 0x7d9   :  { %7187 = vst.msk [vmem:[#allocation5 + $0x50] sm:$0xff] %vm17032_vm4, %v7150_v59  ;;  %vm17048_vm4 = vmmov %vm17043_vm12 }
 0x7da   :  { %7473 = vst.msk [vmem:[#allocation5 + $0x40] sm:$0xff] %vm17033_vm11, %v7434_v36  ;;  %vm17049_vm11 = vmmov %vm17036_vm6 }
 0x7dc   :  { %v7531_v56 = vpop.permute.xlu1 %7530  ;;  %v7777_v54 = vld [vmem:[#allocation5 + $0x38] sm:$0xff]  ;;  %v7056_v63 = vpop.permute.xlu0 %7055 }
 0x7dd   :  { %7570 = vst.msk [vmem:[#allocation5 + $0x40] sm:$0xff] %vm17034_vm8, %v7531_v56  ;;  %8938 = vmatmul.mubr.msk.f32.gmra.mrb[30].mxu1 %vm17035_vm2, %v7777_v54  ;;  %vm17050_vm8 = vmmov %vm17040_vm14 }
 0x7de   :  { %7092 = vst.msk [vmem:[#allocation5 + $0x58] sm:$0xff] %vm17036_vm6, %v7056_v63  ;;  %vm17051_vm2 = vmmov %vm17038_vm9 }
 0x7df   :  { %vm17052_vm6 = vmmov %vm17042_vm1 }
 0x7e0   :  { %v7246_v41 = vpop.permute.xlu1 %7245  ;;  %v7436_v37 = vpop.permute.xlu0 %7435 }
 0x7e1   :  { %7283 = vst.msk [vmem:[#allocation5 + $0x50] sm:$0xff] %vm17037_vm15, %v7246_v41  ;;  %vm17053_vm15 = vmmov %vm17047_vm3 }
 0x7e2   :  { %7474 = vst.msk [vmem:[#allocation5 + $0x48] sm:$0xff] %vm17038_vm9, %v7436_v37  ;;  %vm17054_vm9 = vmmov %vm17049_vm11 }
 0x7e4   :  { %v7627_v55 = vpop.permute.xlu1 %7626  ;;  %v7152_v29 = vpop.permute.xlu0 %7151 }
 0x7e5   :  { %7666 = vst.msk [vmem:[#allocation5 + $0x40] sm:$0xff] %vm17039_vm10, %v7627_v55  ;;  %vm17055_vm10 = vmmov %vm17044_vm0 }
 0x7e6   :  { %7188 = vst.msk [vmem:[#allocation5 + $0x58] sm:$0xff] %vm17040_vm14, %v7152_v29  ;;  %vm17056_vm14 = vmmov %vm17051_vm2 }
 0x7e8   :  { %v7342_v49 = vpop.permute.xlu1 %7341  ;;  %v7533_v9 = vpop.permute.xlu0 %7532 }
 0x7e9   :  { %7379 = vst.msk [vmem:[#allocation5 + $0x50] sm:$0xff] %vm17041_vm13, %v7342_v49  ;;  %vm17057_vm13 = vmmov %vm17046_vm7 }
 0x7ea   :  { %7571 = vst.msk [vmem:[#allocation5 + $0x48] sm:$0xff] %vm17042_vm1, %v7533_v9  ;;  %vm17058_vm1 = vmmov %vm17050_vm8 }
 0x7ec   :  { %v7723_v32 = vpop.permute.xlu1 %7722  ;;  %v7248_v5 = vpop.permute.xlu0 %7247 }
 0x7ed   :  { %7762 = vst.msk [vmem:[#allocation5 + $0x40] sm:$0xff] %vm17043_vm12, %v7723_v32  ;;  %vm17059_vm12 = vmmov %vm17045_vm5 }
 0x7ee   :  { %7284 = vst.msk [vmem:[#allocation5 + $0x58] sm:$0xff] %vm17044_vm0, %v7248_v5  ;;  %vm17060_vm0 = vmmov %vm17052_vm6 }
 0x7f0   :  { %v7344_v27 = vpop.permute.xlu1 %7343  ;;  %v7629_v60 = vpop.permute.xlu0 %7628 }
 0x7f1   :  { %7380 = vst.msk [vmem:[#allocation5 + $0x58] sm:$0xff] %vm17045_vm5, %v7344_v27  ;;  %vm17061_vm5 = vmmov %vm17048_vm4 }
 0x7f2   :  { %7667 = vst.msk [vmem:[#allocation5 + $0x48] sm:$0xff] %vm17046_vm7, %v7629_v60  ;;  %vm17062_vm7 = vmmov %vm17055_vm10 }
 0x7f4   :  { %v7778_v20 = vld [vmem:[#allocation5 + $0x40] sm:$0xff]  ;;  %v7725_v26 = vpop.permute.xlu1 %7724  ;;  %v7058_v58 = vpop.permute.xlu0 %7057 }
 0x7f5   :  { %8940 = vmatprep.mubr.msk.f32.mxu1 %vm17047_vm3, %v7778_v20  ;;  %7763 = vst.msk [vmem:[#allocation5 + $0x48] sm:$0xff] %vm17048_vm4, %v7725_v26  ;;  %vm17063_vm3 = vmmov %vm17059_vm12 }
 0x7f6   :  { %7093 = vst.msk [vmem:[#allocation5 + $0x60] sm:$0xff] %vm17049_vm11, %v7058_v58  ;;  %vm17064_vm4 = vmmov %vm17057_vm13 }
 0x7f7   :  { %vm17065_vm11 = vmmov %vm17061_vm5 }
 0x7f8   :  { %v7154_v47 = vpop.permute.xlu1 %7153  ;;  %v7438_v52 = vpop.permute.xlu0 %7437 }
 0x7f9   :  { %7189 = vst.msk [vmem:[#allocation5 + $0x60] sm:$0xff] %vm17050_vm8, %v7154_v47  ;;  %vm17066_vm8 = vmmov %vm17053_vm15 }
 0x7fa   :  { %7475 = vst.msk [vmem:[#allocation5 + $0x50] sm:$0xff] %vm17051_vm2, %v7438_v52  ;;  %vm17067_vm2 = vmmov %vm17054_vm9 }
 0x7fc   :  { %v7535_v51 = vpop.permute.xlu1 %7534  ;;  %v7779_v46 = vld [vmem:[#allocation5 + $0x48] sm:$0xff]  ;;  %v7060_v18 = vpop.permute.xlu0 %7059 }
 0x7fd   :  { %7572 = vst.msk [vmem:[#allocation5 + $0x50] sm:$0xff] %vm17052_vm6, %v7535_v51  ;;  %8941 = vmatmul.mubr.msk.f32.gmra.mrb[32].mxu1 %vm17053_vm15, %v7779_v46  ;;  %vm17068_vm6 = vmmov %vm17058_vm1 }
 0x7fe   :  { %7094 = vst.msk [vmem:[#allocation5 + $0x68] sm:$0xff] %vm17054_vm9, %v7060_v18  ;;  %vm17069_vm15 = vmmov %vm17056_vm14 }
 0x7ff   :  { %vm17070_vm9 = vmmov %vm17060_vm0 }
 0x800   :  { %v7250_v2 = vpop.permute.xlu1 %7249  ;;  %v7440_v62 = vpop.permute.xlu0 %7439 }
 0x801   :  { %7285 = vst.msk [vmem:[#allocation5 + $0x60] sm:$0xff] %vm17055_vm10, %v7250_v2  ;;  %vm17071_vm10 = vmmov %vm17066_vm8 }
 0x802   :  { %7476 = vst.msk [vmem:[#allocation5 + $0x58] sm:$0xff] %vm17056_vm14, %v7440_v62  ;;  %vm17072_vm14 = vmmov %vm17067_vm2 }
 0x804   :  { %v7631_v10 = vpop.permute.xlu1 %7630  ;;  %v7156_v50 = vpop.permute.xlu0 %7155 }
 0x805   :  { %7668 = vst.msk [vmem:[#allocation5 + $0x50] sm:$0xff] %vm17057_vm13, %v7631_v10  ;;  %vm17073_vm13 = vmmov %vm17062_vm7 }
 0x806   :  { %7190 = vst.msk [vmem:[#allocation5 + $0x68] sm:$0xff] %vm17058_vm1, %v7156_v50  ;;  %vm17074_vm1 = vmmov %vm17069_vm15 }
 0x808   :  { %v7346_v24 = vpop.permute.xlu1 %7345  ;;  %v7537_v30 = vpop.permute.xlu0 %7536 }
 0x809   :  { %7381 = vst.msk [vmem:[#allocation5 + $0x60] sm:$0xff] %vm17059_vm12, %v7346_v24  ;;  %vm17075_vm12 = vmmov %vm17064_vm4 }
 0x80a   :  { %7573 = vst.msk [vmem:[#allocation5 + $0x58] sm:$0xff] %vm17060_vm0, %v7537_v30  ;;  %vm17076_vm0 = vmmov %vm17068_vm6 }
 0x80c   :  { %v7727_v34 = vpop.permute.xlu1 %7726  ;;  %v7252_v45 = vpop.permute.xlu0 %7251 }
 0x80d   :  { %7764 = vst.msk [vmem:[#allocation5 + $0x50] sm:$0xff] %vm17061_vm5, %v7727_v34  ;;  %vm17077_vm5 = vmmov %vm17063_vm3 }
 0x80e   :  { %7286 = vst.msk [vmem:[#allocation5 + $0x68] sm:$0xff] %vm17062_vm7, %v7252_v45  ;;  %vm17078_vm7 = vmmov %vm17070_vm9 }
 0x810   :  { %v7348_v13 = vpop.permute.xlu1 %7347  ;;  %v7633_v31 = vpop.permute.xlu0 %7632 }
 0x811   :  { %7382 = vst.msk [vmem:[#allocation5 + $0x68] sm:$0xff] %vm17063_vm3, %v7348_v13  ;;  %vm17079_vm3 = vmmov %vm17065_vm11 }
 0x812   :  { %7669 = vst.msk [vmem:[#allocation5 + $0x58] sm:$0xff] %vm17064_vm4, %v7633_v31  ;;  %vm17080_vm4 = vmmov %vm17073_vm13 }
 0x814   :  { %v7729_v15 = vpop.permute.xlu1 %7728  ;;  %v7780_v1 = vld [vmem:[#allocation5 + $0x50] sm:$0xff]  ;;  %v7062_v12 = vpop.permute.xlu0 %7061 }
 0x815   :  { %7765 = vst.msk [vmem:[#allocation5 + $0x58] sm:$0xff] %vm17065_vm11, %v7729_v15  ;;  %8943 = vmatprep.mubr.msk.f32.mxu1 %vm17066_vm8, %v7780_v1  ;;  %vm17081_vm11 = vmmov %vm17074_vm1 }
 0x816   :  { %7095 = vst.msk [vmem:[#allocation5 + $0x70] sm:$0xff] %vm17067_vm2, %v7062_v12  ;;  %vm17082_vm8 = vmmov %vm17075_vm12 }
 0x817   :  { %vm17083_vm2 = vmmov %vm17071_vm10 }
 0x818   :  { %v7158_v16 = vpop.permute.xlu1 %7157  ;;  %v7442_v42 = vpop.permute.xlu0 %7441 }
 0x819   :  { %7191 = vst.msk [vmem:[#allocation5 + $0x70] sm:$0xff] %vm17068_vm6, %v7158_v16  ;;  %vm17084_vm6 = vmmov %vm17077_vm5 }
 0x81a   :  { %7477 = vst.msk [vmem:[#allocation5 + $0x60] sm:$0xff] %vm17069_vm15, %v7442_v42  ;;  %vm17085_vm15 = vmmov %vm17074_vm1 }
 0x81c   :  { %v7539_v14 = vpop.permute.xlu1 %7538  ;;  %v7781_v61 = vld [vmem:[#allocation5 + $0x58] sm:$0xff]  ;;  %v7064_v53 = vpop.permute.xlu0 %7063 }
 0x81d   :  { %7574 = vst.msk [vmem:[#allocation5 + $0x60] sm:$0xff] %vm17070_vm9, %v7539_v14  ;;  %8944 = vmatmul.mubr.msk.f32.gmra.mrb[34].mxu1 %vm17071_vm10, %v7781_v61  ;;  %vm17086_vm9 = vmmov %vm17078_vm7 }
 0x81e   :  { %7096 = vst.msk [vmem:[#allocation5 + $0x78] sm:$0xff] %vm17072_vm14, %v7064_v53  ;;  %vm17087_vm10 = vmmov %vm17079_vm3 }
 0x81f   :  { %vm17088_vm14 = vmmov %vm17082_vm8 }
 0x820   :  { %v7254_v40 = vpop.permute.xlu1 %7253  ;;  %v7444_v6 = vpop.permute.xlu0 %7443 }
 0x821   :  { %7287 = vst.msk [vmem:[#allocation5 + $0x70] sm:$0xff] %vm17073_vm13, %v7254_v40  ;;  %vm17089_vm13 = vmmov %vm17078_vm7 }
 0x822   :  { %7478 = vst.msk [vmem:[#allocation5 + $0x68] sm:$0xff] %vm17074_vm1, %v7444_v6  ;;  %vm17090_vm1 = vmmov %vm17079_vm3 }
 0x824   :  { %v7635_v21 = vpop.permute.xlu1 %7634  ;;  %v7160_v57 = vpop.permute.xlu0 %7159 }
 0x825   :  { %7670 = vst.msk [vmem:[#allocation5 + $0x60] sm:$0xff] %vm17075_vm12, %v7635_v21  ;;  %vm17091_vm12 = vmmov %vm17082_vm8 }
 0x826   :  { %7192 = vst.msk [vmem:[#allocation5 + $0x78] sm:$0xff] %vm17076_vm0, %v7160_v57  ;;  %vm17092_vm0 = vmmov %vm17083_vm2 }
 0x828   :  { %v7350_v43 = vpop.permute.xlu1 %7349  ;;  %v7541_v17 = vpop.permute.xlu0 %7540 }
 0x829   :  { %7383 = vst.msk [vmem:[#allocation5 + $0x70] sm:$0xff] %vm17077_vm5, %v7350_v43  ;;  %vm17093_vm5 = vmmov %vm17090_vm1 }
 0x82a   :  { %7575 = vst.msk [vmem:[#allocation5 + $0x68] sm:$0xff] %vm17078_vm7, %v7541_v17  ;;  %vm17094_vm7 = vmmov %vm17092_vm0 }
 0x82c   :  { %v7731_v4 = vpop.permute.xlu1 %7730  ;;  %v7256_v48 = vpop.permute.xlu0 %7255 }
 0x82d   :  { %7766 = vst.msk [vmem:[#allocation5 + $0x60] sm:$0xff] %vm17079_vm3, %v7731_v4  ;;  %vm17095_vm3 = vmmov %vm17092_vm0 }
 0x82e   :  { %7288 = vst.msk [vmem:[#allocation5 + $0x78] sm:$0xff] %vm17080_vm4, %v7256_v48  ;;  %vm17096_vm4 = vcmask 64512  }
 0x830   :  { %v7446_v38 = vpop.permute.xlu1 %7445  ;;  %v7637_v22 = vpop.permute.xlu0 %7636 }
 0x831   :  { %7479 = vst.msk [vmem:[#allocation5 + $0x70] sm:$0xff] %vm17081_vm11, %v7446_v38  ;;  %vm17097_vm11 = vmmov %vm17096_vm4 }
 0x832   :  { %7671 = vst.msk [vmem:[#allocation5 + $0x68] sm:$0xff] %vm17082_vm8, %v7637_v22  ;;  %vm17098_vm8 = vmmov %vm17096_vm4 }
 0x834   :  { %v7448_v19 = vpop.permute.xlu1 %7447  ;;  %v7782_v33 = vld [vmem:[#allocation5 + $0x60] sm:$0xff]  ;;  %v7352_v44 = vpop.permute.xlu0 %7351 }
 0x835   :  { %8946 = vmatprep.mubr.msk.f32.mxu1 %vm17083_vm2, %v7782_v33  ;;  %7384 = vst.msk [vmem:[#allocation5 + $0x78] sm:$0xff] %vm17084_vm6, %v7352_v44  ;;  %vm17099_vm2 = vmmov %vm17096_vm4 }
 0x836   :  { %7480 = vst.msk [vmem:[#allocation5 + $0x78] sm:$0xff] %vm17085_vm15, %v7448_v19  ;;  %vm17100_vm6 = vmmov %vm17099_vm2 }
 0x837   :  { %vm17101_vm15 = vmmov %vm17099_vm2 }
 0x838   :  { %v7545_v25 = vpop.permute.xlu1 %7544  ;;  %v7733_v35 = vpop.permute.xlu0 %7732 }
 0x839   :  { %7577 = vst.msk [vmem:[#allocation5 + $0x78] sm:$0xff] %vm17086_vm9, %v7545_v25  ;;  %vm17102_vm9 = vmmov %vm17099_vm2 }
 0x83a   :  { %7767 = vst.msk [vmem:[#allocation5 + $0x68] sm:$0xff] %vm17087_vm10, %v7733_v35  ;;  %vm17103_vm10 = vmmov %vm17099_vm2 }
 0x83c   :  { %v7641_v0 = vpop.permute.xlu1 %7640  ;;  %v7543_v3 = vpop.permute.xlu0 %7542 }
 0x83d   :  { %7673 = vst.msk [vmem:[#allocation5 + $0x78] sm:$0xff] %vm17088_vm14, %v7641_v0  ;;  %vm17104_vm14 = vmmov %vm17099_vm2 }
 0x83e   :  { %7576 = vst.msk [vmem:[#allocation5 + $0x70] sm:$0xff] %vm17089_vm13, %v7543_v3  ;;  %vm17105_vm13 = vmmov %vm17099_vm2 }
 0x840   :  { %v7737_v39 = vpop.permute.xlu1 %7736  ;;  %v7639_v23 = vpop.permute.xlu0 %7638 }
 0x841   :  { %7769 = vst.msk [vmem:[#allocation5 + $0x78] sm:$0xff] %vm17090_vm1, %v7737_v39  ;;  %v7783_v11 = vld [vmem:[#allocation5 + $0x68] sm:$0xff]  ;;  %vm17106_vm1 = vmmov %vm17099_vm2 }
 0x842   :  { %7672 = vst.msk [vmem:[#allocation5 + $0x70] sm:$0xff] %vm17091_vm12, %v7639_v23  ;;  %8947 = vmatmul.mubr.msk.f32.gmra.mrb[36].mxu1 %vm17092_vm0, %v7783_v11  ;;  %vm17107_vm12 = vmmov %vm17106_vm1 }
 0x843   :  { %vm17108_vm0 = vmmov %vm17106_vm1 }
 0x844   :  { %v7735_v28 = vpop.permute.xlu0 %7734 }
 0x845   :  { %7768 = vst.msk [vmem:[#allocation5 + $0x70] sm:$0xff] %vm17093_vm5, %v7735_v28  ;;  %vm17109_vm5 = vmmov %vm17108_vm0 }
 0x848   :  { %v7785_v8 = vld [vmem:[#allocation5 + $0x78] sm:$0xff] }
 0x84c   :  { %v7784_v7 = vld [vmem:[#allocation5 + $0x70] sm:$0xff] }
 0x84d   :  { %8949 = vmatprep.mubr.msk.f32.mxu1 %vm17094_vm7, %v7784_v7  ;;  %vm17110_vm7 = vmmov %vm17108_vm0 }
 0x84e   :  { %8950 = vmatmul.mubr.msk.f32.gmra.mrb[38].mxu1 %vm17095_vm3, %v7785_v8  ;;  %vm17111_vm3 = vmmov %vm17108_vm0 }
 0x853   :  { %v15638_v59 = vpop.f32.mrb[24].mxu1 }
 0x854   :  { %v7989_v36 = vsel %vm17096_vm4, %v15638_v59, 0.0  ;;  %v8026_v56 = vmul.f32 %v15638_v59, %v15638_v59  ;;  %v15645_v54 = vpop.f32.mrb[25].mxu1  ;;  %vm17112_vm4 = vmmov %vm17108_vm0 }
 0x855   :  { %v7988_v63 = vsel %vm17097_vm11, %v15645_v54, 0.0  ;;  %v8025_v41 = vmul.f32 %v15645_v54, %v15645_v54  ;;  %vm17113_vm11 = vmmov %vm17108_vm0 }
 0x856   :  { %v8042_v37 = vsel %vm17098_vm8, %v8026_v56, 0.0  ;;  %v7990_v55 = vadd.f32 %v7989_v36, %v7988_v63  ;;  %vm17114_vm8 = vmmov %vm17108_vm0 }
 0x857   :  { %v8041_v29 = vsel %vm17099_vm2, %v8025_v41, 0.0  ;;  %vm17115_vm2 = vmmov %vm17108_vm0 }
 0x858   :  { %v8043_v49 = vadd.f32 %v8042_v37, %v8041_v29 }
 0x877   :  { %v15653_v9 = vpop.f32.mrb[26].mxu1 }
 0x878   :  { %v15655_v32 = vpop.f32.mrb[27].mxu1  ;;  %v8028_v5 = vmul.f32 %v15653_v9, %v15653_v9  ;;  %v7993_v26 = vsel %vm17101_vm15, %v15653_v9, 0.0  ;;  %vm17117_vm15 = vmmov %vm17108_vm0 }
 0x879   :  { %v7991_v27 = vsel %vm17100_vm6, %v15655_v32, 0.0  ;;  %v8027_v60 = vmul.f32 %v15655_v32, %v15655_v32  ;;  %vm17116_vm6 = vmmov %vm17108_vm0 }
 0x87a   :  { %v7992_v20 = vadd.f32 %v7991_v27, %v7990_v55  ;;  %v8046_v51 = vsel %vm17103_vm10, %v8028_v5, 0.0  ;;  %vm17119_vm10 = vmmov %vm17108_vm0 }
 0x87b   :  { %v8044_v58 = vsel %vm17102_vm9, %v8027_v60, 0.0  ;;  %vm17118_vm9 = vmmov %vm17108_vm0 }
 0x87c   :  { %v8045_v47 = vadd.f32 %v8044_v58, %v8043_v49  ;;  %v7994_v52 = vadd.f32 %v7993_v26, %v7992_v20 }
 0x87e   :  { %v8047_v46 = vadd.f32 %v8046_v51, %v8045_v47 }
 0x890   :  { %v15667_v18 = vpop.f32.mrb[28].mxu1 }
 0x891   :  { %v15669_v2 = vpop.f32.mrb[29].mxu1  ;;  %v8030_v62 = vmul.f32 %v15667_v18, %v15667_v18  ;;  %v7997_v30 = vsel %vm17105_vm13, %v15667_v18, 0.0  ;;  %vm17121_vm13 = vmmov %vm17108_vm0 }
 0x892   :  { %v7995_v10 = vsel %vm17104_vm14, %v15669_v2, 0.0  ;;  %v8029_v50 = vmul.f32 %v15669_v2, %v15669_v2  ;;  %vm17120_vm14 = vmmov %vm17108_vm0 }
 0x893   :  { %v7996_v24 = vadd.f32 %v7995_v10, %v7994_v52  ;;  %v8050_v31 = vsel %vm17107_vm12, %v8030_v62, 0.0  ;;  %vm17123_vm12 = vmmov %vm17108_vm0 }
 0x894   :  { %v8048_v34 = vsel %vm17106_vm1, %v8029_v50, 0.0  ;;  %vm17122_vm1 = vmmov %vm17108_vm0 }
 0x895   :  { %v8049_v45 = vadd.f32 %v8048_v34, %v8047_v46  ;;  %v7998_v13 = vadd.f32 %v7997_v30, %v7996_v24 }
 0x897   :  { %v8051_v15 = vadd.f32 %v8050_v31, %v8049_v45 }
 0x8b0   :  { %v15681_v1 = vpop.f32.mrb[30].mxu1 }
 0x8b1   :  { %v15683_v12 = vpop.f32.mrb[31].mxu1  ;;  %v8032_v16 = vmul.f32 %v15681_v1, %v15681_v1  ;;  %v8001_v53 = vsel %vm17109_vm5, %v15681_v1, 0.0  ;;  %vm17124_vm5 = vmmov %vm17108_vm0 }
 0x8b2   :  { %v7999_v42 = vsel %vm17108_vm0, %v15683_v12, 0.0  ;;  %v8031_v14 = vmul.f32 %v15683_v12, %v15683_v12 }
 0x8b3   :  { %v8000_v61 = vadd.f32 %v7999_v42, %v7998_v13  ;;  %v8054_v57 = vsel %vm17111_vm3, %v8032_v16, 0.0  ;;  %vm17126_vm3 = vmmov %vm17108_vm0 }
 0x8b4   :  { %v8052_v40 = vsel %vm17110_vm7, %v8031_v14, 0.0  ;;  %vm17125_vm7 = vmmov %vm17108_vm0 }
 0x8b5   :  { %v8053_v6 = vadd.f32 %v8052_v40, %v8051_v15  ;;  %v8002_v21 = vadd.f32 %v8001_v53, %v8000_v61 }
 0x8b7   :  { %v8055_v43 = vadd.f32 %v8054_v57, %v8053_v6 }
 0x8d0   :  { %v15695_v17 = vpop.f32.mrb[32].mxu1 }
 0x8d1   :  { %v15697_v4 = vpop.f32.mrb[33].mxu1  ;;  %v8034_v48 = vmul.f32 %v15695_v17, %v15695_v17  ;;  %v8005_v33 = vsel %vm17113_vm11, %v15695_v17, 0.0 }
 0x8d2   :  { %v8003_v38 = vsel %vm17112_vm4, %v15697_v4, 0.0  ;;  %v8033_v22 = vmul.f32 %v15697_v4, %v15697_v4 }
 0x8d3   :  { %v8004_v19 = vadd.f32 %v8003_v38, %v8002_v21  ;;  %v8058_v0 = vsel %vm17115_vm2, %v8034_v48, 0.0 }
 0x8d4   :  { %v8056_v44 = vsel %vm17114_vm8, %v8033_v22, 0.0 }
 0x8d5   :  { %v8057_v25 = vadd.f32 %v8056_v44, %v8055_v43  ;;  %v8006_v35 = vadd.f32 %v8005_v33, %v8004_v19 }
 0x8d7   :  { %v8059_v3 = vadd.f32 %v8058_v0, %v8057_v25 }
 0x8f0   :  { %v15709_v39 = vpop.f32.mrb[34].mxu1 }
 0x8f1   :  { %v15711_v23 = vpop.f32.mrb[35].mxu1  ;;  %v8036_v11 = vmul.f32 %v15709_v39, %v15709_v39  ;;  %v8009_v36 = vsel %vm17117_vm15, %v15709_v39, 0.0 }
 0x8f2   :  { %v8007_v28 = vsel %vm17116_vm6, %v15711_v23, 0.0  ;;  %v8035_v8 = vmul.f32 %v15711_v23, %v15711_v23 }
 0x8f3   :  { %v8008_v7 = vadd.f32 %v8007_v28, %v8006_v35  ;;  %v8062_v37 = vsel %vm17119_vm10, %v8036_v11, 0.0 }
 0x8f4   :  { %v8060_v56 = vsel %vm17118_vm9, %v8035_v8, 0.0 }
 0x8f5   :  { %v8061_v63 = vadd.f32 %v8060_v56, %v8059_v3  ;;  %v8010_v41 = vadd.f32 %v8009_v36, %v8008_v7 }
 0x8f7   :  { %v8063_v55 = vadd.f32 %v8062_v37, %v8061_v63 }
 0x915   :  { %v15723_v29 = vpop.f32.mrb[36].mxu1 }
 0x916   :  { %v15725_v49 = vpop.f32.mrb[37].mxu1  ;;  %v8038_v5 = vmul.f32 %v15723_v29, %v15723_v29  ;;  %v8013_v26 = vsel %vm17121_vm13, %v15723_v29, 0.0 }
 0x917   :  { %v8011_v27 = vsel %vm17120_vm14, %v15725_v49, 0.0  ;;  %v8037_v60 = vmul.f32 %v15725_v49, %v15725_v49 }
 0x918   :  { %v8012_v20 = vadd.f32 %v8011_v27, %v8010_v41  ;;  %v8066_v51 = vsel %vm17123_vm12, %v8038_v5, 0.0 }
 0x919   :  { %v8064_v58 = vsel %vm17122_vm1, %v8037_v60, 0.0 }
 0x91a   :  { %v8065_v47 = vadd.f32 %v8064_v58, %v8063_v55  ;;  %v8014_v52 = vadd.f32 %v8013_v26, %v8012_v20 }
 0x91c   :  { %v8067_v46 = vadd.f32 %v8066_v51, %v8065_v47 }
 0x921   :  { %v15737_v62 = vpop.f32.mrb[38].mxu1 }
 0x922   :  { %v15739_v10 = vpop.f32.mrb[39].mxu1  ;;  %v8040_v50 = vmul.f32 %v15737_v62, %v15737_v62  ;;  %v8017_v45 = vsel %vm17124_vm5, %v15737_v62, 0.0 }
 0x923   :  { %v8015_v24 = vsel %vm17108_vm0, %v15739_v10, 0.0  ;;  %v8039_v30 = vmul.f32 %v15739_v10, %v15739_v10 }
 0x924   :  { %v8016_v34 = vadd.f32 %v8015_v24, %v8014_v52  ;;  %v8070_v16 = vsel %vm17126_vm3, %v8040_v50, 0.0  ;;  %vm17127_vm3 = vmmov %vm17108_vm0 }
 0x925   :  { %v8068_v13 = vsel %vm17125_vm7, %v8039_v30, 0.0 }
 0x926   :  { %v8018_v31 = vadd.f32 %v8017_v45, %v8016_v34  ;;  %v8069_v15 = vadd.f32 %v8068_v13, %v8067_v46  ;;  %v8697_v13 = vld [vmem:[%s15859_s6] ss:$0 sm:$0xff] }
 0x928   :  { %v8019_v42 = vrot.slane %v8018_v31, 4  ;;  %v8071_v14 = vadd.f32 %v8070_v16, %v8069_v15 }
 0x92a   :  { %v8020_v61 = vadd.f32 %v8019_v42, %v8018_v31  ;;  %v8072_v53 = vrot.slane %v8071_v14, 4 }
 0x92c   :  { %v8021_v40 = vrot.slane %v8020_v61, 2  ;;  %v8073_v6 = vadd.f32 %v8072_v53, %v8071_v14 }
 0x92e   :  { %v8022_v21 = vadd.f32 %v8021_v40, %v8020_v61  ;;  %v8074_v57 = vrot.slane %v8073_v6, 2 }
 0x930   :  { %v8023_v43 = vrot.slane %v8022_v21, 1  ;;  %v8075_v48 = vadd.f32 %v8074_v57, %v8073_v6 }
 0x932   :  { %v8024_v38 = vadd.f32 %v8023_v43, %v8022_v21  ;;  %v8076_v22 = vrot.slane %v8075_v48, 1 }
 0x934   :  { %v8077_v19 = vadd.f32 %v8076_v22, %v8075_v48  ;;  %v8078_v33 = vmul.f32 0.0078125, %v8024_v38 }
 0x936   :  { %v8079_v44 = vmul.f32 0.0078125, %v8077_v19  ;;  %v8080_v25 = vmul.f32 %v8078_v33, %v8078_v33  ;;  %v8084_v35 = vsub.f32 %v15645_v54, %v8078_v33  ;;  %v8085_v0 = vsub.f32 %v15638_v59, %v8078_v33 }
 0x937   :  { %v8086_v3 = vsub.f32 %v15655_v32, %v8078_v33  ;;  %v8087_v11 = vsub.f32 %v15653_v9, %v8078_v33  ;;  %v8088_v28 = vsub.f32 %v15669_v2, %v8078_v33  ;;  %v8089_v8 = vsub.f32 %v15667_v18, %v8078_v33 }
 0x938   :  { %v8081_v7 = vsub.f32 %v8079_v44, %v8080_v25  ;;  %v8090_v36 = vsub.f32 %v15683_v12, %v8078_v33  ;;  %v8091_v56 = vsub.f32 %v15681_v1, %v8078_v33  ;;  %v8092_v63 = vsub.f32 %v15697_v4, %v8078_v33 }
 0x939   :  { %v8093_v41 = vsub.f32 %v15695_v17, %v8078_v33  ;;  %v8094_v54 = vsub.f32 %v15711_v23, %v8078_v33  ;;  %v8095_v59 = vsub.f32 %v15709_v39, %v8078_v33  ;;  %v8096_v32 = vsub.f32 %v15725_v49, %v8078_v33  ;;  %v8696_v39 = vld [vmem:[%s15858_s5] ss:$0 sm:$0xff] }
 0x93a   :  { %v8082_v9 = vadd.f32 1e-05, %v8081_v7  ;;  %v8097_v2 = vsub.f32 %v15723_v29, %v8078_v33  ;;  %v8098_v18 = vsub.f32 %v15739_v10, %v8078_v33  ;;  %v8099_v37 = vsub.f32 %v15737_v62, %v8078_v33 }
 0x93c   :  { %9006 = vrsqrt.f32 %v8082_v9 }
 0x946   :  { %v9007_v12 = vpop.eup %9006 }
 0x947   :  { %v8100_v1 = vmul.f32 %v9007_v12, %v8084_v35  ;;  %v8101_v55 = vmul.f32 %v9007_v12, %v8085_v0  ;;  %v8102_v4 = vmul.f32 %v9007_v12, %v8086_v3  ;;  %v8103_v5 = vmul.f32 %v9007_v12, %v8087_v11 }
 0x948   :  { %v8104_v17 = vmul.f32 %v9007_v12, %v8088_v28  ;;  %v8105_v27 = vmul.f32 %v9007_v12, %v8089_v8  ;;  %v8106_v23 = vmul.f32 %v9007_v12, %v8090_v36  ;;  %v8107_v60 = vmul.f32 %v9007_v12, %v8091_v56 }
 0x949   :  { %v8108_v49 = vmul.f32 %v9007_v12, %v8092_v63  ;;  %v8109_v29 = vmul.f32 %v9007_v12, %v8093_v41  ;;  %v8110_v20 = vmul.f32 %v9007_v12, %v8094_v54  ;;  %v8111_v26 = vmul.f32 %v9007_v12, %v8095_v59 }
 0x94a   :  { %v8112_v58 = vmul.f32 %v9007_v12, %v8096_v32  ;;  %v8113_v47 = vmul.f32 %v9007_v12, %v8097_v2  ;;  %v8114_v52 = vmul.f32 %v9007_v12, %v8098_v18  ;;  %v8115_v51 = vmul.f32 %v9007_v12, %v8099_v37 }
 0x94b   :  { %v8123_v46 = vmul.f32 %v8696_v39, %v8100_v1  ;;  %v8124_v62 = vmul.f32 %v8696_v39, %v8101_v55  ;;  %v8125_v10 = vmul.f32 %v8696_v39, %v8102_v4  ;;  %v8126_v50 = vmul.f32 %v8696_v39, %v8103_v5 }
 0x94c   :  { %v8127_v24 = vmul.f32 %v8696_v39, %v8104_v17  ;;  %v8128_v30 = vmul.f32 %v8696_v39, %v8105_v27  ;;  %v8129_v34 = vmul.f32 %v8696_v39, %v8106_v23  ;;  %v8130_v45 = vmul.f32 %v8696_v39, %v8107_v60 }
 0x94d   :  { %v8131_v31 = vmul.f32 %v8696_v39, %v8108_v49  ;;  %v8132_v15 = vmul.f32 %v8696_v39, %v8109_v29  ;;  %v8133_v16 = vmul.f32 %v8696_v39, %v8110_v20  ;;  %v8134_v42 = vmul.f32 %v8696_v39, %v8111_v26 }
 0x94e   :  { %v8135_v14 = vmul.f32 %v8696_v39, %v8112_v58  ;;  %v8136_v61 = vmul.f32 %v8696_v39, %v8113_v47  ;;  %v8137_v53 = vmul.f32 %v8696_v39, %v8114_v52  ;;  %v8138_v40 = vmul.f32 %v8696_v39, %v8115_v51 }
 0x94f   :  { %v8146_v6 = vadd.f32 %v8697_v13, %v8123_v46  ;;  %v8147_v21 = vadd.f32 %v8697_v13, %v8124_v62  ;;  %v8148_v57 = vadd.f32 %v8697_v13, %v8125_v10  ;;  %v8149_v43 = vadd.f32 %v8697_v13, %v8126_v50 }
 0x950   :  { %v8150_v48 = vadd.f32 %v8697_v13, %v8127_v24  ;;  %v8151_v38 = vadd.f32 %v8697_v13, %v8128_v30  ;;  %v8152_v22 = vadd.f32 %v8697_v13, %v8129_v34  ;;  %v8153_v19 = vadd.f32 %v8697_v13, %v8130_v45 }
 0x951   :  { %v8154_v33 = vadd.f32 %v8697_v13, %v8131_v31  ;;  %v8155_v44 = vadd.f32 %v8697_v13, %v8132_v15  ;;  %v8156_v25 = vadd.f32 %v8697_v13, %v8133_v16  ;;  %v8157_v35 = vadd.f32 %v8697_v13, %v8134_v42 }
 0x952   :  { %v8158_v0 = vadd.f32 %v8697_v13, %v8135_v14  ;;  %v8159_v3 = vadd.f32 %v8697_v13, %v8136_v61  ;;  %v8160_v11 = vadd.f32 %v8697_v13, %v8137_v53  ;;  %v8161_v28 = vadd.f32 %v8697_v13, %v8138_v40 }
 0x953   :  { %vm8162_vm4 = vcmp.ge.f32.partialorder %v8146_v6, 0.0  ;;  %vm8163_vm11 = vcmp.ge.f32.partialorder %v8147_v21, 0.0  ;;  %vm8164_vm8 = vcmp.ge.f32.partialorder %v8148_v57, 0.0  ;;  %vm8165_vm2 = vcmp.ge.f32.partialorder %v8149_v43, 0.0 }
 0x954   :  { %vm8166_vm6 = vcmp.ge.f32.partialorder %v8150_v48, 0.0  ;;  %vm8167_vm15 = vcmp.ge.f32.partialorder %v8151_v38, 0.0  ;;  %vm8168_vm9 = vcmp.ge.f32.partialorder %v8152_v22, 0.0  ;;  %vm8169_vm10 = vcmp.ge.f32.partialorder %v8153_v19, 0.0 }
 0x955   :  { %vm8170_vm14 = vcmp.ge.f32.partialorder %v8154_v33, 0.0  ;;  %vm8171_vm13 = vcmp.ge.f32.partialorder %v8155_v44, 0.0  ;;  %vm8172_vm1 = vcmp.ge.f32.partialorder %v8156_v25, 0.0  ;;  %vm8173_vm12 = vcmp.ge.f32.partialorder %v8157_v35, 0.0 }
 0x956   :  { %vm8175_vm5 = vcmp.ge.f32.partialorder %v8159_v3, 0.0  ;;  %vm8176_vm7 = vcmp.ge.f32.partialorder %v8160_v11, 0.0  ;;  %v8178_v8 = vmul.f32 0.01, %v8146_v6  ;;  %v8179_v7 = vmul.f32 0.01, %v8147_v21 }
 0x957   :  { %v8180_v36 = vmul.f32 0.01, %v8148_v57  ;;  %v8181_v56 = vmul.f32 0.01, %v8149_v43  ;;  %v8182_v63 = vmul.f32 0.01, %v8150_v48 }
 0x958   :  { %v8183_v41 = vmul.f32 0.01, %v8151_v38  ;;  %v8184_v54 = vmul.f32 0.01, %v8152_v22  ;;  %v8185_v59 = vmul.f32 0.01, %v8153_v19  ;;  %v8194_v9 = vsel %vm8162_vm4, %v8146_v6, %v8178_v8  ;;  %vm17128_vm4 = vmmov %vm17108_vm0 }
 0x959   :  { %v8186_v32 = vmul.f32 0.01, %v8154_v33  ;;  %v8187_v2 = vmul.f32 0.01, %v8155_v44  ;;  %v8188_v18 = vmul.f32 0.01, %v8156_v25  ;;  %v8195_v12 = vsel %vm8163_vm11, %v8147_v21, %v8179_v7  ;;  %vm17129_vm11 = vmmov %vm17108_vm0 }
 0x95a   :  { %v8189_v37 = vmul.f32 0.01, %v8157_v35  ;;  %8210 = vst.msk [vmem:[%s15860_s7] sm:$0xff] %vm17108_vm0, %v8194_v9  ;;  %v8190_v1 = vmul.f32 0.01, %v8158_v0  ;;  %v8196_v5 = vsel %vm8164_vm8, %v8148_v57, %v8180_v36  ;;  %v8197_v27 = vsel %vm8165_vm2, %v8149_v43, %v8181_v56  ;;  %vm17130_vm8 = vmmov %vm17108_vm0 }
 0x95b   :  { %v8191_v55 = vmul.f32 0.01, %v8159_v3  ;;  %v8192_v4 = vmul.f32 0.01, %v8160_v11  ;;  %8211 = vst.msk [vmem:[%s15860_s7 + $0x8] sm:$0xff] %vm17127_vm3, %v8195_v12  ;;  %v8198_v23 = vsel %vm8166_vm6, %v8150_v48, %v8182_v63  ;;  %v8199_v60 = vsel %vm8167_vm15, %v8151_v38, %v8183_v41  ;;  %vm17131_vm2 = vmmov %vm17108_vm0 }
 0x95c   :  { %v8193_v17 = vmul.f32 0.01, %v8161_v28  ;;  %8212 = vst.msk [vmem:[%s15860_s7 + $0x10] sm:$0xff] %vm17128_vm4, %v8196_v5  ;;  %v8200_v39 = vsel %vm8168_vm9, %v8152_v22, %v8184_v54  ;;  %v8201_v49 = vsel %vm8169_vm10, %v8153_v19, %v8185_v59  ;;  %v8202_v29 = vsel %vm8170_vm14, %v8154_v33, %v8186_v32  ;;  %vm17133_vm15 = vmmov %vm17108_vm0 }
 0x95d   :  { %v8203_v20 = vsel %vm8171_vm13, %v8155_v44, %v8187_v2  ;;  %8213 = vst.msk [vmem:[%s15860_s7 + $0x18] sm:$0xff] %vm17129_vm11, %v8197_v27  ;;  %v8204_v26 = vsel %vm8172_vm1, %v8156_v25, %v8188_v18  ;;  %v8205_v58 = vsel %vm8173_vm12, %v8157_v35, %v8189_v37  ;;  %vm17132_vm6 = vcmp.ge.f32.partialorder %v8158_v0, 0.0  ;;  %vm17134_vm9 = vmmov %vm17108_vm0 }
 0x95e   :  { %8214 = vst.msk [vmem:[%s15860_s7 + $0x20] sm:$0xff] %vm17130_vm8, %v8198_v23  ;;  %v8206_v47 = vsel %vm17132_vm6, %v8158_v0, %v8190_v1  ;;  %v8207_v52 = vsel %vm8175_vm5, %v8159_v3, %v8191_v55  ;;  %vm17135_vm10 = vmmov %vm17108_vm0  ;;  %v8208_v51 = vsel %vm8176_vm7, %v8160_v11, %v8192_v4  ;;  %vm17137_vm13 = vcmp.ge.f32.partialorder %v8161_v28, 0.0 }
 0x95f   :  { %8215 = vst.msk [vmem:[%s15860_s7 + $0x28] sm:$0xff] %vm17131_vm2, %v8199_v60  ;;  %vm17136_vm14 = vmmov %vm17108_vm0  ;;  %v8209_v46 = vsel %vm17137_vm13, %v8161_v28, %v8193_v17 }
 0x960   :  { %8216 = vst.msk [vmem:[%s15860_s7 + $0x30] sm:$0xff] %vm17133_vm15, %v8200_v39  ;;  %vm17138_vm1 = vmmov %vm17108_vm0 }
 0x961   :  { %8217 = vst.msk [vmem:[%s15860_s7 + $0x38] sm:$0xff] %vm17134_vm9, %v8201_v49  ;;  %vm17139_vm12 = vmmov %vm17108_vm0 }
 0x962   :  { %8218 = vst.msk [vmem:[%s15860_s7 + $0x40] sm:$0xff] %vm17135_vm10, %v8202_v29  ;;  %vm17140_vm5 = vmmov %vm17108_vm0 }
 0x963   :  { %8219 = vst.msk [vmem:[%s15860_s7 + $0x48] sm:$0xff] %vm17136_vm14, %v8203_v20  ;;  %vm17141_vm7 = vmmov %vm17108_vm0 }
 0x964   :  { %8220 = vst.msk [vmem:[%s15860_s7 + $0x50] sm:$0xff] %vm17138_vm1, %v8204_v26  ;;  %vm17142_vm3 = vmmov %vm17108_vm0 }
 0x965   :  { %8221 = vst.msk [vmem:[%s15860_s7 + $0x58] sm:$0xff] %vm17139_vm12, %v8205_v58 }
 0x966   :  { %8222 = vst.msk [vmem:[%s15860_s7 + $0x60] sm:$0xff] %vm17108_vm0, %v8206_v47 }
 0x967   :  { %8223 = vst.msk [vmem:[%s15860_s7 + $0x68] sm:$0xff] %vm17140_vm5, %v8207_v52 }
 0x968   :  { %8224 = vst.msk [vmem:[%s15860_s7 + $0x70] sm:$0xff] %vm17141_vm7, %v8208_v51 }
 0x969   :  { %8225 = vst.msk [vmem:[%s15860_s7 + $0x78] sm:$0xff] %vm17142_vm3, %v8209_v46 }

</bundles_post_ra>
